<compile_context>
chip_gen: v7x
topology: tpu7x:2x2x1
jax: 0.10.0
libtpu: 0.0.40
codegen_flags: <defaults>
</compile_context>

<pallas_src>
import functools

import jax
import jax.numpy as jnp
from jax import lax
from jax.experimental import pallas as pl
from jax.experimental.pallas import tpu as pltpu

LN_EPS = 1e-5                 # torch.nn.LayerNorm default eps
OUT_LANES = 128               # lane-dense output slab width
MXU_DTYPE = jnp.bfloat16      # native MXU fast path on v5e/v6e/v7x
                              # (use jnp.float32 only for bit-exactness debugging)


# --------------------------------------------------------------------------
# Fused whole-network kernel body (one batch tile per grid step).
# --------------------------------------------------------------------------
def _fused_forward_kernel(L, block_meta, *refs):
    """refs = (x_ref, *param_refs, o_ref).

    x_ref : (TB, L, Cin)  f32    -- compact channels, NLC layout
    params: dense-packed conv matrices (K*Cin, Nout), biases (1, Nout),
            LN affines (L, Cout), head weights padded to 128 output lanes.
    o_ref : (TB, 128) f32        -- lane 0 is the real classifier output
    """
    x_ref = refs[0]
    o_ref = refs[-1]
    p = list(refs[1:-1])

    TB = x_ref.shape[0]
    rows = TB * L

    # Within-sample position of every flattened row (hoisted; reused by all convs).
    pos = lax.broadcasted_iota(jnp.int32, (rows, 1), 0) % L

    def conv(x, w_ref, b_ref, K):
        # x: (TB, L, Cin) f32.  'same' Conv1d as ONE dense im2col matmul on the MXU.
        cin = x.shape[-1]
        xf = x.reshape(rows, cin)
        taps = []
        for k in range(K):
            off = k - (K - 1) // 2            # tap reads input position i + off
            if off == 0:
                taps.append(xf)
            else:
                shifted = pltpu.roll(xf, shift=(-off) % rows, axis=0)  # XLU rotate
                valid = (pos + off >= 0) & (pos + off < L)             # zero 'same' pad
                taps.append(jnp.where(valid, shifted, 0.0))
        slab = taps[0] if K == 1 else jnp.concatenate(taps, axis=-1)   # (rows, K*cin)
        y = jnp.dot(slab.astype(w_ref.dtype), w_ref[...],
                    preferred_element_type=jnp.float32)                # f32 acc
        y = y + b_ref[...]
        return y.reshape(TB, L, w_ref.shape[1])

    def layer_norm(y, gamma, beta, cout):
        # nn.LayerNorm((C, L)): per-sample stats over (L, C); two-pass variance.
        n = float(L * cout)
        mean = jnp.sum(jnp.sum(y, axis=2, keepdims=True), axis=1, keepdims=True) / n
        d = y - mean
        var = jnp.sum(jnp.sum(d * d, axis=2, keepdims=True), axis=1, keepdims=True) / n
        return d * lax.rsqrt(var + LN_EPS) * gamma + beta

    x = x_ref[...].astype(jnp.float32)        # (TB, L, Cin)
    idx = 0
    for K, _cin, cout in block_meta:          # 3x ResBlockMAE (static unroll)
        (w_m, b_m, g1, be1, gid, beid,
         w2, b2, g2, be2, w3, b3, g3, be3) = p[idx:idx + 14]
        idx += 14

        # c1 and the 1x1 identity conv share the block input -> one merged matmul.
        y = conv(x, w_m, b_m, K)                                    # (TB, L, 2*cout)
        h = jnp.maximum(layer_norm(y[:, :, :cout], g1[...], be1[...], cout), 0.0)
        idp = layer_norm(y[:, :, cout:], gid[...], beid[...], cout)

        h = jnp.maximum(layer_norm(conv(h, w2, b2, K), g2[...], be2[...], cout), 0.0)
        h = jnp.maximum(layer_norm(conv(h, w3, b3, K), g3[...], be3[...], cout), 0.0)
        x = jnp.maximum(h + idp, 0.0)                               # residual + ReLU

    # Classifier head: AvgPool1d(winsize) -> Linear -> ReLU -> Linear (128 lanes).
    w1, b1, w2c, b2c = p[idx:idx + 4]
    pooled = jnp.mean(x, axis=1)                                    # (TB, c_last)
    h = jnp.dot(pooled.astype(w1.dtype), w1[...],
                preferred_element_type=jnp.float32) + b1[...]
    h = jnp.maximum(h, 0.0)
    out = jnp.dot(h.astype(w2c.dtype), w2c[...],
                  preferred_element_type=jnp.float32) + b2c[...]
    o_ref[...] = out.astype(o_ref.dtype)                            # lane-dense store


def mae_delta_classifier_forward(x_ncl, flat_params, *, block_meta, winsize):
    """x_ncl: (B, in_channels, winsize) -- PyTorch NCL layout.  Returns (B, 1)."""
    B, cin, L = x_ncl.shape
    assert L == winsize and L % 8 == 0
    # NCL -> NLC once (tiny XLA op); channels stay compact — no 4->128 pre-pad in HBM.
    x = jnp.transpose(x_ncl, (0, 2, 1))                             # (B, L, cin)

    # Batch tile: aim for TB*L >= 256 matmul rows (v6e/v7x MXU); pad B to a
    # multiple of TB (padded samples are finite garbage, sliced off afterwards).
    TB = max(1, pl.cdiv(256, L))
    if TB >= B:
        TB = B                                  # single batch tile
    else:
        TB = ((TB + 7) // 8) * 8                # sublane-aligned output tiles
    n_tiles = pl.cdiv(B, TB)
    B_pad = n_tiles * TB
    if B_pad != B:
        x = jnp.pad(x, ((0, B_pad - B), (0, 0), (0, 0)))

    def const_spec(a):                          # params: VMEM-resident, never re-DMA'd
        return pl.BlockSpec(a.shape, lambda b: (0,) * a.ndim)

    kernel = functools.partial(_fused_forward_kernel, L, block_meta)
    out = pl.pallas_call(
        kernel,
        out_shape=jax.ShapeDtypeStruct((B_pad, OUT_LANES), jnp.float32),
        grid=(n_tiles,),
        in_specs=[pl.BlockSpec((TB, L, cin), lambda b: (b, 0, 0))]
                 + [const_spec(a) for a in flat_params],
        out_specs=pl.BlockSpec((TB, OUT_LANES), lambda b: (b, 0)),
        compiler_params=pltpu.CompilerParams(
            dimension_semantics=("parallel",),          # megacore sharding on v7x
            vmem_limit_bytes=48 * 1024 * 1024),         # fits v7x's 64 MiB w/ headroom
    )(x, *flat_params)
    return out[:B, :1]                                  # lane 0 is the real output


# --------------------------------------------------------------------------
# Parameter construction (natural layout) and dense-packing preparation.
# --------------------------------------------------------------------------
def _init_conv_ln(key, cin, cout, k, L, scale=0.1):
    k1, k2, k3, k4 = jax.random.split(key, 4)
    w = jax.random.normal(k1, (k, cin, cout), jnp.float32) * scale
    b = jax.random.normal(k2, (cout,), jnp.float32) * scale
    gamma = 1.0 + jax.random.normal(k3, (L, cout), jnp.float32) * scale
    beta = jax.random.normal(k4, (L, cout), jnp.float32) * scale
    return (w, b, gamma, beta)


def init_params(key, winsize, in_channels, enc_dims, n_hl):
    params = {"blocks": []}
    dims = (in_channels,) + tuple(enc_dims)
    kernels = (5,) + (3,) * (len(enc_dims) - 1)
    for i in range(len(enc_dims)):
        cin, cout, k = dims[i], dims[i + 1], kernels[i]
        key, k1, k2, k3, k4 = jax.random.split(key, 5)
        params["blocks"].append({
            "c1": _init_conv_ln(k1, cin, cout, k, winsize),
            "c2": _init_conv_ln(k2, cout, cout, k, winsize),
            "c3": _init_conv_ln(k3, cout, cout, k, winsize),
            "id": _init_conv_ln(k4, cin, cout, 1, winsize),
        })
    key, k1, k2, k3, k4 = jax.random.split(key, 5)
    params["w1"] = jax.random.normal(k1, (enc_dims[-1], n_hl), jnp.float32) * 0.1
    params["b1"] = jax.random.normal(k2, (n_hl,), jnp.float32) * 0.1
    params["w2"] = jax.random.normal(k3, (n_hl, 1), jnp.float32) * 0.1
    params["b2"] = jax.random.normal(k4, (1,), jnp.float32) * 0.1
    return params


def prepare_params(params, winsize, in_channels, enc_dims, n_hl):
    """Densely pack conv weights for the im2col matmul (contraction depth K*Cin,
    row = k*Cin + c), merge c1 with the 1x1 identity conv, pad only the head to
    128 output lanes, cast matmul weights to MXU_DTYPE.
    Returns (flat list of arrays in kernel order, static per-block (K, Cin, Cout))."""
    dims = (in_channels,) + tuple(enc_dims)
    flat, meta = [], []
    for i, blk in enumerate(params["blocks"]):
        cin, cout = dims[i], dims[i + 1]
        w1, b1, g1, be1 = blk["c1"]
        wid, bid, gid, beid = blk["id"]
        K = w1.shape[0]
        ctr = (K - 1) // 2
        w1_d = w1.reshape(K * cin, cout)                    # dense im2col layout
        wid_d = jnp.zeros((K * cin, cout), jnp.float32)
        wid_d = wid_d.at[ctr * cin:(ctr + 1) * cin, :].set(wid[0])   # centre tap only
        w_m = jnp.concatenate([w1_d, wid_d], axis=1)        # (K*cin, 2*cout)
        b_m = jnp.concatenate([b1, bid]).reshape(1, 2 * cout)
        flat += [w_m.astype(MXU_DTYPE), b_m, g1, be1, gid, beid]
        for name in ("c2", "c3"):
            w, b, g, be = blk[name]
            flat += [w.reshape(K * cout, cout).astype(MXU_DTYPE),
                     b.reshape(1, cout), g, be]
        meta.append((K, cin, cout))
    # Classifier head, padded to a lane-dense 128-wide output slab.
    c_last = enc_dims[-1]
    w1p = jnp.zeros((c_last, OUT_LANES), jnp.float32).at[:, :n_hl].set(params["w1"])
    b1p = jnp.zeros((1, OUT_LANES), jnp.float32).at[0, :n_hl].set(params["b1"])
    w2p = jnp.zeros((OUT_LANES, OUT_LANES), jnp.float32).at[:n_hl, :1].set(params["w2"])
    b2p = jnp.zeros((1, OUT_LANES), jnp.float32).at[0, :1].set(params["b2"])
    flat += [w1p.astype(MXU_DTYPE), b1p, w2p.astype(MXU_DTYPE), b2p]
    return flat, tuple(meta)


if __name__ == "__main__":
    # Small, module-consistent shapes.
    batch, in_channels, winsize = 2, 4, 16
    enc_dims, n_hl = (32, 64, 128), 100

    key = jax.random.PRNGKey(0)
    kx, kp = jax.random.split(key)
    x = jax.random.normal(kx, (batch, in_channels, winsize), jnp.float32)
    params = init_params(kp, winsize, in_channels, enc_dims, n_hl)
    flat_params, block_meta = prepare_params(params, winsize, in_channels,
                                             enc_dims, n_hl)

    fwd = jax.jit(functools.partial(mae_delta_classifier_forward,
                                    block_meta=block_meta, winsize=winsize))
    out = jax.block_until_ready(fwd(x, flat_params))
    assert out.shape == (batch, 1), out.shape
    assert bool(jnp.all(jnp.isfinite(out)))
    print("KERNEL_OK")
</pallas_src>

<mosaic_0001>
module attributes {stable_mosaic.version = 11 : i64} {
  func.func @_fused_forward_kernel(%arg0: i32, %arg1: memref<2x16x4xf32, #tpu.memory_space<vmem>>, %arg2: memref<20x64xbf16, #tpu.memory_space<vmem>>, %arg3: memref<1x64xf32, #tpu.memory_space<vmem>>, %arg4: memref<16x32xf32, #tpu.memory_space<vmem>>, %arg5: memref<16x32xf32, #tpu.memory_space<vmem>>, %arg6: memref<16x32xf32, #tpu.memory_space<vmem>>, %arg7: memref<16x32xf32, #tpu.memory_space<vmem>>, %arg8: memref<160x32xbf16, #tpu.memory_space<vmem>>, %arg9: memref<1x32xf32, #tpu.memory_space<vmem>>, %arg10: memref<16x32xf32, #tpu.memory_space<vmem>>, %arg11: memref<16x32xf32, #tpu.memory_space<vmem>>, %arg12: memref<160x32xbf16, #tpu.memory_space<vmem>>, %arg13: memref<1x32xf32, #tpu.memory_space<vmem>>, %arg14: memref<16x32xf32, #tpu.memory_space<vmem>>, %arg15: memref<16x32xf32, #tpu.memory_space<vmem>>, %arg16: memref<96x128xbf16, #tpu.memory_space<vmem>>, %arg17: memref<1x128xf32, #tpu.memory_space<vmem>>, %arg18: memref<16x64xf32, #tpu.memory_space<vmem>>, %arg19: memref<16x64xf32, #tpu.memory_space<vmem>>, %arg20: memref<16x64xf32, #tpu.memory_space<vmem>>, %arg21: memref<16x64xf32, #tpu.memory_space<vmem>>, %arg22: memref<192x64xbf16, #tpu.memory_space<vmem>>, %arg23: memref<1x64xf32, #tpu.memory_space<vmem>>, %arg24: memref<16x64xf32, #tpu.memory_space<vmem>>, %arg25: memref<16x64xf32, #tpu.memory_space<vmem>>, %arg26: memref<192x64xbf16, #tpu.memory_space<vmem>>, %arg27: memref<1x64xf32, #tpu.memory_space<vmem>>, %arg28: memref<16x64xf32, #tpu.memory_space<vmem>>, %arg29: memref<16x64xf32, #tpu.memory_space<vmem>>, %arg30: memref<192x256xbf16, #tpu.memory_space<vmem>>, %arg31: memref<1x256xf32, #tpu.memory_space<vmem>>, %arg32: memref<16x128xf32, #tpu.memory_space<vmem>>, %arg33: memref<16x128xf32, #tpu.memory_space<vmem>>, %arg34: memref<16x128xf32, #tpu.memory_space<vmem>>, %arg35: memref<16x128xf32, #tpu.memory_space<vmem>>, %arg36: memref<384x128xbf16, #tpu.memory_space<vmem>>, %arg37: memref<1x128xf32, #tpu.memory_space<vmem>>, %arg38: memref<16x128xf32, #tpu.memory_space<vmem>>, %arg39: memref<16x128xf32, #tpu.memory_space<vmem>>, %arg40: memref<384x128xbf16, #tpu.memory_space<vmem>>, %arg41: memref<1x128xf32, #tpu.memory_space<vmem>>, %arg42: memref<16x128xf32, #tpu.memory_space<vmem>>, %arg43: memref<16x128xf32, #tpu.memory_space<vmem>>, %arg44: memref<128x128xbf16, #tpu.memory_space<vmem>>, %arg45: memref<1x128xf32, #tpu.memory_space<vmem>>, %arg46: memref<128x128xbf16, #tpu.memory_space<vmem>>, %arg47: memref<1x128xf32, #tpu.memory_space<vmem>>, %arg48: memref<2x128xf32, #tpu.memory_space<vmem>>) attributes {dimension_semantics = [#tpu.dimension_semantics<parallel>], iteration_bounds = array<i64: 1>, scalar_prefetch = 0 : i64, scratch_operands = 0 : i64, tpu.core_type = #tpu.core_type<tc>, window_params = [{transform_indices = @transform_0, window_bounds = array<i64: 2, 16, 4>}, {pipeline_mode = #tpu.pipeline_mode<synchronous>, transform_indices = @transform_1, window_bounds = array<i64: 20, 64>}, {pipeline_mode = #tpu.pipeline_mode<synchronous>, transform_indices = @transform_2, window_bounds = array<i64: 1, 64>}, {pipeline_mode = #tpu.pipeline_mode<synchronous>, transform_indices = @transform_3, window_bounds = array<i64: 16, 32>}, {pipeline_mode = #tpu.pipeline_mode<synchronous>, transform_indices = @transform_4, window_bounds = array<i64: 16, 32>}, {pipeline_mode = #tpu.pipeline_mode<synchronous>, transform_indices = @transform_5, window_bounds = array<i64: 16, 32>}, {pipeline_mode = #tpu.pipeline_mode<synchronous>, transform_indices = @transform_6, window_bounds = array<i64: 16, 32>}, {pipeline_mode = #tpu.pipeline_mode<synchronous>, transform_indices = @transform_7, window_bounds = array<i64: 160, 32>}, {pipeline_mode = #tpu.pipeline_mode<synchronous>, transform_indices = @transform_8, window_bounds = array<i64: 1, 32>}, {pipeline_mode = #tpu.pipeline_mode<synchronous>, transform_indices = @transform_9, window_bounds = array<i64: 16, 32>}, {pipeline_mode = #tpu.pipeline_mode<synchronous>, transform_indices = @transform_10, window_bounds = array<i64: 16, 32>}, {pipeline_mode = #tpu.pipeline_mode<synchronous>, transform_indices = @transform_11, window_bounds = array<i64: 160, 32>}, {pipeline_mode = #tpu.pipeline_mode<synchronous>, transform_indices = @transform_12, window_bounds = array<i64: 1, 32>}, {pipeline_mode = #tpu.pipeline_mode<synchronous>, transform_indices = @transform_13, window_bounds = array<i64: 16, 32>}, {pipeline_mode = #tpu.pipeline_mode<synchronous>, transform_indices = @transform_14, window_bounds = array<i64: 16, 32>}, {pipeline_mode = #tpu.pipeline_mode<synchronous>, transform_indices = @transform_15, window_bounds = array<i64: 96, 128>}, {pipeline_mode = #tpu.pipeline_mode<synchronous>, transform_indices = @transform_16, window_bounds = array<i64: 1, 128>}, {pipeline_mode = #tpu.pipeline_mode<synchronous>, transform_indices = @transform_17, window_bounds = array<i64: 16, 64>}, {pipeline_mode = #tpu.pipeline_mode<synchronous>, transform_indices = @transform_18, window_bounds = array<i64: 16, 64>}, {pipeline_mode = #tpu.pipeline_mode<synchronous>, transform_indices = @transform_19, window_bounds = array<i64: 16, 64>}, {pipeline_mode = #tpu.pipeline_mode<synchronous>, transform_indices = @transform_20, window_bounds = array<i64: 16, 64>}, {pipeline_mode = #tpu.pipeline_mode<synchronous>, transform_indices = @transform_21, window_bounds = array<i64: 192, 64>}, {pipeline_mode = #tpu.pipeline_mode<synchronous>, transform_indices = @transform_22, window_bounds = array<i64: 1, 64>}, {pipeline_mode = #tpu.pipeline_mode<synchronous>, transform_indices = @transform_23, window_bounds = array<i64: 16, 64>}, {pipeline_mode = #tpu.pipeline_mode<synchronous>, transform_indices = @transform_24, window_bounds = array<i64: 16, 64>}, {pipeline_mode = #tpu.pipeline_mode<synchronous>, transform_indices = @transform_25, window_bounds = array<i64: 192, 64>}, {pipeline_mode = #tpu.pipeline_mode<synchronous>, transform_indices = @transform_26, window_bounds = array<i64: 1, 64>}, {pipeline_mode = #tpu.pipeline_mode<synchronous>, transform_indices = @transform_27, window_bounds = array<i64: 16, 64>}, {pipeline_mode = #tpu.pipeline_mode<synchronous>, transform_indices = @transform_28, window_bounds = array<i64: 16, 64>}, {pipeline_mode = #tpu.pipeline_mode<synchronous>, transform_indices = @transform_29, window_bounds = array<i64: 192, 256>}, {pipeline_mode = #tpu.pipeline_mode<synchronous>, transform_indices = @transform_30, window_bounds = array<i64: 1, 256>}, {pipeline_mode = #tpu.pipeline_mode<synchronous>, transform_indices = @transform_31, window_bounds = array<i64: 16, 128>}, {pipeline_mode = #tpu.pipeline_mode<synchronous>, transform_indices = @transform_32, window_bounds = array<i64: 16, 128>}, {pipeline_mode = #tpu.pipeline_mode<synchronous>, transform_indices = @transform_33, window_bounds = array<i64: 16, 128>}, {pipeline_mode = #tpu.pipeline_mode<synchronous>, transform_indices = @transform_34, window_bounds = array<i64: 16, 128>}, {pipeline_mode = #tpu.pipeline_mode<synchronous>, transform_indices = @transform_35, window_bounds = array<i64: 384, 128>}, {pipeline_mode = #tpu.pipeline_mode<synchronous>, transform_indices = @transform_36, window_bounds = array<i64: 1, 128>}, {pipeline_mode = #tpu.pipeline_mode<synchronous>, transform_indices = @transform_37, window_bounds = array<i64: 16, 128>}, {pipeline_mode = #tpu.pipeline_mode<synchronous>, transform_indices = @transform_38, window_bounds = array<i64: 16, 128>}, {pipeline_mode = #tpu.pipeline_mode<synchronous>, transform_indices = @transform_39, window_bounds = array<i64: 384, 128>}, {pipeline_mode = #tpu.pipeline_mode<synchronous>, transform_indices = @transform_40, window_bounds = array<i64: 1, 128>}, {pipeline_mode = #tpu.pipeline_mode<synchronous>, transform_indices = @transform_41, window_bounds = array<i64: 16, 128>}, {pipeline_mode = #tpu.pipeline_mode<synchronous>, transform_indices = @transform_42, window_bounds = array<i64: 16, 128>}, {pipeline_mode = #tpu.pipeline_mode<synchronous>, transform_indices = @transform_43, window_bounds = array<i64: 128, 128>}, {pipeline_mode = #tpu.pipeline_mode<synchronous>, transform_indices = @transform_44, window_bounds = array<i64: 1, 128>}, {pipeline_mode = #tpu.pipeline_mode<synchronous>, transform_indices = @transform_45, window_bounds = array<i64: 128, 128>}, {pipeline_mode = #tpu.pipeline_mode<synchronous>, transform_indices = @transform_46, window_bounds = array<i64: 1, 128>}, {transform_indices = @transform_47, window_bounds = array<i64: 2, 128>}]} {
    %0 = tpu.iota {dimensions = array<i32: 0>} : vector<32x1xi32>
    %c16_i32 = arith.constant 16 : i32
    %c0_i32 = arith.constant 0 : i32
    %1 = arith.cmpi eq, %c16_i32, %c0_i32 : i32
    %c1_i32 = arith.constant 1 : i32
    %2 = arith.select %1, %c1_i32, %c16_i32 : i32
    %3 = vector.broadcast %2 : i32 to vector<32x1xi32>
    %4 = arith.remsi %0, %3 : vector<32x1xi32>
    %c0_i32_0 = arith.constant 0 : i32
    %5 = vector.broadcast %c0_i32_0 : i32 to vector<32x1xi32>
    %6 = arith.cmpi ne, %4, %5 : vector<32x1xi32>
    %c0_i32_1 = arith.constant 0 : i32
    %7 = vector.broadcast %c0_i32_1 : i32 to vector<32x1xi32>
    %8 = arith.cmpi slt, %4, %7 : vector<32x1xi32>
    %c0_i32_2 = arith.constant 0 : i32
    %9 = arith.cmpi slt, %2, %c0_i32_2 : i32
    %10 = vector.broadcast %9 : i1 to vector<32x1xi1>
    %11 = vector.broadcast %10 : vector<32x1xi1> to vector<32x1xi1>
    %12 = arith.xori %8, %11 : vector<32x1xi1>
    %13 = arith.andi %12, %6 : vector<32x1xi1>
    %14 = vector.broadcast %2 : i32 to vector<32x1xi32>
    %15 = arith.addi %4, %14 : vector<32x1xi32>
    %16 = arith.select %13, %15, %4 : vector<32x1xi1>, vector<32x1xi32>
    %c0 = arith.constant 0 : index
    %c0_3 = arith.constant 0 : index
    %c0_4 = arith.constant 0 : index
    %17 = vector.load %arg1[%c0, %c0_3, %c0_4] : memref<2x16x4xf32, #tpu.memory_space<vmem>>, vector<2x16x4xf32>
    %18 = vector.shape_cast %17 : vector<2x16x4xf32> to vector<32x4xf32>
    %c2_i32 = arith.constant 2 : i32
    %19 = tpu.dynamic_rotate %18 by %c2_i32 dim 0 : vector<32x4xf32>, i32 -> vector<32x4xf32>
    %c-2_i32 = arith.constant -2 : i32
    %20 = vector.broadcast %c-2_i32 : i32 to vector<32x1xi32>
    %21 = arith.addi %16, %20 : vector<32x1xi32>
    %c0_i32_5 = arith.constant 0 : i32
    %22 = vector.broadcast %c0_i32_5 : i32 to vector<32x1xi32>
    %23 = arith.cmpi sge, %21, %22 : vector<32x1xi32>
    %c-2_i32_6 = arith.constant -2 : i32
    %24 = vector.broadcast %c-2_i32_6 : i32 to vector<32x1xi32>
    %25 = arith.addi %16, %24 : vector<32x1xi32>
    %c16_i32_7 = arith.constant 16 : i32
    %26 = vector.broadcast %c16_i32_7 : i32 to vector<32x1xi32>
    %27 = arith.cmpi slt, %25, %26 : vector<32x1xi32>
    %28 = arith.andi %23, %27 : vector<32x1xi1>
    %cst = arith.constant 0.000000e+00 : f32
    %29 = vector.shape_cast %28 : vector<32x1xi1> to vector<32x1xi1>
    %30 = vector.broadcast %29 : vector<32x1xi1> to vector<32x4xi1>
    %31 = vector.broadcast %cst : f32 to vector<32x4xf32>
    %32 = arith.select %30, %19, %31 : vector<32x4xi1>, vector<32x4xf32>
    %c1_i32_8 = arith.constant 1 : i32
    %33 = tpu.dynamic_rotate %18 by %c1_i32_8 dim 0 : vector<32x4xf32>, i32 -> vector<32x4xf32>
    %c-1_i32 = arith.constant -1 : i32
    %34 = vector.broadcast %c-1_i32 : i32 to vector<32x1xi32>
    %35 = arith.addi %16, %34 : vector<32x1xi32>
    %c0_i32_9 = arith.constant 0 : i32
    %36 = vector.broadcast %c0_i32_9 : i32 to vector<32x1xi32>
    %37 = arith.cmpi sge, %35, %36 : vector<32x1xi32>
    %c-1_i32_10 = arith.constant -1 : i32
    %38 = vector.broadcast %c-1_i32_10 : i32 to vector<32x1xi32>
    %39 = arith.addi %16, %38 : vector<32x1xi32>
    %c16_i32_11 = arith.constant 16 : i32
    %40 = vector.broadcast %c16_i32_11 : i32 to vector<32x1xi32>
    %41 = arith.cmpi slt, %39, %40 : vector<32x1xi32>
    %42 = arith.andi %37, %41 : vector<32x1xi1>
    %cst_12 = arith.constant 0.000000e+00 : f32
    %43 = vector.shape_cast %42 : vector<32x1xi1> to vector<32x1xi1>
    %44 = vector.broadcast %43 : vector<32x1xi1> to vector<32x4xi1>
    %45 = vector.broadcast %cst_12 : f32 to vector<32x4xf32>
    %46 = arith.select %44, %33, %45 : vector<32x4xi1>, vector<32x4xf32>
    %c31_i32 = arith.constant 31 : i32
    %47 = tpu.dynamic_rotate %18 by %c31_i32 dim 0 : vector<32x4xf32>, i32 -> vector<32x4xf32>
    %c1_i32_13 = arith.constant 1 : i32
    %48 = vector.broadcast %c1_i32_13 : i32 to vector<32x1xi32>
    %49 = arith.addi %16, %48 : vector<32x1xi32>
    %c0_i32_14 = arith.constant 0 : i32
    %50 = vector.broadcast %c0_i32_14 : i32 to vector<32x1xi32>
    %51 = arith.cmpi sge, %49, %50 : vector<32x1xi32>
    %c1_i32_15 = arith.constant 1 : i32
    %52 = vector.broadcast %c1_i32_15 : i32 to vector<32x1xi32>
    %53 = arith.addi %16, %52 : vector<32x1xi32>
    %c16_i32_16 = arith.constant 16 : i32
    %54 = vector.broadcast %c16_i32_16 : i32 to vector<32x1xi32>
    %55 = arith.cmpi slt, %53, %54 : vector<32x1xi32>
    %56 = arith.andi %51, %55 : vector<32x1xi1>
    %cst_17 = arith.constant 0.000000e+00 : f32
    %57 = vector.shape_cast %56 : vector<32x1xi1> to vector<32x1xi1>
    %58 = vector.broadcast %57 : vector<32x1xi1> to vector<32x4xi1>
    %59 = vector.broadcast %cst_17 : f32 to vector<32x4xf32>
    %60 = arith.select %58, %47, %59 : vector<32x4xi1>, vector<32x4xf32>
    %c30_i32 = arith.constant 30 : i32
    %61 = tpu.dynamic_rotate %18 by %c30_i32 dim 0 : vector<32x4xf32>, i32 -> vector<32x4xf32>
    %c2_i32_18 = arith.constant 2 : i32
    %62 = vector.broadcast %c2_i32_18 : i32 to vector<32x1xi32>
    %63 = arith.addi %16, %62 : vector<32x1xi32>
    %c0_i32_19 = arith.constant 0 : i32
    %64 = vector.broadcast %c0_i32_19 : i32 to vector<32x1xi32>
    %65 = arith.cmpi sge, %63, %64 : vector<32x1xi32>
    %c2_i32_20 = arith.constant 2 : i32
    %66 = vector.broadcast %c2_i32_20 : i32 to vector<32x1xi32>
    %67 = arith.addi %16, %66 : vector<32x1xi32>
    %c16_i32_21 = arith.constant 16 : i32
    %68 = vector.broadcast %c16_i32_21 : i32 to vector<32x1xi32>
    %69 = arith.cmpi slt, %67, %68 : vector<32x1xi32>
    %70 = arith.andi %65, %69 : vector<32x1xi1>
    %cst_22 = arith.constant 0.000000e+00 : f32
    %71 = vector.shape_cast %70 : vector<32x1xi1> to vector<32x1xi1>
    %72 = vector.broadcast %71 : vector<32x1xi1> to vector<32x4xi1>
    %73 = vector.broadcast %cst_22 : f32 to vector<32x4xf32>
    %74 = arith.select %72, %61, %73 : vector<32x4xi1>, vector<32x4xf32>
    %75 = tpu.concatenate %32, %46, %18, %60, %74 in 1 : vector<32x4xf32>, vector<32x4xf32>, vector<32x4xf32>, vector<32x4xf32>, vector<32x4xf32> -> vector<32x20xf32>
    %76 = arith.truncf %75 : vector<32x20xf32> to vector<32x20xbf16>
    %c0_23 = arith.constant 0 : index
    %c0_24 = arith.constant 0 : index
    %77 = vector.load %arg2[%c0_23, %c0_24] : memref<20x64xbf16, #tpu.memory_space<vmem>>, vector<20x64xbf16>
    %cst_25 = arith.constant dense<0.000000e+00> : vector<32x64xf32>
    %78 = tpu.matmul %76, %77, %cst_25 {dimension_numbers = #tpu.dot_dimension_numbers<[1], [0], [0], [1], [0, 0, 1, 1], [], []>} : vector<32x20xbf16>, vector<20x64xbf16>, vector<32x64xf32> -> vector<32x64xf32>
    %c0_26 = arith.constant 0 : index
    %c0_27 = arith.constant 0 : index
    %79 = vector.load %arg3[%c0_26, %c0_27] : memref<1x64xf32, #tpu.memory_space<vmem>>, vector<1x64xf32>
    %80 = vector.broadcast %79 : vector<1x64xf32> to vector<32x64xf32>
    %81 = arith.addf %78, %80 : vector<32x64xf32>
    %82 = vector.shape_cast %81 : vector<32x64xf32> to vector<2x16x64xf32>
    %83 = vector.extract_strided_slice %82 {offsets = [0, 0, 0], sizes = [2, 16, 32], strides = [1, 1, 1]} : vector<2x16x64xf32> to vector<2x16x32xf32>
    %c0_28 = arith.constant 0 : index
    %c0_29 = arith.constant 0 : index
    %84 = vector.load %arg4[%c0_28, %c0_29] : memref<16x32xf32, #tpu.memory_space<vmem>>, vector<16x32xf32>
    %c0_30 = arith.constant 0 : index
    %c0_31 = arith.constant 0 : index
    %85 = vector.load %arg5[%c0_30, %c0_31] : memref<16x32xf32, #tpu.memory_space<vmem>>, vector<16x32xf32>
    %cst_32 = arith.constant dense<0.000000e+00> : vector<2x16xf32>
    %86 = vector.multi_reduction <add>, %83, %cst_32 [2] : vector<2x16x32xf32> to vector<2x16xf32>
    %87 = vector.shape_cast %86 : vector<2x16xf32> to vector<2x16x1xf32>
    %cst_33 = arith.constant dense<0.000000e+00> : vector<2x1xf32>
    %88 = vector.multi_reduction <add>, %87, %cst_33 [1] : vector<2x16x1xf32> to vector<2x1xf32>
    %89 = vector.shape_cast %88 : vector<2x1xf32> to vector<2x1x1xf32>
    %cst_34 = arith.constant 5.120000e+02 : f32
    %90 = vector.broadcast %cst_34 : f32 to vector<2x1x1xf32>
    %91 = arith.divf %89, %90 : vector<2x1x1xf32>
    %92 = vector.broadcast %91 : vector<2x1x1xf32> to vector<2x16x32xf32>
    %93 = arith.subf %83, %92 : vector<2x16x32xf32>
    %94 = arith.mulf %93, %93 : vector<2x16x32xf32>
    %cst_35 = arith.constant dense<0.000000e+00> : vector<2x16xf32>
    %95 = vector.multi_reduction <add>, %94, %cst_35 [2] : vector<2x16x32xf32> to vector<2x16xf32>
    %96 = vector.shape_cast %95 : vector<2x16xf32> to vector<2x16x1xf32>
    %cst_36 = arith.constant dense<0.000000e+00> : vector<2x1xf32>
    %97 = vector.multi_reduction <add>, %96, %cst_36 [1] : vector<2x16x1xf32> to vector<2x1xf32>
    %98 = vector.shape_cast %97 : vector<2x1xf32> to vector<2x1x1xf32>
    %cst_37 = arith.constant 5.120000e+02 : f32
    %99 = vector.broadcast %cst_37 : f32 to vector<2x1x1xf32>
    %100 = arith.divf %98, %99 : vector<2x1x1xf32>
    %cst_38 = arith.constant 9.99999974E-6 : f32
    %101 = vector.broadcast %cst_38 : f32 to vector<2x1x1xf32>
    %102 = arith.addf %100, %101 : vector<2x1x1xf32>
    %103 = math.rsqrt %102 : vector<2x1x1xf32>
    %104 = vector.broadcast %103 : vector<2x1x1xf32> to vector<2x16x32xf32>
    %105 = arith.mulf %93, %104 : vector<2x16x32xf32>
    %106 = vector.shape_cast %84 : vector<16x32xf32> to vector<1x16x32xf32>
    %107 = vector.broadcast %106 : vector<1x16x32xf32> to vector<2x16x32xf32>
    %108 = arith.mulf %105, %107 : vector<2x16x32xf32>
    %109 = vector.shape_cast %85 : vector<16x32xf32> to vector<1x16x32xf32>
    %110 = vector.broadcast %109 : vector<1x16x32xf32> to vector<2x16x32xf32>
    %111 = arith.addf %108, %110 : vector<2x16x32xf32>
    %cst_39 = arith.constant 0.000000e+00 : f32
    %112 = vector.broadcast %cst_39 : f32 to vector<2x16x32xf32>
    %113 = arith.maximumf %111, %112 : vector<2x16x32xf32>
    %114 = vector.extract_strided_slice %82 {offsets = [0, 0, 32], sizes = [2, 16, 32], strides = [1, 1, 1]} : vector<2x16x64xf32> to vector<2x16x32xf32>
    %c0_40 = arith.constant 0 : index
    %c0_41 = arith.constant 0 : index
    %115 = vector.load %arg6[%c0_40, %c0_41] : memref<16x32xf32, #tpu.memory_space<vmem>>, vector<16x32xf32>
    %c0_42 = arith.constant 0 : index
    %c0_43 = arith.constant 0 : index
    %116 = vector.load %arg7[%c0_42, %c0_43] : memref<16x32xf32, #tpu.memory_space<vmem>>, vector<16x32xf32>
    %cst_44 = arith.constant dense<0.000000e+00> : vector<2x16xf32>
    %117 = vector.multi_reduction <add>, %114, %cst_44 [2] : vector<2x16x32xf32> to vector<2x16xf32>
    %118 = vector.shape_cast %117 : vector<2x16xf32> to vector<2x16x1xf32>
    %cst_45 = arith.constant dense<0.000000e+00> : vector<2x1xf32>
    %119 = vector.multi_reduction <add>, %118, %cst_45 [1] : vector<2x16x1xf32> to vector<2x1xf32>
    %120 = vector.shape_cast %119 : vector<2x1xf32> to vector<2x1x1xf32>
    %cst_46 = arith.constant 5.120000e+02 : f32
    %121 = vector.broadcast %cst_46 : f32 to vector<2x1x1xf32>
    %122 = arith.divf %120, %121 : vector<2x1x1xf32>
    %123 = vector.broadcast %122 : vector<2x1x1xf32> to vector<2x16x32xf32>
    %124 = arith.subf %114, %123 : vector<2x16x32xf32>
    %125 = arith.mulf %124, %124 : vector<2x16x32xf32>
    %cst_47 = arith.constant dense<0.000000e+00> : vector<2x16xf32>
    %126 = vector.multi_reduction <add>, %125, %cst_47 [2] : vector<2x16x32xf32> to vector<2x16xf32>
    %127 = vector.shape_cast %126 : vector<2x16xf32> to vector<2x16x1xf32>
    %cst_48 = arith.constant dense<0.000000e+00> : vector<2x1xf32>
    %128 = vector.multi_reduction <add>, %127, %cst_48 [1] : vector<2x16x1xf32> to vector<2x1xf32>
    %129 = vector.shape_cast %128 : vector<2x1xf32> to vector<2x1x1xf32>
    %cst_49 = arith.constant 5.120000e+02 : f32
    %130 = vector.broadcast %cst_49 : f32 to vector<2x1x1xf32>
    %131 = arith.divf %129, %130 : vector<2x1x1xf32>
    %cst_50 = arith.constant 9.99999974E-6 : f32
    %132 = vector.broadcast %cst_50 : f32 to vector<2x1x1xf32>
    %133 = arith.addf %131, %132 : vector<2x1x1xf32>
    %134 = math.rsqrt %133 : vector<2x1x1xf32>
    %135 = vector.broadcast %134 : vector<2x1x1xf32> to vector<2x16x32xf32>
    %136 = arith.mulf %124, %135 : vector<2x16x32xf32>
    %137 = vector.shape_cast %115 : vector<16x32xf32> to vector<1x16x32xf32>
    %138 = vector.broadcast %137 : vector<1x16x32xf32> to vector<2x16x32xf32>
    %139 = arith.mulf %136, %138 : vector<2x16x32xf32>
    %140 = vector.shape_cast %116 : vector<16x32xf32> to vector<1x16x32xf32>
    %141 = vector.broadcast %140 : vector<1x16x32xf32> to vector<2x16x32xf32>
    %142 = arith.addf %139, %141 : vector<2x16x32xf32>
    %143 = vector.shape_cast %113 : vector<2x16x32xf32> to vector<32x32xf32>
    %c2_i32_51 = arith.constant 2 : i32
    %144 = tpu.dynamic_rotate %143 by %c2_i32_51 dim 0 : vector<32x32xf32>, i32 -> vector<32x32xf32>
    %c-2_i32_52 = arith.constant -2 : i32
    %145 = vector.broadcast %c-2_i32_52 : i32 to vector<32x1xi32>
    %146 = arith.addi %16, %145 : vector<32x1xi32>
    %c0_i32_53 = arith.constant 0 : i32
    %147 = vector.broadcast %c0_i32_53 : i32 to vector<32x1xi32>
    %148 = arith.cmpi sge, %146, %147 : vector<32x1xi32>
    %c-2_i32_54 = arith.constant -2 : i32
    %149 = vector.broadcast %c-2_i32_54 : i32 to vector<32x1xi32>
    %150 = arith.addi %16, %149 : vector<32x1xi32>
    %c16_i32_55 = arith.constant 16 : i32
    %151 = vector.broadcast %c16_i32_55 : i32 to vector<32x1xi32>
    %152 = arith.cmpi slt, %150, %151 : vector<32x1xi32>
    %153 = arith.andi %148, %152 : vector<32x1xi1>
    %cst_56 = arith.constant 0.000000e+00 : f32
    %154 = vector.shape_cast %153 : vector<32x1xi1> to vector<32x1xi1>
    %155 = vector.broadcast %154 : vector<32x1xi1> to vector<32x32xi1>
    %156 = vector.broadcast %cst_56 : f32 to vector<32x32xf32>
    %157 = arith.select %155, %144, %156 : vector<32x32xi1>, vector<32x32xf32>
    %c1_i32_57 = arith.constant 1 : i32
    %158 = tpu.dynamic_rotate %143 by %c1_i32_57 dim 0 : vector<32x32xf32>, i32 -> vector<32x32xf32>
    %c-1_i32_58 = arith.constant -1 : i32
    %159 = vector.broadcast %c-1_i32_58 : i32 to vector<32x1xi32>
    %160 = arith.addi %16, %159 : vector<32x1xi32>
    %c0_i32_59 = arith.constant 0 : i32
    %161 = vector.broadcast %c0_i32_59 : i32 to vector<32x1xi32>
    %162 = arith.cmpi sge, %160, %161 : vector<32x1xi32>
    %c-1_i32_60 = arith.constant -1 : i32
    %163 = vector.broadcast %c-1_i32_60 : i32 to vector<32x1xi32>
    %164 = arith.addi %16, %163 : vector<32x1xi32>
    %c16_i32_61 = arith.constant 16 : i32
    %165 = vector.broadcast %c16_i32_61 : i32 to vector<32x1xi32>
    %166 = arith.cmpi slt, %164, %165 : vector<32x1xi32>
    %167 = arith.andi %162, %166 : vector<32x1xi1>
    %cst_62 = arith.constant 0.000000e+00 : f32
    %168 = vector.shape_cast %167 : vector<32x1xi1> to vector<32x1xi1>
    %169 = vector.broadcast %168 : vector<32x1xi1> to vector<32x32xi1>
    %170 = vector.broadcast %cst_62 : f32 to vector<32x32xf32>
    %171 = arith.select %169, %158, %170 : vector<32x32xi1>, vector<32x32xf32>
    %c31_i32_63 = arith.constant 31 : i32
    %172 = tpu.dynamic_rotate %143 by %c31_i32_63 dim 0 : vector<32x32xf32>, i32 -> vector<32x32xf32>
    %c1_i32_64 = arith.constant 1 : i32
    %173 = vector.broadcast %c1_i32_64 : i32 to vector<32x1xi32>
    %174 = arith.addi %16, %173 : vector<32x1xi32>
    %c0_i32_65 = arith.constant 0 : i32
    %175 = vector.broadcast %c0_i32_65 : i32 to vector<32x1xi32>
    %176 = arith.cmpi sge, %174, %175 : vector<32x1xi32>
    %c1_i32_66 = arith.constant 1 : i32
    %177 = vector.broadcast %c1_i32_66 : i32 to vector<32x1xi32>
    %178 = arith.addi %16, %177 : vector<32x1xi32>
    %c16_i32_67 = arith.constant 16 : i32
    %179 = vector.broadcast %c16_i32_67 : i32 to vector<32x1xi32>
    %180 = arith.cmpi slt, %178, %179 : vector<32x1xi32>
    %181 = arith.andi %176, %180 : vector<32x1xi1>
    %cst_68 = arith.constant 0.000000e+00 : f32
    %182 = vector.shape_cast %181 : vector<32x1xi1> to vector<32x1xi1>
    %183 = vector.broadcast %182 : vector<32x1xi1> to vector<32x32xi1>
    %184 = vector.broadcast %cst_68 : f32 to vector<32x32xf32>
    %185 = arith.select %183, %172, %184 : vector<32x32xi1>, vector<32x32xf32>
    %c30_i32_69 = arith.constant 30 : i32
    %186 = tpu.dynamic_rotate %143 by %c30_i32_69 dim 0 : vector<32x32xf32>, i32 -> vector<32x32xf32>
    %c2_i32_70 = arith.constant 2 : i32
    %187 = vector.broadcast %c2_i32_70 : i32 to vector<32x1xi32>
    %188 = arith.addi %16, %187 : vector<32x1xi32>
    %c0_i32_71 = arith.constant 0 : i32
    %189 = vector.broadcast %c0_i32_71 : i32 to vector<32x1xi32>
    %190 = arith.cmpi sge, %188, %189 : vector<32x1xi32>
    %c2_i32_72 = arith.constant 2 : i32
    %191 = vector.broadcast %c2_i32_72 : i32 to vector<32x1xi32>
    %192 = arith.addi %16, %191 : vector<32x1xi32>
    %c16_i32_73 = arith.constant 16 : i32
    %193 = vector.broadcast %c16_i32_73 : i32 to vector<32x1xi32>
    %194 = arith.cmpi slt, %192, %193 : vector<32x1xi32>
    %195 = arith.andi %190, %194 : vector<32x1xi1>
    %cst_74 = arith.constant 0.000000e+00 : f32
    %196 = vector.shape_cast %195 : vector<32x1xi1> to vector<32x1xi1>
    %197 = vector.broadcast %196 : vector<32x1xi1> to vector<32x32xi1>
    %198 = vector.broadcast %cst_74 : f32 to vector<32x32xf32>
    %199 = arith.select %197, %186, %198 : vector<32x32xi1>, vector<32x32xf32>
    %200 = tpu.concatenate %157, %171, %143, %185, %199 in 1 : vector<32x32xf32>, vector<32x32xf32>, vector<32x32xf32>, vector<32x32xf32>, vector<32x32xf32> -> vector<32x160xf32>
    %201 = arith.truncf %200 : vector<32x160xf32> to vector<32x160xbf16>
    %c0_75 = arith.constant 0 : index
    %c0_76 = arith.constant 0 : index
    %202 = vector.load %arg8[%c0_75, %c0_76] : memref<160x32xbf16, #tpu.memory_space<vmem>>, vector<160x32xbf16>
    %cst_77 = arith.constant dense<0.000000e+00> : vector<32x32xf32>
    %203 = tpu.matmul %201, %202, %cst_77 {dimension_numbers = #tpu.dot_dimension_numbers<[1], [0], [0], [1], [0, 0, 1, 1], [], []>} : vector<32x160xbf16>, vector<160x32xbf16>, vector<32x32xf32> -> vector<32x32xf32>
    %c0_78 = arith.constant 0 : index
    %c0_79 = arith.constant 0 : index
    %204 = vector.load %arg9[%c0_78, %c0_79] : memref<1x32xf32, #tpu.memory_space<vmem>>, vector<1x32xf32>
    %205 = vector.broadcast %204 : vector<1x32xf32> to vector<32x32xf32>
    %206 = arith.addf %203, %205 : vector<32x32xf32>
    %207 = vector.shape_cast %206 : vector<32x32xf32> to vector<2x16x32xf32>
    %c0_80 = arith.constant 0 : index
    %c0_81 = arith.constant 0 : index
    %208 = vector.load %arg10[%c0_80, %c0_81] : memref<16x32xf32, #tpu.memory_space<vmem>>, vector<16x32xf32>
    %c0_82 = arith.constant 0 : index
    %c0_83 = arith.constant 0 : index
    %209 = vector.load %arg11[%c0_82, %c0_83] : memref<16x32xf32, #tpu.memory_space<vmem>>, vector<16x32xf32>
    %cst_84 = arith.constant dense<0.000000e+00> : vector<2x16xf32>
    %210 = vector.multi_reduction <add>, %207, %cst_84 [2] : vector<2x16x32xf32> to vector<2x16xf32>
    %211 = vector.shape_cast %210 : vector<2x16xf32> to vector<2x16x1xf32>
    %cst_85 = arith.constant dense<0.000000e+00> : vector<2x1xf32>
    %212 = vector.multi_reduction <add>, %211, %cst_85 [1] : vector<2x16x1xf32> to vector<2x1xf32>
    %213 = vector.shape_cast %212 : vector<2x1xf32> to vector<2x1x1xf32>
    %cst_86 = arith.constant 5.120000e+02 : f32
    %214 = vector.broadcast %cst_86 : f32 to vector<2x1x1xf32>
    %215 = arith.divf %213, %214 : vector<2x1x1xf32>
    %216 = vector.broadcast %215 : vector<2x1x1xf32> to vector<2x16x32xf32>
    %217 = arith.subf %207, %216 : vector<2x16x32xf32>
    %218 = arith.mulf %217, %217 : vector<2x16x32xf32>
    %cst_87 = arith.constant dense<0.000000e+00> : vector<2x16xf32>
    %219 = vector.multi_reduction <add>, %218, %cst_87 [2] : vector<2x16x32xf32> to vector<2x16xf32>
    %220 = vector.shape_cast %219 : vector<2x16xf32> to vector<2x16x1xf32>
    %cst_88 = arith.constant dense<0.000000e+00> : vector<2x1xf32>
    %221 = vector.multi_reduction <add>, %220, %cst_88 [1] : vector<2x16x1xf32> to vector<2x1xf32>
    %222 = vector.shape_cast %221 : vector<2x1xf32> to vector<2x1x1xf32>
    %cst_89 = arith.constant 5.120000e+02 : f32
    %223 = vector.broadcast %cst_89 : f32 to vector<2x1x1xf32>
    %224 = arith.divf %222, %223 : vector<2x1x1xf32>
    %cst_90 = arith.constant 9.99999974E-6 : f32
    %225 = vector.broadcast %cst_90 : f32 to vector<2x1x1xf32>
    %226 = arith.addf %224, %225 : vector<2x1x1xf32>
    %227 = math.rsqrt %226 : vector<2x1x1xf32>
    %228 = vector.broadcast %227 : vector<2x1x1xf32> to vector<2x16x32xf32>
    %229 = arith.mulf %217, %228 : vector<2x16x32xf32>
    %230 = vector.shape_cast %208 : vector<16x32xf32> to vector<1x16x32xf32>
    %231 = vector.broadcast %230 : vector<1x16x32xf32> to vector<2x16x32xf32>
    %232 = arith.mulf %229, %231 : vector<2x16x32xf32>
    %233 = vector.shape_cast %209 : vector<16x32xf32> to vector<1x16x32xf32>
    %234 = vector.broadcast %233 : vector<1x16x32xf32> to vector<2x16x32xf32>
    %235 = arith.addf %232, %234 : vector<2x16x32xf32>
    %cst_91 = arith.constant 0.000000e+00 : f32
    %236 = vector.broadcast %cst_91 : f32 to vector<2x16x32xf32>
    %237 = arith.maximumf %235, %236 : vector<2x16x32xf32>
    %238 = vector.shape_cast %237 : vector<2x16x32xf32> to vector<32x32xf32>
    %c2_i32_92 = arith.constant 2 : i32
    %239 = tpu.dynamic_rotate %238 by %c2_i32_92 dim 0 : vector<32x32xf32>, i32 -> vector<32x32xf32>
    %c-2_i32_93 = arith.constant -2 : i32
    %240 = vector.broadcast %c-2_i32_93 : i32 to vector<32x1xi32>
    %241 = arith.addi %16, %240 : vector<32x1xi32>
    %c0_i32_94 = arith.constant 0 : i32
    %242 = vector.broadcast %c0_i32_94 : i32 to vector<32x1xi32>
    %243 = arith.cmpi sge, %241, %242 : vector<32x1xi32>
    %c-2_i32_95 = arith.constant -2 : i32
    %244 = vector.broadcast %c-2_i32_95 : i32 to vector<32x1xi32>
    %245 = arith.addi %16, %244 : vector<32x1xi32>
    %c16_i32_96 = arith.constant 16 : i32
    %246 = vector.broadcast %c16_i32_96 : i32 to vector<32x1xi32>
    %247 = arith.cmpi slt, %245, %246 : vector<32x1xi32>
    %248 = arith.andi %243, %247 : vector<32x1xi1>
    %cst_97 = arith.constant 0.000000e+00 : f32
    %249 = vector.shape_cast %248 : vector<32x1xi1> to vector<32x1xi1>
    %250 = vector.broadcast %249 : vector<32x1xi1> to vector<32x32xi1>
    %251 = vector.broadcast %cst_97 : f32 to vector<32x32xf32>
    %252 = arith.select %250, %239, %251 : vector<32x32xi1>, vector<32x32xf32>
    %c1_i32_98 = arith.constant 1 : i32
    %253 = tpu.dynamic_rotate %238 by %c1_i32_98 dim 0 : vector<32x32xf32>, i32 -> vector<32x32xf32>
    %c-1_i32_99 = arith.constant -1 : i32
    %254 = vector.broadcast %c-1_i32_99 : i32 to vector<32x1xi32>
    %255 = arith.addi %16, %254 : vector<32x1xi32>
    %c0_i32_100 = arith.constant 0 : i32
    %256 = vector.broadcast %c0_i32_100 : i32 to vector<32x1xi32>
    %257 = arith.cmpi sge, %255, %256 : vector<32x1xi32>
    %c-1_i32_101 = arith.constant -1 : i32
    %258 = vector.broadcast %c-1_i32_101 : i32 to vector<32x1xi32>
    %259 = arith.addi %16, %258 : vector<32x1xi32>
    %c16_i32_102 = arith.constant 16 : i32
    %260 = vector.broadcast %c16_i32_102 : i32 to vector<32x1xi32>
    %261 = arith.cmpi slt, %259, %260 : vector<32x1xi32>
    %262 = arith.andi %257, %261 : vector<32x1xi1>
    %cst_103 = arith.constant 0.000000e+00 : f32
    %263 = vector.shape_cast %262 : vector<32x1xi1> to vector<32x1xi1>
    %264 = vector.broadcast %263 : vector<32x1xi1> to vector<32x32xi1>
    %265 = vector.broadcast %cst_103 : f32 to vector<32x32xf32>
    %266 = arith.select %264, %253, %265 : vector<32x32xi1>, vector<32x32xf32>
    %c31_i32_104 = arith.constant 31 : i32
    %267 = tpu.dynamic_rotate %238 by %c31_i32_104 dim 0 : vector<32x32xf32>, i32 -> vector<32x32xf32>
    %c1_i32_105 = arith.constant 1 : i32
    %268 = vector.broadcast %c1_i32_105 : i32 to vector<32x1xi32>
    %269 = arith.addi %16, %268 : vector<32x1xi32>
    %c0_i32_106 = arith.constant 0 : i32
    %270 = vector.broadcast %c0_i32_106 : i32 to vector<32x1xi32>
    %271 = arith.cmpi sge, %269, %270 : vector<32x1xi32>
    %c1_i32_107 = arith.constant 1 : i32
    %272 = vector.broadcast %c1_i32_107 : i32 to vector<32x1xi32>
    %273 = arith.addi %16, %272 : vector<32x1xi32>
    %c16_i32_108 = arith.constant 16 : i32
    %274 = vector.broadcast %c16_i32_108 : i32 to vector<32x1xi32>
    %275 = arith.cmpi slt, %273, %274 : vector<32x1xi32>
    %276 = arith.andi %271, %275 : vector<32x1xi1>
    %cst_109 = arith.constant 0.000000e+00 : f32
    %277 = vector.shape_cast %276 : vector<32x1xi1> to vector<32x1xi1>
    %278 = vector.broadcast %277 : vector<32x1xi1> to vector<32x32xi1>
    %279 = vector.broadcast %cst_109 : f32 to vector<32x32xf32>
    %280 = arith.select %278, %267, %279 : vector<32x32xi1>, vector<32x32xf32>
    %c30_i32_110 = arith.constant 30 : i32
    %281 = tpu.dynamic_rotate %238 by %c30_i32_110 dim 0 : vector<32x32xf32>, i32 -> vector<32x32xf32>
    %c2_i32_111 = arith.constant 2 : i32
    %282 = vector.broadcast %c2_i32_111 : i32 to vector<32x1xi32>
    %283 = arith.addi %16, %282 : vector<32x1xi32>
    %c0_i32_112 = arith.constant 0 : i32
    %284 = vector.broadcast %c0_i32_112 : i32 to vector<32x1xi32>
    %285 = arith.cmpi sge, %283, %284 : vector<32x1xi32>
    %c2_i32_113 = arith.constant 2 : i32
    %286 = vector.broadcast %c2_i32_113 : i32 to vector<32x1xi32>
    %287 = arith.addi %16, %286 : vector<32x1xi32>
    %c16_i32_114 = arith.constant 16 : i32
    %288 = vector.broadcast %c16_i32_114 : i32 to vector<32x1xi32>
    %289 = arith.cmpi slt, %287, %288 : vector<32x1xi32>
    %290 = arith.andi %285, %289 : vector<32x1xi1>
    %cst_115 = arith.constant 0.000000e+00 : f32
    %291 = vector.shape_cast %290 : vector<32x1xi1> to vector<32x1xi1>
    %292 = vector.broadcast %291 : vector<32x1xi1> to vector<32x32xi1>
    %293 = vector.broadcast %cst_115 : f32 to vector<32x32xf32>
    %294 = arith.select %292, %281, %293 : vector<32x32xi1>, vector<32x32xf32>
    %295 = tpu.concatenate %252, %266, %238, %280, %294 in 1 : vector<32x32xf32>, vector<32x32xf32>, vector<32x32xf32>, vector<32x32xf32>, vector<32x32xf32> -> vector<32x160xf32>
    %296 = arith.truncf %295 : vector<32x160xf32> to vector<32x160xbf16>
    %c0_116 = arith.constant 0 : index
    %c0_117 = arith.constant 0 : index
    %297 = vector.load %arg12[%c0_116, %c0_117] : memref<160x32xbf16, #tpu.memory_space<vmem>>, vector<160x32xbf16>
    %cst_118 = arith.constant dense<0.000000e+00> : vector<32x32xf32>
    %298 = tpu.matmul %296, %297, %cst_118 {dimension_numbers = #tpu.dot_dimension_numbers<[1], [0], [0], [1], [0, 0, 1, 1], [], []>} : vector<32x160xbf16>, vector<160x32xbf16>, vector<32x32xf32> -> vector<32x32xf32>
    %c0_119 = arith.constant 0 : index
    %c0_120 = arith.constant 0 : index
    %299 = vector.load %arg13[%c0_119, %c0_120] : memref<1x32xf32, #tpu.memory_space<vmem>>, vector<1x32xf32>
    %300 = vector.broadcast %299 : vector<1x32xf32> to vector<32x32xf32>
    %301 = arith.addf %298, %300 : vector<32x32xf32>
    %302 = vector.shape_cast %301 : vector<32x32xf32> to vector<2x16x32xf32>
    %c0_121 = arith.constant 0 : index
    %c0_122 = arith.constant 0 : index
    %303 = vector.load %arg14[%c0_121, %c0_122] : memref<16x32xf32, #tpu.memory_space<vmem>>, vector<16x32xf32>
    %c0_123 = arith.constant 0 : index
    %c0_124 = arith.constant 0 : index
    %304 = vector.load %arg15[%c0_123, %c0_124] : memref<16x32xf32, #tpu.memory_space<vmem>>, vector<16x32xf32>
    %cst_125 = arith.constant dense<0.000000e+00> : vector<2x16xf32>
    %305 = vector.multi_reduction <add>, %302, %cst_125 [2] : vector<2x16x32xf32> to vector<2x16xf32>
    %306 = vector.shape_cast %305 : vector<2x16xf32> to vector<2x16x1xf32>
    %cst_126 = arith.constant dense<0.000000e+00> : vector<2x1xf32>
    %307 = vector.multi_reduction <add>, %306, %cst_126 [1] : vector<2x16x1xf32> to vector<2x1xf32>
    %308 = vector.shape_cast %307 : vector<2x1xf32> to vector<2x1x1xf32>
    %cst_127 = arith.constant 5.120000e+02 : f32
    %309 = vector.broadcast %cst_127 : f32 to vector<2x1x1xf32>
    %310 = arith.divf %308, %309 : vector<2x1x1xf32>
    %311 = vector.broadcast %310 : vector<2x1x1xf32> to vector<2x16x32xf32>
    %312 = arith.subf %302, %311 : vector<2x16x32xf32>
    %313 = arith.mulf %312, %312 : vector<2x16x32xf32>
    %cst_128 = arith.constant dense<0.000000e+00> : vector<2x16xf32>
    %314 = vector.multi_reduction <add>, %313, %cst_128 [2] : vector<2x16x32xf32> to vector<2x16xf32>
    %315 = vector.shape_cast %314 : vector<2x16xf32> to vector<2x16x1xf32>
    %cst_129 = arith.constant dense<0.000000e+00> : vector<2x1xf32>
    %316 = vector.multi_reduction <add>, %315, %cst_129 [1] : vector<2x16x1xf32> to vector<2x1xf32>
    %317 = vector.shape_cast %316 : vector<2x1xf32> to vector<2x1x1xf32>
    %cst_130 = arith.constant 5.120000e+02 : f32
    %318 = vector.broadcast %cst_130 : f32 to vector<2x1x1xf32>
    %319 = arith.divf %317, %318 : vector<2x1x1xf32>
    %cst_131 = arith.constant 9.99999974E-6 : f32
    %320 = vector.broadcast %cst_131 : f32 to vector<2x1x1xf32>
    %321 = arith.addf %319, %320 : vector<2x1x1xf32>
    %322 = math.rsqrt %321 : vector<2x1x1xf32>
    %323 = vector.broadcast %322 : vector<2x1x1xf32> to vector<2x16x32xf32>
    %324 = arith.mulf %312, %323 : vector<2x16x32xf32>
    %325 = vector.shape_cast %303 : vector<16x32xf32> to vector<1x16x32xf32>
    %326 = vector.broadcast %325 : vector<1x16x32xf32> to vector<2x16x32xf32>
    %327 = arith.mulf %324, %326 : vector<2x16x32xf32>
    %328 = vector.shape_cast %304 : vector<16x32xf32> to vector<1x16x32xf32>
    %329 = vector.broadcast %328 : vector<1x16x32xf32> to vector<2x16x32xf32>
    %330 = arith.addf %327, %329 : vector<2x16x32xf32>
    %cst_132 = arith.constant 0.000000e+00 : f32
    %331 = vector.broadcast %cst_132 : f32 to vector<2x16x32xf32>
    %332 = arith.maximumf %330, %331 : vector<2x16x32xf32>
    %333 = arith.addf %332, %142 : vector<2x16x32xf32>
    %cst_133 = arith.constant 0.000000e+00 : f32
    %334 = vector.broadcast %cst_133 : f32 to vector<2x16x32xf32>
    %335 = arith.maximumf %333, %334 : vector<2x16x32xf32>
    %336 = vector.shape_cast %335 : vector<2x16x32xf32> to vector<32x32xf32>
    %c1_i32_134 = arith.constant 1 : i32
    %337 = tpu.dynamic_rotate %336 by %c1_i32_134 dim 0 : vector<32x32xf32>, i32 -> vector<32x32xf32>
    %c-1_i32_135 = arith.constant -1 : i32
    %338 = vector.broadcast %c-1_i32_135 : i32 to vector<32x1xi32>
    %339 = arith.addi %16, %338 : vector<32x1xi32>
    %c0_i32_136 = arith.constant 0 : i32
    %340 = vector.broadcast %c0_i32_136 : i32 to vector<32x1xi32>
    %341 = arith.cmpi sge, %339, %340 : vector<32x1xi32>
    %c-1_i32_137 = arith.constant -1 : i32
    %342 = vector.broadcast %c-1_i32_137 : i32 to vector<32x1xi32>
    %343 = arith.addi %16, %342 : vector<32x1xi32>
    %c16_i32_138 = arith.constant 16 : i32
    %344 = vector.broadcast %c16_i32_138 : i32 to vector<32x1xi32>
    %345 = arith.cmpi slt, %343, %344 : vector<32x1xi32>
    %346 = arith.andi %341, %345 : vector<32x1xi1>
    %cst_139 = arith.constant 0.000000e+00 : f32
    %347 = vector.shape_cast %346 : vector<32x1xi1> to vector<32x1xi1>
    %348 = vector.broadcast %347 : vector<32x1xi1> to vector<32x32xi1>
    %349 = vector.broadcast %cst_139 : f32 to vector<32x32xf32>
    %350 = arith.select %348, %337, %349 : vector<32x32xi1>, vector<32x32xf32>
    %c31_i32_140 = arith.constant 31 : i32
    %351 = tpu.dynamic_rotate %336 by %c31_i32_140 dim 0 : vector<32x32xf32>, i32 -> vector<32x32xf32>
    %c1_i32_141 = arith.constant 1 : i32
    %352 = vector.broadcast %c1_i32_141 : i32 to vector<32x1xi32>
    %353 = arith.addi %16, %352 : vector<32x1xi32>
    %c0_i32_142 = arith.constant 0 : i32
    %354 = vector.broadcast %c0_i32_142 : i32 to vector<32x1xi32>
    %355 = arith.cmpi sge, %353, %354 : vector<32x1xi32>
    %c1_i32_143 = arith.constant 1 : i32
    %356 = vector.broadcast %c1_i32_143 : i32 to vector<32x1xi32>
    %357 = arith.addi %16, %356 : vector<32x1xi32>
    %c16_i32_144 = arith.constant 16 : i32
    %358 = vector.broadcast %c16_i32_144 : i32 to vector<32x1xi32>
    %359 = arith.cmpi slt, %357, %358 : vector<32x1xi32>
    %360 = arith.andi %355, %359 : vector<32x1xi1>
    %cst_145 = arith.constant 0.000000e+00 : f32
    %361 = vector.shape_cast %360 : vector<32x1xi1> to vector<32x1xi1>
    %362 = vector.broadcast %361 : vector<32x1xi1> to vector<32x32xi1>
    %363 = vector.broadcast %cst_145 : f32 to vector<32x32xf32>
    %364 = arith.select %362, %351, %363 : vector<32x32xi1>, vector<32x32xf32>
    %365 = tpu.concatenate %350, %336, %364 in 1 : vector<32x32xf32>, vector<32x32xf32>, vector<32x32xf32> -> vector<32x96xf32>
    %366 = arith.truncf %365 : vector<32x96xf32> to vector<32x96xbf16>
    %c0_146 = arith.constant 0 : index
    %c0_147 = arith.constant 0 : index
    %367 = vector.load %arg16[%c0_146, %c0_147] : memref<96x128xbf16, #tpu.memory_space<vmem>>, vector<96x128xbf16>
    %cst_148 = arith.constant dense<0.000000e+00> : vector<32x128xf32>
    %368 = tpu.matmul %366, %367, %cst_148 {dimension_numbers = #tpu.dot_dimension_numbers<[1], [0], [0], [1], [0, 0, 1, 1], [], []>} : vector<32x96xbf16>, vector<96x128xbf16>, vector<32x128xf32> -> vector<32x128xf32>
    %c0_149 = arith.constant 0 : index
    %c0_150 = arith.constant 0 : index
    %369 = vector.load %arg17[%c0_149, %c0_150] : memref<1x128xf32, #tpu.memory_space<vmem>>, vector<1x128xf32>
    %370 = vector.broadcast %369 : vector<1x128xf32> to vector<32x128xf32>
    %371 = arith.addf %368, %370 : vector<32x128xf32>
    %372 = vector.shape_cast %371 : vector<32x128xf32> to vector<2x16x128xf32>
    %373 = vector.extract_strided_slice %372 {offsets = [0, 0, 0], sizes = [2, 16, 64], strides = [1, 1, 1]} : vector<2x16x128xf32> to vector<2x16x64xf32>
    %c0_151 = arith.constant 0 : index
    %c0_152 = arith.constant 0 : index
    %374 = vector.load %arg18[%c0_151, %c0_152] : memref<16x64xf32, #tpu.memory_space<vmem>>, vector<16x64xf32>
    %c0_153 = arith.constant 0 : index
    %c0_154 = arith.constant 0 : index
    %375 = vector.load %arg19[%c0_153, %c0_154] : memref<16x64xf32, #tpu.memory_space<vmem>>, vector<16x64xf32>
    %cst_155 = arith.constant dense<0.000000e+00> : vector<2x16xf32>
    %376 = vector.multi_reduction <add>, %373, %cst_155 [2] : vector<2x16x64xf32> to vector<2x16xf32>
    %377 = vector.shape_cast %376 : vector<2x16xf32> to vector<2x16x1xf32>
    %cst_156 = arith.constant dense<0.000000e+00> : vector<2x1xf32>
    %378 = vector.multi_reduction <add>, %377, %cst_156 [1] : vector<2x16x1xf32> to vector<2x1xf32>
    %379 = vector.shape_cast %378 : vector<2x1xf32> to vector<2x1x1xf32>
    %cst_157 = arith.constant 1.024000e+03 : f32
    %380 = vector.broadcast %cst_157 : f32 to vector<2x1x1xf32>
    %381 = arith.divf %379, %380 : vector<2x1x1xf32>
    %382 = vector.broadcast %381 : vector<2x1x1xf32> to vector<2x16x64xf32>
    %383 = arith.subf %373, %382 : vector<2x16x64xf32>
    %384 = arith.mulf %383, %383 : vector<2x16x64xf32>
    %cst_158 = arith.constant dense<0.000000e+00> : vector<2x16xf32>
    %385 = vector.multi_reduction <add>, %384, %cst_158 [2] : vector<2x16x64xf32> to vector<2x16xf32>
    %386 = vector.shape_cast %385 : vector<2x16xf32> to vector<2x16x1xf32>
    %cst_159 = arith.constant dense<0.000000e+00> : vector<2x1xf32>
    %387 = vector.multi_reduction <add>, %386, %cst_159 [1] : vector<2x16x1xf32> to vector<2x1xf32>
    %388 = vector.shape_cast %387 : vector<2x1xf32> to vector<2x1x1xf32>
    %cst_160 = arith.constant 1.024000e+03 : f32
    %389 = vector.broadcast %cst_160 : f32 to vector<2x1x1xf32>
    %390 = arith.divf %388, %389 : vector<2x1x1xf32>
    %cst_161 = arith.constant 9.99999974E-6 : f32
    %391 = vector.broadcast %cst_161 : f32 to vector<2x1x1xf32>
    %392 = arith.addf %390, %391 : vector<2x1x1xf32>
    %393 = math.rsqrt %392 : vector<2x1x1xf32>
    %394 = vector.broadcast %393 : vector<2x1x1xf32> to vector<2x16x64xf32>
    %395 = arith.mulf %383, %394 : vector<2x16x64xf32>
    %396 = vector.shape_cast %374 : vector<16x64xf32> to vector<1x16x64xf32>
    %397 = vector.broadcast %396 : vector<1x16x64xf32> to vector<2x16x64xf32>
    %398 = arith.mulf %395, %397 : vector<2x16x64xf32>
    %399 = vector.shape_cast %375 : vector<16x64xf32> to vector<1x16x64xf32>
    %400 = vector.broadcast %399 : vector<1x16x64xf32> to vector<2x16x64xf32>
    %401 = arith.addf %398, %400 : vector<2x16x64xf32>
    %cst_162 = arith.constant 0.000000e+00 : f32
    %402 = vector.broadcast %cst_162 : f32 to vector<2x16x64xf32>
    %403 = arith.maximumf %401, %402 : vector<2x16x64xf32>
    %404 = vector.extract_strided_slice %372 {offsets = [0, 0, 64], sizes = [2, 16, 64], strides = [1, 1, 1]} : vector<2x16x128xf32> to vector<2x16x64xf32>
    %c0_163 = arith.constant 0 : index
    %c0_164 = arith.constant 0 : index
    %405 = vector.load %arg20[%c0_163, %c0_164] : memref<16x64xf32, #tpu.memory_space<vmem>>, vector<16x64xf32>
    %c0_165 = arith.constant 0 : index
    %c0_166 = arith.constant 0 : index
    %406 = vector.load %arg21[%c0_165, %c0_166] : memref<16x64xf32, #tpu.memory_space<vmem>>, vector<16x64xf32>
    %cst_167 = arith.constant dense<0.000000e+00> : vector<2x16xf32>
    %407 = vector.multi_reduction <add>, %404, %cst_167 [2] : vector<2x16x64xf32> to vector<2x16xf32>
    %408 = vector.shape_cast %407 : vector<2x16xf32> to vector<2x16x1xf32>
    %cst_168 = arith.constant dense<0.000000e+00> : vector<2x1xf32>
    %409 = vector.multi_reduction <add>, %408, %cst_168 [1] : vector<2x16x1xf32> to vector<2x1xf32>
    %410 = vector.shape_cast %409 : vector<2x1xf32> to vector<2x1x1xf32>
    %cst_169 = arith.constant 1.024000e+03 : f32
    %411 = vector.broadcast %cst_169 : f32 to vector<2x1x1xf32>
    %412 = arith.divf %410, %411 : vector<2x1x1xf32>
    %413 = vector.broadcast %412 : vector<2x1x1xf32> to vector<2x16x64xf32>
    %414 = arith.subf %404, %413 : vector<2x16x64xf32>
    %415 = arith.mulf %414, %414 : vector<2x16x64xf32>
    %cst_170 = arith.constant dense<0.000000e+00> : vector<2x16xf32>
    %416 = vector.multi_reduction <add>, %415, %cst_170 [2] : vector<2x16x64xf32> to vector<2x16xf32>
    %417 = vector.shape_cast %416 : vector<2x16xf32> to vector<2x16x1xf32>
    %cst_171 = arith.constant dense<0.000000e+00> : vector<2x1xf32>
    %418 = vector.multi_reduction <add>, %417, %cst_171 [1] : vector<2x16x1xf32> to vector<2x1xf32>
    %419 = vector.shape_cast %418 : vector<2x1xf32> to vector<2x1x1xf32>
    %cst_172 = arith.constant 1.024000e+03 : f32
    %420 = vector.broadcast %cst_172 : f32 to vector<2x1x1xf32>
    %421 = arith.divf %419, %420 : vector<2x1x1xf32>
    %cst_173 = arith.constant 9.99999974E-6 : f32
    %422 = vector.broadcast %cst_173 : f32 to vector<2x1x1xf32>
    %423 = arith.addf %421, %422 : vector<2x1x1xf32>
    %424 = math.rsqrt %423 : vector<2x1x1xf32>
    %425 = vector.broadcast %424 : vector<2x1x1xf32> to vector<2x16x64xf32>
    %426 = arith.mulf %414, %425 : vector<2x16x64xf32>
    %427 = vector.shape_cast %405 : vector<16x64xf32> to vector<1x16x64xf32>
    %428 = vector.broadcast %427 : vector<1x16x64xf32> to vector<2x16x64xf32>
    %429 = arith.mulf %426, %428 : vector<2x16x64xf32>
    %430 = vector.shape_cast %406 : vector<16x64xf32> to vector<1x16x64xf32>
    %431 = vector.broadcast %430 : vector<1x16x64xf32> to vector<2x16x64xf32>
    %432 = arith.addf %429, %431 : vector<2x16x64xf32>
    %433 = vector.shape_cast %403 : vector<2x16x64xf32> to vector<32x64xf32>
    %c1_i32_174 = arith.constant 1 : i32
    %434 = tpu.dynamic_rotate %433 by %c1_i32_174 dim 0 : vector<32x64xf32>, i32 -> vector<32x64xf32>
    %c-1_i32_175 = arith.constant -1 : i32
    %435 = vector.broadcast %c-1_i32_175 : i32 to vector<32x1xi32>
    %436 = arith.addi %16, %435 : vector<32x1xi32>
    %c0_i32_176 = arith.constant 0 : i32
    %437 = vector.broadcast %c0_i32_176 : i32 to vector<32x1xi32>
    %438 = arith.cmpi sge, %436, %437 : vector<32x1xi32>
    %c-1_i32_177 = arith.constant -1 : i32
    %439 = vector.broadcast %c-1_i32_177 : i32 to vector<32x1xi32>
    %440 = arith.addi %16, %439 : vector<32x1xi32>
    %c16_i32_178 = arith.constant 16 : i32
    %441 = vector.broadcast %c16_i32_178 : i32 to vector<32x1xi32>
    %442 = arith.cmpi slt, %440, %441 : vector<32x1xi32>
    %443 = arith.andi %438, %442 : vector<32x1xi1>
    %cst_179 = arith.constant 0.000000e+00 : f32
    %444 = vector.shape_cast %443 : vector<32x1xi1> to vector<32x1xi1>
    %445 = vector.broadcast %444 : vector<32x1xi1> to vector<32x64xi1>
    %446 = vector.broadcast %cst_179 : f32 to vector<32x64xf32>
    %447 = arith.select %445, %434, %446 : vector<32x64xi1>, vector<32x64xf32>
    %c31_i32_180 = arith.constant 31 : i32
    %448 = tpu.dynamic_rotate %433 by %c31_i32_180 dim 0 : vector<32x64xf32>, i32 -> vector<32x64xf32>
    %c1_i32_181 = arith.constant 1 : i32
    %449 = vector.broadcast %c1_i32_181 : i32 to vector<32x1xi32>
    %450 = arith.addi %16, %449 : vector<32x1xi32>
    %c0_i32_182 = arith.constant 0 : i32
    %451 = vector.broadcast %c0_i32_182 : i32 to vector<32x1xi32>
    %452 = arith.cmpi sge, %450, %451 : vector<32x1xi32>
    %c1_i32_183 = arith.constant 1 : i32
    %453 = vector.broadcast %c1_i32_183 : i32 to vector<32x1xi32>
    %454 = arith.addi %16, %453 : vector<32x1xi32>
    %c16_i32_184 = arith.constant 16 : i32
    %455 = vector.broadcast %c16_i32_184 : i32 to vector<32x1xi32>
    %456 = arith.cmpi slt, %454, %455 : vector<32x1xi32>
    %457 = arith.andi %452, %456 : vector<32x1xi1>
    %cst_185 = arith.constant 0.000000e+00 : f32
    %458 = vector.shape_cast %457 : vector<32x1xi1> to vector<32x1xi1>
    %459 = vector.broadcast %458 : vector<32x1xi1> to vector<32x64xi1>
    %460 = vector.broadcast %cst_185 : f32 to vector<32x64xf32>
    %461 = arith.select %459, %448, %460 : vector<32x64xi1>, vector<32x64xf32>
    %462 = tpu.concatenate %447, %433, %461 in 1 : vector<32x64xf32>, vector<32x64xf32>, vector<32x64xf32> -> vector<32x192xf32>
    %463 = arith.truncf %462 : vector<32x192xf32> to vector<32x192xbf16>
    %c0_186 = arith.constant 0 : index
    %c0_187 = arith.constant 0 : index
    %464 = vector.load %arg22[%c0_186, %c0_187] : memref<192x64xbf16, #tpu.memory_space<vmem>>, vector<192x64xbf16>
    %cst_188 = arith.constant dense<0.000000e+00> : vector<32x64xf32>
    %465 = tpu.matmul %463, %464, %cst_188 {dimension_numbers = #tpu.dot_dimension_numbers<[1], [0], [0], [1], [0, 0, 1, 1], [], []>} : vector<32x192xbf16>, vector<192x64xbf16>, vector<32x64xf32> -> vector<32x64xf32>
    %c0_189 = arith.constant 0 : index
    %c0_190 = arith.constant 0 : index
    %466 = vector.load %arg23[%c0_189, %c0_190] : memref<1x64xf32, #tpu.memory_space<vmem>>, vector<1x64xf32>
    %467 = vector.broadcast %466 : vector<1x64xf32> to vector<32x64xf32>
    %468 = arith.addf %465, %467 : vector<32x64xf32>
    %469 = vector.shape_cast %468 : vector<32x64xf32> to vector<2x16x64xf32>
    %c0_191 = arith.constant 0 : index
    %c0_192 = arith.constant 0 : index
    %470 = vector.load %arg24[%c0_191, %c0_192] : memref<16x64xf32, #tpu.memory_space<vmem>>, vector<16x64xf32>
    %c0_193 = arith.constant 0 : index
    %c0_194 = arith.constant 0 : index
    %471 = vector.load %arg25[%c0_193, %c0_194] : memref<16x64xf32, #tpu.memory_space<vmem>>, vector<16x64xf32>
    %cst_195 = arith.constant dense<0.000000e+00> : vector<2x16xf32>
    %472 = vector.multi_reduction <add>, %469, %cst_195 [2] : vector<2x16x64xf32> to vector<2x16xf32>
    %473 = vector.shape_cast %472 : vector<2x16xf32> to vector<2x16x1xf32>
    %cst_196 = arith.constant dense<0.000000e+00> : vector<2x1xf32>
    %474 = vector.multi_reduction <add>, %473, %cst_196 [1] : vector<2x16x1xf32> to vector<2x1xf32>
    %475 = vector.shape_cast %474 : vector<2x1xf32> to vector<2x1x1xf32>
    %cst_197 = arith.constant 1.024000e+03 : f32
    %476 = vector.broadcast %cst_197 : f32 to vector<2x1x1xf32>
    %477 = arith.divf %475, %476 : vector<2x1x1xf32>
    %478 = vector.broadcast %477 : vector<2x1x1xf32> to vector<2x16x64xf32>
    %479 = arith.subf %469, %478 : vector<2x16x64xf32>
    %480 = arith.mulf %479, %479 : vector<2x16x64xf32>
    %cst_198 = arith.constant dense<0.000000e+00> : vector<2x16xf32>
    %481 = vector.multi_reduction <add>, %480, %cst_198 [2] : vector<2x16x64xf32> to vector<2x16xf32>
    %482 = vector.shape_cast %481 : vector<2x16xf32> to vector<2x16x1xf32>
    %cst_199 = arith.constant dense<0.000000e+00> : vector<2x1xf32>
    %483 = vector.multi_reduction <add>, %482, %cst_199 [1] : vector<2x16x1xf32> to vector<2x1xf32>
    %484 = vector.shape_cast %483 : vector<2x1xf32> to vector<2x1x1xf32>
    %cst_200 = arith.constant 1.024000e+03 : f32
    %485 = vector.broadcast %cst_200 : f32 to vector<2x1x1xf32>
    %486 = arith.divf %484, %485 : vector<2x1x1xf32>
    %cst_201 = arith.constant 9.99999974E-6 : f32
    %487 = vector.broadcast %cst_201 : f32 to vector<2x1x1xf32>
    %488 = arith.addf %486, %487 : vector<2x1x1xf32>
    %489 = math.rsqrt %488 : vector<2x1x1xf32>
    %490 = vector.broadcast %489 : vector<2x1x1xf32> to vector<2x16x64xf32>
    %491 = arith.mulf %479, %490 : vector<2x16x64xf32>
    %492 = vector.shape_cast %470 : vector<16x64xf32> to vector<1x16x64xf32>
    %493 = vector.broadcast %492 : vector<1x16x64xf32> to vector<2x16x64xf32>
    %494 = arith.mulf %491, %493 : vector<2x16x64xf32>
    %495 = vector.shape_cast %471 : vector<16x64xf32> to vector<1x16x64xf32>
    %496 = vector.broadcast %495 : vector<1x16x64xf32> to vector<2x16x64xf32>
    %497 = arith.addf %494, %496 : vector<2x16x64xf32>
    %cst_202 = arith.constant 0.000000e+00 : f32
    %498 = vector.broadcast %cst_202 : f32 to vector<2x16x64xf32>
    %499 = arith.maximumf %497, %498 : vector<2x16x64xf32>
    %500 = vector.shape_cast %499 : vector<2x16x64xf32> to vector<32x64xf32>
    %c1_i32_203 = arith.constant 1 : i32
    %501 = tpu.dynamic_rotate %500 by %c1_i32_203 dim 0 : vector<32x64xf32>, i32 -> vector<32x64xf32>
    %c-1_i32_204 = arith.constant -1 : i32
    %502 = vector.broadcast %c-1_i32_204 : i32 to vector<32x1xi32>
    %503 = arith.addi %16, %502 : vector<32x1xi32>
    %c0_i32_205 = arith.constant 0 : i32
    %504 = vector.broadcast %c0_i32_205 : i32 to vector<32x1xi32>
    %505 = arith.cmpi sge, %503, %504 : vector<32x1xi32>
    %c-1_i32_206 = arith.constant -1 : i32
    %506 = vector.broadcast %c-1_i32_206 : i32 to vector<32x1xi32>
    %507 = arith.addi %16, %506 : vector<32x1xi32>
    %c16_i32_207 = arith.constant 16 : i32
    %508 = vector.broadcast %c16_i32_207 : i32 to vector<32x1xi32>
    %509 = arith.cmpi slt, %507, %508 : vector<32x1xi32>
    %510 = arith.andi %505, %509 : vector<32x1xi1>
    %cst_208 = arith.constant 0.000000e+00 : f32
    %511 = vector.shape_cast %510 : vector<32x1xi1> to vector<32x1xi1>
    %512 = vector.broadcast %511 : vector<32x1xi1> to vector<32x64xi1>
    %513 = vector.broadcast %cst_208 : f32 to vector<32x64xf32>
    %514 = arith.select %512, %501, %513 : vector<32x64xi1>, vector<32x64xf32>
    %c31_i32_209 = arith.constant 31 : i32
    %515 = tpu.dynamic_rotate %500 by %c31_i32_209 dim 0 : vector<32x64xf32>, i32 -> vector<32x64xf32>
    %c1_i32_210 = arith.constant 1 : i32
    %516 = vector.broadcast %c1_i32_210 : i32 to vector<32x1xi32>
    %517 = arith.addi %16, %516 : vector<32x1xi32>
    %c0_i32_211 = arith.constant 0 : i32
    %518 = vector.broadcast %c0_i32_211 : i32 to vector<32x1xi32>
    %519 = arith.cmpi sge, %517, %518 : vector<32x1xi32>
    %c1_i32_212 = arith.constant 1 : i32
    %520 = vector.broadcast %c1_i32_212 : i32 to vector<32x1xi32>
    %521 = arith.addi %16, %520 : vector<32x1xi32>
    %c16_i32_213 = arith.constant 16 : i32
    %522 = vector.broadcast %c16_i32_213 : i32 to vector<32x1xi32>
    %523 = arith.cmpi slt, %521, %522 : vector<32x1xi32>
    %524 = arith.andi %519, %523 : vector<32x1xi1>
    %cst_214 = arith.constant 0.000000e+00 : f32
    %525 = vector.shape_cast %524 : vector<32x1xi1> to vector<32x1xi1>
    %526 = vector.broadcast %525 : vector<32x1xi1> to vector<32x64xi1>
    %527 = vector.broadcast %cst_214 : f32 to vector<32x64xf32>
    %528 = arith.select %526, %515, %527 : vector<32x64xi1>, vector<32x64xf32>
    %529 = tpu.concatenate %514, %500, %528 in 1 : vector<32x64xf32>, vector<32x64xf32>, vector<32x64xf32> -> vector<32x192xf32>
    %530 = arith.truncf %529 : vector<32x192xf32> to vector<32x192xbf16>
    %c0_215 = arith.constant 0 : index
    %c0_216 = arith.constant 0 : index
    %531 = vector.load %arg26[%c0_215, %c0_216] : memref<192x64xbf16, #tpu.memory_space<vmem>>, vector<192x64xbf16>
    %cst_217 = arith.constant dense<0.000000e+00> : vector<32x64xf32>
    %532 = tpu.matmul %530, %531, %cst_217 {dimension_numbers = #tpu.dot_dimension_numbers<[1], [0], [0], [1], [0, 0, 1, 1], [], []>} : vector<32x192xbf16>, vector<192x64xbf16>, vector<32x64xf32> -> vector<32x64xf32>
    %c0_218 = arith.constant 0 : index
    %c0_219 = arith.constant 0 : index
    %533 = vector.load %arg27[%c0_218, %c0_219] : memref<1x64xf32, #tpu.memory_space<vmem>>, vector<1x64xf32>
    %534 = vector.broadcast %533 : vector<1x64xf32> to vector<32x64xf32>
    %535 = arith.addf %532, %534 : vector<32x64xf32>
    %536 = vector.shape_cast %535 : vector<32x64xf32> to vector<2x16x64xf32>
    %c0_220 = arith.constant 0 : index
    %c0_221 = arith.constant 0 : index
    %537 = vector.load %arg28[%c0_220, %c0_221] : memref<16x64xf32, #tpu.memory_space<vmem>>, vector<16x64xf32>
    %c0_222 = arith.constant 0 : index
    %c0_223 = arith.constant 0 : index
    %538 = vector.load %arg29[%c0_222, %c0_223] : memref<16x64xf32, #tpu.memory_space<vmem>>, vector<16x64xf32>
    %cst_224 = arith.constant dense<0.000000e+00> : vector<2x16xf32>
    %539 = vector.multi_reduction <add>, %536, %cst_224 [2] : vector<2x16x64xf32> to vector<2x16xf32>
    %540 = vector.shape_cast %539 : vector<2x16xf32> to vector<2x16x1xf32>
    %cst_225 = arith.constant dense<0.000000e+00> : vector<2x1xf32>
    %541 = vector.multi_reduction <add>, %540, %cst_225 [1] : vector<2x16x1xf32> to vector<2x1xf32>
    %542 = vector.shape_cast %541 : vector<2x1xf32> to vector<2x1x1xf32>
    %cst_226 = arith.constant 1.024000e+03 : f32
    %543 = vector.broadcast %cst_226 : f32 to vector<2x1x1xf32>
    %544 = arith.divf %542, %543 : vector<2x1x1xf32>
    %545 = vector.broadcast %544 : vector<2x1x1xf32> to vector<2x16x64xf32>
    %546 = arith.subf %536, %545 : vector<2x16x64xf32>
    %547 = arith.mulf %546, %546 : vector<2x16x64xf32>
    %cst_227 = arith.constant dense<0.000000e+00> : vector<2x16xf32>
    %548 = vector.multi_reduction <add>, %547, %cst_227 [2] : vector<2x16x64xf32> to vector<2x16xf32>
    %549 = vector.shape_cast %548 : vector<2x16xf32> to vector<2x16x1xf32>
    %cst_228 = arith.constant dense<0.000000e+00> : vector<2x1xf32>
    %550 = vector.multi_reduction <add>, %549, %cst_228 [1] : vector<2x16x1xf32> to vector<2x1xf32>
    %551 = vector.shape_cast %550 : vector<2x1xf32> to vector<2x1x1xf32>
    %cst_229 = arith.constant 1.024000e+03 : f32
    %552 = vector.broadcast %cst_229 : f32 to vector<2x1x1xf32>
    %553 = arith.divf %551, %552 : vector<2x1x1xf32>
    %cst_230 = arith.constant 9.99999974E-6 : f32
    %554 = vector.broadcast %cst_230 : f32 to vector<2x1x1xf32>
    %555 = arith.addf %553, %554 : vector<2x1x1xf32>
    %556 = math.rsqrt %555 : vector<2x1x1xf32>
    %557 = vector.broadcast %556 : vector<2x1x1xf32> to vector<2x16x64xf32>
    %558 = arith.mulf %546, %557 : vector<2x16x64xf32>
    %559 = vector.shape_cast %537 : vector<16x64xf32> to vector<1x16x64xf32>
    %560 = vector.broadcast %559 : vector<1x16x64xf32> to vector<2x16x64xf32>
    %561 = arith.mulf %558, %560 : vector<2x16x64xf32>
    %562 = vector.shape_cast %538 : vector<16x64xf32> to vector<1x16x64xf32>
    %563 = vector.broadcast %562 : vector<1x16x64xf32> to vector<2x16x64xf32>
    %564 = arith.addf %561, %563 : vector<2x16x64xf32>
    %cst_231 = arith.constant 0.000000e+00 : f32
    %565 = vector.broadcast %cst_231 : f32 to vector<2x16x64xf32>
    %566 = arith.maximumf %564, %565 : vector<2x16x64xf32>
    %567 = arith.addf %566, %432 : vector<2x16x64xf32>
    %cst_232 = arith.constant 0.000000e+00 : f32
    %568 = vector.broadcast %cst_232 : f32 to vector<2x16x64xf32>
    %569 = arith.maximumf %567, %568 : vector<2x16x64xf32>
    %570 = vector.shape_cast %569 : vector<2x16x64xf32> to vector<32x64xf32>
    %c1_i32_233 = arith.constant 1 : i32
    %571 = tpu.dynamic_rotate %570 by %c1_i32_233 dim 0 : vector<32x64xf32>, i32 -> vector<32x64xf32>
    %c-1_i32_234 = arith.constant -1 : i32
    %572 = vector.broadcast %c-1_i32_234 : i32 to vector<32x1xi32>
    %573 = arith.addi %16, %572 : vector<32x1xi32>
    %c0_i32_235 = arith.constant 0 : i32
    %574 = vector.broadcast %c0_i32_235 : i32 to vector<32x1xi32>
    %575 = arith.cmpi sge, %573, %574 : vector<32x1xi32>
    %c-1_i32_236 = arith.constant -1 : i32
    %576 = vector.broadcast %c-1_i32_236 : i32 to vector<32x1xi32>
    %577 = arith.addi %16, %576 : vector<32x1xi32>
    %c16_i32_237 = arith.constant 16 : i32
    %578 = vector.broadcast %c16_i32_237 : i32 to vector<32x1xi32>
    %579 = arith.cmpi slt, %577, %578 : vector<32x1xi32>
    %580 = arith.andi %575, %579 : vector<32x1xi1>
    %cst_238 = arith.constant 0.000000e+00 : f32
    %581 = vector.shape_cast %580 : vector<32x1xi1> to vector<32x1xi1>
    %582 = vector.broadcast %581 : vector<32x1xi1> to vector<32x64xi1>
    %583 = vector.broadcast %cst_238 : f32 to vector<32x64xf32>
    %584 = arith.select %582, %571, %583 : vector<32x64xi1>, vector<32x64xf32>
    %c31_i32_239 = arith.constant 31 : i32
    %585 = tpu.dynamic_rotate %570 by %c31_i32_239 dim 0 : vector<32x64xf32>, i32 -> vector<32x64xf32>
    %c1_i32_240 = arith.constant 1 : i32
    %586 = vector.broadcast %c1_i32_240 : i32 to vector<32x1xi32>
    %587 = arith.addi %16, %586 : vector<32x1xi32>
    %c0_i32_241 = arith.constant 0 : i32
    %588 = vector.broadcast %c0_i32_241 : i32 to vector<32x1xi32>
    %589 = arith.cmpi sge, %587, %588 : vector<32x1xi32>
    %c1_i32_242 = arith.constant 1 : i32
    %590 = vector.broadcast %c1_i32_242 : i32 to vector<32x1xi32>
    %591 = arith.addi %16, %590 : vector<32x1xi32>
    %c16_i32_243 = arith.constant 16 : i32
    %592 = vector.broadcast %c16_i32_243 : i32 to vector<32x1xi32>
    %593 = arith.cmpi slt, %591, %592 : vector<32x1xi32>
    %594 = arith.andi %589, %593 : vector<32x1xi1>
    %cst_244 = arith.constant 0.000000e+00 : f32
    %595 = vector.shape_cast %594 : vector<32x1xi1> to vector<32x1xi1>
    %596 = vector.broadcast %595 : vector<32x1xi1> to vector<32x64xi1>
    %597 = vector.broadcast %cst_244 : f32 to vector<32x64xf32>
    %598 = arith.select %596, %585, %597 : vector<32x64xi1>, vector<32x64xf32>
    %599 = tpu.concatenate %584, %570, %598 in 1 : vector<32x64xf32>, vector<32x64xf32>, vector<32x64xf32> -> vector<32x192xf32>
    %600 = arith.truncf %599 : vector<32x192xf32> to vector<32x192xbf16>
    %c0_245 = arith.constant 0 : index
    %c0_246 = arith.constant 0 : index
    %601 = vector.load %arg30[%c0_245, %c0_246] : memref<192x256xbf16, #tpu.memory_space<vmem>>, vector<192x256xbf16>
    %cst_247 = arith.constant dense<0.000000e+00> : vector<32x256xf32>
    %602 = tpu.matmul %600, %601, %cst_247 {dimension_numbers = #tpu.dot_dimension_numbers<[1], [0], [0], [1], [0, 0, 1, 1], [], []>} : vector<32x192xbf16>, vector<192x256xbf16>, vector<32x256xf32> -> vector<32x256xf32>
    %c0_248 = arith.constant 0 : index
    %c0_249 = arith.constant 0 : index
    %603 = vector.load %arg31[%c0_248, %c0_249] : memref<1x256xf32, #tpu.memory_space<vmem>>, vector<1x256xf32>
    %604 = vector.broadcast %603 : vector<1x256xf32> to vector<32x256xf32>
    %605 = arith.addf %602, %604 : vector<32x256xf32>
    %606 = vector.shape_cast %605 : vector<32x256xf32> to vector<2x16x256xf32>
    %607 = vector.extract_strided_slice %606 {offsets = [0, 0, 0], sizes = [2, 16, 128], strides = [1, 1, 1]} : vector<2x16x256xf32> to vector<2x16x128xf32>
    %c0_250 = arith.constant 0 : index
    %c0_251 = arith.constant 0 : index
    %608 = vector.load %arg32[%c0_250, %c0_251] : memref<16x128xf32, #tpu.memory_space<vmem>>, vector<16x128xf32>
    %c0_252 = arith.constant 0 : index
    %c0_253 = arith.constant 0 : index
    %609 = vector.load %arg33[%c0_252, %c0_253] : memref<16x128xf32, #tpu.memory_space<vmem>>, vector<16x128xf32>
    %cst_254 = arith.constant dense<0.000000e+00> : vector<2x16xf32>
    %610 = vector.multi_reduction <add>, %607, %cst_254 [2] : vector<2x16x128xf32> to vector<2x16xf32>
    %611 = vector.shape_cast %610 : vector<2x16xf32> to vector<2x16x1xf32>
    %cst_255 = arith.constant dense<0.000000e+00> : vector<2x1xf32>
    %612 = vector.multi_reduction <add>, %611, %cst_255 [1] : vector<2x16x1xf32> to vector<2x1xf32>
    %613 = vector.shape_cast %612 : vector<2x1xf32> to vector<2x1x1xf32>
    %cst_256 = arith.constant 2.048000e+03 : f32
    %614 = vector.broadcast %cst_256 : f32 to vector<2x1x1xf32>
    %615 = arith.divf %613, %614 : vector<2x1x1xf32>
    %616 = vector.broadcast %615 : vector<2x1x1xf32> to vector<2x16x128xf32>
    %617 = arith.subf %607, %616 : vector<2x16x128xf32>
    %618 = arith.mulf %617, %617 : vector<2x16x128xf32>
    %cst_257 = arith.constant dense<0.000000e+00> : vector<2x16xf32>
    %619 = vector.multi_reduction <add>, %618, %cst_257 [2] : vector<2x16x128xf32> to vector<2x16xf32>
    %620 = vector.shape_cast %619 : vector<2x16xf32> to vector<2x16x1xf32>
    %cst_258 = arith.constant dense<0.000000e+00> : vector<2x1xf32>
    %621 = vector.multi_reduction <add>, %620, %cst_258 [1] : vector<2x16x1xf32> to vector<2x1xf32>
    %622 = vector.shape_cast %621 : vector<2x1xf32> to vector<2x1x1xf32>
    %cst_259 = arith.constant 2.048000e+03 : f32
    %623 = vector.broadcast %cst_259 : f32 to vector<2x1x1xf32>
    %624 = arith.divf %622, %623 : vector<2x1x1xf32>
    %cst_260 = arith.constant 9.99999974E-6 : f32
    %625 = vector.broadcast %cst_260 : f32 to vector<2x1x1xf32>
    %626 = arith.addf %624, %625 : vector<2x1x1xf32>
    %627 = math.rsqrt %626 : vector<2x1x1xf32>
    %628 = vector.broadcast %627 : vector<2x1x1xf32> to vector<2x16x128xf32>
    %629 = arith.mulf %617, %628 : vector<2x16x128xf32>
    %630 = vector.shape_cast %608 : vector<16x128xf32> to vector<1x16x128xf32>
    %631 = vector.broadcast %630 : vector<1x16x128xf32> to vector<2x16x128xf32>
    %632 = arith.mulf %629, %631 : vector<2x16x128xf32>
    %633 = vector.shape_cast %609 : vector<16x128xf32> to vector<1x16x128xf32>
    %634 = vector.broadcast %633 : vector<1x16x128xf32> to vector<2x16x128xf32>
    %635 = arith.addf %632, %634 : vector<2x16x128xf32>
    %cst_261 = arith.constant 0.000000e+00 : f32
    %636 = vector.broadcast %cst_261 : f32 to vector<2x16x128xf32>
    %637 = arith.maximumf %635, %636 : vector<2x16x128xf32>
    %638 = vector.extract_strided_slice %606 {offsets = [0, 0, 128], sizes = [2, 16, 128], strides = [1, 1, 1]} : vector<2x16x256xf32> to vector<2x16x128xf32>
    %c0_262 = arith.constant 0 : index
    %c0_263 = arith.constant 0 : index
    %639 = vector.load %arg34[%c0_262, %c0_263] : memref<16x128xf32, #tpu.memory_space<vmem>>, vector<16x128xf32>
    %c0_264 = arith.constant 0 : index
    %c0_265 = arith.constant 0 : index
    %640 = vector.load %arg35[%c0_264, %c0_265] : memref<16x128xf32, #tpu.memory_space<vmem>>, vector<16x128xf32>
    %cst_266 = arith.constant dense<0.000000e+00> : vector<2x16xf32>
    %641 = vector.multi_reduction <add>, %638, %cst_266 [2] : vector<2x16x128xf32> to vector<2x16xf32>
    %642 = vector.shape_cast %641 : vector<2x16xf32> to vector<2x16x1xf32>
    %cst_267 = arith.constant dense<0.000000e+00> : vector<2x1xf32>
    %643 = vector.multi_reduction <add>, %642, %cst_267 [1] : vector<2x16x1xf32> to vector<2x1xf32>
    %644 = vector.shape_cast %643 : vector<2x1xf32> to vector<2x1x1xf32>
    %cst_268 = arith.constant 2.048000e+03 : f32
    %645 = vector.broadcast %cst_268 : f32 to vector<2x1x1xf32>
    %646 = arith.divf %644, %645 : vector<2x1x1xf32>
    %647 = vector.broadcast %646 : vector<2x1x1xf32> to vector<2x16x128xf32>
    %648 = arith.subf %638, %647 : vector<2x16x128xf32>
    %649 = arith.mulf %648, %648 : vector<2x16x128xf32>
    %cst_269 = arith.constant dense<0.000000e+00> : vector<2x16xf32>
    %650 = vector.multi_reduction <add>, %649, %cst_269 [2] : vector<2x16x128xf32> to vector<2x16xf32>
    %651 = vector.shape_cast %650 : vector<2x16xf32> to vector<2x16x1xf32>
    %cst_270 = arith.constant dense<0.000000e+00> : vector<2x1xf32>
    %652 = vector.multi_reduction <add>, %651, %cst_270 [1] : vector<2x16x1xf32> to vector<2x1xf32>
    %653 = vector.shape_cast %652 : vector<2x1xf32> to vector<2x1x1xf32>
    %cst_271 = arith.constant 2.048000e+03 : f32
    %654 = vector.broadcast %cst_271 : f32 to vector<2x1x1xf32>
    %655 = arith.divf %653, %654 : vector<2x1x1xf32>
    %cst_272 = arith.constant 9.99999974E-6 : f32
    %656 = vector.broadcast %cst_272 : f32 to vector<2x1x1xf32>
    %657 = arith.addf %655, %656 : vector<2x1x1xf32>
    %658 = math.rsqrt %657 : vector<2x1x1xf32>
    %659 = vector.broadcast %658 : vector<2x1x1xf32> to vector<2x16x128xf32>
    %660 = arith.mulf %648, %659 : vector<2x16x128xf32>
    %661 = vector.shape_cast %639 : vector<16x128xf32> to vector<1x16x128xf32>
    %662 = vector.broadcast %661 : vector<1x16x128xf32> to vector<2x16x128xf32>
    %663 = arith.mulf %660, %662 : vector<2x16x128xf32>
    %664 = vector.shape_cast %640 : vector<16x128xf32> to vector<1x16x128xf32>
    %665 = vector.broadcast %664 : vector<1x16x128xf32> to vector<2x16x128xf32>
    %666 = arith.addf %663, %665 : vector<2x16x128xf32>
    %667 = vector.shape_cast %637 : vector<2x16x128xf32> to vector<32x128xf32>
    %c1_i32_273 = arith.constant 1 : i32
    %668 = tpu.dynamic_rotate %667 by %c1_i32_273 dim 0 : vector<32x128xf32>, i32 -> vector<32x128xf32>
    %c-1_i32_274 = arith.constant -1 : i32
    %669 = vector.broadcast %c-1_i32_274 : i32 to vector<32x1xi32>
    %670 = arith.addi %16, %669 : vector<32x1xi32>
    %c0_i32_275 = arith.constant 0 : i32
    %671 = vector.broadcast %c0_i32_275 : i32 to vector<32x1xi32>
    %672 = arith.cmpi sge, %670, %671 : vector<32x1xi32>
    %c-1_i32_276 = arith.constant -1 : i32
    %673 = vector.broadcast %c-1_i32_276 : i32 to vector<32x1xi32>
    %674 = arith.addi %16, %673 : vector<32x1xi32>
    %c16_i32_277 = arith.constant 16 : i32
    %675 = vector.broadcast %c16_i32_277 : i32 to vector<32x1xi32>
    %676 = arith.cmpi slt, %674, %675 : vector<32x1xi32>
    %677 = arith.andi %672, %676 : vector<32x1xi1>
    %cst_278 = arith.constant 0.000000e+00 : f32
    %678 = vector.shape_cast %677 : vector<32x1xi1> to vector<32x1xi1>
    %679 = vector.broadcast %678 : vector<32x1xi1> to vector<32x128xi1>
    %680 = vector.broadcast %cst_278 : f32 to vector<32x128xf32>
    %681 = arith.select %679, %668, %680 : vector<32x128xi1>, vector<32x128xf32>
    %c31_i32_279 = arith.constant 31 : i32
    %682 = tpu.dynamic_rotate %667 by %c31_i32_279 dim 0 : vector<32x128xf32>, i32 -> vector<32x128xf32>
    %c1_i32_280 = arith.constant 1 : i32
    %683 = vector.broadcast %c1_i32_280 : i32 to vector<32x1xi32>
    %684 = arith.addi %16, %683 : vector<32x1xi32>
    %c0_i32_281 = arith.constant 0 : i32
    %685 = vector.broadcast %c0_i32_281 : i32 to vector<32x1xi32>
    %686 = arith.cmpi sge, %684, %685 : vector<32x1xi32>
    %c1_i32_282 = arith.constant 1 : i32
    %687 = vector.broadcast %c1_i32_282 : i32 to vector<32x1xi32>
    %688 = arith.addi %16, %687 : vector<32x1xi32>
    %c16_i32_283 = arith.constant 16 : i32
    %689 = vector.broadcast %c16_i32_283 : i32 to vector<32x1xi32>
    %690 = arith.cmpi slt, %688, %689 : vector<32x1xi32>
    %691 = arith.andi %686, %690 : vector<32x1xi1>
    %cst_284 = arith.constant 0.000000e+00 : f32
    %692 = vector.shape_cast %691 : vector<32x1xi1> to vector<32x1xi1>
    %693 = vector.broadcast %692 : vector<32x1xi1> to vector<32x128xi1>
    %694 = vector.broadcast %cst_284 : f32 to vector<32x128xf32>
    %695 = arith.select %693, %682, %694 : vector<32x128xi1>, vector<32x128xf32>
    %696 = tpu.concatenate %681, %667, %695 in 1 : vector<32x128xf32>, vector<32x128xf32>, vector<32x128xf32> -> vector<32x384xf32>
    %697 = arith.truncf %696 : vector<32x384xf32> to vector<32x384xbf16>
    %c0_285 = arith.constant 0 : index
    %c0_286 = arith.constant 0 : index
    %698 = vector.load %arg36[%c0_285, %c0_286] : memref<384x128xbf16, #tpu.memory_space<vmem>>, vector<384x128xbf16>
    %cst_287 = arith.constant dense<0.000000e+00> : vector<32x128xf32>
    %699 = tpu.matmul %697, %698, %cst_287 {dimension_numbers = #tpu.dot_dimension_numbers<[1], [0], [0], [1], [0, 0, 1, 1], [], []>} : vector<32x384xbf16>, vector<384x128xbf16>, vector<32x128xf32> -> vector<32x128xf32>
    %c0_288 = arith.constant 0 : index
    %c0_289 = arith.constant 0 : index
    %700 = vector.load %arg37[%c0_288, %c0_289] : memref<1x128xf32, #tpu.memory_space<vmem>>, vector<1x128xf32>
    %701 = vector.broadcast %700 : vector<1x128xf32> to vector<32x128xf32>
    %702 = arith.addf %699, %701 : vector<32x128xf32>
    %703 = vector.shape_cast %702 : vector<32x128xf32> to vector<2x16x128xf32>
    %c0_290 = arith.constant 0 : index
    %c0_291 = arith.constant 0 : index
    %704 = vector.load %arg38[%c0_290, %c0_291] : memref<16x128xf32, #tpu.memory_space<vmem>>, vector<16x128xf32>
    %c0_292 = arith.constant 0 : index
    %c0_293 = arith.constant 0 : index
    %705 = vector.load %arg39[%c0_292, %c0_293] : memref<16x128xf32, #tpu.memory_space<vmem>>, vector<16x128xf32>
    %cst_294 = arith.constant dense<0.000000e+00> : vector<2x16xf32>
    %706 = vector.multi_reduction <add>, %703, %cst_294 [2] : vector<2x16x128xf32> to vector<2x16xf32>
    %707 = vector.shape_cast %706 : vector<2x16xf32> to vector<2x16x1xf32>
    %cst_295 = arith.constant dense<0.000000e+00> : vector<2x1xf32>
    %708 = vector.multi_reduction <add>, %707, %cst_295 [1] : vector<2x16x1xf32> to vector<2x1xf32>
    %709 = vector.shape_cast %708 : vector<2x1xf32> to vector<2x1x1xf32>
    %cst_296 = arith.constant 2.048000e+03 : f32
    %710 = vector.broadcast %cst_296 : f32 to vector<2x1x1xf32>
    %711 = arith.divf %709, %710 : vector<2x1x1xf32>
    %712 = vector.broadcast %711 : vector<2x1x1xf32> to vector<2x16x128xf32>
    %713 = arith.subf %703, %712 : vector<2x16x128xf32>
    %714 = arith.mulf %713, %713 : vector<2x16x128xf32>
    %cst_297 = arith.constant dense<0.000000e+00> : vector<2x16xf32>
    %715 = vector.multi_reduction <add>, %714, %cst_297 [2] : vector<2x16x128xf32> to vector<2x16xf32>
    %716 = vector.shape_cast %715 : vector<2x16xf32> to vector<2x16x1xf32>
    %cst_298 = arith.constant dense<0.000000e+00> : vector<2x1xf32>
    %717 = vector.multi_reduction <add>, %716, %cst_298 [1] : vector<2x16x1xf32> to vector<2x1xf32>
    %718 = vector.shape_cast %717 : vector<2x1xf32> to vector<2x1x1xf32>
    %cst_299 = arith.constant 2.048000e+03 : f32
    %719 = vector.broadcast %cst_299 : f32 to vector<2x1x1xf32>
    %720 = arith.divf %718, %719 : vector<2x1x1xf32>
    %cst_300 = arith.constant 9.99999974E-6 : f32
    %721 = vector.broadcast %cst_300 : f32 to vector<2x1x1xf32>
    %722 = arith.addf %720, %721 : vector<2x1x1xf32>
    %723 = math.rsqrt %722 : vector<2x1x1xf32>
    %724 = vector.broadcast %723 : vector<2x1x1xf32> to vector<2x16x128xf32>
    %725 = arith.mulf %713, %724 : vector<2x16x128xf32>
    %726 = vector.shape_cast %704 : vector<16x128xf32> to vector<1x16x128xf32>
    %727 = vector.broadcast %726 : vector<1x16x128xf32> to vector<2x16x128xf32>
    %728 = arith.mulf %725, %727 : vector<2x16x128xf32>
    %729 = vector.shape_cast %705 : vector<16x128xf32> to vector<1x16x128xf32>
    %730 = vector.broadcast %729 : vector<1x16x128xf32> to vector<2x16x128xf32>
    %731 = arith.addf %728, %730 : vector<2x16x128xf32>
    %cst_301 = arith.constant 0.000000e+00 : f32
    %732 = vector.broadcast %cst_301 : f32 to vector<2x16x128xf32>
    %733 = arith.maximumf %731, %732 : vector<2x16x128xf32>
    %734 = vector.shape_cast %733 : vector<2x16x128xf32> to vector<32x128xf32>
    %c1_i32_302 = arith.constant 1 : i32
    %735 = tpu.dynamic_rotate %734 by %c1_i32_302 dim 0 : vector<32x128xf32>, i32 -> vector<32x128xf32>
    %c-1_i32_303 = arith.constant -1 : i32
    %736 = vector.broadcast %c-1_i32_303 : i32 to vector<32x1xi32>
    %737 = arith.addi %16, %736 : vector<32x1xi32>
    %c0_i32_304 = arith.constant 0 : i32
    %738 = vector.broadcast %c0_i32_304 : i32 to vector<32x1xi32>
    %739 = arith.cmpi sge, %737, %738 : vector<32x1xi32>
    %c-1_i32_305 = arith.constant -1 : i32
    %740 = vector.broadcast %c-1_i32_305 : i32 to vector<32x1xi32>
    %741 = arith.addi %16, %740 : vector<32x1xi32>
    %c16_i32_306 = arith.constant 16 : i32
    %742 = vector.broadcast %c16_i32_306 : i32 to vector<32x1xi32>
    %743 = arith.cmpi slt, %741, %742 : vector<32x1xi32>
    %744 = arith.andi %739, %743 : vector<32x1xi1>
    %cst_307 = arith.constant 0.000000e+00 : f32
    %745 = vector.shape_cast %744 : vector<32x1xi1> to vector<32x1xi1>
    %746 = vector.broadcast %745 : vector<32x1xi1> to vector<32x128xi1>
    %747 = vector.broadcast %cst_307 : f32 to vector<32x128xf32>
    %748 = arith.select %746, %735, %747 : vector<32x128xi1>, vector<32x128xf32>
    %c31_i32_308 = arith.constant 31 : i32
    %749 = tpu.dynamic_rotate %734 by %c31_i32_308 dim 0 : vector<32x128xf32>, i32 -> vector<32x128xf32>
    %c1_i32_309 = arith.constant 1 : i32
    %750 = vector.broadcast %c1_i32_309 : i32 to vector<32x1xi32>
    %751 = arith.addi %16, %750 : vector<32x1xi32>
    %c0_i32_310 = arith.constant 0 : i32
    %752 = vector.broadcast %c0_i32_310 : i32 to vector<32x1xi32>
    %753 = arith.cmpi sge, %751, %752 : vector<32x1xi32>
    %c1_i32_311 = arith.constant 1 : i32
    %754 = vector.broadcast %c1_i32_311 : i32 to vector<32x1xi32>
    %755 = arith.addi %16, %754 : vector<32x1xi32>
    %c16_i32_312 = arith.constant 16 : i32
    %756 = vector.broadcast %c16_i32_312 : i32 to vector<32x1xi32>
    %757 = arith.cmpi slt, %755, %756 : vector<32x1xi32>
    %758 = arith.andi %753, %757 : vector<32x1xi1>
    %cst_313 = arith.constant 0.000000e+00 : f32
    %759 = vector.shape_cast %758 : vector<32x1xi1> to vector<32x1xi1>
    %760 = vector.broadcast %759 : vector<32x1xi1> to vector<32x128xi1>
    %761 = vector.broadcast %cst_313 : f32 to vector<32x128xf32>
    %762 = arith.select %760, %749, %761 : vector<32x128xi1>, vector<32x128xf32>
    %763 = tpu.concatenate %748, %734, %762 in 1 : vector<32x128xf32>, vector<32x128xf32>, vector<32x128xf32> -> vector<32x384xf32>
    %764 = arith.truncf %763 : vector<32x384xf32> to vector<32x384xbf16>
    %c0_314 = arith.constant 0 : index
    %c0_315 = arith.constant 0 : index
    %765 = vector.load %arg40[%c0_314, %c0_315] : memref<384x128xbf16, #tpu.memory_space<vmem>>, vector<384x128xbf16>
    %cst_316 = arith.constant dense<0.000000e+00> : vector<32x128xf32>
    %766 = tpu.matmul %764, %765, %cst_316 {dimension_numbers = #tpu.dot_dimension_numbers<[1], [0], [0], [1], [0, 0, 1, 1], [], []>} : vector<32x384xbf16>, vector<384x128xbf16>, vector<32x128xf32> -> vector<32x128xf32>
    %c0_317 = arith.constant 0 : index
    %c0_318 = arith.constant 0 : index
    %767 = vector.load %arg41[%c0_317, %c0_318] : memref<1x128xf32, #tpu.memory_space<vmem>>, vector<1x128xf32>
    %768 = vector.broadcast %767 : vector<1x128xf32> to vector<32x128xf32>
    %769 = arith.addf %766, %768 : vector<32x128xf32>
    %770 = vector.shape_cast %769 : vector<32x128xf32> to vector<2x16x128xf32>
    %c0_319 = arith.constant 0 : index
    %c0_320 = arith.constant 0 : index
    %771 = vector.load %arg42[%c0_319, %c0_320] : memref<16x128xf32, #tpu.memory_space<vmem>>, vector<16x128xf32>
    %c0_321 = arith.constant 0 : index
    %c0_322 = arith.constant 0 : index
    %772 = vector.load %arg43[%c0_321, %c0_322] : memref<16x128xf32, #tpu.memory_space<vmem>>, vector<16x128xf32>
    %cst_323 = arith.constant dense<0.000000e+00> : vector<2x16xf32>
    %773 = vector.multi_reduction <add>, %770, %cst_323 [2] : vector<2x16x128xf32> to vector<2x16xf32>
    %774 = vector.shape_cast %773 : vector<2x16xf32> to vector<2x16x1xf32>
    %cst_324 = arith.constant dense<0.000000e+00> : vector<2x1xf32>
    %775 = vector.multi_reduction <add>, %774, %cst_324 [1] : vector<2x16x1xf32> to vector<2x1xf32>
    %776 = vector.shape_cast %775 : vector<2x1xf32> to vector<2x1x1xf32>
    %cst_325 = arith.constant 2.048000e+03 : f32
    %777 = vector.broadcast %cst_325 : f32 to vector<2x1x1xf32>
    %778 = arith.divf %776, %777 : vector<2x1x1xf32>
    %779 = vector.broadcast %778 : vector<2x1x1xf32> to vector<2x16x128xf32>
    %780 = arith.subf %770, %779 : vector<2x16x128xf32>
    %781 = arith.mulf %780, %780 : vector<2x16x128xf32>
    %cst_326 = arith.constant dense<0.000000e+00> : vector<2x16xf32>
    %782 = vector.multi_reduction <add>, %781, %cst_326 [2] : vector<2x16x128xf32> to vector<2x16xf32>
    %783 = vector.shape_cast %782 : vector<2x16xf32> to vector<2x16x1xf32>
    %cst_327 = arith.constant dense<0.000000e+00> : vector<2x1xf32>
    %784 = vector.multi_reduction <add>, %783, %cst_327 [1] : vector<2x16x1xf32> to vector<2x1xf32>
    %785 = vector.shape_cast %784 : vector<2x1xf32> to vector<2x1x1xf32>
    %cst_328 = arith.constant 2.048000e+03 : f32
    %786 = vector.broadcast %cst_328 : f32 to vector<2x1x1xf32>
    %787 = arith.divf %785, %786 : vector<2x1x1xf32>
    %cst_329 = arith.constant 9.99999974E-6 : f32
    %788 = vector.broadcast %cst_329 : f32 to vector<2x1x1xf32>
    %789 = arith.addf %787, %788 : vector<2x1x1xf32>
    %790 = math.rsqrt %789 : vector<2x1x1xf32>
    %791 = vector.broadcast %790 : vector<2x1x1xf32> to vector<2x16x128xf32>
    %792 = arith.mulf %780, %791 : vector<2x16x128xf32>
    %793 = vector.shape_cast %771 : vector<16x128xf32> to vector<1x16x128xf32>
    %794 = vector.broadcast %793 : vector<1x16x128xf32> to vector<2x16x128xf32>
    %795 = arith.mulf %792, %794 : vector<2x16x128xf32>
    %796 = vector.shape_cast %772 : vector<16x128xf32> to vector<1x16x128xf32>
    %797 = vector.broadcast %796 : vector<1x16x128xf32> to vector<2x16x128xf32>
    %798 = arith.addf %795, %797 : vector<2x16x128xf32>
    %cst_330 = arith.constant 0.000000e+00 : f32
    %799 = vector.broadcast %cst_330 : f32 to vector<2x16x128xf32>
    %800 = arith.maximumf %798, %799 : vector<2x16x128xf32>
    %801 = arith.addf %800, %666 : vector<2x16x128xf32>
    %cst_331 = arith.constant 0.000000e+00 : f32
    %802 = vector.broadcast %cst_331 : f32 to vector<2x16x128xf32>
    %803 = arith.maximumf %801, %802 : vector<2x16x128xf32>
    %cst_332 = arith.constant dense<0.000000e+00> : vector<2x128xf32>
    %804 = vector.multi_reduction <add>, %803, %cst_332 [1] : vector<2x16x128xf32> to vector<2x128xf32>
    %cst_333 = arith.constant 1.600000e+01 : f32
    %805 = vector.broadcast %cst_333 : f32 to vector<2x128xf32>
    %806 = arith.divf %804, %805 : vector<2x128xf32>
    %807 = arith.truncf %806 : vector<2x128xf32> to vector<2x128xbf16>
    %c0_334 = arith.constant 0 : index
    %c0_335 = arith.constant 0 : index
    %808 = vector.load %arg44[%c0_334, %c0_335] : memref<128x128xbf16, #tpu.memory_space<vmem>>, vector<128x128xbf16>
    %cst_336 = arith.constant dense<0.000000e+00> : vector<2x128xf32>
    %809 = tpu.matmul %807, %808, %cst_336 {dimension_numbers = #tpu.dot_dimension_numbers<[1], [0], [0], [1], [0, 0, 1, 1], [], []>} : vector<2x128xbf16>, vector<128x128xbf16>, vector<2x128xf32> -> vector<2x128xf32>
    %c0_337 = arith.constant 0 : index
    %c0_338 = arith.constant 0 : index
    %810 = vector.load %arg45[%c0_337, %c0_338] : memref<1x128xf32, #tpu.memory_space<vmem>>, vector<1x128xf32>
    %811 = vector.broadcast %810 : vector<1x128xf32> to vector<2x128xf32>
    %812 = arith.addf %809, %811 : vector<2x128xf32>
    %cst_339 = arith.constant 0.000000e+00 : f32
    %813 = vector.broadcast %cst_339 : f32 to vector<2x128xf32>
    %814 = arith.maximumf %812, %813 : vector<2x128xf32>
    %815 = arith.truncf %814 : vector<2x128xf32> to vector<2x128xbf16>
    %c0_340 = arith.constant 0 : index
    %c0_341 = arith.constant 0 : index
    %816 = vector.load %arg46[%c0_340, %c0_341] : memref<128x128xbf16, #tpu.memory_space<vmem>>, vector<128x128xbf16>
    %cst_342 = arith.constant dense<0.000000e+00> : vector<2x128xf32>
    %817 = tpu.matmul %815, %816, %cst_342 {dimension_numbers = #tpu.dot_dimension_numbers<[1], [0], [0], [1], [0, 0, 1, 1], [], []>} : vector<2x128xbf16>, vector<128x128xbf16>, vector<2x128xf32> -> vector<2x128xf32>
    %c0_343 = arith.constant 0 : index
    %c0_344 = arith.constant 0 : index
    %818 = vector.load %arg47[%c0_343, %c0_344] : memref<1x128xf32, #tpu.memory_space<vmem>>, vector<1x128xf32>
    %819 = vector.broadcast %818 : vector<1x128xf32> to vector<2x128xf32>
    %820 = arith.addf %817, %819 : vector<2x128xf32>
    %c0_345 = arith.constant 0 : index
    %c0_346 = arith.constant 0 : index
    %821 = vector.load %arg48[%c0_345, %c0_346] : memref<2x128xf32, #tpu.memory_space<vmem>>, vector<2x128xf32>
    tpu.vector_store %arg48[%c0_345, %c0_346], %820 {strides = array<i32>} : memref<2x128xf32, #tpu.memory_space<vmem>>, vector<2x128xf32>,
    return
  }
  func.func @transform_0(%arg0: i32) -> (i32, i32, i32) {
    %c0_i32 = arith.constant 0 : i32
    %c0_i32_0 = arith.constant 0 : i32
    %c0_i32_1 = arith.constant 0 : i32
    return %arg0, %c0_i32, %c0_i32_0 : i32, i32, i32
  }
  func.func @transform_1(%arg0: i32) -> (i32, i32) {
    %c0_i32 = arith.constant 0 : i32
    %c0_i32_0 = arith.constant 0 : i32
    %c0_i32_1 = arith.constant 0 : i32
    return %c0_i32, %c0_i32_0 : i32, i32
  }
  func.func @transform_2(%arg0: i32) -> (i32, i32) {
    %c0_i32 = arith.constant 0 : i32
    %c0_i32_0 = arith.constant 0 : i32
    %c0_i32_1 = arith.constant 0 : i32
    return %c0_i32, %c0_i32_0 : i32, i32
  }
  func.func @transform_3(%arg0: i32) -> (i32, i32) {
    %c0_i32 = arith.constant 0 : i32
    %c0_i32_0 = arith.constant 0 : i32
    %c0_i32_1 = arith.constant 0 : i32
    return %c0_i32, %c0_i32_0 : i32, i32
  }
  func.func @transform_4(%arg0: i32) -> (i32, i32) {
    %c0_i32 = arith.constant 0 : i32
    %c0_i32_0 = arith.constant 0 : i32
    %c0_i32_1 = arith.constant 0 : i32
    return %c0_i32, %c0_i32_0 : i32, i32
  }
  func.func @transform_5(%arg0: i32) -> (i32, i32) {
    %c0_i32 = arith.constant 0 : i32
    %c0_i32_0 = arith.constant 0 : i32
    %c0_i32_1 = arith.constant 0 : i32
    return %c0_i32, %c0_i32_0 : i32, i32
  }
  func.func @transform_6(%arg0: i32) -> (i32, i32) {
    %c0_i32 = arith.constant 0 : i32
    %c0_i32_0 = arith.constant 0 : i32
    %c0_i32_1 = arith.constant 0 : i32
    return %c0_i32, %c0_i32_0 : i32, i32
  }
  func.func @transform_7(%arg0: i32) -> (i32, i32) {
    %c0_i32 = arith.constant 0 : i32
    %c0_i32_0 = arith.constant 0 : i32
    %c0_i32_1 = arith.constant 0 : i32
    return %c0_i32, %c0_i32_0 : i32, i32
  }
  func.func @transform_8(%arg0: i32) -> (i32, i32) {
    %c0_i32 = arith.constant 0 : i32
    %c0_i32_0 = arith.constant 0 : i32
    %c0_i32_1 = arith.constant 0 : i32
    return %c0_i32, %c0_i32_0 : i32, i32
  }
  func.func @transform_9(%arg0: i32) -> (i32, i32) {
    %c0_i32 = arith.constant 0 : i32
    %c0_i32_0 = arith.constant 0 : i32
    %c0_i32_1 = arith.constant 0 : i32
    return %c0_i32, %c0_i32_0 : i32, i32
  }
  func.func @transform_10(%arg0: i32) -> (i32, i32) {
    %c0_i32 = arith.constant 0 : i32
    %c0_i32_0 = arith.constant 0 : i32
    %c0_i32_1 = arith.constant 0 : i32
    return %c0_i32, %c0_i32_0 : i32, i32
  }
  func.func @transform_11(%arg0: i32) -> (i32, i32) {
    %c0_i32 = arith.constant 0 : i32
    %c0_i32_0 = arith.constant 0 : i32
    %c0_i32_1 = arith.constant 0 : i32
    return %c0_i32, %c0_i32_0 : i32, i32
  }
  func.func @transform_12(%arg0: i32) -> (i32, i32) {
    %c0_i32 = arith.constant 0 : i32
    %c0_i32_0 = arith.constant 0 : i32
    %c0_i32_1 = arith.constant 0 : i32
    return %c0_i32, %c0_i32_0 : i32, i32
  }
  func.func @transform_13(%arg0: i32) -> (i32, i32) {
    %c0_i32 = arith.constant 0 : i32
    %c0_i32_0 = arith.constant 0 : i32
    %c0_i32_1 = arith.constant 0 : i32
    return %c0_i32, %c0_i32_0 : i32, i32
  }
  func.func @transform_14(%arg0: i32) -> (i32, i32) {
    %c0_i32 = arith.constant 0 : i32
    %c0_i32_0 = arith.constant 0 : i32
    %c0_i32_1 = arith.constant 0 : i32
    return %c0_i32, %c0_i32_0 : i32, i32
  }
  func.func @transform_15(%arg0: i32) -> (i32, i32) {
    %c0_i32 = arith.constant 0 : i32
    %c0_i32_0 = arith.constant 0 : i32
    %c0_i32_1 = arith.constant 0 : i32
    return %c0_i32, %c0_i32_0 : i32, i32
  }
  func.func @transform_16(%arg0: i32) -> (i32, i32) {
    %c0_i32 = arith.constant 0 : i32
    %c0_i32_0 = arith.constant 0 : i32
    %c0_i32_1 = arith.constant 0 : i32
    return %c0_i32, %c0_i32_0 : i32, i32
  }
  func.func @transform_17(%arg0: i32) -> (i32, i32) {
    %c0_i32 = arith.constant 0 : i32
    %c0_i32_0 = arith.constant 0 : i32
    %c0_i32_1 = arith.constant 0 : i32
    return %c0_i32, %c0_i32_0 : i32, i32
  }
  func.func @transform_18(%arg0: i32) -> (i32, i32) {
    %c0_i32 = arith.constant 0 : i32
    %c0_i32_0 = arith.constant 0 : i32
    %c0_i32_1 = arith.constant 0 : i32
    return %c0_i32, %c0_i32_0 : i32, i32
  }
  func.func @transform_19(%arg0: i32) -> (i32, i32) {
    %c0_i32 = arith.constant 0 : i32
    %c0_i32_0 = arith.constant 0 : i32
    %c0_i32_1 = arith.constant 0 : i32
    return %c0_i32, %c0_i32_0 : i32, i32
  }
  func.func @transform_20(%arg0: i32) -> (i32, i32) {
    %c0_i32 = arith.constant 0 : i32
    %c0_i32_0 = arith.constant 0 : i32
    %c0_i32_1 = arith.constant 0 : i32
    return %c0_i32, %c0_i32_0 : i32, i32
  }
  func.func @transform_21(%arg0: i32) -> (i32, i32) {
    %c0_i32 = arith.constant 0 : i32
    %c0_i32_0 = arith.constant 0 : i32
    %c0_i32_1 = arith.constant 0 : i32
    return %c0_i32, %c0_i32_0 : i32, i32
  }
  func.func @transform_22(%arg0: i32) -> (i32, i32) {
    %c0_i32 = arith.constant 0 : i32
    %c0_i32_0 = arith.constant 0 : i32
    %c0_i32_1 = arith.constant 0 : i32
    return %c0_i32, %c0_i32_0 : i32, i32
  }
  func.func @transform_23(%arg0: i32) -> (i32, i32) {
    %c0_i32 = arith.constant 0 : i32
    %c0_i32_0 = arith.constant 0 : i32
    %c0_i32_1 = arith.constant 0 : i32
    return %c0_i32, %c0_i32_0 : i32, i32
  }
  func.func @transform_24(%arg0: i32) -> (i32, i32) {
    %c0_i32 = arith.constant 0 : i32
    %c0_i32_0 = arith.constant 0 : i32
    %c0_i32_1 = arith.constant 0 : i32
    return %c0_i32, %c0_i32_0 : i32, i32
  }
  func.func @transform_25(%arg0: i32) -> (i32, i32) {
    %c0_i32 = arith.constant 0 : i32
    %c0_i32_0 = arith.constant 0 : i32
    %c0_i32_1 = arith.constant 0 : i32
    return %c0_i32, %c0_i32_0 : i32, i32
  }
  func.func @transform_26(%arg0: i32) -> (i32, i32) {
    %c0_i32 = arith.constant 0 : i32
    %c0_i32_0 = arith.constant 0 : i32
    %c0_i32_1 = arith.constant 0 : i32
    return %c0_i32, %c0_i32_0 : i32, i32
  }
  func.func @transform_27(%arg0: i32) -> (i32, i32) {
    %c0_i32 = arith.constant 0 : i32
    %c0_i32_0 = arith.constant 0 : i32
    %c0_i32_1 = arith.constant 0 : i32
    return %c0_i32, %c0_i32_0 : i32, i32
  }
  func.func @transform_28(%arg0: i32) -> (i32, i32) {
    %c0_i32 = arith.constant 0 : i32
    %c0_i32_0 = arith.constant 0 : i32
    %c0_i32_1 = arith.constant 0 : i32
    return %c0_i32, %c0_i32_0 : i32, i32
  }
  func.func @transform_29(%arg0: i32) -> (i32, i32) {
    %c0_i32 = arith.constant 0 : i32
    %c0_i32_0 = arith.constant 0 : i32
    %c0_i32_1 = arith.constant 0 : i32
    return %c0_i32, %c0_i32_0 : i32, i32
  }
  func.func @transform_30(%arg0: i32) -> (i32, i32) {
    %c0_i32 = arith.constant 0 : i32
    %c0_i32_0 = arith.constant 0 : i32
    %c0_i32_1 = arith.constant 0 : i32
    return %c0_i32, %c0_i32_0 : i32, i32
  }
  func.func @transform_31(%arg0: i32) -> (i32, i32) {
    %c0_i32 = arith.constant 0 : i32
    %c0_i32_0 = arith.constant 0 : i32
    %c0_i32_1 = arith.constant 0 : i32
    return %c0_i32, %c0_i32_0 : i32, i32
  }
  func.func @transform_32(%arg0: i32) -> (i32, i32) {
    %c0_i32 = arith.constant 0 : i32
    %c0_i32_0 = arith.constant 0 : i32
    %c0_i32_1 = arith.constant 0 : i32
    return %c0_i32, %c0_i32_0 : i32, i32
  }
  func.func @transform_33(%arg0: i32) -> (i32, i32) {
    %c0_i32 = arith.constant 0 : i32
    %c0_i32_0 = arith.constant 0 : i32
    %c0_i32_1 = arith.constant 0 : i32
    return %c0_i32, %c0_i32_0 : i32, i32
  }
  func.func @transform_34(%arg0: i32) -> (i32, i32) {
    %c0_i32 = arith.constant 0 : i32
    %c0_i32_0 = arith.constant 0 : i32
    %c0_i32_1 = arith.constant 0 : i32
    return %c0_i32, %c0_i32_0 : i32, i32
  }
  func.func @transform_35(%arg0: i32) -> (i32, i32) {
    %c0_i32 = arith.constant 0 : i32
    %c0_i32_0 = arith.constant 0 : i32
    %c0_i32_1 = arith.constant 0 : i32
    return %c0_i32, %c0_i32_0 : i32, i32
  }
  func.func @transform_36(%arg0: i32) -> (i32, i32) {
    %c0_i32 = arith.constant 0 : i32
    %c0_i32_0 = arith.constant 0 : i32
    %c0_i32_1 = arith.constant 0 : i32
    return %c0_i32, %c0_i32_0 : i32, i32
  }
  func.func @transform_37(%arg0: i32) -> (i32, i32) {
    %c0_i32 = arith.constant 0 : i32
    %c0_i32_0 = arith.constant 0 : i32
    %c0_i32_1 = arith.constant 0 : i32
    return %c0_i32, %c0_i32_0 : i32, i32
  }
  func.func @transform_38(%arg0: i32) -> (i32, i32) {
    %c0_i32 = arith.constant 0 : i32
    %c0_i32_0 = arith.constant 0 : i32
    %c0_i32_1 = arith.constant 0 : i32
    return %c0_i32, %c0_i32_0 : i32, i32
  }
  func.func @transform_39(%arg0: i32) -> (i32, i32) {
    %c0_i32 = arith.constant 0 : i32
    %c0_i32_0 = arith.constant 0 : i32
    %c0_i32_1 = arith.constant 0 : i32
    return %c0_i32, %c0_i32_0 : i32, i32
  }
  func.func @transform_40(%arg0: i32) -> (i32, i32) {
    %c0_i32 = arith.constant 0 : i32
    %c0_i32_0 = arith.constant 0 : i32
    %c0_i32_1 = arith.constant 0 : i32
    return %c0_i32, %c0_i32_0 : i32, i32
  }
  func.func @transform_41(%arg0: i32) -> (i32, i32) {
    %c0_i32 = arith.constant 0 : i32
    %c0_i32_0 = arith.constant 0 : i32
    %c0_i32_1 = arith.constant 0 : i32
    return %c0_i32, %c0_i32_0 : i32, i32
  }
  func.func @transform_42(%arg0: i32) -> (i32, i32) {
    %c0_i32 = arith.constant 0 : i32
    %c0_i32_0 = arith.constant 0 : i32
    %c0_i32_1 = arith.constant 0 : i32
    return %c0_i32, %c0_i32_0 : i32, i32
  }
  func.func @transform_43(%arg0: i32) -> (i32, i32) {
    %c0_i32 = arith.constant 0 : i32
    %c0_i32_0 = arith.constant 0 : i32
    %c0_i32_1 = arith.constant 0 : i32
    return %c0_i32, %c0_i32_0 : i32, i32
  }
  func.func @transform_44(%arg0: i32) -> (i32, i32) {
    %c0_i32 = arith.constant 0 : i32
    %c0_i32_0 = arith.constant 0 : i32
    %c0_i32_1 = arith.constant 0 : i32
    return %c0_i32, %c0_i32_0 : i32, i32
  }
  func.func @transform_45(%arg0: i32) -> (i32, i32) {
    %c0_i32 = arith.constant 0 : i32
    %c0_i32_0 = arith.constant 0 : i32
    %c0_i32_1 = arith.constant 0 : i32
    return %c0_i32, %c0_i32_0 : i32, i32
  }
  func.func @transform_46(%arg0: i32) -> (i32, i32) {
    %c0_i32 = arith.constant 0 : i32
    %c0_i32_0 = arith.constant 0 : i32
    %c0_i32_1 = arith.constant 0 : i32
    return %c0_i32, %c0_i32_0 : i32, i32
  }
  func.func @transform_47(%arg0: i32) -> (i32, i32) {
    %c0_i32 = arith.constant 0 : i32
    %c0_i32_0 = arith.constant 0 : i32
    return %arg0, %c0_i32 : i32, i32
  }
}

</mosaic_0001>

<bundles_post_ra>
// kernel: mae_delta_classifier_forward.1
= control target key start
LH: loop header
LB: loop body
LE: loop exit
PB: predicated region body
PF: predicated region fallthrough
CT: control target
= control target key end

     0   :  { %s6025_s6 = smov 1   ;;  %s6026_s10 = smov 2   ;;  %s7725_s0 = inlined_call_operand.smem [shape: u32[48], index: -1, kind: input, shape index: {}] }
   0x1   :  { %s6123_s5 = sld [smem:[%s7725_s0]]   ;;  %s6027_s14 = smov 3  }
   0x2   :  { %s6128_s9 = sld [smem:[%s7725_s0 + %s6025_s6]]   ;;  %s6028_s18 = smov 4  }
   0x3   :  { %s6133_s13 = sld [smem:[%s7725_s0 + %s6026_s10]]   ;;  %s6029_s22 = smov 5  }
   0x4   :  { %s6138_s17 = sld [smem:[%s7725_s0 + %s6027_s14]]   ;;  %s6030_s26 = smov 6  }
   0x5   :  { %s6143_s21 = sld [smem:[%s7725_s0 + %s6028_s18]]   ;;  %s6031_s30 = smov 7  }
   0x6   :  { %s6148_s25 = sld [smem:[%s7725_s0 + %s6029_s22]]   ;;  %s6032_s4 = smov 8  }
   0x7   :  { %7755 = sst [smem:[#allocation65_spill]] %s6123_s5  ;;  %s6033_s10 = smov 9  }
   0x8   :  { %7756 = sst [smem:[#allocation66_spill]] %s6128_s9  ;;  %s6034_s15 = smov 10  }
   0x9   :  { %s6153_s29 = sld [smem:[%s7725_s0 + %s6030_s26]]   ;;  %s6035_s20 = smov 11  }
   0xa   :  { %7757 = sst [smem:[#allocation67_spill]] %s6138_s17  ;;  %s6036_s26 = smov 12  }
   0xb   :  { %s6158_s3 = sld [smem:[%s7725_s0 + %s6031_s30]]   ;;  %s6037_s1 = smov 13  }
   0xc   :  { %7758 = sst [smem:[#allocation68_spill]] %s6148_s25  ;;  %s6038_s7 = smov 14  }
   0xd   :  { %s6163_s8 = sld [smem:[%s7725_s0 + %s6032_s4]]   ;;  %s6040_s22 = smov 16  }
   0xe   :  { %s6168_s14 = sld [smem:[%s7725_s0 + %s6033_s10]]   ;;  %s6041_s28 = smov 17  }
   0xf   :  { %s6173_s19 = sld [smem:[%s7725_s0 + %s6034_s15]]   ;;  %s6039_s15 = smov 15  }
  0x10   :  { %s6178_s24 = sld [smem:[%s7725_s0 + %s6035_s20]]  }
  0x11   :  { %7759 = sst [smem:[#allocation69_spill]] %s6158_s3 }
  0x12   :  { %s6183_s30 = sld [smem:[%s7725_s0 + %s6036_s26]]  }
  0x13   :  { %7760 = sst [smem:[#allocation70_spill]] %s6163_s8 }
  0x14   :  { %s6188_s6 = sld [smem:[%s7725_s0 + %s6037_s1]]  }
  0x15   :  { %7761 = sst [smem:[#allocation71_spill]] %s6173_s19 }
  0x16   :  { %7762 = sst [smem:[#allocation72_spill]] %s6178_s24 }
  0x17   :  { %s6193_s12 = sld [smem:[%s7725_s0 + %s6038_s7]]   ;;  %s6042_s7 = smov 18  }
  0x18   :  { %s6198_s20 = sld [smem:[%s7725_s0 + %s6039_s15]]   ;;  %s6043_s15 = smov 19  }
  0x19   :  { %s6203_s27 = sld [smem:[%s7725_s0 + %s6040_s22]]   ;;  %s6044_s22 = smov 20  }
  0x1a   :  { %7763 = sst [smem:[#allocation73_spill]] %s6188_s6 }
  0x1b   :  { %s6208_s4 = sld [smem:[%s7725_s0 + %s6041_s28]]   ;;  %s6045_s28 = smov 21  }
  0x1c   :  { %s6213_s24 = sld [smem:[%s7725_s0 + %s6042_s7]]   ;;  %s6046_s7 = smov 22  }
  0x1d   :  { %s6218_s3 = sld [smem:[%s7725_s0 + %s6043_s15]]   ;;  %s6047_s15 = smov 23  }
  0x1e   :  { %7764 = sst [smem:[#allocation74_spill]] %s6198_s20 }
  0x1f   :  { %7765 = sst [smem:[#allocation75_spill]] %s6203_s27 }
  0x20   :  { %s6223_s27 = sld [smem:[%s7725_s0 + %s6044_s22]]   ;;  %s6048_s22 = smov 24  }
  0x21   :  { %s6228_s5 = sld [smem:[%s7725_s0 + %s6045_s28]]   ;;  %s6049_s28 = smov 25  }
  0x22   :  { %7766 = sst [smem:[#allocation76_spill]] %s6213_s24 }
  0x23   :  { %s6233_s24 = sld [smem:[%s7725_s0 + %s6046_s7]]   ;;  %s6050_s7 = smov 26  }
  0x24   :  { %s6238_s20 = sld [smem:[%s7725_s0 + %s6047_s15]]   ;;  %s6051_s15 = smov 27  }
  0x25   :  { %s6253_s6 = sld [smem:[%s7725_s0 + %s6050_s7]]   ;;  %s6054_s7 = smov 30  }
  0x26   :  { %7767 = sst [smem:[#allocation77_spill]] %s6223_s27 }
  0x27   :  { %7768 = sst [smem:[#allocation78_spill]] %s6228_s5 }
  0x28   :  { %s6243_s27 = sld [smem:[%s7725_s0 + %s6048_s22]]   ;;  %s6052_s22 = smov 28  }
  0x29   :  { %s6248_s5 = sld [smem:[%s7725_s0 + %s6049_s28]]   ;;  %s6053_s28 = smov 29  }
  0x2a   :  { %7769 = sst [smem:[#allocation79_spill]] %s6238_s20 }
  0x2b   :  { %7771 = sst [smem:[#allocation81_spill]] %s6253_s6 }
  0x2c   :  { %s6258_s20 = sld [smem:[%s7725_s0 + %s6051_s15]]   ;;  %s6055_s15 = smov 31  }
  0x2d   :  { %s6263_s19 = sld [smem:[%s7725_s0 + %s6052_s22]]   ;;  %s6056_s22 = smov 32  }
  0x2e   :  { %s6273_s6 = sld [smem:[%s7725_s0 + %s6054_s7]]   ;;  %s6058_s7 = smov 34  }
  0x2f   :  { %7770 = sst [smem:[#allocation80_spill]] %s6248_s5 }
  0x30   :  { %s6268_s5 = sld [smem:[%s7725_s0 + %s6053_s28]]   ;;  %s6057_s28 = smov 33  }
  0x31   :  { %s6278_s8 = sld [smem:[%s7725_s0 + %s6055_s15]]   ;;  %s6059_s15 = smov 35  }
  0x32   :  { %s6298_s25 = sld [smem:[%s7725_s0 + %s6059_s15]]   ;;  %s6063_s15 = smov 39  }
  0x33   :  { %7772 = sst [smem:[#allocation82_spill]] %s6263_s19 }
  0x34   :  { %7774 = sst [smem:[#allocation84_spill]] %s6273_s6 }
  0x35   :  { %s6283_s19 = sld [smem:[%s7725_s0 + %s6056_s22]]   ;;  %s6060_s22 = smov 36  }
  0x36   :  { %7773 = sst [smem:[#allocation83_spill]] %s6268_s5 }
  0x37   :  { %s6288_s5 = sld [smem:[%s7725_s0 + %s6057_s28]]   ;;  %s6061_s28 = smov 37  }
  0x38   :  { %s6293_s6 = sld [smem:[%s7725_s0 + %s6058_s7]]   ;;  %s6062_s7 = smov 38  }
  0x39   :  { %7777 = sst [smem:[#allocation87_spill]] %s6298_s25 }
  0x3a   :  { %s6308_s17 = sld [smem:[%s7725_s0 + %s6061_s28]]   ;;  %s6065_s28 = smov 41  }
  0x3b   :  { %7775 = sst [smem:[#allocation85_spill]] %s6283_s19 }
  0x3c   :  { %s6303_s19 = sld [smem:[%s7725_s0 + %s6060_s22]]   ;;  %s6064_s22 = smov 40  }
  0x3d   :  { %s6318_s25 = sld [smem:[%s7725_s0 + %s6063_s15]]   ;;  %s6067_s15 = smov 43  }
  0x3e   :  { %7776 = sst [smem:[#allocation86_spill]] %s6293_s6 }
  0x3f   :  { %s6313_s6 = sld [smem:[%s7725_s0 + %s6062_s7]]   ;;  %s6066_s7 = smov 42  }
  0x40   :  { %7778 = sst [smem:[#allocation88_spill]] %s6308_s17 }
  0x41   :  { %s6323_s9 = sld [smem:[%s7725_s0 + %s6064_s22]]   ;;  %s6068_s22 = smov 44  }
  0x42   :  { %s6328_s17 = sld [smem:[%s7725_s0 + %s6065_s28]]   ;;  %s6069_s28 = smov 45  }
  0x43   :  { %7780 = sst [smem:[#allocation90_spill]] %s6318_s25 }
  0x44   :  { %s6338_s25 = sld [smem:[%s7725_s0 + %s6067_s15]]   ;;  %s6071_s15 = smov 47  }
  0x45   :  { %7779 = sst [smem:[#allocation89_spill]] %s6313_s6 }
  0x46   :  { %s6333_s6 = sld [smem:[%s7725_s0 + %s6066_s7]]   ;;  %s6070_s7 = smov 46  }
  0x47   :  { %7781 = sst [smem:[#allocation91_spill]] %s6323_s9 }
  0x48   :  { %7782 = sst [smem:[#allocation92_spill]] %s6328_s17 }
  0x49   :  { %s6343_s9 = sld [smem:[%s7725_s0 + %s6068_s22]]  }
  0x4a   :  { %7784 = sst [smem:[#allocation94_spill]] %s6338_s25 }
  0x4b   :  { %s6348_s17 = sld [smem:[%s7725_s0 + %s6069_s28]]  }
  0x4c   :  { %7783 = sst [smem:[#allocation93_spill]] %s6333_s6 }
  0x4d   :  { %s6353_s6 = sld [smem:[%s7725_s0 + %s6070_s7]]  }
  0x4e   :  { %s6358_s25 = sld [smem:[%s7725_s0 + %s6071_s15]]  }
  0x4f   :  { %100 = vsyncpa [#allocation3], 0 }
  0x50   :  { %101 = vsyncpa [#allocation5], 0 }
  0x51   :  { %102 = vsyncpa [#allocation8], 0 }
  0x52   :  { %103 = vsyncpa [#allocation11], 0 }
  0x53   :  { %104 = vsyncpa [#allocation14], 0 }
  0x54   :  { %105 = vsyncpa [#allocation17], 0 }
  0x55   :  { %106 = vsyncpa [#allocation20], 0 }
  0x56   :  { %107 = vsyncpa [#allocation23], 0 }
  0x57   :  { %108 = vsyncpa [#allocation26], 0 }
  0x58   :  { %109 = vsyncpa [#allocation29], 0 }
  0x59   :  { %110 = vsyncpa [#allocation32], 0 }
  0x5a   :  { %111 = vsyncpa [#allocation35], 0 }
  0x5b   :  { %112 = vsyncpa [#allocation38], 0 }
  0x5c   :  { %113 = vsyncpa [#allocation41], 0 }
  0x5d   :  { %114 = vsyncpa [#allocation44], 0 }
  0x5e   :  { %115 = vsyncpa [#allocation47], 0  ;;  %s6072_s0 = smov [#allocation4]   ;;  %s5311_s23 = scalar_lea.hbm %s6133_s13, 16 }
  0x5f   :  { %s136_s22 = sshll.u32 %s6072_s0, 4  ;;  %p5312_p0 = scmp.ne.s32.totalorder %s6133_s13, %s5311_s23  ;;  %s137_s22 = int_to_ptr.vmem [resolvable:$true] %s136_s22 }
  0x60   :  { %p5315_p1 = scmp.lt.u32.totalorder %s5311_s23, %s6133_s13 }
  0x62   :  { %p5317_p2 = pnand %p5315_p1, %p5312_p0 }
  0x64   :  { %5320 = shalt.err (!%p5317_p2)
}
  0x65   :  { %s5321_s26 = scalar_lea.vmem %s137_s22, 16  ;;  %s5325_s28 = scalar_lea.vmem %s137_s22, 32 }
  0x66   :  { %p5322_p3 = scmp.ne.s32.totalorder %s137_s22, %s5321_s26  ;;  %p5326_p4 = scmp.lt.s32.totalorder %s137_s22, %s137_s22 }
  0x67   :  { %p5327_p5 = scmp.lt.s32.totalorder %s5325_s28, %s5321_s26 }
  0x69   :  { %p5328_p6 = por %p5327_p5, %p5326_p4 }
  0x6b   :  { %p5329_p7 = pnand %p5328_p6, %p5322_p3 }
  0x6d   :  { %5332 = shalt.err (!%p5329_p7)
}
  0x6e   :  { %139 = dma.hbm_to_vmem [thread:$0]  %s6133_s13, 16, %s137_s22, [#allocation5]  }
  0x6f   :  { %s6073_s1 = smov [#allocation7]   ;;  %s6074_s7 = smov [#allocation10]  }
  0x70   :  { %s157_s2 = sshll.u32 %s6073_s1, 4  ;;  %s181_s10 = sshll.u32 %s6074_s7, 4  ;;  %s158_s2 = int_to_ptr.vmem [resolvable:$true] %s157_s2  ;;  %s182_s10 = int_to_ptr.vmem [resolvable:$true] %s181_s10 }
  0x71   :  { %s5333_s11 = scalar_lea.hbm %s6143_s21, 256 }
  0x72   :  { %p5334_p8 = scmp.ne.s32.totalorder %s6143_s21, %s5333_s11  ;;  %p5337_p9 = scmp.lt.u32.totalorder %s5333_s11, %s6143_s21 }
  0x74   :  { %p5339_p10 = pnand %p5337_p9, %p5334_p8 }
  0x76   :  { %5342 = shalt.err (!%p5339_p10)
}
  0x77   :  { %s5343_s15 = scalar_lea.vmem %s158_s2, 256  ;;  %p5348_p12 = scmp.lt.s32.totalorder %s158_s2, %s158_s2 }
  0x78   :  { %p5344_p11 = scmp.ne.s32.totalorder %s158_s2, %s5343_s15  ;;  %p5349_p13 = scmp.lt.s32.totalorder %s5343_s15, %s5343_s15 }
  0x7a   :  { %p5350_p0 = por %p5349_p13, %p5348_p12 }
  0x7c   :  { %p5351_p1 = pnand %p5350_p0, %p5344_p11 }
  0x7e   :  { %5354 = shalt.err (!%p5351_p1)
}
  0x7f   :  { %s6075_s16 = smov 128   ;;  %s6076_s13 = smov 8  }
  0x80   :  { %163 = dma.hbm_to_vmem [thread:$0]  %s6143_s21, 256, %s158_s2, [#allocation8], %s6075_s16, %s6075_s16, %s6076_s13  }
  0x81   :  { %s5355_s18 = scalar_lea.hbm %s6153_s29, 256 }
  0x82   :  { %p5356_p2 = scmp.ne.s32.totalorder %s6153_s29, %s5355_s18  ;;  %p5359_p3 = scmp.lt.u32.totalorder %s5355_s18, %s6153_s29 }
  0x84   :  { %p5361_p4 = pnand %p5359_p3, %p5356_p2 }
  0x86   :  { %5364 = shalt.err (!%p5361_p4)
}
  0x87   :  { %s5365_s0 = scalar_lea.vmem %s182_s10, 256  ;;  %p5370_p6 = scmp.lt.s32.totalorder %s182_s10, %s182_s10 }
  0x88   :  { %p5366_p5 = scmp.ne.s32.totalorder %s182_s10, %s5365_s0  ;;  %p5371_p7 = scmp.lt.s32.totalorder %s5365_s0, %s5365_s0 }
  0x8a   :  { %p5372_p8 = por %p5371_p7, %p5370_p6 }
  0x8c   :  { %p5373_p9 = pnand %p5372_p8, %p5366_p5 }
  0x8e   :  { %5376 = shalt.err (!%p5373_p9)
}
  0x8f   :  { %187 = dma.hbm_to_vmem [thread:$0]  %s6153_s29, 256, %s182_s10, [#allocation11], %s6075_s16, %s6075_s16, %s6076_s13  }
  0x90   :  { %s6077_s21 = smov [#allocation13]   ;;  %s6078_s23 = smov [#allocation16]  }
  0x91   :  { %s205_s22 = sshll.u32 %s6077_s21, 4  ;;  %s232_s26 = sshll.u32 %s6078_s23, 4  ;;  %s206_s22 = int_to_ptr.vmem [resolvable:$true] %s205_s22  ;;  %s233_s26 = int_to_ptr.vmem [resolvable:$true] %s232_s26 }
  0x92   :  { %s5377_s28 = scalar_lea.hbm %s6168_s14, 256 }
  0x93   :  { %p5378_p10 = scmp.ne.s32.totalorder %s6168_s14, %s5377_s28  ;;  %p5381_p11 = scmp.lt.u32.totalorder %s5377_s28, %s6168_s14 }
  0x95   :  { %p5383_p12 = pnand %p5381_p11, %p5378_p10 }
  0x97   :  { %5386 = shalt.err (!%p5383_p12)
}
  0x98   :  { %s5387_s1 = scalar_lea.vmem %s206_s22, 256  ;;  %p5392_p0 = scmp.lt.s32.totalorder %s206_s22, %s206_s22 }
  0x99   :  { %p5388_p13 = scmp.ne.s32.totalorder %s206_s22, %s5387_s1  ;;  %p5393_p1 = scmp.lt.s32.totalorder %s5387_s1, %s5387_s1 }
  0x9b   :  { %p5394_p2 = por %p5393_p1, %p5392_p0 }
  0x9d   :  { %p5395_p3 = pnand %p5394_p2, %p5388_p13 }
  0x9f   :  { %5398 = shalt.err (!%p5395_p3)
}
  0xa0   :  { %211 = dma.hbm_to_vmem [thread:$0]  %s6168_s14, 256, %s206_s22, [#allocation14], %s6075_s16, %s6075_s16, %s6076_s13  }
  0xa1   :  { %s5399_s29 = scalar_lea.hbm %s6183_s30, 16 }
  0xa2   :  { %p5400_p4 = scmp.ne.s32.totalorder %s6183_s30, %s5399_s29  ;;  %p5403_p5 = scmp.lt.u32.totalorder %s5399_s29, %s6183_s30 }
  0xa4   :  { %p5405_p6 = pnand %p5403_p5, %p5400_p4 }
  0xa6   :  { %5408 = shalt.err (!%p5405_p6)
}
  0xa7   :  { %s5409_s2 = scalar_lea.vmem %s233_s26, 16  ;;  %s5413_s7 = scalar_lea.vmem %s233_s26, 32 }
  0xa8   :  { %p5410_p7 = scmp.ne.s32.totalorder %s233_s26, %s5409_s2  ;;  %p5414_p8 = scmp.lt.s32.totalorder %s233_s26, %s233_s26 }
  0xa9   :  { %p5415_p9 = scmp.lt.s32.totalorder %s5413_s7, %s5409_s2 }
  0xab   :  { %p5416_p10 = por %p5415_p9, %p5414_p8 }
  0xad   :  { %p5417_p11 = pnand %p5416_p10, %p5410_p7 }
  0xaf   :  { %5420 = shalt.err (!%p5417_p11)
}
  0xb0   :  { %235 = dma.hbm_to_vmem [thread:$0]  %s6183_s30, 16, %s233_s26, [#allocation17]  }
  0xb1   :  { %s6079_s14 = smov [#allocation19]   ;;  %s6080_s11 = smov [#allocation22]  }
  0xb2   :  { %s253_s10 = sshll.u32 %s6079_s14, 4  ;;  %s279_s15 = sshll.u32 %s6080_s11, 4  ;;  %s254_s10 = int_to_ptr.vmem [resolvable:$true] %s253_s10  ;;  %s280_s15 = int_to_ptr.vmem [resolvable:$true] %s279_s15 }
  0xb3   :  { %s5421_s18 = scalar_lea.hbm %s6193_s12, 256 }
  0xb4   :  { %p5422_p12 = scmp.ne.s32.totalorder %s6193_s12, %s5421_s18  ;;  %p5425_p13 = scmp.lt.u32.totalorder %s5421_s18, %s6193_s12 }
  0xb6   :  { %p5427_p0 = pnand %p5425_p13, %p5422_p12 }
  0xb8   :  { %5430 = shalt.err (!%p5427_p0)
}
  0xb9   :  { %s5431_s0 = scalar_lea.vmem %s254_s10, 256  ;;  %p5436_p2 = scmp.lt.s32.totalorder %s254_s10, %s254_s10 }
  0xba   :  { %p5432_p1 = scmp.ne.s32.totalorder %s254_s10, %s5431_s0  ;;  %p5437_p3 = scmp.lt.s32.totalorder %s5431_s0, %s5431_s0 }
  0xbc   :  { %p5438_p4 = por %p5437_p3, %p5436_p2 }
  0xbe   :  { %p5439_p5 = pnand %p5438_p4, %p5432_p1 }
  0xc0   :  { %5442 = shalt.err (!%p5439_p5)
}
  0xc1   :  { %259 = dma.hbm_to_vmem [thread:$0]  %s6193_s12, 256, %s254_s10, [#allocation20], %s6075_s16, %s6075_s16, %s6076_s13  }
  0xc2   :  { %s5443_s30 = scalar_lea.hbm %s6208_s4, 256 }
  0xc3   :  { %p5444_p6 = scmp.ne.s32.totalorder %s6208_s4, %s5443_s30  ;;  %p5447_p7 = scmp.lt.u32.totalorder %s5443_s30, %s6208_s4 }
  0xc5   :  { %p5449_p8 = pnand %p5447_p7, %p5444_p6 }
  0xc7   :  { %5452 = shalt.err (!%p5449_p8)
}
  0xc8   :  { %s5453_s21 = scalar_lea.vmem %s280_s15, 256  ;;  %p5458_p10 = scmp.lt.s32.totalorder %s280_s15, %s280_s15 }
  0xc9   :  { %p5454_p9 = scmp.ne.s32.totalorder %s280_s15, %s5453_s21  ;;  %p5459_p11 = scmp.lt.s32.totalorder %s5453_s21, %s5453_s21 }
  0xcb   :  { %p5460_p12 = por %p5459_p11, %p5458_p10 }
  0xcd   :  { %p5461_p13 = pnand %p5460_p12, %p5454_p9 }
  0xcf   :  { %5464 = shalt.err (!%p5461_p13)
}
  0xd0   :  { %285 = dma.hbm_to_vmem [thread:$0]  %s6208_s4, 256, %s280_s15, [#allocation23], %s6075_s16, %s6075_s16, %s6076_s13  }
  0xd1   :  { %s6081_s12 = smov [#allocation25]   ;;  %s6082_s23 = smov [#allocation28]  }
  0xd2   :  { %s303_s22 = sshll.u32 %s6081_s12, 4  ;;  %s330_s26 = sshll.u32 %s6082_s23, 4  ;;  %s304_s22 = int_to_ptr.vmem [resolvable:$true] %s303_s22  ;;  %s331_s26 = int_to_ptr.vmem [resolvable:$true] %s330_s26 }
  0xd3   :  { %s5465_s28 = scalar_lea.hbm %s6218_s3, 256 }
  0xd4   :  { %p5466_p0 = scmp.ne.s32.totalorder %s6218_s3, %s5465_s28  ;;  %p5469_p1 = scmp.lt.u32.totalorder %s5465_s28, %s6218_s3 }
  0xd6   :  { %p5471_p2 = pnand %p5469_p1, %p5466_p0 }
  0xd8   :  { %5474 = shalt.err (!%p5471_p2)
}
  0xd9   :  { %s5475_s1 = scalar_lea.vmem %s304_s22, 256  ;;  %p5480_p4 = scmp.lt.s32.totalorder %s304_s22, %s304_s22 }
  0xda   :  { %p5476_p3 = scmp.ne.s32.totalorder %s304_s22, %s5475_s1  ;;  %p5481_p5 = scmp.lt.s32.totalorder %s5475_s1, %s5475_s1 }
  0xdc   :  { %p5482_p6 = por %p5481_p5, %p5480_p4 }
  0xde   :  { %p5483_p7 = pnand %p5482_p6, %p5476_p3 }
  0xe0   :  { %5486 = shalt.err (!%p5483_p7)
}
  0xe1   :  { %309 = dma.hbm_to_vmem [thread:$0]  %s6218_s3, 256, %s304_s22, [#allocation26], %s6075_s16, %s6075_s16, %s6076_s13  }
  0xe2   :  { %s5487_s4 = scalar_lea.hbm %s6233_s24, 16 }
  0xe3   :  { %p5488_p8 = scmp.ne.s32.totalorder %s6233_s24, %s5487_s4  ;;  %p5491_p9 = scmp.lt.u32.totalorder %s5487_s4, %s6233_s24 }
  0xe5   :  { %p5493_p10 = pnand %p5491_p9, %p5488_p8 }
  0xe7   :  { %5496 = shalt.err (!%p5493_p10)
}
  0xe8   :  { %s5497_s29 = scalar_lea.vmem %s331_s26, 16  ;;  %s5501_s2 = scalar_lea.vmem %s331_s26, 32 }
  0xe9   :  { %p5498_p11 = scmp.ne.s32.totalorder %s331_s26, %s5497_s29  ;;  %p5502_p12 = scmp.lt.s32.totalorder %s331_s26, %s331_s26 }
  0xea   :  { %p5503_p13 = scmp.lt.s32.totalorder %s5501_s2, %s5497_s29 }
  0xec   :  { %p5504_p0 = por %p5503_p13, %p5502_p12 }
  0xee   :  { %p5505_p1 = pnand %p5504_p0, %p5498_p11 }
  0xf0   :  { %5508 = shalt.err (!%p5505_p1)
}
  0xf1   :  { %333 = dma.hbm_to_vmem [thread:$0]  %s6233_s24, 16, %s331_s26, [#allocation29]  }
  0xf2   :  { %s6083_s3 = smov [#allocation31]   ;;  %s6084_s14 = smov [#allocation34]  }
  0xf3   :  { %s351_s7 = sshll.u32 %s6083_s3, 4  ;;  %s375_s10 = sshll.u32 %s6084_s14, 4  ;;  %s352_s7 = int_to_ptr.vmem [resolvable:$true] %s351_s7  ;;  %s376_s10 = int_to_ptr.vmem [resolvable:$true] %s375_s10 }
  0xf4   :  { %s5509_s11 = scalar_lea.hbm %s6243_s27, 256 }
  0xf5   :  { %p5510_p2 = scmp.ne.s32.totalorder %s6243_s27, %s5509_s11  ;;  %p5513_p3 = scmp.lt.u32.totalorder %s5509_s11, %s6243_s27 }
  0xf7   :  { %p5515_p4 = pnand %p5513_p3, %p5510_p2 }
  0xf9   :  { %5518 = shalt.err (!%p5515_p4)
}
  0xfa   :  { %s5519_s15 = scalar_lea.vmem %s352_s7, 256  ;;  %p5524_p6 = scmp.lt.s32.totalorder %s352_s7, %s352_s7 }
  0xfb   :  { %p5520_p5 = scmp.ne.s32.totalorder %s352_s7, %s5519_s15  ;;  %p5525_p7 = scmp.lt.s32.totalorder %s5519_s15, %s5519_s15 }
  0xfd   :  { %p5526_p8 = por %p5525_p7, %p5524_p6 }
  0xff   :  { %p5527_p9 = pnand %p5526_p8, %p5520_p5 }
 0x101   :  { %5530 = shalt.err (!%p5527_p9)
}
 0x102   :  { %357 = dma.hbm_to_vmem [thread:$0]  %s6243_s27, 256, %s352_s7, [#allocation32], %s6075_s16, %s6075_s16, %s6076_s13  }
 0x103   :  { %s5531_s24 = scalar_lea.hbm %s6258_s20, 256 }
 0x104   :  { %p5532_p10 = scmp.ne.s32.totalorder %s6258_s20, %s5531_s24  ;;  %p5535_p11 = scmp.lt.u32.totalorder %s5531_s24, %s6258_s20 }
 0x106   :  { %p5537_p12 = pnand %p5535_p11, %p5532_p10 }
 0x108   :  { %5540 = shalt.err (!%p5537_p12)
}
 0x109   :  { %s5541_s18 = scalar_lea.vmem %s376_s10, 256  ;;  %p5546_p0 = scmp.lt.s32.totalorder %s376_s10, %s376_s10 }
 0x10a   :  { %p5542_p13 = scmp.ne.s32.totalorder %s376_s10, %s5541_s18  ;;  %p5547_p1 = scmp.lt.s32.totalorder %s5541_s18, %s5541_s18 }
 0x10c   :  { %p5548_p2 = por %p5547_p1, %p5546_p0 }
 0x10e   :  { %p5549_p3 = pnand %p5548_p2, %p5542_p13 }
 0x110   :  { %5552 = shalt.err (!%p5549_p3)
}
 0x111   :  { %381 = dma.hbm_to_vmem [thread:$0]  %s6258_s20, 256, %s376_s10, [#allocation35], %s6075_s16, %s6075_s16, %s6076_s13  }
 0x112   :  { %s6085_s27 = smov [#allocation37]   ;;  %s6086_s30 = smov [#allocation40]  }
 0x113   :  { %s403_s0 = sshll.u32 %s6085_s27, 4  ;;  %s427_s21 = sshll.u32 %s6086_s30, 4  ;;  %s404_s0 = int_to_ptr.vmem [resolvable:$true] %s403_s0  ;;  %s428_s21 = int_to_ptr.vmem [resolvable:$true] %s427_s21 }
 0x114   :  { %s5553_s12 = scalar_lea.hbm %s6278_s8, 256 }
 0x115   :  { %p5554_p4 = scmp.ne.s32.totalorder %s6278_s8, %s5553_s12  ;;  %p5557_p5 = scmp.lt.u32.totalorder %s5553_s12, %s6278_s8 }
 0x117   :  { %p5559_p6 = pnand %p5557_p5, %p5554_p4 }
 0x119   :  { %5562 = shalt.err (!%p5559_p6)
}
 0x11a   :  { %s5563_s22 = scalar_lea.vmem %s404_s0, 256  ;;  %p5568_p8 = scmp.lt.s32.totalorder %s404_s0, %s404_s0 }
 0x11b   :  { %p5564_p7 = scmp.ne.s32.totalorder %s404_s0, %s5563_s22  ;;  %p5569_p9 = scmp.lt.s32.totalorder %s5563_s22, %s5563_s22 }
 0x11d   :  { %p5570_p10 = por %p5569_p9, %p5568_p8 }
 0x11f   :  { %p5571_p11 = pnand %p5570_p10, %p5564_p7 }
 0x121   :  { %5574 = shalt.err (!%p5571_p11)
}
 0x122   :  { %409 = dma.hbm_to_vmem [thread:$0]  %s6278_s8, 256, %s404_s0, [#allocation38], %s6075_s16, %s6075_s16, %s6076_s13  }
 0x123   :  { %s5575_s20 = scalar_lea.hbm %s6288_s5, 256 }
 0x124   :  { %p5576_p12 = scmp.ne.s32.totalorder %s6288_s5, %s5575_s20  ;;  %p5579_p13 = scmp.lt.u32.totalorder %s5575_s20, %s6288_s5 }
 0x126   :  { %p5581_p0 = pnand %p5579_p13, %p5576_p12 }
 0x128   :  { %5584 = shalt.err (!%p5581_p0)
}
 0x129   :  { %s5585_s23 = scalar_lea.vmem %s428_s21, 256  ;;  %p5590_p2 = scmp.lt.s32.totalorder %s428_s21, %s428_s21 }
 0x12a   :  { %p5586_p1 = scmp.ne.s32.totalorder %s428_s21, %s5585_s23  ;;  %p5591_p3 = scmp.lt.s32.totalorder %s5585_s23, %s5585_s23 }
 0x12c   :  { %p5592_p4 = por %p5591_p3, %p5590_p2 }
 0x12e   :  { %p5593_p5 = pnand %p5592_p4, %p5586_p1 }
 0x130   :  { %5596 = shalt.err (!%p5593_p5)
}
 0x131   :  { %433 = dma.hbm_to_vmem [thread:$0]  %s6288_s5, 256, %s428_s21, [#allocation41], %s6075_s16, %s6075_s16, %s6076_s13  }
 0x132   :  { %s6087_s8 = smov [#allocation43]   ;;  %s6088_s28 = smov [#allocation46]  }
 0x133   :  { %s454_s26 = sshll.u32 %s6087_s8, 4  ;;  %s480_s1 = sshll.u32 %s6088_s28, 4  ;;  %s455_s26 = int_to_ptr.vmem [resolvable:$true] %s454_s26  ;;  %s481_s1 = int_to_ptr.vmem [resolvable:$true] %s480_s1 }
 0x134   :  { %s5597_s4 = scalar_lea.hbm %s6303_s19, 16 }
 0x135   :  { %p5598_p6 = scmp.ne.s32.totalorder %s6303_s19, %s5597_s4  ;;  %p5601_p7 = scmp.lt.u32.totalorder %s5597_s4, %s6303_s19 }
 0x137   :  { %p5603_p8 = pnand %p5601_p7, %p5598_p6 }
 0x139   :  { %5606 = shalt.err (!%p5603_p8)
}
 0x13a   :  { %s5607_s29 = scalar_lea.vmem %s455_s26, 16  ;;  %s5611_s2 = scalar_lea.vmem %s455_s26, 32 }
 0x13b   :  { %p5608_p9 = scmp.ne.s32.totalorder %s455_s26, %s5607_s29  ;;  %p5612_p10 = scmp.lt.s32.totalorder %s455_s26, %s455_s26 }
 0x13c   :  { %p5613_p11 = scmp.lt.s32.totalorder %s5611_s2, %s5607_s29 }
 0x13e   :  { %p5614_p12 = por %p5613_p11, %p5612_p10 }
 0x140   :  { %p5615_p13 = pnand %p5614_p12, %p5608_p9 }
 0x142   :  { %5618 = shalt.err (!%p5615_p13)
}
 0x143   :  { %s7785_s5 = sld [smem:[#allocation91_spill]] }
 0x144   :  { %457 = dma.hbm_to_vmem [thread:$0]  %s6303_s19, 16, %s455_s26, [#allocation44]  }
 0x149   :  { %s5619_s3 = scalar_lea.hbm %s7785_s5, 16 }
 0x14a   :  { %p5620_p0 = scmp.ne.s32.totalorder %s7785_s5, %s5619_s3  ;;  %p5623_p1 = scmp.lt.u32.totalorder %s5619_s3, %s7785_s5 }
 0x14c   :  { %p5625_p2 = pnand %p5623_p1, %p5620_p0 }
 0x14e   :  { %5628 = shalt.err (!%p5625_p2)
}
 0x14f   :  { %s5629_s7 = scalar_lea.vmem %s481_s1, 16  ;;  %s5633_s14 = scalar_lea.vmem %s481_s1, 32 }
 0x150   :  { %p5630_p3 = scmp.ne.s32.totalorder %s481_s1, %s5629_s7  ;;  %p5634_p4 = scmp.lt.s32.totalorder %s481_s1, %s481_s1 }
 0x151   :  { %p5635_p5 = scmp.lt.s32.totalorder %s5633_s14, %s5629_s7 }
 0x153   :  { %p5636_p6 = por %p5635_p5, %p5634_p4 }
 0x155   :  { %p5637_p7 = pnand %p5636_p6, %p5630_p3 }
 0x157   :  { %5640 = shalt.err (!%p5637_p7)
}
 0x158   :  { %s7786_s10 = sld [smem:[#allocation66_spill]]  ;;  %s6089_s19 = smov [#allocation2]  }
 0x159   :  { %483 = dma.hbm_to_vmem [thread:$0]  %s7785_s5, 16, %s481_s1, [#allocation47]  }
 0x15a   :  { %s123_s11 = sshll.u32 %s6089_s19, 4  ;;  %s124_s11 = int_to_ptr.vmem [resolvable:$true] %s123_s11 }
 0x15e   :  { %s5641_s15 = scalar_lea.hbm %s7786_s10, 192 }
 0x15f   :  { %p5642_p8 = scmp.ne.s32.totalorder %s7786_s10, %s5641_s15  ;;  %p5645_p9 = scmp.lt.u32.totalorder %s5641_s15, %s7786_s10 }
 0x161   :  { %p5647_p10 = pnand %p5645_p9, %p5642_p8 }
 0x163   :  { %5650 = shalt.err (!%p5647_p10)
}
 0x164   :  { %s5651_s24 = scalar_lea.vmem %s124_s11, 192  ;;  %p5656_p12 = scmp.lt.s32.totalorder %s124_s11, %s124_s11 }
 0x165   :  { %p5652_p11 = scmp.ne.s32.totalorder %s124_s11, %s5651_s24  ;;  %p5657_p13 = scmp.lt.s32.totalorder %s5651_s24, %s5651_s24 }
 0x167   :  { %p5658_p0 = por %p5657_p13, %p5656_p12 }
 0x169   :  { %p5659_p1 = pnand %p5658_p0, %p5652_p11 }
 0x16b   :  { %5662 = shalt.err (!%p5659_p1)
}
 0x16c   :  { %s6090_s18 = smov 64   ;;  %s7787_s27 = sld [smem:[#allocation67_spill]] }
 0x16d   :  { %s6091_s0 = smov 4   ;;  %s6092_s30 = smov [#allocation6]  }
 0x16e   :  { %129 = dma.hbm_to_vmem [thread:$0]  %s7786_s10, 192, %s124_s11, [#allocation3], %s6090_s18, %s6090_s18, %s6091_s0  }
 0x16f   :  { %s145_s21 = sshll.u32 %s6092_s30, 4  ;;  %s6093_s12 = smov [#allocation9]   ;;  %s146_s21 = int_to_ptr.vmem [resolvable:$true] %s145_s21 }
 0x170   :  { %s169_s22 = sshll.u32 %s6093_s12, 4  ;;  %s6457_s22 = int_to_ptr.vmem [resolvable:$true] %s169_s22 }
 0x172   :  { %s5663_s20 = scalar_lea.hbm %s7787_s27, 256 }
 0x173   :  { %p5664_p2 = scmp.ne.s32.totalorder %s7787_s27, %s5663_s20  ;;  %p5667_p3 = scmp.lt.u32.totalorder %s5663_s20, %s7787_s27 }
 0x175   :  { %p5669_p4 = pnand %p5667_p3, %p5664_p2 }
 0x177   :  { %5672 = shalt.err (!%p5669_p4)
}
 0x178   :  { %s5673_s23 = scalar_lea.vmem %s146_s21, 256  ;;  %p5678_p6 = scmp.lt.s32.totalorder %s146_s21, %s146_s21 }
 0x179   :  { %p5674_p5 = scmp.ne.s32.totalorder %s146_s21, %s5673_s23  ;;  %p5679_p7 = scmp.lt.s32.totalorder %s5673_s23, %s5673_s23 }
 0x17b   :  { %p5680_p8 = por %p5679_p7, %p5678_p6 }
 0x17d   :  { %p5681_p9 = pnand %p5680_p8, %p5674_p5 }
 0x17f   :  { %5684 = shalt.err (!%p5681_p9)
}
 0x180   :  { %s7788_s8 = sld [smem:[#allocation68_spill]] }
 0x181   :  { %151 = dma.hbm_to_vmem [thread:$0]  %s7787_s27, 256, %s146_s21, [#allocation5], %s6075_s16, %s6075_s16, %s6076_s13  }
 0x186   :  { %s5685_s26 = scalar_lea.hbm %s7788_s8, 256 }
 0x187   :  { %p5686_p10 = scmp.ne.s32.totalorder %s7788_s8, %s5685_s26  ;;  %p5689_p11 = scmp.lt.u32.totalorder %s5685_s26, %s7788_s8 }
 0x189   :  { %p5691_p12 = pnand %p5689_p11, %p5686_p10 }
 0x18b   :  { %5694 = shalt.err (!%p5691_p12)
}
 0x18c   :  { %s5695_s28 = scalar_lea.vmem %s6457_s22, 256  ;;  %p5700_p0 = scmp.lt.s32.totalorder %s6457_s22, %s6457_s22 }
 0x18d   :  { %p5696_p13 = scmp.ne.s32.totalorder %s6457_s22, %s5695_s28  ;;  %p5701_p1 = scmp.lt.s32.totalorder %s5695_s28, %s5695_s28 }
 0x18f   :  { %p5702_p2 = por %p5701_p1, %p5700_p0 }
 0x191   :  { %p5703_p3 = pnand %p5702_p2, %p5696_p13 }
 0x193   :  { %5706 = shalt.err (!%p5703_p3)
}
 0x194   :  { %s7789_s1 = sld [smem:[#allocation70_spill]]  ;;  %s6094_s4 = smov [#allocation12]  }
 0x195   :  { %175 = dma.hbm_to_vmem [thread:$0]  %s7788_s8, 256, %s6457_s22, [#allocation8], %s6075_s16, %s6075_s16, %s6076_s13  }
 0x196   :  { %s196_s29 = sshll.u32 %s6094_s4, 4  ;;  %s6095_s2 = smov [#allocation15]   ;;  %s197_s29 = int_to_ptr.vmem [resolvable:$true] %s196_s29 }
 0x197   :  { %s217_s5 = sshll.u32 %s6095_s2, 4  ;;  %s6478_s5 = int_to_ptr.vmem [resolvable:$true] %s217_s5 }
 0x19a   :  { %s5707_s3 = scalar_lea.hbm %s7789_s1, 16 }
 0x19b   :  { %p5708_p4 = scmp.ne.s32.totalorder %s7789_s1, %s5707_s3  ;;  %p5711_p5 = scmp.lt.u32.totalorder %s5707_s3, %s7789_s1 }
 0x19d   :  { %p5713_p6 = pnand %p5711_p5, %p5708_p4 }
 0x19f   :  { %5716 = shalt.err (!%p5713_p6)
}
 0x1a0   :  { %s5717_s7 = scalar_lea.vmem %s197_s29, 16  ;;  %s5721_s14 = scalar_lea.vmem %s197_s29, 32 }
 0x1a1   :  { %p5718_p7 = scmp.ne.s32.totalorder %s197_s29, %s5717_s7  ;;  %p5722_p8 = scmp.lt.s32.totalorder %s197_s29, %s197_s29 }
 0x1a2   :  { %p5723_p9 = scmp.lt.s32.totalorder %s5721_s14, %s5717_s7 }
 0x1a4   :  { %p5724_p10 = por %p5723_p9, %p5722_p8 }
 0x1a6   :  { %p5725_p11 = pnand %p5724_p10, %p5718_p7 }
 0x1a8   :  { %5728 = shalt.err (!%p5725_p11)
}
 0x1a9   :  { %s7790_s10 = sld [smem:[#allocation71_spill]] }
 0x1aa   :  { %199 = dma.hbm_to_vmem [thread:$0]  %s7789_s1, 16, %s197_s29, [#allocation11]  }
 0x1af   :  { %s5729_s19 = scalar_lea.hbm %s7790_s10, 256 }
 0x1b0   :  { %p5730_p12 = scmp.ne.s32.totalorder %s7790_s10, %s5729_s19  ;;  %p5733_p13 = scmp.lt.u32.totalorder %s5729_s19, %s7790_s10 }
 0x1b2   :  { %p5735_p0 = pnand %p5733_p13, %p5730_p12 }
 0x1b4   :  { %5738 = shalt.err (!%p5735_p0)
}
 0x1b5   :  { %s5739_s11 = scalar_lea.vmem %s6478_s5, 256  ;;  %p5744_p2 = scmp.lt.s32.totalorder %s6478_s5, %s6478_s5 }
 0x1b6   :  { %p5740_p1 = scmp.ne.s32.totalorder %s6478_s5, %s5739_s11  ;;  %p5745_p3 = scmp.lt.s32.totalorder %s5739_s11, %s5739_s11 }
 0x1b8   :  { %p5746_p4 = por %p5745_p3, %p5744_p2 }
 0x1ba   :  { %p5747_p5 = pnand %p5746_p4, %p5740_p1 }
 0x1bc   :  { %5750 = shalt.err (!%p5747_p5)
}
 0x1bd   :  { %s7791_s15 = sld [smem:[#allocation73_spill]]  ;;  %s6096_s24 = smov [#allocation18]  }
 0x1be   :  { %223 = dma.hbm_to_vmem [thread:$0]  %s7790_s10, 256, %s6478_s5, [#allocation14], %s6075_s16, %s6075_s16, %s6076_s13  }
 0x1bf   :  { %s241_s27 = sshll.u32 %s6096_s24, 4  ;;  %s6097_s30 = smov [#allocation21]   ;;  %s242_s27 = int_to_ptr.vmem [resolvable:$true] %s241_s27 }
 0x1c0   :  { %s265_s21 = sshll.u32 %s6097_s30, 4  ;;  %s6496_s21 = int_to_ptr.vmem [resolvable:$true] %s265_s21 }
 0x1c3   :  { %s5751_s12 = scalar_lea.hbm %s7791_s15, 256 }
 0x1c4   :  { %p5752_p6 = scmp.ne.s32.totalorder %s7791_s15, %s5751_s12  ;;  %p5755_p7 = scmp.lt.u32.totalorder %s5751_s12, %s7791_s15 }
 0x1c6   :  { %p5757_p8 = pnand %p5755_p7, %p5752_p6 }
 0x1c8   :  { %5760 = shalt.err (!%p5757_p8)
}
 0x1c9   :  { %s5761_s22 = scalar_lea.vmem %s242_s27, 256  ;;  %p5766_p10 = scmp.lt.s32.totalorder %s242_s27, %s242_s27 }
 0x1ca   :  { %p5762_p9 = scmp.ne.s32.totalorder %s242_s27, %s5761_s22  ;;  %p5767_p11 = scmp.lt.s32.totalorder %s5761_s22, %s5761_s22 }
 0x1cc   :  { %p5768_p12 = por %p5767_p11, %p5766_p10 }
 0x1ce   :  { %p5769_p13 = pnand %p5768_p12, %p5762_p9 }
 0x1d0   :  { %5772 = shalt.err (!%p5769_p13)
}
 0x1d1   :  { %s7792_s20 = sld [smem:[#allocation74_spill]] }
 0x1d2   :  { %247 = dma.hbm_to_vmem [thread:$0]  %s7791_s15, 256, %s242_s27, [#allocation17], %s6075_s16, %s6075_s16, %s6076_s13  }
 0x1d7   :  { %s5773_s23 = scalar_lea.hbm %s7792_s20, 768 }
 0x1d8   :  { %p5774_p0 = scmp.ne.s32.totalorder %s7792_s20, %s5773_s23  ;;  %p5777_p1 = scmp.lt.u32.totalorder %s5773_s23, %s7792_s20 }
 0x1da   :  { %p5779_p2 = pnand %p5777_p1, %p5774_p0 }
 0x1dc   :  { %5782 = shalt.err (!%p5779_p2)
}
 0x1dd   :  { %s5783_s8 = scalar_lea.vmem %s6496_s21, 768  ;;  %p5788_p4 = scmp.lt.s32.totalorder %s6496_s21, %s6496_s21 }
 0x1de   :  { %p5784_p3 = scmp.ne.s32.totalorder %s6496_s21, %s5783_s8  ;;  %p5789_p5 = scmp.lt.s32.totalorder %s5783_s8, %s5783_s8 }
 0x1e0   :  { %p5790_p6 = por %p5789_p5, %p5788_p4 }
 0x1e2   :  { %p5791_p7 = pnand %p5790_p6, %p5784_p3 }
 0x1e4   :  { %5794 = shalt.err (!%p5791_p7)
}
 0x1e5   :  { %s7793_s26 = sld [smem:[#allocation76_spill]]  ;;  %s6098_s28 = smov [#allocation24]  }
 0x1e6   :  { %271 = dma.hbm_to_vmem [thread:$0]  %s7792_s20, 768, %s6496_s21, [#allocation20], %s6090_s18, %s6090_s18, %s6091_s0  }
 0x1e7   :  { %s291_s1 = sshll.u32 %s6098_s28, 4  ;;  %s6099_s4 = smov [#allocation27]   ;;  %s292_s1 = int_to_ptr.vmem [resolvable:$true] %s291_s1 }
 0x1e8   :  { %s315_s29 = sshll.u32 %s6099_s4, 4  ;;  %s6517_s29 = int_to_ptr.vmem [resolvable:$true] %s315_s29 }
 0x1eb   :  { %s5795_s2 = scalar_lea.hbm %s7793_s26, 256 }
 0x1ec   :  { %p5796_p8 = scmp.ne.s32.totalorder %s7793_s26, %s5795_s2  ;;  %p5799_p9 = scmp.lt.u32.totalorder %s5795_s2, %s7793_s26 }
 0x1ee   :  { %p5801_p10 = pnand %p5799_p9, %p5796_p8 }
 0x1f0   :  { %5804 = shalt.err (!%p5801_p10)
}
 0x1f1   :  { %s5805_s5 = scalar_lea.vmem %s292_s1, 256  ;;  %p5810_p12 = scmp.lt.s32.totalorder %s292_s1, %s292_s1 }
 0x1f2   :  { %p5806_p11 = scmp.ne.s32.totalorder %s292_s1, %s5805_s5  ;;  %p5811_p13 = scmp.lt.s32.totalorder %s5805_s5, %s5805_s5 }
 0x1f4   :  { %p5812_p0 = por %p5811_p13, %p5810_p12 }
 0x1f6   :  { %p5813_p1 = pnand %p5812_p0, %p5806_p11 }
 0x1f8   :  { %5816 = shalt.err (!%p5813_p1)
}
 0x1f9   :  { %s7794_s3 = sld [smem:[#allocation77_spill]] }
 0x1fa   :  { %297 = dma.hbm_to_vmem [thread:$0]  %s7793_s26, 256, %s292_s1, [#allocation23], %s6075_s16, %s6075_s16, %s6076_s13  }
 0x1ff   :  { %s5817_s7 = scalar_lea.hbm %s7794_s3, 256 }
 0x200   :  { %p5818_p2 = scmp.ne.s32.totalorder %s7794_s3, %s5817_s7  ;;  %p5821_p3 = scmp.lt.u32.totalorder %s5817_s7, %s7794_s3 }
 0x202   :  { %p5823_p4 = pnand %p5821_p3, %p5818_p2 }
 0x204   :  { %5826 = shalt.err (!%p5823_p4)
}
 0x205   :  { %s5827_s14 = scalar_lea.vmem %s6517_s29, 256  ;;  %p5832_p6 = scmp.lt.s32.totalorder %s6517_s29, %s6517_s29 }
 0x206   :  { %p5828_p5 = scmp.ne.s32.totalorder %s6517_s29, %s5827_s14  ;;  %p5833_p7 = scmp.lt.s32.totalorder %s5827_s14, %s5827_s14 }
 0x208   :  { %p5834_p8 = por %p5833_p7, %p5832_p6 }
 0x20a   :  { %p5835_p9 = pnand %p5834_p8, %p5828_p5 }
 0x20c   :  { %5838 = shalt.err (!%p5835_p9)
}
 0x20d   :  { %s7795_s10 = sld [smem:[#allocation79_spill]]  ;;  %s6100_s19 = smov [#allocation30]  }
 0x20e   :  { %321 = dma.hbm_to_vmem [thread:$0]  %s7794_s3, 256, %s6517_s29, [#allocation26], %s6075_s16, %s6075_s16, %s6076_s13  }
 0x20f   :  { %s339_s11 = sshll.u32 %s6100_s19, 4  ;;  %s6101_s15 = smov [#allocation33]   ;;  %s340_s11 = int_to_ptr.vmem [resolvable:$true] %s339_s11 }
 0x210   :  { %s366_s24 = sshll.u32 %s6101_s15, 4  ;;  %s367_s24 = int_to_ptr.vmem [resolvable:$true] %s366_s24 }
 0x213   :  { %s5839_s27 = scalar_lea.hbm %s7795_s10, 256 }
 0x214   :  { %p5840_p10 = scmp.ne.s32.totalorder %s7795_s10, %s5839_s27  ;;  %p5843_p11 = scmp.lt.u32.totalorder %s5839_s27, %s7795_s10 }
 0x216   :  { %p5845_p12 = pnand %p5843_p11, %p5840_p10 }
 0x218   :  { %5848 = shalt.err (!%p5845_p12)
}
 0x219   :  { %s5849_s30 = scalar_lea.vmem %s340_s11, 256  ;;  %p5854_p0 = scmp.lt.s32.totalorder %s340_s11, %s340_s11 }
 0x21a   :  { %p5850_p13 = scmp.ne.s32.totalorder %s340_s11, %s5849_s30  ;;  %p5855_p1 = scmp.lt.s32.totalorder %s5849_s30, %s5849_s30 }
 0x21c   :  { %p5856_p2 = por %p5855_p1, %p5854_p0 }
 0x21e   :  { %p5857_p3 = pnand %p5856_p2, %p5850_p13 }
 0x220   :  { %5860 = shalt.err (!%p5857_p3)
}
 0x221   :  { %s7796_s21 = sld [smem:[#allocation81_spill]] }
 0x222   :  { %345 = dma.hbm_to_vmem [thread:$0]  %s7795_s10, 256, %s340_s11, [#allocation29], %s6075_s16, %s6075_s16, %s6076_s13  }
 0x227   :  { %s5861_s12 = scalar_lea.hbm %s7796_s21, 16 }
 0x228   :  { %p5862_p4 = scmp.ne.s32.totalorder %s7796_s21, %s5861_s12  ;;  %p5865_p5 = scmp.lt.u32.totalorder %s5861_s12, %s7796_s21 }
 0x22a   :  { %p5867_p6 = pnand %p5865_p5, %p5862_p4 }
 0x22c   :  { %5870 = shalt.err (!%p5867_p6)
}
 0x22d   :  { %s5871_s22 = scalar_lea.vmem %s367_s24, 16  ;;  %s5875_s20 = scalar_lea.vmem %s367_s24, 32 }
 0x22e   :  { %p5872_p7 = scmp.ne.s32.totalorder %s367_s24, %s5871_s22  ;;  %p5876_p8 = scmp.lt.s32.totalorder %s367_s24, %s367_s24 }
 0x22f   :  { %p5877_p9 = scmp.lt.s32.totalorder %s5875_s20, %s5871_s22 }
 0x231   :  { %p5878_p10 = por %p5877_p9, %p5876_p8 }
 0x233   :  { %p5879_p11 = pnand %p5878_p10, %p5872_p7 }
 0x235   :  { %5882 = shalt.err (!%p5879_p11)
}
 0x236   :  { %s7797_s23 = sld [smem:[#allocation82_spill]]  ;;  %s6102_s8 = smov [#allocation36]  }
 0x237   :  { %369 = dma.hbm_to_vmem [thread:$0]  %s7796_s21, 16, %s367_s24, [#allocation32]  }
 0x238   :  { %s387_s26 = sshll.u32 %s6102_s8, 4  ;;  %s6103_s28 = smov [#allocation39]   ;;  %s388_s26 = int_to_ptr.vmem [resolvable:$true] %s387_s26 }
 0x239   :  { %s415_s1 = sshll.u32 %s6103_s28, 4  ;;  %s6549_s1 = int_to_ptr.vmem [resolvable:$true] %s415_s1 }
 0x23c   :  { %s5883_s4 = scalar_lea.hbm %s7797_s23, 256 }
 0x23d   :  { %p5884_p12 = scmp.ne.s32.totalorder %s7797_s23, %s5883_s4  ;;  %p5887_p13 = scmp.lt.u32.totalorder %s5883_s4, %s7797_s23 }
 0x23f   :  { %p5889_p0 = pnand %p5887_p13, %p5884_p12 }
 0x241   :  { %5892 = shalt.err (!%p5889_p0)
}
 0x242   :  { %s5893_s29 = scalar_lea.vmem %s388_s26, 256  ;;  %p5898_p2 = scmp.lt.s32.totalorder %s388_s26, %s388_s26 }
 0x243   :  { %p5894_p1 = scmp.ne.s32.totalorder %s388_s26, %s5893_s29  ;;  %p5899_p3 = scmp.lt.s32.totalorder %s5893_s29, %s5893_s29 }
 0x245   :  { %p5900_p4 = por %p5899_p3, %p5898_p2 }
 0x247   :  { %p5901_p5 = pnand %p5900_p4, %p5894_p1 }
 0x249   :  { %5904 = shalt.err (!%p5901_p5)
}
 0x24a   :  { %s7798_s2 = sld [smem:[#allocation85_spill]] }
 0x24b   :  { %393 = dma.hbm_to_vmem [thread:$0]  %s7797_s23, 256, %s388_s26, [#allocation35], %s6075_s16, %s6075_s16, %s6076_s13  }
 0x250   :  { %s5905_s5 = scalar_lea.hbm %s7798_s2, 256 }
 0x251   :  { %p5906_p6 = scmp.ne.s32.totalorder %s7798_s2, %s5905_s5  ;;  %p5909_p7 = scmp.lt.u32.totalorder %s5905_s5, %s7798_s2 }
 0x253   :  { %p5911_p8 = pnand %p5909_p7, %p5906_p6 }
 0x255   :  { %5914 = shalt.err (!%p5911_p8)
}
 0x256   :  { %s5915_s3 = scalar_lea.vmem %s6549_s1, 256  ;;  %p5920_p10 = scmp.lt.s32.totalorder %s6549_s1, %s6549_s1 }
 0x257   :  { %p5916_p9 = scmp.ne.s32.totalorder %s6549_s1, %s5915_s3  ;;  %p5921_p11 = scmp.lt.s32.totalorder %s5915_s3, %s5915_s3 }
 0x259   :  { %p5922_p12 = por %p5921_p11, %p5920_p10 }
 0x25b   :  { %p5923_p13 = pnand %p5922_p12, %p5916_p9 }
 0x25d   :  { %5926 = shalt.err (!%p5923_p13)
}
 0x25e   :  { %s7799_s7 = sld [smem:[#allocation86_spill]]  ;;  %s6104_s14 = smov [#allocation42]  }
 0x25f   :  { %421 = dma.hbm_to_vmem [thread:$0]  %s7798_s2, 256, %s6549_s1, [#allocation38], %s6075_s16, %s6075_s16, %s6076_s13  }
 0x260   :  { %s439_s10 = sshll.u32 %s6104_s14, 4  ;;  %s6105_s19 = smov [#allocation45]   ;;  %s440_s10 = int_to_ptr.vmem [resolvable:$true] %s439_s10 }
 0x261   :  { %s465_s11 = sshll.u32 %s6105_s19, 4  ;;  %s6570_s11 = int_to_ptr.vmem [resolvable:$true] %s465_s11 }
 0x264   :  { %s5927_s15 = scalar_lea.hbm %s7799_s7, 256 }
 0x265   :  { %p5928_p0 = scmp.ne.s32.totalorder %s7799_s7, %s5927_s15  ;;  %p5931_p1 = scmp.lt.u32.totalorder %s5927_s15, %s7799_s7 }
 0x267   :  { %p5933_p2 = pnand %p5931_p1, %p5928_p0 }
 0x269   :  { %5936 = shalt.err (!%p5933_p2)
}
 0x26a   :  { %s5937_s24 = scalar_lea.vmem %s440_s10, 256  ;;  %p5942_p4 = scmp.lt.s32.totalorder %s440_s10, %s440_s10 }
 0x26b   :  { %p5938_p3 = scmp.ne.s32.totalorder %s440_s10, %s5937_s24  ;;  %p5943_p5 = scmp.lt.s32.totalorder %s5937_s24, %s5937_s24 }
 0x26d   :  { %p5944_p6 = por %p5943_p5, %p5942_p4 }
 0x26f   :  { %p5945_p7 = pnand %p5944_p6, %p5938_p3 }
 0x271   :  { %5948 = shalt.err (!%p5945_p7)
}
 0x272   :  { %s7800_s27 = sld [smem:[#allocation89_spill]] }
 0x273   :  { %445 = dma.hbm_to_vmem [thread:$0]  %s7799_s7, 256, %s440_s10, [#allocation41], %s6075_s16, %s6075_s16, %s6076_s13  }
 0x278   :  { %s5949_s30 = scalar_lea.hbm %s7800_s27, 256 }
 0x279   :  { %p5950_p8 = scmp.ne.s32.totalorder %s7800_s27, %s5949_s30  ;;  %p5953_p9 = scmp.lt.u32.totalorder %s5949_s30, %s7800_s27 }
 0x27b   :  { %p5955_p10 = pnand %p5953_p9, %p5950_p8 }
 0x27d   :  { %5958 = shalt.err (!%p5955_p10)
}
 0x27e   :  { %s5959_s21 = scalar_lea.vmem %s6570_s11, 256  ;;  %p5964_p12 = scmp.lt.s32.totalorder %s6570_s11, %s6570_s11 }
 0x27f   :  { %p5960_p11 = scmp.ne.s32.totalorder %s6570_s11, %s5959_s21  ;;  %p5965_p13 = scmp.lt.s32.totalorder %s5959_s21, %s5959_s21 }
 0x281   :  { %p5966_p0 = por %p5965_p13, %p5964_p12 }
 0x283   :  { %p5967_p1 = pnand %p5966_p0, %p5960_p11 }
 0x285   :  { %5970 = shalt.err (!%p5967_p1)
}
 0x286   :  { %s7801_s12 = sld [smem:[#allocation93_spill]]  ;;  %s6106_s22 = smov [#allocation48]  }
 0x287   :  { %471 = dma.hbm_to_vmem [thread:$0]  %s7800_s27, 256, %s6570_s11, [#allocation44], %s6075_s16, %s6075_s16, %s6076_s13  }
 0x288   :  { %s491_s20 = sshll.u32 %s6106_s22, 4  ;;  %s492_s20 = int_to_ptr.vmem [resolvable:$true] %s491_s20 }
 0x28c   :  { %s5971_s23 = scalar_lea.hbm %s7801_s12, 256 }
 0x28d   :  { %p5972_p2 = scmp.ne.s32.totalorder %s7801_s12, %s5971_s23  ;;  %p5975_p3 = scmp.lt.u32.totalorder %s5971_s23, %s7801_s12 }
 0x28f   :  { %p5977_p4 = pnand %p5975_p3, %p5972_p2 }
 0x291   :  { %5980 = shalt.err (!%p5977_p4)
}
 0x292   :  { %s5981_s8 = scalar_lea.vmem %s492_s20, 256  ;;  %p5986_p6 = scmp.lt.s32.totalorder %s492_s20, %s492_s20 }
 0x293   :  { %p5982_p5 = scmp.ne.s32.totalorder %s492_s20, %s5981_s8  ;;  %p5987_p7 = scmp.lt.s32.totalorder %s5981_s8, %s5981_s8 }
 0x295   :  { %p5988_p8 = por %p5987_p7, %p5986_p6 }
 0x297   :  { %p5989_p9 = pnand %p5988_p8, %p5982_p5 }
 0x299   :  { %5992 = shalt.err (!%p5989_p9)
}
 0x29a   :  { %497 = dma.hbm_to_vmem [thread:$0]  %s7801_s12, 256, %s492_s20, [#allocation47], %s6075_s16, %s6075_s16, %s6076_s13  }
 0x29b   :  { %5993 = dma.done.wait [#allocation3], 192  }
 0x29c   :  { %5994 = vsyncadd [#allocation3], 4294967104 }
 0x29d   :  { %5995 = dma.done.wait [#allocation5], 272  }
 0x29e   :  { %5996 = vsyncadd [#allocation5], 4294967024 }
 0x29f   :  { %5997 = dma.done.wait [#allocation8], 512  }
 0x2a0   :  { %5998 = vsyncadd [#allocation8], 4294966784 }
 0x2a1   :  { %5999 = dma.done.wait [#allocation11], 272  }
 0x2a2   :  { %6000 = vsyncadd [#allocation11], 4294967024 }
 0x2a3   :  { %6001 = dma.done.wait [#allocation14], 512  }
 0x2a4   :  { %6002 = vsyncadd [#allocation14], 4294966784 }
 0x2a5   :  { %6003 = dma.done.wait [#allocation17], 272  }
 0x2a6   :  { %6004 = vsyncadd [#allocation17], 4294967024 }
 0x2a7   :  { %6005 = dma.done.wait [#allocation20], 1024  }
 0x2a8   :  { %6006 = vsyncadd [#allocation20], 4294966272 }
 0x2a9   :  { %6007 = dma.done.wait [#allocation23], 512  }
 0x2aa   :  { %6008 = vsyncadd [#allocation23], 4294966784 }
 0x2ab   :  { %6009 = dma.done.wait [#allocation26], 512  }
 0x2ac   :  { %6010 = vsyncadd [#allocation26], 4294966784 }
 0x2ad   :  { %6011 = dma.done.wait [#allocation29], 272  }
 0x2ae   :  { %6012 = vsyncadd [#allocation29], 4294967024 }
 0x2af   :  { %6013 = dma.done.wait [#allocation32], 272  }
 0x2b0   :  { %6014 = vsyncadd [#allocation32], 4294967024 }
 0x2b1   :  { %6015 = dma.done.wait [#allocation35], 512  }
 0x2b2   :  { %6016 = vsyncadd [#allocation35], 4294966784 }
 0x2b3   :  { %6017 = dma.done.wait [#allocation38], 512  }
 0x2b4   :  { %6018 = vsyncadd [#allocation38], 4294966784 }
 0x2b5   :  { %6019 = dma.done.wait [#allocation41], 512  }
 0x2b6   :  { %6020 = vsyncadd [#allocation41], 4294966784 }
 0x2b7   :  { %6021 = dma.done.wait [#allocation44], 272  }
 0x2b8   :  { %6022 = vsyncadd [#allocation44], 4294967024 }
 0x2b9   :  { %6023 = dma.done.wait [#allocation47], 272  }
 0x2ba   :  { %6024 = vsyncadd [#allocation47], 4294967024  ;;  %s7802_s16 = sld [smem:[#allocation65_spill]]  ;;  %v600_v0 = vlaneseq  ;;  %v5111_v29 = vld [vmem:[#allocation2] sm:$0xff]   ;;  %vm917_vm10 = vcmask 1041408   ;;  %vm869_vm13 = vcmask 31744  }
 0x2bb   :  { %4766 = vmatprep.subr.bf16.mxu1 %v5111_v29  ;;  %v5112_v51 = vld [vmem:[#allocation2 + $0x8] ss:$0 sps:$4 sm:$0x33]   ;;  %vm874_vm14 = vcmask 64512   ;;  %vm879_vm15 = vcmask 97280   ;;  %s7803_s26 = sld [smem:[#allocation69_spill]] }
 0x2bc   :  { %v6598_v1 = vshrl.u32 %v600_v0, 7  ;;  %4767 = vmatpush3.bf16.msra.mxu1 %v5111_v29  ;;  %s6110_s28 = smov 32   ;;  %s6111_s1 = smov 96  }
 0x2bd   :  { %4870 = vmatprep.subr.msk.bf16.mxu1 %vm917_vm10, %v5112_v51  ;;  %s7805_s4 = sld [smem:[#allocation72_spill]]  ;;  %s7807_s29 = sld [smem:[#allocation75_spill]] }
 0x2be   :  { %v609_v2 = vand.u32 15, %v6598_v1  ;;  %v604_v3 = vadd.s32 24, %v6598_v1  ;;  %v6603_v4 = vadd.s32 16, %v6598_v1  ;;  %v6606_v5 = vadd.s32 8, %v6598_v1  ;;  %s7808_s2 = sld [smem:[#allocation78_spill]]  ;;  %s7809_s5 = sld [smem:[#allocation80_spill]] }
 0x2bf   :  { %vm698_vm0 = vcmp.lt.s32.totalorder %v6598_v1, 1  ;;  %vm735_vm1 = vcmp.lt.s32.totalorder %v6598_v1, 7  ;;  %vm772_vm2 = vcmp.lt.s32.totalorder %v6598_v1, 6  ;;  %vm661_vm3 = vcmp.lt.s32.totalorder %v6598_v1, 2  ;;  %s7810_s3 = sld [smem:[#allocation83_spill]]  ;;  %s7812_s7 = sld [smem:[#allocation87_spill]] }
 0x2c0   :  { %v6611_v6 = vadd.s32 4294967295, %v609_v2  ;;  %v6616_v7 = vld [vmem:[%s7802_s16] sm:$0xff]  ;;  %v6619_v8 = vld [vmem:[%s7802_s16 + $0x8] sm:$0xff]  ;;  %v6622_v9 = vld [vmem:[%s7802_s16 + $0x10] sm:$0xff]  ;;  %v630_v10 = vand.u32 15, %v604_v3  ;;  %v623_v11 = vand.u32 15, %v6603_v4 }
 0x2c1   :  { %v616_v12 = vand.u32 15, %v6606_v5  ;;  %v658_v13 = vrot.slane %v6619_v8, 6  ;;  %v4961_v14 = vpack.i.bf16 %v6619_v8, %v6616_v7  ;;  %v657_v15 = vrot.slane %v6616_v7, 6  ;;  %v6631_v16 = vld [vmem:[%s7802_s16 + $0x18] sm:$0xff]  ;;  %s7821_s14 = sld [smem:[#allocation90_spill]]  ;;  %s7822_s10 = sld [smem:[#allocation88_spill]] }
 0x2c2   :  { %v659_v17 = vrot.slane %v6622_v9, 6  ;;  %v660_v18 = vrot.slane %v6631_v16, 6  ;;  %v4966_v19 = vpack.i.bf16 %v6631_v16, %v6622_v9  ;;  %v694_v20 = vrot.slane %v6616_v7, 7  ;;  %s7823_s19 = sld [smem:[#allocation94_spill]]  ;;  %s7824_s11 = sld [smem:[#allocation92_spill]] }
 0x2c3   :  { %v695_v21 = vrot.slane %v6619_v8, 7  ;;  %4962 = vrot.lane.b32.xlu1 %v4961_v14, %s6076_s13  ;;  %v697_v22 = vrot.slane %v6631_v16, 7  ;;  %vm707_vm4 = vcmp.ge.s32.totalorder %v6611_v6, 0  ;;  %v731_v23 = vrot.slane %v6616_v7, 1 }
 0x2c4   :  { %v733_v24 = vrot.slane %v6622_v9, 1  ;;  %v734_v26 = vrot.slane %v6631_v16, 1  ;;  %v6648_v27 = vadd.s32 1, %v630_v10  ;;  %v696_v28 = vrot.slane %v6622_v9, 7 }
 0x2c5   :  { %v701_v25 = vsel %vm698_vm0, %v694_v20, %v695_v21  ;;  %v702_v30 = vsel %vm698_vm0, %v697_v22, %v694_v20  ;;  %v6655_v31 = vadd.s32 4294967295, %v623_v11  ;;  %v768_v32 = vrot.slane %v6616_v7, 2 }
 0x2c6   :  { %v770_v33 = vrot.slane %v6622_v9, 2  ;;  %v727_v34 = vsel %vm707_vm4, %v702_v30, 0.0  ;;  %v736_v35 = vsel %vm735_vm1, %v733_v24, %v734_v26  ;;  %v739_v36 = vsel %vm735_vm1, %v734_v26, %v731_v23 }
 0x2c7   :  { %vm751_vm5 = vcmp.lt.s32.totalorder %v6648_v27, 16  ;;  %4967 = vrot.lane.b32.xlu1 %v4966_v19, %s6076_s13  ;;  %v4971_v37 = vpack.i.bf16 %v701_v25, %v727_v34  ;;  %v699_v39 = vsel %vm698_vm0, %v696_v28, %v697_v22  ;;  %v700_v40 = vsel %vm698_vm0, %v695_v21, %v696_v28  ;;  %s6107_s13 = smov 12  }
 0x2c8   :  { %v767_v38 = vsel %vm751_vm5, %v739_v36, 0.0  ;;  %vm709_vm6 = vcmp.ge.s32.totalorder %v6655_v31, 0  ;;  %v771_v42 = vrot.slane %v6631_v16, 2  ;;  %v6675_v43 = vadd.s32 2, %v630_v10 }
 0x2c9   :  { %v4986_v41 = vpack.i.bf16 %v767_v38, %v736_v35  ;;  %4972 = vrot.lane.b32.xlu0 %v4971_v37, %s6091_s0  ;;  %v729_v44 = vsel %vm709_vm6, %v700_v40, 0.0  ;;  %v732_v45 = vrot.slane %v6619_v8, 1  ;;  %v6681_v46 = vadd.s32 1, %v616_v12 }
 0x2ca   :  { %v769_v47 = vrot.slane %v6619_v8, 2  ;;  %v4976_v48 = vpack.i.bf16 %v699_v39, %v729_v44  ;;  %v773_v49 = vsel %vm772_vm2, %v770_v33, %v771_v42  ;;  %v776_v50 = vsel %vm772_vm2, %v771_v42, %v768_v32 }
 0x2cb   :  { %vm788_vm7 = vcmp.lt.s32.totalorder %v6675_v43, 16  ;;  %4987 = vrot.lane.b32.xlu1 %v4986_v41, %s6107_s13  ;;  %v737_v53 = vsel %vm735_vm1, %v732_v45, %v733_v24  ;;  %v738_v54 = vsel %vm735_vm1, %v731_v23, %v732_v45  ;;  %vm749_vm8 = vcmp.lt.s32.totalorder %v6681_v46, 16 }
 0x2cc   :  { %v804_v52 = vsel %vm788_vm7, %v776_v50, 0.0  ;;  %v765_v56 = vsel %vm749_vm8, %v737_v53, 0.0  ;;  %v774_v58 = vsel %vm772_vm2, %v769_v47, %v770_v33  ;;  %v6701_v59 = vadd.s32 2, %v616_v12 }
 0x2cd   :  { %v4996_v55 = vpack.i.bf16 %v804_v52, %v773_v49  ;;  %4977 = vrot.lane.b32.xlu0 %v4976_v48, %s6091_s0  ;;  %v4981_v57 = vpack.i.bf16 %v765_v56, %v738_v54  ;;  %v664_v60 = vsel %vm661_vm3, %v657_v15, %v658_v13  ;;  %v775_v61 = vsel %vm772_vm2, %v768_v32, %v769_v47  ;;  %s6108_s0 = smov 16   ;;  %v4472_v56 = vld [vmem:[#allocation4] ss:$0 sm:$0xff] }
 0x2ce   :  { %v665_v62 = vsel %vm661_vm3, %v660_v18, %v657_v15  ;;  %v662_v63 = vsel %vm661_vm3, %v659_v17, %v660_v18  ;;  %v663_v0 = vsel %vm661_vm3, %v658_v13, %v659_v17  ;;  %vm786_vm9 = vcmp.lt.s32.totalorder %v6701_v59, 16 }
 0x2cf   :  { %4997 = vrot.lane.b32.xlu1 %v4996_v55, %s6108_s0  ;;  %v802_v3 = vsel %vm786_vm9, %v774_v58, 0.0  ;;  %v919_v5 = vsel %vm917_vm10, %v5112_v51, 0  ;;  %v6722_v8 = vadd.s32 4294967294, %v623_v11  ;;  %v6726_v12 = vadd.s32 4294967294, %v609_v2 }
 0x2d0   :  { %v4991_v7 = vpack.i.bf16 %v802_v3, %v775_v61  ;;  %4769 = vmatpush3.bf16.msra.mxu1 %v919_v5  ;;  %vm884_vm10 = vcmask 130048  }
 0x2d1   :  { %4982 = vrot.lane.b32.xlu0 %v4981_v57, %s6107_s13  ;;  %vm7754_vm11 = vcmp.ge.s32.totalorder %v6722_v8, 0  ;;  %vm670_vm12 = vcmp.ge.s32.totalorder %v6726_v12, 0 }
 0x2d2   :  { %v692_v15 = vsel %vm7754_vm11, %v663_v0, 0.0  ;;  %v690_v22 = vsel %vm670_vm12, %v665_v62, 0.0  ;;  %vm974_vm11 = vcmask 261120  }
 0x2d5   :  { %4992 = vrot.lane.b32.xlu0 %v4991_v7, %s6108_s0 }
 0x335   :  { %v4963_v9 = vpop.permute.xlu1 %4962 }
 0x336   :  { %v4965_v29 = vunpack.i.h.bf16 %v4963_v9  ;;  %v4964_v30 = vunpack.i.l.bf16 %v4963_v9 }
 0x339   :  { %v4968_v10 = vpop.permute.xlu1 %4967 }
 0x33a   :  { %v4970_v16 = vunpack.i.h.bf16 %v4968_v10  ;;  %v4969_v17 = vunpack.i.l.bf16 %v4968_v10 }
 0x33b   :  { %v4973_v13 = vpop.permute.xlu0 %4972 }
 0x33c   :  { %v4975_v4 = vunpack.i.h.bf16 %v4973_v13  ;;  %v4974_v11 = vunpack.i.l.bf16 %v4973_v13 }
 0x33d   :  { %v4988_v14 = vpop.permute.xlu1 %4987 }
 0x33e   :  { %v4990_v19 = vunpack.i.h.bf16 %v4988_v14  ;;  %v4989_v20 = vunpack.i.l.bf16 %v4988_v14  ;;  %v870_v35 = vsel %vm869_vm13, %v690_v22, %v4974_v11  ;;  %v871_v36 = vsel %vm869_vm13, %v664_v60, %v4975_v4 }
 0x33f   :  { %v4978_v18 = vpop.permute.xlu0 %4977  ;;  %v875_v49 = vsel %vm874_vm14, %v870_v35, %v4964_v30  ;;  %v876_v50 = vsel %vm874_vm14, %v871_v36, %v4965_v29 }
 0x340   :  { %v4980_v21 = vunpack.i.h.bf16 %v4978_v18  ;;  %v4979_v2 = vunpack.i.l.bf16 %v4978_v18 }
 0x341   :  { %v4998_v23 = vpop.permute.xlu1 %4997 }
 0x342   :  { %v873_v24 = vsel %vm869_vm13, %v662_v63, %v4980_v21  ;;  %v872_v25 = vsel %vm869_vm13, %v692_v15, %v4979_v2  ;;  %v5000_v26 = vunpack.i.h.bf16 %v4998_v23  ;;  %v4999_v28 = vunpack.i.l.bf16 %v4998_v23 }
 0x343   :  { %v878_v32 = vsel %vm874_vm14, %v873_v24, %v4970_v16  ;;  %v877_v33 = vsel %vm874_vm14, %v872_v25, %v4969_v17  ;;  %v4983_v34 = vpop.permute.xlu0 %4982  ;;  %vm910_vm13 = vcmask 162816   ;;  %vm1292_vm14 = vcmask 523264  }
 0x344   :  { %v882_v37 = vsel %vm879_vm15, %v877_v33, %v4989_v20  ;;  %v883_v38 = vsel %vm879_vm15, %v878_v32, %v4990_v19  ;;  %v4985_v39 = vunpack.i.h.bf16 %v4983_v34  ;;  %v4984_v40 = vunpack.i.l.bf16 %v4983_v34 }
 0x345   :  { %v887_v41 = vsel %vm884_vm10, %v882_v37, %v4999_v28  ;;  %v888_v42 = vsel %vm884_vm10, %v883_v38, %v5000_v26 }
 0x346   :  { %v890_v44 = vpack.c.bf16 %v888_v42, %v887_v41  ;;  %v880_v51 = vsel %vm879_vm15, %v875_v49, %v4984_v40  ;;  %v881_v52 = vsel %vm879_vm15, %v876_v50, %v4985_v39  ;;  %v5115_v49 = vld [vmem:[%s7803_s26 + $0x10] sm:$0xff]   ;;  %v5116_v50 = vld [vmem:[%s7803_s26 + $0x18] sm:$0xff]   ;;  %vm1297_vm15 = vcmask 785408  }
 0x347   :  { %v4993_v45 = vpop.permute.xlu0 %4992 }
 0x348   :  { %v4995_v47 = vunpack.i.h.bf16 %v4993_v45  ;;  %v4994_v48 = vunpack.i.l.bf16 %v4993_v45  ;;  %v5113_v45 = vld [vmem:[%s7803_s26] sm:$0xff]  }
 0x34a   :  { %v885_v53 = vsel %vm884_vm10, %v880_v51, %v4994_v48  ;;  %v886_v54 = vsel %vm884_vm10, %v881_v52, %v4995_v47  ;;  %v6109_v47 = vmov 0   ;;  %v5114_v48 = vld [vmem:[%s7803_s26 + $0x8] sm:$0xff]   ;;  %v5117_v51 = vld [vmem:[%s7803_s26 + $0x20] sm:$0xff]   ;;  %vm7804_vm10 = vcmp.ge.s32.totalorder %v6722_v8, 0 }
 0x34b   :  { %v889_v55 = vpack.c.bf16 %v886_v54, %v885_v53  ;;  %1399 = vmatprep.subr.bf16.mxu1 %v6109_v47  ;;  %1741 = vmatprep.subr.bf16.mxu0 %v6109_v47 }
 0x34d   :  { %4770 = vmatprep.mubr.msk.bf16.mxu1 %vm910_vm13, %v889_v55 }
 0x34e   :  { %4771 = vmatmul.mubr.msk.bf16.vlgmr.msra.gmra.mrb[0].mxu1 %vm910_vm13, %v890_v44 }
 0x34f   :  { %1400 = vmatpush1.bf16.msra.mxu1 %v5113_v45 }
 0x350   :  { %1401 = vmatprep.subr.bf16.mxu1 %v6109_v47 }
 0x353   :  { %1402 = vmatpush1.bf16.msra.mxu1 %v5114_v48  ;;  %v5121_v48 = vld [vmem:[%s7803_s26 + $0x40] sm:$0xff]  }
 0x354   :  { %1403 = vmatprep.subr.bf16.mxu1 %v6109_v47 }
 0x357   :  { %1404 = vmatpush1.bf16.msra.mxu1 %v5115_v49 }
 0x358   :  { %1405 = vmatprep.subr.bf16.mxu1 %v6109_v47 }
 0x35b   :  { %1406 = vmatpush1.bf16.msra.mxu1 %v5116_v50 }
 0x35c   :  { %1407 = vmatprep.subr.bf16.mxu1 %v6109_v47 }
 0x35f   :  { %1408 = vmatpush1.bf16.msra.mxu1 %v5117_v51 }
 0x360   :  { %1409 = vmatprep.subr.bf16.mxu1 %v6109_v47 }
 0x421   :  { %v4772_v57 = vpop.f32.mrb[0].mxu1 }
 0x422   :  { %v955_v58 = vpop.f32.mrb[1].mxu1  ;;  %v6752_v63 = vadd.f32 %v4772_v57, %v4472_v56 }
 0x423   :  { %v6750_v60 = vadd.f32 %v4472_v56, %v955_v58  ;;  %v4773_v61 = vpop.f32.mrb[2].mxu1 }
 0x424   :  { %v958_v62 = vpop.f32.mrb[3].mxu1  ;;  %v6760_v7 = vadd.f32 %v4773_v61, %v4472_v56  ;;  %v981_v9 = vsel %vm974_vm11, %v6752_v63, 0.0 }
 0x425   :  { %v6754_v0 = vadd.f32 %v4472_v56, %v958_v62  ;;  %v975_v3 = vsel %vm974_vm11, %v6750_v60, 0.0 }
 0x426   :  { %976 = vadd.xlane.f32.xlu0 %v975_v3  ;;  %v984_v10 = vsel %vm974_vm11, %v6760_v7, 0.0 }
 0x427   :  { %v978_v5 = vsel %vm974_vm11, %v6754_v0, 0.0 }
 0x428   :  { %979 = vadd.xlane.f32.xlu1 %v978_v5 }
 0x42a   :  { %982 = vadd.xlane.f32.xlu0 %v981_v9 }
 0x42e   :  { %985 = vadd.xlane.f32.xlu0 %v984_v10 }
 0x4b3   :  { %v977_v13 = vpop.xlane.xlu0 %976 }
 0x4b5   :  { %v980_v14 = vpop.xlane.xlu1 %979 }
 0x4b6   :  { %v987_v15 = vadd.f32 %v980_v14, %v977_v13 }
 0x4b7   :  { %v983_v16 = vpop.xlane.xlu0 %982 }
 0x4b8   :  { %v988_v17 = vrot.slane %v987_v15, 4 }
 0x4ba   :  { %v989_v4 = vadd.f32 %v988_v17, %v987_v15 }
 0x4bb   :  { %v986_v11 = vpop.xlane.xlu0 %985 }
 0x4bc   :  { %v990_v18 = vrot.slane %v989_v4, 2  ;;  %v994_v19 = vadd.f32 %v986_v11, %v983_v16 }
 0x4be   :  { %v991_v20 = vadd.f32 %v990_v18, %v989_v4  ;;  %v995_v21 = vrot.slane %v994_v19, 4 }
 0x4c0   :  { %v992_v2 = vrot.slane %v991_v20, 1  ;;  %v996_v22 = vadd.f32 %v995_v21, %v994_v19 }
 0x4c2   :  { %v997_v23 = vrot.slane %v996_v22, 2  ;;  %v993_v24 = vadd.f32 %v992_v2, %v991_v20  ;;  %v5118_v20 = vld [vmem:[%s7803_s26 + $0x28] sm:$0xff]  }
 0x4c3   :  { %v970_v2 = vld [vmem:[#allocation6] sm:$0xff]  ;;  %1410 = vmatpush1.bf16.msra.mxu1 %v5118_v20 }
 0x4c4   :  { %v998_v25 = vadd.f32 %v997_v23, %v996_v22  ;;  %v1002_v26 = vmul.f32 0.001953125, %v993_v24  ;;  %v971_v22 = vld [vmem:[#allocation6 + $0x8] sm:$0xff]  ;;  %1411 = vmatprep.subr.bf16.mxu1 %v6109_v47 }
 0x4c5   :  { %v5119_v23 = vld [vmem:[%s7803_s26 + $0x30] sm:$0xff]  }
 0x4c6   :  { %v999_v28 = vrot.slane %v998_v25, 1  ;;  %v6767_v29 = vsub.f32 %v6754_v0, %v1002_v26  ;;  %v6770_v30 = vsub.f32 %v6750_v60, %v1002_v26  ;;  %v972_v26 = vld [vmem:[#allocation7] sm:$0xff] }
 0x4c7   :  { %1412 = vmatpush1.bf16.msra.mxu1 %v5119_v23 }
 0x4c8   :  { %v1009_v32 = vmul.f32 %v6767_v29, %v6767_v29  ;;  %v1008_v33 = vmul.f32 %v6770_v30, %v6770_v30  ;;  %v1000_v34 = vadd.f32 %v999_v28, %v998_v25  ;;  %v973_v28 = vld [vmem:[#allocation7 + $0x8] sm:$0xff]  ;;  %1413 = vmatprep.subr.bf16.mxu1 %v6109_v47 }
 0x4ca   :  { %v1015_v35 = vsel %vm974_vm11, %v1009_v32, 0.0  ;;  %v1012_v36 = vsel %vm974_vm11, %v1008_v33, 0.0  ;;  %v1003_v37 = vmul.f32 0.001953125, %v1000_v34  ;;  %v5120_v34 = vld [vmem:[%s7803_s26 + $0x38] sm:$0xff]  }
 0x4cb   :  { %1016 = vadd.xlane.f32.xlu0 %v1015_v35  ;;  %1013 = vadd.xlane.f32.xlu1 %v1012_v36 }
 0x4cc   :  { %v6779_v38 = vsub.f32 %v6760_v7, %v1003_v37  ;;  %v6782_v39 = vsub.f32 %v6752_v63, %v1003_v37  ;;  %1414 = vmatpush1.bf16.msra.mxu1 %v5120_v34 }
 0x4cd   :  { %1415 = vmatprep.subr.bf16.mxu1 %v6109_v47 }
 0x4ce   :  { %v1011_v40 = vmul.f32 %v6779_v38, %v6779_v38  ;;  %v1010_v41 = vmul.f32 %v6782_v39, %v6782_v39 }
 0x4d0   :  { %v1021_v42 = vsel %vm974_vm11, %v1011_v40, 0.0  ;;  %v1018_v44 = vsel %vm974_vm11, %v1010_v41, 0.0  ;;  %1416 = vmatpush1.bf16.msra.mxu1 %v5121_v48 }
 0x4d1   :  { %1022 = vadd.xlane.f32.xlu0 %v1021_v42  ;;  %1019 = vadd.xlane.f32.xlu1 %v1018_v44 }
 0x4d2   :  { %1417 = vmatprep.subr.bf16.mxu1 %v6109_v47 }
 0x558   :  { %v1014_v52 = vpop.xlane.xlu1 %1013  ;;  %v1017_v53 = vpop.xlane.xlu0 %1016 }
 0x559   :  { %v1024_v54 = vadd.f32 %v1017_v53, %v1014_v52 }
 0x55b   :  { %v1025_v55 = vrot.slane %v1024_v54, 4 }
 0x55d   :  { %v1026_v56 = vadd.f32 %v1025_v55, %v1024_v54 }
 0x55e   :  { %v1020_v57 = vpop.xlane.xlu1 %1019  ;;  %v1023_v58 = vpop.xlane.xlu0 %1022 }
 0x55f   :  { %v1027_v61 = vrot.slane %v1026_v56, 2  ;;  %v1031_v62 = vadd.f32 %v1023_v58, %v1020_v57 }
 0x561   :  { %v1028_v3 = vadd.f32 %v1027_v61, %v1026_v56  ;;  %v1032_v5 = vrot.slane %v1031_v62, 4  ;;  %v5122_v61 = vld [vmem:[%s7803_s26 + $0x48] sm:$0xff]  }
 0x562   :  { %1418 = vmatpush1.bf16.msra.mxu1 %v5122_v61 }
 0x563   :  { %v1029_v9 = vrot.slane %v1028_v3, 1  ;;  %v1033_v10 = vadd.f32 %v1032_v5, %v1031_v62 }
 0x565   :  { %v1030_v13 = vadd.f32 %v1029_v9, %v1028_v3  ;;  %v1034_v14 = vrot.slane %v1033_v10, 2 }
 0x567   :  { %v1038_v15 = vmul.f32 0.001953125, %v1030_v13  ;;  %v1035_v16 = vadd.f32 %v1034_v14, %v1033_v10 }
 0x569   :  { %v1040_v17 = vadd.f32 1e-05, %v1038_v15  ;;  %v1036_v4 = vrot.slane %v1035_v16, 1 }
 0x56b   :  { %5263 = vrsqrt.f32 %v1040_v17  ;;  %v1037_v11 = vadd.f32 %v1036_v4, %v1035_v16 }
 0x56d   :  { %v1039_v18 = vmul.f32 0.001953125, %v1037_v11 }
 0x56f   :  { %v1041_v19 = vadd.f32 1e-05, %v1039_v18 }
 0x571   :  { %5265 = vrsqrt.f32 %v1041_v19 }
 0x575   :  { %v5264_v21 = vpop.eup %5263 }
 0x576   :  { %v1044_v24 = vmul.f32 %v5264_v21, %v6770_v30  ;;  %v1045_v25 = vmul.f32 %v5264_v21, %v6767_v29 }
 0x578   :  { %v1048_v32 = vmul.f32 %v1044_v24, %v970_v2  ;;  %v1049_v33 = vmul.f32 %v1045_v25, %v971_v22 }
 0x57a   :  { %v1052_v35 = vadd.f32 %v1048_v32, %v972_v26  ;;  %v1053_v36 = vadd.f32 %v1049_v33, %v973_v28 }
 0x57b   :  { %v5266_v37 = vpop.eup %5265 }
 0x57c   :  { %v6809_v40 = vmax.f32 %v1052_v35, 0.0  ;;  %v1057_v41 = vmax.f32 %v1053_v36, 0.0  ;;  %v1046_v30 = vmul.f32 %v5266_v37, %v6782_v39  ;;  %v1047_v29 = vmul.f32 %v5266_v37, %v6779_v38 }
 0x57e   :  { %v5001_v42 = vpack.i.bf16 %v1057_v41, %v6809_v40  ;;  %v1050_v44 = vmul.f32 %v1046_v30, %v970_v2  ;;  %v1051_v45 = vmul.f32 %v1047_v29, %v971_v22  ;;  %v1192_v51 = vrot.slane %v6809_v40, 6 }
 0x57f   :  { %v1204_v52 = vrot.slane %v6809_v40, 7  ;;  %v1205_v39 = vrot.slane %v1057_v41, 7  ;;  %v1193_v53 = vrot.slane %v1057_v41, 6  ;;  %v1228_v55 = vrot.slane %v6809_v40, 2 }
 0x580   :  { %5002 = vrot.lane.b32.xlu0 %v5001_v42, %s6090_s18  ;;  %v1054_v49 = vadd.f32 %v1050_v44, %v972_v26  ;;  %v1055_v50 = vadd.f32 %v1051_v45, %v973_v28  ;;  %v1229_v56 = vrot.slane %v1057_v41, 2  ;;  %v1217_v57 = vrot.slane %v1057_v41, 1 }
 0x581   :  { %v1198_v58 = vsel %vm661_vm3, %v1192_v51, %v1193_v53  ;;  %v1210_v10 = vsel %vm698_vm0, %v1204_v52, %v1205_v39  ;;  %v1216_v13 = vrot.slane %v6809_v40, 1 }
 0x582   :  { %v1058_v38 = vmax.f32 %v1054_v49, 0.0  ;;  %v1059_v54 = vmax.f32 %v1055_v50, 0.0  ;;  %v1234_v19 = vsel %vm772_vm2, %v1228_v55, %v1229_v56 }
 0x583   :  { %v1222_v32 = vsel %vm735_vm1, %v1216_v13, %v1217_v57 }
 0x584   :  { %v5006_v62 = vpack.i.bf16 %v1059_v54, %v1058_v38  ;;  %v1207_v3 = vrot.slane %v1059_v54, 7  ;;  %v1230_v5 = vrot.slane %v1058_v38, 2  ;;  %v1218_v9 = vrot.slane %v1058_v38, 1 }
 0x585   :  { %v1206_v14 = vrot.slane %v1058_v38, 7  ;;  %v1195_v15 = vrot.slane %v1059_v54, 6  ;;  %v1194_v11 = vrot.slane %v1058_v38, 6  ;;  %v1231_v21 = vrot.slane %v1059_v54, 2 }
 0x586   :  { %5007 = vrot.lane.b32.xlu0 %v5006_v62, %s6090_s18  ;;  %v1211_v16 = vsel %vm698_vm0, %v1207_v3, %v1204_v52  ;;  %v1233_v17 = vsel %vm772_vm2, %v1229_v56, %v1230_v5  ;;  %v1221_v4 = vsel %vm735_vm1, %v1217_v57, %v1218_v9  ;;  %v1219_v26 = vrot.slane %v1059_v54, 1 }
 0x587   :  { %v1212_v18 = vsel %vm707_vm4, %v1211_v16, 0.0  ;;  %v1237_v20 = vsel %vm786_vm9, %v1233_v17, 0.0  ;;  %v1225_v23 = vsel %vm749_vm8, %v1221_v4, 0.0  ;;  %v1199_v24 = vsel %vm661_vm3, %v1195_v15, %v1192_v51 }
 0x588   :  { %v5011_v2 = vpack.i.bf16 %v1210_v10, %v1212_v18  ;;  %v1303_v22 = vpack.c.bf16 %v1237_v20, %v1234_v19  ;;  %v1209_v25 = vsel %vm698_vm0, %v1205_v39, %v1206_v14  ;;  %v1196_v28 = vsel %vm661_vm3, %v1194_v11, %v1195_v15 }
 0x589   :  { %v1197_v33 = vsel %vm661_vm3, %v1193_v53, %v1194_v11  ;;  %v1232_v34 = vsel %vm772_vm2, %v1230_v5, %v1231_v21  ;;  %v1235_v35 = vsel %vm772_vm2, %v1231_v21, %v1228_v55  ;;  %v5016_v36 = vpack.i.bf16 %v1225_v23, %v1222_v32 }
 0x58a   :  { %5012 = vrot.lane.b32.xlu1 %v5011_v2, %s6110_s28  ;;  %4488 = vmatprep.mubr.msk.bf16.mxu1 %vm974_vm11, %v1303_v22  ;;  %v1239_v37 = vsel %vm788_vm7, %v1235_v35, 0.0  ;;  %v1208_v40 = vsel %vm698_vm0, %v1206_v14, %v1207_v3  ;;  %v1214_v41 = vsel %vm709_vm6, %v1209_v25, 0.0  ;;  %v1223_v29 = vsel %vm735_vm1, %v1219_v26, %v1216_v13 }
 0x58b   :  { %v1305_v30 = vpack.c.bf16 %v1239_v37, %v1232_v34  ;;  %v5021_v42 = vpack.i.bf16 %v1208_v40, %v1214_v41  ;;  %v1220_v44 = vsel %vm735_vm1, %v1218_v9, %v1219_v26  ;;  %v1227_v45 = vsel %vm751_vm5, %v1223_v29, 0.0  ;;  %v4477_v26 = vld [vmem:[#allocation12] ss:$0 sm:$0xff] }
 0x58c   :  { %v5026_v48 = vpack.i.bf16 %v1227_v45, %v1220_v44  ;;  %v1200_v39 = vsel %vm670_vm12, %v1199_v24, 0.0  ;;  %v1202_v16 = vsel %vm7804_vm10, %v1197_v33, 0.0 }
 0x58e   :  { %5017 = vrot.lane.b32.xlu1 %v5016_v36, %s6111_s1 }
 0x592   :  { %5022 = vrot.lane.b32.xlu1 %v5021_v42, %s6110_s28 }
 0x596   :  { %5027 = vrot.lane.b32.xlu1 %v5026_v48, %s6111_s1 }
 0x5f2   :  { %v5003_v50 = vpop.permute.xlu0 %5002 }
 0x5f3   :  { %v5005_v54 = vunpack.i.h.bf16 %v5003_v50  ;;  %v5004_v55 = vunpack.i.l.bf16 %v5003_v50 }
 0x5fc   :  { %v5013_v49 = vpop.permute.xlu1 %5012 }
 0x5fd   :  { %v5015_v51 = vunpack.i.h.bf16 %v5013_v49  ;;  %v5014_v52 = vunpack.i.l.bf16 %v5013_v49 }
 0x5ff   :  { %v1289_v53 = vsel %vm974_vm11, %v1198_v58, %v5015_v51  ;;  %v1288_v38 = vsel %vm974_vm11, %v1200_v39, %v5014_v52  ;;  %v5008_v58 = vpop.permute.xlu0 %5007 }
 0x600   :  { %v5018_v56 = vpop.permute.xlu1 %5017  ;;  %v1293_v62 = vsel %vm1292_vm14, %v1288_v38, %v5004_v55  ;;  %v1294_v3 = vsel %vm1292_vm14, %v1289_v53, %v5005_v54  ;;  %v5010_v11 = vunpack.i.h.bf16 %v5008_v58  ;;  %v5009_v18 = vunpack.i.l.bf16 %v5008_v58 }
 0x601   :  { %v5020_v57 = vunpack.i.h.bf16 %v5018_v56  ;;  %v5019_v61 = vunpack.i.l.bf16 %v5018_v56 }
 0x603   :  { %v1298_v5 = vsel %vm1297_vm15, %v1293_v62, %v5019_v61  ;;  %v1299_v9 = vsel %vm1297_vm15, %v1294_v3, %v5020_v57 }
 0x604   :  { %v5023_v10 = vpop.permute.xlu1 %5022  ;;  %v1302_v13 = vpack.c.bf16 %v1299_v9, %v1298_v5 }
 0x605   :  { %v5025_v14 = vunpack.i.h.bf16 %v5023_v10  ;;  %v5024_v15 = vunpack.i.l.bf16 %v5023_v10 }
 0x606   :  { %1432 = vmatmul.mubr.bf16.vlgmr.msra.gmra.mrb[4].mxu1 %v1302_v13 }
 0x607   :  { %v1290_v17 = vsel %vm974_vm11, %v1202_v16, %v5024_v15  ;;  %v1291_v4 = vsel %vm974_vm11, %v1196_v28, %v5025_v14  ;;  %4489 = vmatprep.mubr.msk.bf16.mxu1 %vm974_vm11, %v1305_v30 }
 0x608   :  { %v5028_v19 = vpop.permute.xlu1 %5027  ;;  %v1295_v2 = vsel %vm1292_vm14, %v1290_v17, %v5009_v18  ;;  %v1296_v22 = vsel %vm1292_vm14, %v1291_v4, %v5010_v11 }
 0x609   :  { %v5030_v20 = vunpack.i.h.bf16 %v5028_v19  ;;  %v5029_v21 = vunpack.i.l.bf16 %v5028_v19 }
 0x60b   :  { %v1300_v23 = vsel %vm1297_vm15, %v1295_v2, %v5029_v21  ;;  %v1301_v24 = vsel %vm1297_vm15, %v1296_v22, %v5030_v20 }
 0x60c   :  { %v1304_v25 = vpack.c.bf16 %v1301_v24, %v1300_v23 }
 0x60e   :  { %1440 = vmatmul.mubr.bf16.gmra.mrb[8].mxu1 %v1304_v25  ;;  %v5123_v25 = vld [vmem:[%s7805_s4] sm:$0xff]  }
 0x60f   :  { %1742 = vmatpush1.bf16.msra.mxu0 %v5123_v25 }
 0x610   :  { %1743 = vmatprep.subr.bf16.mxu0 %v6109_v47 }
 0x6d9   :  { %v1433_v32 = vpop.f32.mrb[4].mxu1 }
 0x6da   :  { %v1434_v28 = vadd.f32 %v4477_v26, %v1433_v32  ;;  %v1435_v33 = vpop.f32.mrb[5].mxu1  ;;  %v5125_v32 = vld [vmem:[%s7805_s4 + $0x10] sm:$0xff]  }
 0x6db   :  { %v1436_v34 = vpop.f32.mrb[6].mxu1 }
 0x6dc   :  { %v1437_v35 = vadd.f32 %v4477_v26, %v1436_v34  ;;  %v1438_v36 = vpop.f32.mrb[7].mxu1  ;;  %v1452_v37 = vsel %vm974_vm11, %v1434_v28, 0.0 }
 0x6dd   :  { %1453 = vadd.xlane.f32.xlu0 %v1452_v37 }
 0x6de   :  { %v1455_v40 = vsel %vm974_vm11, %v1437_v35, 0.0 }
 0x6df   :  { %1456 = vadd.xlane.f32.xlu1 %v1455_v40 }
 0x6e1   :  { %v1441_v41 = vpop.f32.mrb[8].mxu1 }
 0x6e2   :  { %v1442_v30 = vadd.f32 %v4477_v26, %v1441_v41  ;;  %v1443_v29 = vpop.f32.mrb[9].mxu1 }
 0x6e3   :  { %v1444_v42 = vpop.f32.mrb[10].mxu1 }
 0x6e4   :  { %v1445_v44 = vadd.f32 %v4477_v26, %v1444_v42  ;;  %v1446_v45 = vpop.f32.mrb[11].mxu1  ;;  %v1458_v48 = vsel %vm974_vm11, %v1442_v30, 0.0  ;;  %v5124_v26 = vld [vmem:[%s7805_s4 + $0x8] sm:$0xff]  }
 0x6e5   :  { %1459 = vadd.xlane.f32.xlu0 %v1458_v48  ;;  %1744 = vmatpush1.bf16.msra.mxu0 %v5124_v26 }
 0x6e6   :  { %v1461_v49 = vsel %vm974_vm11, %v1445_v44, 0.0  ;;  %1745 = vmatprep.subr.bf16.mxu0 %v6109_v47 }
 0x6e9   :  { %1462 = vadd.xlane.f32.xlu0 %v1461_v49  ;;  %1746 = vmatpush1.bf16.msra.mxu0 %v5125_v32 }
 0x6ea   :  { %1747 = vmatprep.subr.bf16.mxu0 %v6109_v47 }
 0x76a   :  { %v1454_v50 = vpop.xlane.xlu0 %1453 }
 0x76c   :  { %v1457_v51 = vpop.xlane.xlu1 %1456 }
 0x76d   :  { %v1464_v52 = vadd.f32 %v1457_v51, %v1454_v50 }
 0x76f   :  { %v1465_v39 = vrot.slane %v1464_v52, 4 }
 0x771   :  { %v1466_v53 = vadd.f32 %v1465_v39, %v1464_v52 }
 0x772   :  { %v1460_v38 = vpop.xlane.xlu0 %1459 }
 0x773   :  { %v1467_v54 = vrot.slane %v1466_v53, 2 }
 0x775   :  { %v1468_v55 = vadd.f32 %v1467_v54, %v1466_v53 }
 0x776   :  { %v1463_v56 = vpop.xlane.xlu0 %1462 }
 0x777   :  { %v1469_v57 = vrot.slane %v1468_v55, 1  ;;  %v1471_v61 = vadd.f32 %v1463_v56, %v1460_v38  ;;  %v5127_v56 = vld [vmem:[%s7805_s4 + $0x20] sm:$0xff]  }
 0x779   :  { %v1472_v62 = vrot.slane %v1471_v61, 4  ;;  %v1470_v3 = vadd.f32 %v1469_v57, %v1468_v55 }
 0x77b   :  { %v1473_v5 = vadd.f32 %v1472_v62, %v1471_v61  ;;  %v1478_v9 = vmul.f32 0.001953125, %v1470_v3  ;;  %v1448_v61 = vld [vmem:[#allocation13] sm:$0xff]  ;;  %v1449_v62 = vld [vmem:[#allocation13 + $0x8] sm:$0xff]  ;;  %v5128_v3 = vld [vmem:[%s7805_s4 + $0x28] sm:$0xff]  }
 0x77d   :  { %v1474_v10 = vrot.slane %v1473_v5, 2  ;;  %v6894_v13 = vsub.f32 %v1437_v35, %v1478_v9  ;;  %v1480_v58 = vsub.f32 %v1434_v28, %v1478_v9  ;;  %v5126_v28 = vld [vmem:[%s7805_s4 + $0x18] sm:$0xff]  }
 0x77e   :  { %1748 = vmatpush1.bf16.msra.mxu0 %v5126_v28 }
 0x77f   :  { %v1475_v14 = vadd.f32 %v1474_v10, %v1473_v5  ;;  %v1485_v15 = vmul.f32 %v6894_v13, %v6894_v13  ;;  %v1484_v16 = vmul.f32 %v1480_v58, %v1480_v58  ;;  %1749 = vmatprep.subr.bf16.mxu0 %v6109_v47  ;;  %v1450_v10 = vld [vmem:[#allocation15] sm:$0xff] }
 0x781   :  { %v1476_v17 = vrot.slane %v1475_v14, 1  ;;  %v1491_v4 = vsel %vm974_vm11, %v1485_v15, 0.0  ;;  %v1488_v11 = vsel %vm974_vm11, %v1484_v16, 0.0 }
 0x782   :  { %1492 = vadd.xlane.f32.xlu0 %v1491_v4  ;;  %1489 = vadd.xlane.f32.xlu1 %v1488_v11 }
 0x783   :  { %v1477_v18 = vadd.f32 %v1476_v17, %v1475_v14  ;;  %1750 = vmatpush1.bf16.msra.mxu0 %v5127_v56  ;;  %v1451_v14 = vld [vmem:[#allocation15 + $0x8] sm:$0xff]  ;;  %v5129_v17 = vld [vmem:[%s7805_s4 + $0x30] sm:$0xff]  }
 0x784   :  { %1751 = vmatprep.subr.bf16.mxu0 %v6109_v47 }
 0x785   :  { %v1479_v19 = vmul.f32 0.001953125, %v1477_v18 }
 0x787   :  { %v6900_v20 = vsub.f32 %v1445_v44, %v1479_v19  ;;  %v6902_v21 = vsub.f32 %v1442_v30, %v1479_v19  ;;  %1752 = vmatpush1.bf16.msra.mxu0 %v5128_v3 }
 0x788   :  { %1753 = vmatprep.subr.bf16.mxu0 %v6109_v47 }
 0x789   :  { %v1487_v2 = vmul.f32 %v6900_v20, %v6900_v20  ;;  %v1486_v22 = vmul.f32 %v6902_v21, %v6902_v21 }
 0x78b   :  { %v1497_v23 = vsel %vm974_vm11, %v1487_v2, 0.0  ;;  %v1494_v24 = vsel %vm974_vm11, %v1486_v22, 0.0  ;;  %1754 = vmatpush1.bf16.msra.mxu0 %v5129_v17 }
 0x78c   :  { %1498 = vadd.xlane.f32.xlu0 %v1497_v23  ;;  %1495 = vadd.xlane.f32.xlu1 %v1494_v24 }
 0x78d   :  { %1755 = vmatprep.subr.bf16.mxu0 %v6109_v47 }
 0x80f   :  { %v1490_v33 = vpop.xlane.xlu1 %1489  ;;  %v1493_v34 = vpop.xlane.xlu0 %1492 }
 0x810   :  { %v1500_v35 = vadd.f32 %v1493_v34, %v1490_v33  ;;  %v5131_v33 = vld [vmem:[%s7805_s4 + $0x40] sm:$0xff]  }
 0x812   :  { %v1501_v36 = vrot.slane %v1500_v35, 4 }
 0x814   :  { %v1502_v37 = vadd.f32 %v1501_v36, %v1500_v35 }
 0x816   :  { %v1503_v40 = vrot.slane %v1502_v37, 2 }
 0x818   :  { %v1504_v41 = vadd.f32 %v1503_v40, %v1502_v37  ;;  %v5132_v40 = vld [vmem:[%s7805_s4 + $0x48] sm:$0xff]  }
 0x819   :  { %v1496_v30 = vpop.xlane.xlu1 %1495  ;;  %v1499_v29 = vpop.xlane.xlu0 %1498 }
 0x81a   :  { %v1505_v42 = vrot.slane %v1504_v41, 1  ;;  %v1507_v44 = vadd.f32 %v1499_v29, %v1496_v30 }
 0x81c   :  { %v1506_v45 = vadd.f32 %v1505_v42, %v1504_v41  ;;  %v1508_v48 = vrot.slane %v1507_v44, 4 }
 0x81e   :  { %v1514_v49 = vmul.f32 0.001953125, %v1506_v45  ;;  %v1509_v50 = vadd.f32 %v1508_v48, %v1507_v44 }
 0x820   :  { %v1516_v51 = vadd.f32 1e-05, %v1514_v49  ;;  %v1510_v52 = vrot.slane %v1509_v50, 2 }
 0x822   :  { %5267 = vrsqrt.f32 %v1516_v51  ;;  %v1511_v39 = vadd.f32 %v1510_v52, %v1509_v50 }
 0x824   :  { %v1512_v53 = vrot.slane %v1511_v39, 1 }
 0x826   :  { %v1513_v38 = vadd.f32 %v1512_v53, %v1511_v39 }
 0x828   :  { %v1515_v54 = vmul.f32 0.001953125, %v1513_v38 }
 0x82a   :  { %v1517_v55 = vadd.f32 1e-05, %v1515_v54 }
 0x82c   :  { %v5268_v57 = vpop.eup %5267  ;;  %5269 = vrsqrt.f32 %v1517_v55 }
 0x82d   :  { %v1520_v5 = vmul.f32 %v5268_v57, %v1480_v58  ;;  %v1521_v9 = vmul.f32 %v5268_v57, %v6894_v13  ;;  %v5130_v58 = vld [vmem:[%s7805_s4 + $0x38] sm:$0xff]  }
 0x82e   :  { %1756 = vmatpush1.bf16.msra.mxu0 %v5130_v58 }
 0x82f   :  { %v1524_v15 = vmul.f32 %v1520_v5, %v1448_v61  ;;  %v1525_v16 = vmul.f32 %v1521_v9, %v1449_v62  ;;  %1757 = vmatprep.subr.bf16.mxu0 %v6109_v47 }
 0x831   :  { %v1528_v4 = vadd.f32 %v1524_v15, %v1450_v10  ;;  %v1529_v11 = vadd.f32 %v1525_v16, %v1451_v14 }
 0x832   :  { %1758 = vmatpush1.bf16.msra.mxu0 %v5131_v33 }
 0x833   :  { %v6924_v18 = vmax.f32 %v1528_v4, 0.0  ;;  %v1533_v19 = vmax.f32 %v1529_v11, 0.0  ;;  %1759 = vmatprep.subr.bf16.mxu0 %v6109_v47 }
 0x835   :  { %v5031_v13 = vpack.i.bf16 %v1533_v19, %v6924_v18  ;;  %v1536_v22 = vrot.slane %v6924_v18, 6  ;;  %v1537_v25 = vrot.slane %v1533_v19, 6  ;;  %v1548_v36 = vrot.slane %v6924_v18, 7 }
 0x836   :  { %v5270_v2 = vpop.eup %5269  ;;  %v1549_v37 = vrot.slane %v1533_v19, 7  ;;  %v1572_v41 = vrot.slane %v6924_v18, 2  ;;  %v1573_v30 = vrot.slane %v1533_v19, 2  ;;  %v1561_v29 = vrot.slane %v1533_v19, 1  ;;  %1760 = vmatpush1.bf16.msra.mxu0 %v5132_v40 }
 0x837   :  { %5032 = vrot.lane.b32.xlu0 %v5031_v13, %s6090_s18  ;;  %v1522_v23 = vmul.f32 %v5270_v2, %v6902_v21  ;;  %v1523_v24 = vmul.f32 %v5270_v2, %v6900_v20  ;;  %v6935_v28 = vsel %vm661_vm3, %v1536_v22, %v1537_v25  ;;  %v1560_v50 = vrot.slane %v6924_v18, 1  ;;  %2456 = vmatprep.subr.bf16.mxu0 %v6109_v47 }
 0x838   :  { %v1554_v49 = vsel %vm698_vm0, %v1548_v36, %v1549_v37  ;;  %v1578_v56 = vsel %vm772_vm2, %v1572_v41, %v1573_v30 }
 0x839   :  { %v1526_v26 = vmul.f32 %v1522_v23, %v1448_v61  ;;  %v1527_v32 = vmul.f32 %v1523_v24, %v1449_v62  ;;  %v1566_v15 = vsel %vm735_vm1, %v1560_v50, %v1561_v29 }
 0x83b   :  { %v1530_v34 = vadd.f32 %v1526_v26, %v1450_v10  ;;  %v1531_v35 = vadd.f32 %v1527_v32, %v1451_v14 }
 0x83d   :  { %v1534_v21 = vmax.f32 %v1530_v34, 0.0  ;;  %v1535_v20 = vmax.f32 %v1531_v35, 0.0 }
 0x83f   :  { %v5036_v42 = vpack.i.bf16 %v1535_v20, %v1534_v21  ;;  %v1551_v44 = vrot.slane %v1535_v20, 7  ;;  %v1574_v45 = vrot.slane %v1534_v21, 2  ;;  %v1562_v48 = vrot.slane %v1534_v21, 1 }
 0x840   :  { %v1550_v51 = vrot.slane %v1534_v21, 7  ;;  %v1539_v52 = vrot.slane %v1535_v20, 6  ;;  %v1538_v54 = vrot.slane %v1534_v21, 6  ;;  %v1575_v61 = vrot.slane %v1535_v20, 2 }
 0x841   :  { %5037 = vrot.lane.b32.xlu0 %v5036_v42, %s6090_s18  ;;  %v1555_v39 = vsel %vm698_vm0, %v1551_v44, %v1548_v36  ;;  %v1577_v53 = vsel %vm772_vm2, %v1573_v30, %v1574_v45  ;;  %v1565_v38 = vsel %vm735_vm1, %v1561_v29, %v1562_v48  ;;  %v1563_v14 = vrot.slane %v1535_v20, 1 }
 0x842   :  { %v1556_v55 = vsel %vm707_vm4, %v1555_v39, 0.0  ;;  %v1581_v57 = vsel %vm786_vm9, %v1577_v53, 0.0  ;;  %v1569_v5 = vsel %vm749_vm8, %v1565_v38, 0.0  ;;  %v1543_v9 = vsel %vm661_vm3, %v1539_v52, %v1536_v22 }
 0x843   :  { %v5041_v62 = vpack.i.bf16 %v1554_v49, %v1556_v55  ;;  %v1645_v3 = vpack.c.bf16 %v1581_v57, %v1578_v56  ;;  %v1553_v10 = vsel %vm698_vm0, %v1549_v37, %v1550_v51  ;;  %v1540_v59 = vsel %vm661_vm3, %v1538_v54, %v1539_v52 }
 0x844   :  { %v1541_v16 = vsel %vm661_vm3, %v1537_v25, %v1538_v54  ;;  %v1576_v17 = vsel %vm772_vm2, %v1574_v45, %v1575_v61  ;;  %v1579_v4 = vsel %vm772_vm2, %v1575_v61, %v1572_v41  ;;  %v5046_v11 = vpack.i.bf16 %v1569_v5, %v1566_v15  ;;  %vm7806_vm2 = vmmov %vm7804_vm10 }
 0x845   :  { %5042 = vrot.lane.b32.xlu1 %v5041_v62, %s6110_s28  ;;  %1068 = vrot.lane.b32.xlu0 %v6750_v60, %s6111_s1  ;;  %v1583_v18 = vsel %vm788_vm7, %v1579_v4, 0.0  ;;  %v1552_v19 = vsel %vm698_vm0, %v1550_v51, %v1551_v44  ;;  %v1558_v58 = vsel %vm709_vm6, %v1553_v10, 0.0  ;;  %v1567_v2 = vsel %vm735_vm1, %v1563_v14, %v1560_v50 }
 0x846   :  { %4501 = vmatprep.mubr.msk.bf16.mxu0 %vm974_vm11, %v1645_v3  ;;  %v1647_v13 = vpack.c.bf16 %v1583_v18, %v1576_v17  ;;  %v5051_v22 = vpack.i.bf16 %v1552_v19, %v1558_v58  ;;  %v1564_v43 = vsel %vm735_vm1, %v1562_v48, %v1563_v14  ;;  %v1571_v23 = vsel %vm751_vm5, %v1567_v2, 0.0 }
 0x847   :  { %v5056_v24 = vpack.i.bf16 %v1571_v23, %v1564_v43  ;;  %v1544_v37 = vsel %vm670_vm12, %v1543_v9, 0.0  ;;  %v1546_v53 = vsel %vm7806_vm2, %v1541_v16, 0.0  ;;  %vm6112_vm3 = vmmov 1  }
 0x848   :  { %vm7513_vm7 = vmpackc.low %vm6112_vm3, %vm707_vm4 }
 0x849   :  { %1072 = vrot.lane.b32.xlu0 %v6752_v63, %s6111_s1  ;;  %5047 = vrot.lane.b32.xlu1 %v5046_v11, %s6111_s1  ;;  %vm7537_vm9 = vmpackc.low %vm751_vm5, %vm6112_vm3 }
 0x84d   :  { %5052 = vrot.lane.b32.xlu1 %v5051_v22, %s6110_s28 }
 0x851   :  { %5057 = vrot.lane.b32.xlu1 %v5056_v24, %s6111_s1 }
 0x855   :  { %1070 = vrot.lane.b32.xlu1 %v6754_v0, %s6111_s1 }
 0x859   :  { %1074 = vrot.lane.b32.xlu1 %v6760_v7, %s6111_s1 }
 0x8a9   :  { %v5033_v25 = vpop.permute.xlu0 %5032 }
 0x8aa   :  { %v5035_v40 = vunpack.i.h.bf16 %v5033_v25  ;;  %v5034_v41 = vunpack.i.l.bf16 %v5033_v25 }
 0x8b3   :  { %v5038_v26 = vpop.permute.xlu0 %5037 }
 0x8b4   :  { %v5040_v55 = vunpack.i.h.bf16 %v5038_v26  ;;  %v5039_v56 = vunpack.i.l.bf16 %v5038_v26 }
 0x8b7   :  { %v5043_v32 = vpop.permute.xlu1 %5042  ;;  %v1069_v33 = vpop.permute.xlu0 %1068 }
 0x8b8   :  { %v5045_v34 = vunpack.i.h.bf16 %v5043_v32  ;;  %v5044_v35 = vunpack.i.l.bf16 %v5043_v32  ;;  %v1080_v36 = vsel %vm974_vm11, %v1069_v33, 0.0 }
 0x8b9   :  { %1081 = vadd.xlane.f32.xlu0 %v1080_v36 }
 0x8ba   :  { %v1633_v21 = vsel %vm974_vm11, %v6935_v28, %v5045_v34  ;;  %v1632_v20 = vsel %vm974_vm11, %v1544_v37, %v5044_v35 }
 0x8bb   :  { %v5048_v30 = vpop.permute.xlu1 %5047  ;;  %v1073_v29 = vpop.permute.xlu0 %1072  ;;  %v1636_v48 = vsel %vm1292_vm14, %v1632_v20, %v5034_v41  ;;  %v1637_v12 = vsel %vm1292_vm14, %v1633_v21, %v5035_v40 }
 0x8bc   :  { %v5050_v42 = vunpack.i.h.bf16 %v5048_v30  ;;  %v5049_v44 = vunpack.i.l.bf16 %v5048_v30  ;;  %v1086_v45 = vsel %vm974_vm11, %v1073_v29, 0.0 }
 0x8bd   :  { %1087 = vadd.xlane.f32.xlu0 %v1086_v45 }
 0x8be   :  { %v1640_v49 = vsel %vm1297_vm15, %v1636_v48, %v5049_v44  ;;  %v1641_v50 = vsel %vm1297_vm15, %v1637_v12, %v5050_v42  ;;  %v4490_v42 = vld [vmem:[#allocation16] ss:$0 sm:$0xff] }
 0x8bf   :  { %v5053_v28 = vpop.permute.xlu1 %5052  ;;  %v1644_v51 = vpack.c.bf16 %v1641_v50, %v1640_v49 }
 0x8c0   :  { %v5055_v52 = vunpack.i.h.bf16 %v5053_v28  ;;  %v5054_v39 = vunpack.i.l.bf16 %v5053_v28 }
 0x8c1   :  { %1774 = vmatmul.mubr.bf16.vlgmr.msra.gmra.mrb[0].mxu0 %v1644_v51 }
 0x8c2   :  { %v1634_v38 = vsel %vm974_vm11, %v1546_v53, %v5054_v39  ;;  %v1635_v54 = vsel %vm974_vm11, %v1540_v59, %v5055_v52  ;;  %4502 = vmatprep.mubr.msk.bf16.mxu0 %vm974_vm11, %v1647_v13 }
 0x8c3   :  { %v5058_v57 = vpop.permute.xlu1 %5057  ;;  %v1638_v3 = vsel %vm1292_vm14, %v1634_v38, %v5039_v56  ;;  %v1639_v5 = vsel %vm1292_vm14, %v1635_v54, %v5040_v55 }
 0x8c4   :  { %v5060_v61 = vunpack.i.h.bf16 %v5058_v57  ;;  %v5059_v62 = vunpack.i.l.bf16 %v5058_v57 }
 0x8c6   :  { %v1642_v9 = vsel %vm1297_vm15, %v1638_v3, %v5059_v62  ;;  %v1643_v8 = vsel %vm1297_vm15, %v1639_v5, %v5060_v61 }
 0x8c7   :  { %v1071_v10 = vpop.permute.xlu1 %1070  ;;  %v1646_v14 = vpack.c.bf16 %v1643_v8, %v1642_v9 }
 0x8c8   :  { %v1083_v15 = vsel %vm974_vm11, %v1071_v10, 0.0  ;;  %v1060_v10 = vld [vmem:[#allocation9] sm:$0xff] }
 0x8c9   :  { %1084 = vadd.xlane.f32.xlu1 %v1083_v15  ;;  %1782 = vmatmul.mubr.bf16.gmra.mrb[4].mxu0 %v1646_v14  ;;  %v1062_v14 = vld [vmem:[#allocation10] sm:$0xff]  ;;  %v1063_v15 = vld [vmem:[#allocation10 + $0x8] sm:$0xff] }
 0x8cb   :  { %v1075_v59 = vpop.permute.xlu1 %1074 }
 0x8cc   :  { %v1089_v16 = vsel %vm974_vm11, %v1075_v59, 0.0  ;;  %v1061_v59 = vld [vmem:[#allocation9 + $0x8] sm:$0xff] }
 0x8cd   :  { %1090 = vadd.xlane.f32.xlu0 %v1089_v16 }
 0x946   :  { %v1082_v17 = vpop.xlane.xlu0 %1081 }
 0x94a   :  { %v1088_v4 = vpop.xlane.xlu0 %1087 }
 0x956   :  { %v1085_v11 = vpop.xlane.xlu1 %1084 }
 0x957   :  { %v1092_v18 = vadd.f32 %v1085_v11, %v1082_v17 }
 0x959   :  { %v1093_v19 = vrot.slane %v1092_v18, 4 }
 0x95a   :  { %v1091_v58 = vpop.xlane.xlu0 %1090 }
 0x95b   :  { %v1094_v13 = vadd.f32 %v1093_v19, %v1092_v18  ;;  %v1099_v2 = vadd.f32 %v1091_v58, %v1088_v4 }
 0x95d   :  { %v1095_v22 = vrot.slane %v1094_v13, 2  ;;  %v1100_v43 = vrot.slane %v1099_v2, 4 }
 0x95f   :  { %v1096_v23 = vadd.f32 %v1095_v22, %v1094_v13  ;;  %v1101_v24 = vadd.f32 %v1100_v43, %v1099_v2 }
 0x961   :  { %v1097_v25 = vrot.slane %v1096_v23, 1  ;;  %v1102_v26 = vrot.slane %v1101_v24, 2 }
 0x963   :  { %v1098_v32 = vadd.f32 %v1097_v25, %v1096_v23  ;;  %v1103_v33 = vadd.f32 %v1102_v26, %v1101_v24 }
 0x965   :  { %v1104_v34 = vrot.slane %v1103_v33, 1  ;;  %v1106_v35 = vmul.f32 0.001953125, %v1098_v32 }
 0x967   :  { %v1105_v36 = vadd.f32 %v1104_v34, %v1103_v33  ;;  %v7024_v37 = vsub.f32 %v6754_v0, %v1106_v35  ;;  %v7027_v21 = vsub.f32 %v6750_v60, %v1106_v35 }
 0x969   :  { %v1113_v20 = vmul.f32 %v7024_v37, %v7024_v37  ;;  %v1112_v40 = vmul.f32 %v7027_v21, %v7027_v21  ;;  %v1107_v41 = vmul.f32 0.001953125, %v1105_v36 }
 0x96b   :  { %1122 = vrot.lane.b32.xlu0 %v1113_v20, %s6111_s1  ;;  %1120 = vrot.lane.b32.xlu1 %v1112_v40, %s6111_s1  ;;  %v7036_v30 = vsub.f32 %v6752_v63, %v1107_v41  ;;  %v7041_v60 = vsub.f32 %v6760_v7, %v1107_v41 }
 0x96d   :  { %v1114_v0 = vmul.f32 %v7036_v30, %v7036_v30  ;;  %v1115_v29 = vmul.f32 %v7041_v60, %v7041_v60 }
 0x96f   :  { %1124 = vrot.lane.b32.xlu1 %v1114_v0, %s6111_s1 }
 0x973   :  { %1126 = vrot.lane.b32.xlu1 %v1115_v29, %s6111_s1 }
 0x994   :  { %v1775_v44 = vpop.f32.mrb[0].mxu0 }
 0x995   :  { %v1776_v45 = vadd.f32 %v4490_v42, %v1775_v44  ;;  %v1777_v48 = vpop.f32.mrb[1].mxu0 }
 0x996   :  { %v1778_v12 = vpop.f32.mrb[2].mxu0 }
 0x997   :  { %v1779_v63 = vadd.f32 %v4490_v42, %v1778_v12  ;;  %v1780_v49 = vpop.f32.mrb[3].mxu0  ;;  %v1794_v50 = vsel %vm974_vm11, %v1776_v45, 0.0 }
 0x998   :  { %1795 = vadd.xlane.f32.xlu0 %v1794_v50 }
 0x999   :  { %v1797_v7 = vsel %vm974_vm11, %v1779_v63, 0.0 }
 0x99a   :  { %1798 = vadd.xlane.f32.xlu1 %v1797_v7 }
 0x99c   :  { %v1783_v28 = vpop.f32.mrb[4].mxu0 }
 0x99d   :  { %v1784_v51 = vadd.f32 %v4490_v42, %v1783_v28  ;;  %v1785_v52 = vpop.f32.mrb[5].mxu0 }
 0x99e   :  { %v1786_v39 = vpop.f32.mrb[6].mxu0 }
 0x99f   :  { %v1787_v53 = vadd.f32 %v4490_v42, %v1786_v39  ;;  %v1788_v38 = vpop.f32.mrb[7].mxu0  ;;  %v1800_v54 = vsel %vm974_vm11, %v1784_v51, 0.0 }
 0x9a0   :  { %1801 = vadd.xlane.f32.xlu0 %v1800_v54 }
 0x9a1   :  { %v1803_v55 = vsel %vm974_vm11, %v1787_v53, 0.0 }
 0x9a4   :  { %1804 = vadd.xlane.f32.xlu0 %v1803_v55 }
 0x9dd   :  { %v1121_v56 = vpop.permute.xlu1 %1120  ;;  %v1123_v57 = vpop.permute.xlu0 %1122 }
 0x9de   :  { %v1132_v61 = vsel %vm974_vm11, %v1121_v56, 0.0  ;;  %v1135_v62 = vsel %vm974_vm11, %v1123_v57, 0.0 }
 0x9df   :  { %1133 = vadd.xlane.f32.xlu1 %v1132_v61  ;;  %1136 = vadd.xlane.f32.xlu0 %v1135_v62 }
 0x9e1   :  { %v1125_v3 = vpop.permute.xlu1 %1124 }
 0x9e2   :  { %v1138_v5 = vsel %vm974_vm11, %v1125_v3, 0.0 }
 0x9e3   :  { %1139 = vadd.xlane.f32.xlu1 %v1138_v5 }
 0x9e5   :  { %v1127_v9 = vpop.permute.xlu1 %1126 }
 0x9e6   :  { %v1141_v8 = vsel %vm974_vm11, %v1127_v9, 0.0 }
 0x9e7   :  { %1142 = vadd.xlane.f32.xlu0 %v1141_v8 }
 0x9f4   :  { %1170 = vrot.lane.b32.xlu1 %v1060_v10, %s6110_s28 }
 0x9f8   :  { %1182 = vrot.lane.b32.xlu1 %v1062_v14, %s6110_s28 }
 0x9fc   :  { %1184 = vrot.lane.b32.xlu1 %v1063_v15, %s6110_s28 }
 0x9fd   :  { %1172 = vrot.lane.b32.xlu0 %v1061_v59, %s6110_s28 }
 0xa25   :  { %v1796_v16 = vpop.xlane.xlu0 %1795 }
 0xa27   :  { %v1799_v17 = vpop.xlane.xlu1 %1798 }
 0xa28   :  { %v1806_v4 = vadd.f32 %v1799_v17, %v1796_v16 }
 0xa2a   :  { %v1807_v11 = vrot.slane %v1806_v4, 4 }
 0xa2c   :  { %v1808_v18 = vadd.f32 %v1807_v11, %v1806_v4 }
 0xa2d   :  { %v1802_v19 = vpop.xlane.xlu0 %1801 }
 0xa2e   :  { %v1809_v58 = vrot.slane %v1808_v18, 2 }
 0xa30   :  { %v1810_v13 = vadd.f32 %v1809_v58, %v1808_v18 }
 0xa31   :  { %v1805_v2 = vpop.xlane.xlu0 %1804 }
 0xa32   :  { %v1811_v22 = vrot.slane %v1810_v13, 1  ;;  %v1813_v43 = vadd.f32 %v1805_v2, %v1802_v19 }
 0xa34   :  { %v1814_v23 = vrot.slane %v1813_v43, 4  ;;  %v1812_v24 = vadd.f32 %v1811_v22, %v1810_v13 }
 0xa36   :  { %v1815_v25 = vadd.f32 %v1814_v23, %v1813_v43  ;;  %v1820_v26 = vmul.f32 0.001953125, %v1812_v24 }
 0xa38   :  { %v1816_v32 = vrot.slane %v1815_v25, 2  ;;  %v7059_v33 = vsub.f32 %v1779_v63, %v1820_v26  ;;  %v7061_v34 = vsub.f32 %v1776_v45, %v1820_v26 }
 0xa3a   :  { %v1817_v35 = vadd.f32 %v1816_v32, %v1815_v25  ;;  %v1827_v36 = vmul.f32 %v7059_v33, %v7059_v33  ;;  %v1826_v20 = vmul.f32 %v7061_v34, %v7061_v34 }
 0xa3c   :  { %v1818_v40 = vrot.slane %v1817_v35, 1  ;;  %v1833_v41 = vsel %vm974_vm11, %v1827_v36, 0.0  ;;  %v1830_v0 = vsel %vm974_vm11, %v1826_v20, 0.0  ;;  %v5133_v36 = vld [vmem:[#allocation21] sm:$0xff]   ;;  %v5135_v20 = vld [vmem:[#allocation21 + $0x10] sm:$0xff]  }
 0xa3d   :  { %1834 = vadd.xlane.f32.xlu1 %v1833_v41  ;;  %1831 = vadd.xlane.f32.xlu0 %v1830_v0 }
 0xa3e   :  { %v1819_v29 = vadd.f32 %v1818_v40, %v1817_v35  ;;  %4774 = vmatprep.subr.bf16.mxu1 %v5133_v36 }
 0xa3f   :  { %4775 = vmatpush3.bf16.msra.mxu1 %v5133_v36 }
 0xa40   :  { %v1821_v42 = vmul.f32 0.001953125, %v1819_v29 }
 0xa42   :  { %v7069_v44 = vsub.f32 %v1784_v51, %v1821_v42  ;;  %v7071_v45 = vsub.f32 %v1787_v53, %v1821_v42 }
 0xa44   :  { %v1828_v48 = vmul.f32 %v7069_v44, %v7069_v44  ;;  %v1829_v63 = vmul.f32 %v7071_v45, %v7071_v45 }
 0xa46   :  { %v1836_v12 = vsel %vm974_vm11, %v1828_v48, 0.0  ;;  %v1839_v49 = vsel %vm974_vm11, %v1829_v63, 0.0 }
 0xa47   :  { %1837 = vadd.xlane.f32.xlu0 %v1836_v12 }
 0xa4b   :  { %1840 = vadd.xlane.f32.xlu0 %v1839_v49 }
 0xa6c   :  { %v1134_v50 = vpop.xlane.xlu1 %1133  ;;  %v1137_v7 = vpop.xlane.xlu0 %1136 }
 0xa6d   :  { %v1144_v28 = vadd.f32 %v1137_v7, %v1134_v50 }
 0xa6f   :  { %v1145_v52 = vrot.slane %v1144_v28, 4 }
 0xa70   :  { %v1140_v53 = vpop.xlane.xlu1 %1139 }
 0xa71   :  { %v1146_v51 = vadd.f32 %v1145_v52, %v1144_v28 }
 0xa73   :  { %v1147_v39 = vrot.slane %v1146_v51, 2 }
 0xa74   :  { %v1143_v38 = vpop.xlane.xlu0 %1142  ;;  %v1171_v14 = vpop.permute.xlu1 %1170 }
 0xa75   :  { %v1148_v54 = vadd.f32 %v1147_v39, %v1146_v51  ;;  %v1151_v55 = vadd.f32 %v1143_v38, %v1140_v53 }
 0xa77   :  { %v1149_v56 = vrot.slane %v1148_v54, 1  ;;  %v1152_v57 = vrot.slane %v1151_v55, 4 }
 0xa78   :  { %v1183_v17 = vpop.permute.xlu1 %1182  ;;  %v1173_v11 = vpop.permute.xlu0 %1172 }
 0xa79   :  { %v1150_v61 = vadd.f32 %v1149_v56, %v1148_v54  ;;  %v1153_v62 = vadd.f32 %v1152_v57, %v1151_v55 }
 0xa7b   :  { %v1158_v3 = vmul.f32 0.001953125, %v1150_v61  ;;  %v1154_v5 = vrot.slane %v1153_v62, 2 }
 0xa7c   :  { %v1185_v58 = vpop.permute.xlu1 %1184 }
 0xa7d   :  { %v1160_v9 = vadd.f32 1e-05, %v1158_v3  ;;  %v1155_v8 = vadd.f32 %v1154_v5, %v1153_v62  ;;  %v1791_v62 = vld [vmem:[#allocation18 + $0x8] sm:$0xff] }
 0xa7f   :  { %5271 = vrsqrt.f32 %v1160_v9  ;;  %v1156_v10 = vrot.slane %v1155_v8, 1 }
 0xa81   :  { %v1157_v15 = vadd.f32 %v1156_v10, %v1155_v8  ;;  %v1793_v8 = vld [vmem:[#allocation19 + $0x8] sm:$0xff]  ;;  %v1790_v10 = vld [vmem:[#allocation18] sm:$0xff] }
 0xa83   :  { %v1159_v59 = vmul.f32 0.001953125, %v1157_v15 }
 0xa85   :  { %v1161_v16 = vadd.f32 1e-05, %v1159_v59 }
 0xa87   :  { %5273 = vrsqrt.f32 %v1161_v16 }
 0xa89   :  { %v5272_v4 = vpop.eup %5271 }
 0xa8a   :  { %v1164_v18 = vmul.f32 %v5272_v4, %v7027_v21  ;;  %v1165_v19 = vmul.f32 %v5272_v4, %v7024_v37  ;;  %v5134_v37 = vld [vmem:[#allocation21 + $0x8] sm:$0xff]  }
 0xa8b   :  { %4776 = vmatprep.subr.bf16.mxu1 %v5134_v37 }
 0xa8c   :  { %v1177_v13 = vmul.f32 %v1173_v11, %v1165_v19  ;;  %v1176_v2 = vmul.f32 %v1171_v14, %v1164_v18  ;;  %4777 = vmatpush3.bf16.msra.mxu1 %v5134_v37 }
 0xa8d   :  { %4778 = vmatprep.subr.bf16.mxu1 %v5135_v20 }
 0xa8e   :  { %v1189_v22 = vadd.f32 %v1185_v58, %v1177_v13  ;;  %v1188_v24 = vadd.f32 %v1183_v17, %v1176_v2  ;;  %v5136_v13 = vld [vmem:[#allocation21 + $0x18] sm:$0xff]  }
 0xa90   :  { %1884 = vrot.lane.b32.xlu1 %v1189_v22, %s6111_s1  ;;  %4779 = vmatpush3.bf16.msra.mxu1 %v5135_v20 }
 0xa91   :  { %v5274_v43 = vpop.eup %5273  ;;  %4780 = vmatprep.subr.bf16.mxu1 %v5136_v13 }
 0xa92   :  { %v1166_v23 = vmul.f32 %v5274_v43, %v7036_v30  ;;  %v1167_v25 = vmul.f32 %v5274_v43, %v7041_v60 }
 0xa94   :  { %v1178_v26 = vmul.f32 %v1171_v14, %v1166_v23  ;;  %v1179_v32 = vmul.f32 %v1173_v11, %v1167_v25  ;;  %1882 = vrot.lane.b32.xlu1 %v1188_v24, %s6111_s1  ;;  %4781 = vmatpush3.bf16.msra.mxu1 %v5136_v13  ;;  %v5137_v25 = vld [vmem:[#allocation21 + $0x20] sm:$0xff]  }
 0xa95   :  { %4782 = vmatprep.subr.bf16.mxu1 %v5137_v25 }
 0xa96   :  { %v1190_v35 = vadd.f32 %v1183_v17, %v1178_v26  ;;  %v1191_v21 = vadd.f32 %v1185_v58, %v1179_v32  ;;  %v1792_v17 = vld [vmem:[#allocation19] sm:$0xff] }
 0xa98   :  { %1886 = vrot.lane.b32.xlu0 %v1190_v35, %s6111_s1  ;;  %1888 = vrot.lane.b32.xlu1 %v1191_v21, %s6111_s1 }
 0xa99   :  { %4783 = vmatpush3.bf16.msra.mxu1 %v5137_v25 }
 0xaca   :  { %v1835_v30 = vpop.xlane.xlu1 %1834  ;;  %v1832_v60 = vpop.xlane.xlu0 %1831 }
 0xacb   :  { %v1842_v40 = vadd.f32 %v1835_v30, %v1832_v60  ;;  %v5138_v60 = vld [vmem:[#allocation21 + $0x28] sm:$0xff]  }
 0xacc   :  { %4784 = vmatprep.subr.bf16.mxu1 %v5138_v60 }
 0xacd   :  { %v1843_v41 = vrot.slane %v1842_v40, 4  ;;  %4785 = vmatpush3.bf16.msra.mxu1 %v5138_v60 }
 0xace   :  { %2750 = vmatprep.subr.bf16.mxu1 %v6109_v47 }
 0xacf   :  { %v1844_v0 = vadd.f32 %v1843_v41, %v1842_v40 }
 0xad1   :  { %v1845_v29 = vrot.slane %v1844_v0, 2 }
 0xad3   :  { %v1846_v42 = vadd.f32 %v1845_v29, %v1844_v0 }
 0xad4   :  { %v1838_v48 = vpop.xlane.xlu0 %1837 }
 0xad5   :  { %v1847_v12 = vrot.slane %v1846_v42, 1 }
 0xad7   :  { %v1848_v7 = vadd.f32 %v1847_v12, %v1846_v42 }
 0xad8   :  { %v1841_v63 = vpop.xlane.xlu0 %1840 }
 0xad9   :  { %v1849_v49 = vadd.f32 %v1841_v63, %v1838_v48  ;;  %v1856_v51 = vmul.f32 0.001953125, %v1848_v7 }
 0xadb   :  { %v1850_v50 = vrot.slane %v1849_v49, 4  ;;  %v1858_v38 = vadd.f32 1e-05, %v1856_v51 }
 0xadd   :  { %v1851_v28 = vadd.f32 %v1850_v50, %v1849_v49  ;;  %5275 = vrsqrt.f32 %v1858_v38 }
 0xadf   :  { %v1852_v52 = vrot.slane %v1851_v28, 2 }
 0xae1   :  { %v1853_v39 = vadd.f32 %v1852_v52, %v1851_v28 }
 0xae3   :  { %v1854_v53 = vrot.slane %v1853_v39, 1 }
 0xae5   :  { %v1855_v54 = vadd.f32 %v1854_v53, %v1853_v39 }
 0xae7   :  { %v1857_v55 = vmul.f32 0.001953125, %v1855_v54  ;;  %v5276_v57 = vpop.eup %5275 }
 0xae8   :  { %v1863_v61 = vmul.f32 %v5276_v57, %v7059_v33  ;;  %v1862_v5 = vmul.f32 %v5276_v57, %v7061_v34 }
 0xae9   :  { %v1859_v56 = vadd.f32 1e-05, %v1857_v55 }
 0xaea   :  { %v1867_v3 = vmul.f32 %v1863_v61, %v1791_v62  ;;  %v1866_v15 = vmul.f32 %v1862_v5, %v1790_v10 }
 0xaeb   :  { %5277 = vrsqrt.f32 %v1859_v56 }
 0xaec   :  { %v1871_v14 = vadd.f32 %v1867_v3, %v1793_v8  ;;  %v1870_v11 = vadd.f32 %v1866_v15, %v1792_v17 }
 0xaee   :  { %v1875_v4 = vmax.f32 %v1871_v14, 0.0  ;;  %v1874_v2 = vmax.f32 %v1870_v11, 0.0 }
 0xaf5   :  { %v5278_v9 = vpop.eup %5277 }
 0xaf6   :  { %v1865_v59 = vmul.f32 %v5278_v9, %v7071_v45  ;;  %v1864_v16 = vmul.f32 %v5278_v9, %v7069_v44 }
 0xaf8   :  { %v1869_v18 = vmul.f32 %v1865_v59, %v1791_v62  ;;  %v1868_v19 = vmul.f32 %v1864_v16, %v1790_v10 }
 0xafa   :  { %v1873_v22 = vadd.f32 %v1869_v18, %v1793_v8  ;;  %v1872_v34 = vadd.f32 %v1868_v19, %v1792_v17 }
 0xafc   :  { %v1877_v26 = vmax.f32 %v1873_v22, 0.0  ;;  %v1876_v44 = vmax.f32 %v1872_v34, 0.0 }
 0xb02   :  { %v1885_v58 = vpop.permute.xlu1 %1884 }
 0xb03   :  { %v1895_v33 = vadd.f32 %v1885_v58, %v1875_v4 }
 0xb05   :  { %v1899_v23 = vmax.f32 %v1895_v33, 0.0 }
 0xb06   :  { %v1883_v43 = vpop.permute.xlu1 %1882 }
 0xb07   :  { %v1894_v24 = vadd.f32 %v1883_v43, %v1874_v2  ;;  %v1903_v21 = vrot.slane %v1899_v23, 7  ;;  %v1915_v29 = vrot.slane %v1899_v23, 1 }
 0xb09   :  { %v1898_v45 = vmax.f32 %v1894_v24, 0.0  ;;  %v4503_v24 = vld [vmem:[%s7807_s29] ss:$0 sm:$0xff] }
 0xb0a   :  { %v1889_v32 = vpop.permute.xlu1 %1888  ;;  %v1887_v35 = vpop.permute.xlu0 %1886 }
 0xb0b   :  { %v1902_v36 = vrot.slane %v1898_v45, 7  ;;  %v1897_v37 = vadd.f32 %v1889_v32, %v1877_v26  ;;  %v1896_v20 = vadd.f32 %v1887_v35, %v1876_v44  ;;  %v5061_v30 = vpack.i.bf16 %v1899_v23, %v1898_v45 }
 0xb0c   :  { %v1914_v42 = vrot.slane %v1898_v45, 1 }
 0xb0d   :  { %v1901_v40 = vmax.f32 %v1897_v37, 0.0  ;;  %v1900_v41 = vmax.f32 %v1896_v20, 0.0  ;;  %v1908_v0 = vsel %vm698_vm0, %v1902_v36, %v1903_v21  ;;  %5062 = vrot.lane.b32.xlu0 %v5061_v30, %s6110_s28 }
 0xb0e   :  { %v1920_v39 = vsel %vm735_vm1, %v1914_v42, %v1915_v29 }
 0xb0f   :  { %v1905_v48 = vrot.slane %v1901_v40, 7  ;;  %v1917_v12 = vrot.slane %v1901_v40, 1  ;;  %v1904_v63 = vrot.slane %v1900_v41, 7  ;;  %v1916_v49 = vrot.slane %v1900_v41, 1 }
 0xb10   :  { %v5066_v50 = vpack.i.bf16 %v1901_v40, %v1900_v41 }
 0xb11   :  { %v1919_v7 = vsel %vm735_vm1, %v1915_v29, %v1916_v49  ;;  %v1918_v28 = vsel %vm735_vm1, %v1916_v49, %v1917_v12  ;;  %v1921_v52 = vsel %vm735_vm1, %v1917_v12, %v1914_v42  ;;  %v1909_v51 = vsel %vm698_vm0, %v1905_v48, %v1902_v36 }
 0xb12   :  { %5067 = vrot.lane.b32.xlu1 %v5066_v50, %s6110_s28  ;;  %v1923_v53 = vsel %vm749_vm8, %v1919_v7, 0.0  ;;  %v1925_v38 = vsel %vm751_vm5, %v1921_v52, 0.0  ;;  %v1906_v54 = vsel %vm698_vm0, %v1904_v63, %v1905_v48  ;;  %v1907_v57 = vsel %vm698_vm0, %v1903_v21, %v1904_v63 }
 0xb13   :  { %v5071_v55 = vpack.i.bf16 %v1923_v53, %v1920_v39  ;;  %v5076_v56 = vpack.i.bf16 %v1925_v38, %v1918_v28  ;;  %v1910_v14 = vsel %vm707_vm4, %v1909_v51, 0.0  ;;  %v1912_v15 = vsel %vm709_vm6, %v1907_v57, 0.0 }
 0xb15   :  { %5072 = vrot.lane.b32.xlu0 %v5071_v55, %s6090_s18 }
 0xb16   :  { %5077 = vrot.lane.b32.xlu1 %v5076_v56, %s6090_s18 }
 0xb7f   :  { %v5063_v61 = vpop.permute.xlu0 %5062 }
 0xb80   :  { %v5065_v3 = vunpack.i.h.bf16 %v5063_v61  ;;  %v5064_v5 = vunpack.i.l.bf16 %v5063_v61 }
 0xb82   :  { %v1959_v4 = vsel %vm974_vm11, %v1908_v0, %v5065_v3  ;;  %v1958_v11 = vsel %vm974_vm11, %v1910_v14, %v5064_v5 }
 0xb84   :  { %v5068_v62 = vpop.permute.xlu1 %5067 }
 0xb85   :  { %v5070_v9 = vunpack.i.h.bf16 %v5068_v62  ;;  %v5069_v8 = vunpack.i.l.bf16 %v5068_v62 }
 0xb87   :  { %v5073_v10 = vpop.permute.xlu0 %5072  ;;  %v1960_v58 = vsel %vm974_vm11, %v1912_v15, %v5069_v8  ;;  %v1961_v33 = vsel %vm974_vm11, %v1906_v54, %v5070_v9 }
 0xb88   :  { %v5078_v59 = vpop.permute.xlu1 %5077  ;;  %v5075_v16 = vunpack.i.h.bf16 %v5073_v10  ;;  %v5074_v17 = vunpack.i.l.bf16 %v5073_v10 }
 0xb89   :  { %v5080_v18 = vunpack.i.h.bf16 %v5078_v59  ;;  %v5079_v19 = vunpack.i.l.bf16 %v5078_v59 }
 0xb8a   :  { %v1962_v13 = vsel %vm1292_vm14, %v1958_v11, %v5074_v17  ;;  %v1963_v2 = vsel %vm1292_vm14, %v1959_v4, %v5075_v16  ;;  %v5139_v17 = vld [vmem:[%s7808_s2] sm:$0xff]   ;;  %v5140_v4 = vld [vmem:[%s7808_s2 + $0x8] sm:$0xff]   ;;  %v5141_v11 = vld [vmem:[%s7808_s2 + $0x10] sm:$0xff]  }
 0xb8b   :  { %v1964_v22 = vsel %vm1292_vm14, %v1960_v58, %v5079_v19  ;;  %v1965_v34 = vsel %vm1292_vm14, %v1961_v33, %v5080_v18  ;;  %v1966_v43 = vpack.c.bf16 %v1963_v2, %v1962_v13  ;;  %2457 = vmatpush1.bf16.msra.mxu0 %v5139_v17  ;;  %v5142_v18 = vld [vmem:[%s7808_s2 + $0x18] sm:$0xff]   ;;  %v5143_v19 = vld [vmem:[%s7808_s2 + $0x20] sm:$0xff]   ;;  %v5144_v58 = vld [vmem:[%s7808_s2 + $0x28] sm:$0xff]  }
 0xb8c   :  { %v1967_v23 = vpack.c.bf16 %v1965_v34, %v1964_v22  ;;  %2458 = vmatprep.subr.bf16.mxu0 %v6109_v47  ;;  %v5145_v33 = vld [vmem:[%s7808_s2 + $0x30] sm:$0xff]   ;;  %v5146_v13 = vld [vmem:[%s7808_s2 + $0x38] sm:$0xff]   ;;  %v5147_v2 = vld [vmem:[%s7808_s2 + $0x40] sm:$0xff]  }
 0xb8d   :  { %4786 = vmatprep.mubr.msk.bf16.mxu1 %vm1297_vm15, %v1966_v43  ;;  %v5148_v22 = vld [vmem:[%s7808_s2 + $0x48] sm:$0xff]   ;;  %v5149_v34 = vld [vmem:[%s7808_s2 + $0x50] sm:$0xff]  }
 0xb8e   :  { %4787 = vmatmul.mubr.msk.bf16.vlgmr.msra.gmra.mrb[12].mxu1 %vm1297_vm15, %v1967_v23 }
 0xb8f   :  { %2459 = vmatpush1.bf16.msra.mxu0 %v5140_v4 }
 0xb90   :  { %2460 = vmatprep.subr.bf16.mxu0 %v6109_v47 }
 0xb93   :  { %2461 = vmatpush1.bf16.msra.mxu0 %v5141_v11 }
 0xb94   :  { %2462 = vmatprep.subr.bf16.mxu0 %v6109_v47 }
 0xb97   :  { %2463 = vmatpush1.bf16.msra.mxu0 %v5142_v18 }
 0xb98   :  { %2464 = vmatprep.subr.bf16.mxu0 %v6109_v47 }
 0xb9b   :  { %2465 = vmatpush1.bf16.msra.mxu0 %v5143_v19 }
 0xb9c   :  { %2466 = vmatprep.subr.bf16.mxu0 %v6109_v47 }
 0xb9f   :  { %2467 = vmatpush1.bf16.msra.mxu0 %v5144_v58 }
 0xba0   :  { %2468 = vmatprep.subr.bf16.mxu0 %v6109_v47 }
 0xba3   :  { %2469 = vmatpush1.bf16.msra.mxu0 %v5145_v33 }
 0xba4   :  { %2470 = vmatprep.subr.bf16.mxu0 %v6109_v47 }
 0xba7   :  { %2471 = vmatpush1.bf16.msra.mxu0 %v5146_v13 }
 0xba8   :  { %2472 = vmatprep.subr.bf16.mxu0 %v6109_v47 }
 0xbab   :  { %2473 = vmatpush1.bf16.msra.mxu0 %v5147_v2 }
 0xbac   :  { %2474 = vmatprep.subr.bf16.mxu0 %v6109_v47 }
 0xbaf   :  { %2475 = vmatpush1.bf16.msra.mxu0 %v5148_v22 }
 0xbb0   :  { %2476 = vmatprep.subr.bf16.mxu0 %v6109_v47 }
 0xbb3   :  { %2477 = vmatpush1.bf16.msra.mxu0 %v5149_v34 }
 0xbb4   :  { %2478 = vmatprep.subr.bf16.mxu0 %v6109_v47 }
 0xc61   :  { %v4788_v25 = vpop.f32.mrb[12].mxu1 }
 0xc62   :  { %v2063_v45 = vpop.f32.mrb[13].mxu1  ;;  %v7133_v35 = vadd.f32 %v4788_v25, %v4503_v24 }
 0xc63   :  { %v7131_v26 = vadd.f32 %v4503_v24, %v2063_v45  ;;  %v4789_v44 = vpop.f32.mrb[14].mxu1 }
 0xc64   :  { %v2066_v32 = vpop.f32.mrb[15].mxu1  ;;  %v7141_v20 = vadd.f32 %v4789_v44, %v4503_v24  ;;  %v2088_v30 = vsel %vm1292_vm14, %v7133_v35, 0.0 }
 0xc65   :  { %v7135_v21 = vadd.f32 %v4503_v24, %v2066_v32  ;;  %v2082_v36 = vsel %vm1292_vm14, %v7131_v26, 0.0 }
 0xc66   :  { %2083 = vadd.xlane.f32.xlu0 %v2082_v36  ;;  %v2091_v60 = vsel %vm1292_vm14, %v7141_v20, 0.0 }
 0xc67   :  { %v2085_v37 = vsel %vm1292_vm14, %v7135_v21, 0.0 }
 0xc68   :  { %2086 = vadd.xlane.f32.xlu1 %v2085_v37 }
 0xc6a   :  { %2089 = vadd.xlane.f32.xlu0 %v2088_v30 }
 0xc6e   :  { %2092 = vadd.xlane.f32.xlu0 %v2091_v60 }
 0xcf3   :  { %v2084_v40 = vpop.xlane.xlu0 %2083 }
 0xcf5   :  { %v2087_v41 = vpop.xlane.xlu1 %2086 }
 0xcf6   :  { %v2094_v0 = vadd.f32 %v2087_v41, %v2084_v40 }
 0xcf7   :  { %v2090_v29 = vpop.xlane.xlu0 %2089 }
 0xcf8   :  { %v2095_v42 = vrot.slane %v2094_v0, 4 }
 0xcfa   :  { %v2096_v48 = vadd.f32 %v2095_v42, %v2094_v0 }
 0xcfb   :  { %v2093_v12 = vpop.xlane.xlu0 %2092 }
 0xcfc   :  { %v2097_v63 = vrot.slane %v2096_v48, 2  ;;  %v2101_v49 = vadd.f32 %v2093_v12, %v2090_v29 }
 0xcfe   :  { %v2098_v50 = vadd.f32 %v2097_v63, %v2096_v48  ;;  %v2102_v7 = vrot.slane %v2101_v49, 4 }
 0xd00   :  { %v2099_v28 = vrot.slane %v2098_v50, 1  ;;  %v2103_v52 = vadd.f32 %v2102_v7, %v2101_v49 }
 0xd02   :  { %v2100_v51 = vadd.f32 %v2099_v28, %v2098_v50  ;;  %v2104_v39 = vrot.slane %v2103_v52, 2 }
 0xd04   :  { %v2105_v53 = vadd.f32 %v2104_v39, %v2103_v52  ;;  %v2109_v38 = vmul.f32 0.0009765625, %v2100_v51  ;;  %v2078_v52 = vld [vmem:[#allocation22] sm:$0xff]  ;;  %v2079_v51 = vld [vmem:[#allocation22 + $0x8] sm:$0xff] }
 0xd06   :  { %v2106_v54 = vrot.slane %v2105_v53, 1  ;;  %v7148_v55 = vsub.f32 %v7135_v21, %v2109_v38  ;;  %v7151_v56 = vsub.f32 %v7131_v26, %v2109_v38  ;;  %v5150_v38 = vld [vmem:[%s7808_s2 + $0x58] sm:$0xff]  }
 0xd07   :  { %2479 = vmatpush1.bf16.msra.mxu0 %v5150_v38  ;;  %v4512_v38 = vld [vmem:[#allocation28] ss:$0 sm:$0xff] }
 0xd08   :  { %v2107_v57 = vadd.f32 %v2106_v54, %v2105_v53  ;;  %v2116_v61 = vmul.f32 %v7148_v55, %v7148_v55  ;;  %v2115_v62 = vmul.f32 %v7151_v56, %v7151_v56  ;;  %v2080_v54 = vld [vmem:[#allocation24] sm:$0xff] }
 0xd0a   :  { %v2122_v3 = vsel %vm1292_vm14, %v2116_v61, 0.0  ;;  %v2119_v5 = vsel %vm1292_vm14, %v2115_v62, 0.0  ;;  %v2110_v9 = vmul.f32 0.0009765625, %v2107_v57  ;;  %v2081_v57 = vld [vmem:[#allocation24 + $0x8] sm:$0xff] }
 0xd0b   :  { %2123 = vadd.xlane.f32.xlu0 %v2122_v3  ;;  %2120 = vadd.xlane.f32.xlu1 %v2119_v5 }
 0xd0c   :  { %v7160_v8 = vsub.f32 %v7141_v20, %v2110_v9  ;;  %v7163_v10 = vsub.f32 %v7133_v35, %v2110_v9 }
 0xd0e   :  { %v2118_v14 = vmul.f32 %v7160_v8, %v7160_v8  ;;  %v2117_v15 = vmul.f32 %v7163_v10, %v7163_v10 }
 0xd10   :  { %v2128_v59 = vsel %vm1292_vm14, %v2118_v14, 0.0  ;;  %v2125_v16 = vsel %vm1292_vm14, %v2117_v15, 0.0 }
 0xd11   :  { %2129 = vadd.xlane.f32.xlu0 %v2128_v59  ;;  %2126 = vadd.xlane.f32.xlu1 %v2125_v16 }
 0xd98   :  { %v2121_v43 = vpop.xlane.xlu1 %2120  ;;  %v2124_v23 = vpop.xlane.xlu0 %2123 }
 0xd99   :  { %v2131_v24 = vadd.f32 %v2124_v23, %v2121_v43 }
 0xd9b   :  { %v2132_v25 = vrot.slane %v2131_v24, 4 }
 0xd9d   :  { %v2133_v45 = vadd.f32 %v2132_v25, %v2131_v24 }
 0xd9e   :  { %v2127_v44 = vpop.xlane.xlu1 %2126  ;;  %v2130_v32 = vpop.xlane.xlu0 %2129 }
 0xd9f   :  { %v2134_v36 = vrot.slane %v2133_v45, 2  ;;  %v2138_v37 = vadd.f32 %v2130_v32, %v2127_v44 }
 0xda1   :  { %v2135_v30 = vadd.f32 %v2134_v36, %v2133_v45  ;;  %v2139_v60 = vrot.slane %v2138_v37, 4 }
 0xda3   :  { %v2136_v40 = vrot.slane %v2135_v30, 1  ;;  %v2140_v41 = vadd.f32 %v2139_v60, %v2138_v37 }
 0xda5   :  { %v2137_v0 = vadd.f32 %v2136_v40, %v2135_v30  ;;  %v2141_v29 = vrot.slane %v2140_v41, 2 }
 0xda7   :  { %v2145_v42 = vmul.f32 0.0009765625, %v2137_v0  ;;  %v2142_v48 = vadd.f32 %v2141_v29, %v2140_v41 }
 0xda9   :  { %v2147_v12 = vadd.f32 1e-05, %v2145_v42  ;;  %v2143_v63 = vrot.slane %v2142_v48, 1 }
 0xdab   :  { %5279 = vrsqrt.f32 %v2147_v12  ;;  %v2144_v49 = vadd.f32 %v2143_v63, %v2142_v48 }
 0xdad   :  { %v2146_v50 = vmul.f32 0.0009765625, %v2144_v49 }
 0xdaf   :  { %v2148_v7 = vadd.f32 1e-05, %v2146_v50 }
 0xdb1   :  { %5281 = vrsqrt.f32 %v2148_v7 }
 0xdb5   :  { %v5280_v28 = vpop.eup %5279 }
 0xdb6   :  { %v2151_v39 = vmul.f32 %v5280_v28, %v7151_v56  ;;  %v2152_v53 = vmul.f32 %v5280_v28, %v7148_v55 }
 0xdb8   :  { %v2155_v61 = vmul.f32 %v2151_v39, %v2078_v52  ;;  %v2156_v62 = vmul.f32 %v2152_v53, %v2079_v51 }
 0xdba   :  { %v2159_v3 = vadd.f32 %v2155_v61, %v2080_v54  ;;  %v2160_v5 = vadd.f32 %v2156_v62, %v2081_v57 }
 0xdbb   :  { %v5282_v9 = vpop.eup %5281 }
 0xdbc   :  { %v2163_v14 = vmax.f32 %v2159_v3, 0.0  ;;  %v2164_v15 = vmax.f32 %v2160_v5, 0.0  ;;  %v2153_v59 = vmul.f32 %v5282_v9, %v7163_v10  ;;  %v2154_v16 = vmul.f32 %v5282_v9, %v7160_v8 }
 0xdbe   :  { %v2300_v17 = vrot.slane %v2164_v15, 7  ;;  %v5081_v4 = vpack.i.bf16 %v2164_v15, %v2163_v14  ;;  %v2299_v56 = vrot.slane %v2163_v14, 7  ;;  %v2157_v11 = vmul.f32 %v2153_v59, %v2078_v52 }
 0xdbf   :  { %v2158_v55 = vmul.f32 %v2154_v16, %v2079_v51  ;;  %v2312_v2 = vrot.slane %v2164_v15, 1  ;;  %v2311_v22 = vrot.slane %v2163_v14, 1 }
 0xdc0   :  { %5082 = vrot.lane.b32.xlu1 %v5081_v4, %s6090_s18  ;;  %v2305_v18 = vsel %vm698_vm0, %v2299_v56, %v2300_v17  ;;  %v2161_v19 = vadd.f32 %v2157_v11, %v2080_v54 }
 0xdc1   :  { %v2162_v58 = vadd.f32 %v2158_v55, %v2081_v57  ;;  %v2317_v30 = vsel %vm735_vm1, %v2311_v22, %v2312_v2 }
 0xdc2   :  { %v2165_v33 = vmax.f32 %v2161_v19, 0.0 }
 0xdc3   :  { %v2166_v13 = vmax.f32 %v2162_v58, 0.0 }
 0xdc4   :  { %v2301_v8 = vrot.slane %v2165_v33, 7  ;;  %v2313_v23 = vrot.slane %v2165_v33, 1 }
 0xdc5   :  { %v2302_v34 = vrot.slane %v2166_v13, 7  ;;  %v2314_v10 = vrot.slane %v2166_v13, 1  ;;  %v5086_v43 = vpack.i.bf16 %v2166_v13, %v2165_v33 }
 0xdc6   :  { %v2304_v44 = vsel %vm698_vm0, %v2300_v17, %v2301_v8  ;;  %v2316_v32 = vsel %vm735_vm1, %v2312_v2, %v2313_v23 }
 0xdc7   :  { %5087 = vrot.lane.b32.xlu0 %v5086_v43, %s6090_s18  ;;  %v2306_v24 = vsel %vm698_vm0, %v2302_v34, %v2299_v56  ;;  %v2318_v25 = vsel %vm735_vm1, %v2314_v10, %v2311_v22  ;;  %v2303_v45 = vsel %vm698_vm0, %v2301_v8, %v2302_v34  ;;  %v2315_v36 = vsel %vm735_vm1, %v2313_v23, %v2314_v10 }
 0xdc8   :  { %v2322_v37 = vsel %vm751_vm5, %v2318_v25, 0.0  ;;  %v2320_v60 = vsel %vm749_vm8, %v2316_v32, 0.0  ;;  %v2307_v48 = vsel %vm707_vm4, %v2306_v24, 0.0  ;;  %v2309_v52 = vsel %vm709_vm6, %v2304_v44, 0.0 }
 0xdc9   :  { %v2346_v40 = vpack.c.bf16 %v2322_v37, %v2315_v36  ;;  %v2344_v41 = vpack.c.bf16 %v2320_v60, %v2317_v30 }
 0xdcb   :  { %4525 = vmatprep.mubr.msk.bf16.mxu0 %vm1292_vm14, %v2344_v41 }
 0xe32   :  { %v5083_v0 = vpop.permute.xlu1 %5082 }
 0xe33   :  { %v5085_v29 = vunpack.i.h.bf16 %v5083_v0  ;;  %v5084_v42 = vunpack.i.l.bf16 %v5083_v0 }
 0xe35   :  { %v2339_v12 = vsel %vm1292_vm14, %v2307_v48, %v5084_v42  ;;  %v2340_v63 = vsel %vm1292_vm14, %v2305_v18, %v5085_v29 }
 0xe36   :  { %v2343_v49 = vpack.c.bf16 %v2340_v63, %v2339_v12 }
 0xe38   :  { %2489 = vmatmul.mubr.bf16.vlgmr.msra.gmra.mrb[8].mxu0 %v2343_v49 }
 0xe39   :  { %v5088_v50 = vpop.permute.xlu0 %5087  ;;  %4526 = vmatprep.mubr.msk.bf16.mxu0 %vm1292_vm14, %v2346_v40 }
 0xe3a   :  { %v5090_v7 = vunpack.i.h.bf16 %v5088_v50  ;;  %v5089_v28 = vunpack.i.l.bf16 %v5088_v50 }
 0xe3c   :  { %v2341_v51 = vsel %vm1292_vm14, %v2309_v52, %v5089_v28  ;;  %v2342_v39 = vsel %vm1292_vm14, %v2303_v45, %v5090_v7  ;;  %v5151_v28 = vld [vmem:[%s7809_s5] sm:$0xff]   ;;  %v5152_v52 = vld [vmem:[%s7809_s5 + $0x8] sm:$0xff]  }
 0xe3d   :  { %v2345_v53 = vpack.c.bf16 %v2342_v39, %v2341_v51  ;;  %2751 = vmatpush1.bf16.msra.mxu1 %v5151_v28  ;;  %v5153_v51 = vld [vmem:[%s7809_s5 + $0x10] sm:$0xff]   ;;  %v5154_v39 = vld [vmem:[%s7809_s5 + $0x18] sm:$0xff]  }
 0xe3e   :  { %2752 = vmatprep.subr.bf16.mxu1 %v6109_v47 }
 0xe40   :  { %2497 = vmatmul.mubr.bf16.gmra.mrb[12].mxu0 %v2345_v53  ;;  %v5155_v53 = vld [vmem:[%s7809_s5 + $0x20] sm:$0xff]  }
 0xe41   :  { %2753 = vmatpush1.bf16.msra.mxu1 %v5152_v52 }
 0xe42   :  { %2754 = vmatprep.subr.bf16.mxu1 %v6109_v47 }
 0xe45   :  { %2755 = vmatpush1.bf16.msra.mxu1 %v5153_v51 }
 0xe46   :  { %2756 = vmatprep.subr.bf16.mxu1 %v6109_v47 }
 0xe49   :  { %2757 = vmatpush1.bf16.msra.mxu1 %v5154_v39 }
 0xe4a   :  { %2758 = vmatprep.subr.bf16.mxu1 %v6109_v47 }
 0xe4d   :  { %2759 = vmatpush1.bf16.msra.mxu1 %v5155_v53 }
 0xe4e   :  { %2760 = vmatprep.subr.bf16.mxu1 %v6109_v47 }
 0xf0b   :  { %v2490_v54 = vpop.f32.mrb[8].mxu0 }
 0xf0c   :  { %v2491_v57 = vadd.f32 %v4512_v38, %v2490_v54  ;;  %v2492_v61 = vpop.f32.mrb[9].mxu0  ;;  %v5157_v54 = vld [vmem:[%s7809_s5 + $0x30] sm:$0xff]  }
 0xf0d   :  { %v2493_v62 = vpop.f32.mrb[10].mxu0  ;;  %v5159_v61 = vld [vmem:[%s7809_s5 + $0x40] sm:$0xff]  }
 0xf0e   :  { %v2494_v3 = vadd.f32 %v4512_v38, %v2493_v62  ;;  %v2495_v5 = vpop.f32.mrb[11].mxu0  ;;  %v2509_v9 = vsel %vm1292_vm14, %v2491_v57, 0.0  ;;  %v5160_v62 = vld [vmem:[%s7809_s5 + $0x48] sm:$0xff]  }
 0xf0f   :  { %2510 = vadd.xlane.f32.xlu1 %v2509_v9 }
 0xf10   :  { %v2512_v14 = vsel %vm1292_vm14, %v2494_v3, 0.0 }
 0xf11   :  { %2513 = vadd.xlane.f32.xlu0 %v2512_v14 }
 0xf13   :  { %v2498_v15 = vpop.f32.mrb[12].mxu0 }
 0xf14   :  { %v2499_v59 = vadd.f32 %v4512_v38, %v2498_v15  ;;  %v2500_v16 = vpop.f32.mrb[13].mxu0 }
 0xf15   :  { %v2501_v17 = vpop.f32.mrb[14].mxu0 }
 0xf16   :  { %v2502_v4 = vadd.f32 %v4512_v38, %v2501_v17  ;;  %v2503_v56 = vpop.f32.mrb[15].mxu0  ;;  %v2515_v11 = vsel %vm1292_vm14, %v2499_v59, 0.0  ;;  %v5156_v38 = vld [vmem:[%s7809_s5 + $0x28] sm:$0xff]  }
 0xf17   :  { %2516 = vadd.xlane.f32.xlu1 %v2515_v11  ;;  %2761 = vmatpush1.bf16.msra.mxu1 %v5156_v38 }
 0xf18   :  { %v2518_v55 = vsel %vm1292_vm14, %v2502_v4, 0.0  ;;  %2762 = vmatprep.subr.bf16.mxu1 %v6109_v47 }
 0xf19   :  { %2519 = vadd.xlane.f32.xlu0 %v2518_v55 }
 0xf1b   :  { %2763 = vmatpush1.bf16.msra.mxu1 %v5157_v54 }
 0xf1c   :  { %2764 = vmatprep.subr.bf16.mxu1 %v6109_v47 }
 0xf9c   :  { %v2511_v18 = vpop.xlane.xlu1 %2510 }
 0xf9e   :  { %v2514_v19 = vpop.xlane.xlu0 %2513 }
 0xf9f   :  { %v2521_v58 = vadd.f32 %v2514_v19, %v2511_v18 }
 0xfa1   :  { %v2522_v33 = vrot.slane %v2521_v58, 4 }
 0xfa3   :  { %v2523_v13 = vadd.f32 %v2522_v33, %v2521_v58 }
 0xfa4   :  { %v2517_v22 = vpop.xlane.xlu1 %2516 }
 0xfa5   :  { %v2524_v2 = vrot.slane %v2523_v13, 2 }
 0xfa6   :  { %v2520_v34 = vpop.xlane.xlu0 %2519 }
 0xfa7   :  { %v2525_v10 = vadd.f32 %v2524_v2, %v2523_v13  ;;  %v2528_v43 = vadd.f32 %v2520_v34, %v2517_v22 }
 0xfa9   :  { %v2526_v8 = vrot.slane %v2525_v10, 1  ;;  %v2529_v23 = vrot.slane %v2528_v43, 4 }
 0xfab   :  { %v2527_v24 = vadd.f32 %v2526_v8, %v2525_v10  ;;  %v2530_v25 = vadd.f32 %v2529_v23, %v2528_v43  ;;  %v2505_v23 = vld [vmem:[#allocation30] sm:$0xff] }
 0xfad   :  { %v2531_v45 = vrot.slane %v2530_v25, 2  ;;  %v2535_v44 = vmul.f32 0.0009765625, %v2527_v24  ;;  %v2506_v24 = vld [vmem:[#allocation30 + $0x8] sm:$0xff] }
 0xfaf   :  { %v2532_v32 = vadd.f32 %v2531_v45, %v2530_v25  ;;  %v7234_v36 = vsub.f32 %v2494_v3, %v2535_v44  ;;  %v7236_v37 = vsub.f32 %v2491_v57, %v2535_v44  ;;  %v5158_v57 = vld [vmem:[%s7809_s5 + $0x38] sm:$0xff]   ;;  %v5161_v3 = vld [vmem:[%s7809_s5 + $0x50] sm:$0xff]  }
 0xfb0   :  { %2765 = vmatpush1.bf16.msra.mxu1 %v5158_v57  ;;  %v5162_v44 = vld [vmem:[%s7809_s5 + $0x58] sm:$0xff]  }
 0xfb1   :  { %v2533_v30 = vrot.slane %v2532_v32, 1  ;;  %v2542_v60 = vmul.f32 %v7234_v36, %v7234_v36  ;;  %v2541_v40 = vmul.f32 %v7236_v37, %v7236_v37  ;;  %2766 = vmatprep.subr.bf16.mxu1 %v6109_v47 }
 0xfb3   :  { %v2534_v41 = vadd.f32 %v2533_v30, %v2532_v32  ;;  %v2548_v0 = vsel %vm1292_vm14, %v2542_v60, 0.0  ;;  %v2545_v29 = vsel %vm1292_vm14, %v2541_v40, 0.0  ;;  %v2507_v32 = vld [vmem:[#allocation31] sm:$0xff]  ;;  %v2508_v30 = vld [vmem:[#allocation31 + $0x8] sm:$0xff] }
 0xfb4   :  { %2549 = vadd.xlane.f32.xlu0 %v2548_v0  ;;  %2546 = vadd.xlane.f32.xlu1 %v2545_v29 }
 0xfb5   :  { %v2536_v42 = vmul.f32 0.0009765625, %v2534_v41  ;;  %2767 = vmatpush1.bf16.msra.mxu1 %v5159_v61 }
 0xfb6   :  { %2768 = vmatprep.subr.bf16.mxu1 %v6109_v47 }
 0xfb7   :  { %v7244_v48 = vsub.f32 %v2502_v4, %v2536_v42  ;;  %v7246_v12 = vsub.f32 %v2499_v59, %v2536_v42 }
 0xfb9   :  { %v2544_v63 = vmul.f32 %v7244_v48, %v7244_v48  ;;  %v2543_v49 = vmul.f32 %v7246_v12, %v7246_v12  ;;  %2769 = vmatpush1.bf16.msra.mxu1 %v5160_v62 }
 0xfba   :  { %2770 = vmatprep.subr.bf16.mxu1 %v6109_v47 }
 0xfbb   :  { %v2554_v50 = vsel %vm1292_vm14, %v2544_v63, 0.0  ;;  %v2551_v7 = vsel %vm1292_vm14, %v2543_v49, 0.0 }
 0xfbc   :  { %2555 = vadd.xlane.f32.xlu0 %v2554_v50  ;;  %2552 = vadd.xlane.f32.xlu1 %v2551_v7 }
 0xfbd   :  { %2771 = vmatpush1.bf16.msra.mxu1 %v5161_v3 }
 0xfbe   :  { %2772 = vmatprep.subr.bf16.mxu1 %v6109_v47 }
 0xfc1   :  { %2773 = vmatpush1.bf16.msra.mxu1 %v5162_v44 }
0x1041   :  { %v2550_v5 = vpop.xlane.xlu0 %2549  ;;  %v2547_v9 = vpop.xlane.xlu1 %2546 }
0x1042   :  { %v2557_v14 = vadd.f32 %v2550_v5, %v2547_v9 }
0x1044   :  { %v2558_v15 = vrot.slane %v2557_v14, 4 }
0x1046   :  { %v2559_v59 = vadd.f32 %v2558_v15, %v2557_v14 }
0x1048   :  { %v2560_v16 = vrot.slane %v2559_v59, 2 }
0x1049   :  { %v2556_v17 = vpop.xlane.xlu0 %2555  ;;  %v2553_v4 = vpop.xlane.xlu1 %2552 }
0x104a   :  { %v2561_v56 = vadd.f32 %v2560_v16, %v2559_v59  ;;  %v2564_v11 = vadd.f32 %v2556_v17, %v2553_v4 }
0x104c   :  { %v2562_v55 = vrot.slane %v2561_v56, 1  ;;  %v2565_v18 = vrot.slane %v2564_v11, 4 }
0x104e   :  { %v2563_v19 = vadd.f32 %v2562_v55, %v2561_v56  ;;  %v2566_v58 = vadd.f32 %v2565_v18, %v2564_v11 }
0x1050   :  { %v2571_v33 = vmul.f32 0.0009765625, %v2563_v19  ;;  %v2567_v13 = vrot.slane %v2566_v58, 2 }
0x1052   :  { %v2573_v2 = vadd.f32 1e-05, %v2571_v33  ;;  %v2568_v22 = vadd.f32 %v2567_v13, %v2566_v58 }
0x1054   :  { %5283 = vrsqrt.f32 %v2573_v2  ;;  %v2569_v47 = vrot.slane %v2568_v22, 1 }
0x1056   :  { %v2570_v34 = vadd.f32 %v2569_v47, %v2568_v22 }
0x1058   :  { %v2572_v10 = vmul.f32 0.0009765625, %v2570_v34 }
0x105a   :  { %v2574_v43 = vadd.f32 1e-05, %v2572_v10 }
0x105c   :  { %5285 = vrsqrt.f32 %v2574_v43 }
0x105e   :  { %v5284_v8 = vpop.eup %5283 }
0x105f   :  { %v2577_v25 = vmul.f32 %v5284_v8, %v7236_v37  ;;  %v2578_v45 = vmul.f32 %v5284_v8, %v7234_v36 }
0x1061   :  { %v2581_v60 = vmul.f32 %v2577_v25, %v2505_v23  ;;  %v2582_v40 = vmul.f32 %v2578_v45, %v2506_v24 }
0x1063   :  { %v2585_v41 = vadd.f32 %v2581_v60, %v2507_v32  ;;  %v2586_v0 = vadd.f32 %v2582_v40, %v2508_v30 }
0x1065   :  { %v2589_v29 = vmax.f32 %v2585_v41, 0.0  ;;  %v2590_v42 = vmax.f32 %v2586_v0, 0.0 }
0x1066   :  { %v5286_v63 = vpop.eup %5285 }
0x1067   :  { %v2594_v49 = vrot.slane %v2590_v42, 7  ;;  %v5091_v50 = vpack.i.bf16 %v2590_v42, %v2589_v29  ;;  %v2593_v7 = vrot.slane %v2589_v29, 7  ;;  %v2579_v28 = vmul.f32 %v5286_v63, %v7246_v12 }
0x1068   :  { %v2580_v37 = vmul.f32 %v5286_v63, %v7244_v48  ;;  %v2606_v57 = vrot.slane %v2590_v42, 1  ;;  %v2605_v61 = vrot.slane %v2589_v29, 1 }
0x1069   :  { %5092 = vrot.lane.b32.xlu1 %v5091_v50, %s6090_s18  ;;  %v2599_v36 = vsel %vm698_vm0, %v2593_v7, %v2594_v49  ;;  %v2583_v52 = vmul.f32 %v2579_v28, %v2505_v23 }
0x106a   :  { %v2584_v51 = vmul.f32 %v2580_v37, %v2506_v24  ;;  %v2611_v56 = vsel %vm735_vm1, %v2605_v61, %v2606_v57 }
0x106b   :  { %v2587_v39 = vadd.f32 %v2583_v52, %v2507_v32 }
0x106c   :  { %v2588_v53 = vadd.f32 %v2584_v51, %v2508_v30 }
0x106d   :  { %2175 = vrot.lane.b32.xlu1 %v7131_v26, %s6090_s18  ;;  %v2591_v38 = vmax.f32 %v2587_v39, 0.0 }
0x106e   :  { %v2592_v54 = vmax.f32 %v2588_v53, 0.0 }
0x106f   :  { %v2595_v48 = vrot.slane %v2591_v38, 7  ;;  %v2607_v5 = vrot.slane %v2591_v38, 1 }
0x1070   :  { %v2596_v62 = vrot.slane %v2592_v54, 7  ;;  %v2608_v12 = vrot.slane %v2592_v54, 1  ;;  %v5096_v3 = vpack.i.bf16 %v2592_v54, %v2591_v38 }
0x1071   :  { %2177 = vrot.lane.b32.xlu1 %v7135_v21, %s6090_s18  ;;  %v2598_v59 = vsel %vm698_vm0, %v2594_v49, %v2595_v48  ;;  %v2610_v16 = vsel %vm735_vm1, %v2606_v57, %v2607_v5 }
0x1072   :  { %5097 = vrot.lane.b32.xlu0 %v5096_v3, %s6090_s18  ;;  %v2600_v9 = vsel %vm698_vm0, %v2596_v62, %v2593_v7  ;;  %v2612_v14 = vsel %vm735_vm1, %v2608_v12, %v2605_v61  ;;  %v2597_v15 = vsel %vm698_vm0, %v2595_v48, %v2596_v62  ;;  %v2609_v17 = vsel %vm735_vm1, %v2607_v5, %v2608_v12 }
0x1073   :  { %v2616_v4 = vsel %vm751_vm5, %v2612_v14, 0.0  ;;  %v2614_v11 = vsel %vm749_vm8, %v2610_v16, 0.0  ;;  %v2601_v13 = vsel %vm707_vm4, %v2600_v9, 0.0  ;;  %v2603_v45 = vsel %vm709_vm6, %v2598_v59, 0.0  ;;  %v4527_v16 = vld [vmem:[#allocation33] ss:$0 sm:$0xff] }
0x1074   :  { %v2640_v55 = vpack.c.bf16 %v2616_v4, %v2609_v17  ;;  %v2638_v18 = vpack.c.bf16 %v2614_v11, %v2611_v56 }
0x1075   :  { %2181 = vrot.lane.b32.xlu1 %v7141_v20, %s6090_s18 }
0x1076   :  { %2179 = vrot.lane.b32.xlu0 %v7133_v35, %s6090_s18  ;;  %4540 = vmatprep.mubr.msk.bf16.mxu1 %vm1292_vm14, %v2638_v18 }
0x10db   :  { %v5093_v19 = vpop.permute.xlu1 %5092 }
0x10dc   :  { %v5095_v58 = vunpack.i.h.bf16 %v5093_v19  ;;  %v5094_v33 = vunpack.i.l.bf16 %v5093_v19 }
0x10de   :  { %v2634_v2 = vsel %vm1292_vm14, %v2599_v36, %v5095_v58  ;;  %v2633_v22 = vsel %vm1292_vm14, %v2601_v13, %v5094_v33 }
0x10df   :  { %v2637_v47 = vpack.c.bf16 %v2634_v2, %v2633_v22  ;;  %v2176_v34 = vpop.permute.xlu1 %2175 }
0x10e0   :  { %v2187_v10 = vsel %vm1292_vm14, %v2176_v34, 0.0 }
0x10e1   :  { %2188 = vadd.xlane.f32.xlu0 %v2187_v10  ;;  %2783 = vmatmul.mubr.bf16.vlgmr.msra.gmra.mrb[16].mxu1 %v2637_v47 }
0x10e2   :  { %4541 = vmatprep.mubr.msk.bf16.mxu1 %vm1292_vm14, %v2640_v55 }
0x10e3   :  { %v2178_v43 = vpop.permute.xlu1 %2177 }
0x10e4   :  { %v5098_v8 = vpop.permute.xlu0 %5097  ;;  %v2190_v23 = vsel %vm1292_vm14, %v2178_v43, 0.0 }
0x10e5   :  { %v5100_v24 = vunpack.i.h.bf16 %v5098_v8  ;;  %v5099_v25 = vunpack.i.l.bf16 %v5098_v8  ;;  %2191 = vadd.xlane.f32.xlu1 %v2190_v23 }
0x10e7   :  { %v2635_v44 = vsel %vm1292_vm14, %v2603_v45, %v5099_v25  ;;  %v2636_v32 = vsel %vm1292_vm14, %v2597_v15, %v5100_v24  ;;  %v2182_v41 = vpop.permute.xlu1 %2181 }
0x10e8   :  { %v2180_v30 = vpop.permute.xlu0 %2179  ;;  %v2639_v60 = vpack.c.bf16 %v2636_v32, %v2635_v44  ;;  %v2196_v0 = vsel %vm1292_vm14, %v2182_v41, 0.0  ;;  %v2167_v32 = vld [vmem:[#allocation25] sm:$0xff] }
0x10e9   :  { %v2193_v40 = vsel %vm1292_vm14, %v2180_v30, 0.0  ;;  %v2169_v30 = vld [vmem:[#allocation27] sm:$0xff] }
0x10ea   :  { %2194 = vadd.xlane.f32.xlu0 %v2193_v40  ;;  %2791 = vmatmul.mubr.bf16.gmra.mrb[20].mxu1 %v2639_v60  ;;  %v2170_v60 = vld [vmem:[#allocation27 + $0x8] sm:$0xff]  ;;  %v2168_v40 = vld [vmem:[#allocation25 + $0x8] sm:$0xff] }
0x10ee   :  { %2197 = vadd.xlane.f32.xlu0 %v2196_v0 }
0x116e   :  { %v2189_v29 = vpop.xlane.xlu0 %2188 }
0x1172   :  { %v2192_v42 = vpop.xlane.xlu1 %2191 }
0x1173   :  { %v2199_v63 = vadd.f32 %v2192_v42, %v2189_v29 }
0x1175   :  { %v2200_v49 = vrot.slane %v2199_v63, 4 }
0x1177   :  { %v2201_v50 = vadd.f32 %v2200_v49, %v2199_v63  ;;  %v2195_v7 = vpop.xlane.xlu0 %2194 }
0x1179   :  { %v2202_v28 = vrot.slane %v2201_v50, 2 }
0x117b   :  { %v2203_v37 = vadd.f32 %v2202_v28, %v2201_v50  ;;  %v2198_v36 = vpop.xlane.xlu0 %2197 }
0x117c   :  { %v2206_v52 = vadd.f32 %v2198_v36, %v2195_v7 }
0x117d   :  { %v2204_v51 = vrot.slane %v2203_v37, 1 }
0x117e   :  { %v2207_v39 = vrot.slane %v2206_v52, 4 }
0x117f   :  { %v2205_v53 = vadd.f32 %v2204_v51, %v2203_v37 }
0x1180   :  { %v2208_v38 = vadd.f32 %v2207_v39, %v2206_v52 }
0x1181   :  { %v2213_v54 = vmul.f32 0.0009765625, %v2205_v53 }
0x1182   :  { %v2209_v57 = vrot.slane %v2208_v38, 2 }
0x1183   :  { %v7326_v61 = vsub.f32 %v7135_v21, %v2213_v54  ;;  %v7329_v62 = vsub.f32 %v7131_v26, %v2213_v54 }
0x1184   :  { %v2210_v12 = vadd.f32 %v2209_v57, %v2208_v38 }
0x1185   :  { %v2220_v3 = vmul.f32 %v7326_v61, %v7326_v61  ;;  %v2219_v48 = vmul.f32 %v7329_v62, %v7329_v62 }
0x1186   :  { %v2211_v5 = vrot.slane %v2210_v12, 1 }
0x1187   :  { %2229 = vrot.lane.b32.xlu0 %v2220_v3, %s6090_s18  ;;  %2227 = vrot.lane.b32.xlu1 %v2219_v48, %s6090_s18 }
0x1188   :  { %v2212_v9 = vadd.f32 %v2211_v5, %v2210_v12 }
0x118a   :  { %v2214_v14 = vmul.f32 0.0009765625, %v2212_v9 }
0x118c   :  { %v7338_v21 = vsub.f32 %v7133_v35, %v2214_v14  ;;  %v7343_v15 = vsub.f32 %v7141_v20, %v2214_v14 }
0x118e   :  { %v2221_v26 = vmul.f32 %v7338_v21, %v7338_v21  ;;  %v2222_v59 = vmul.f32 %v7343_v15, %v7343_v15 }
0x1190   :  { %2231 = vrot.lane.b32.xlu1 %v2221_v26, %s6090_s18 }
0x1194   :  { %2233 = vrot.lane.b32.xlu1 %v2222_v59, %s6090_s18 }
0x11b4   :  { %v2784_v17 = vpop.f32.mrb[16].mxu1 }
0x11b5   :  { %v2785_v4 = vadd.f32 %v4527_v16, %v2784_v17  ;;  %v2786_v56 = vpop.f32.mrb[17].mxu1 }
0x11b6   :  { %v2787_v11 = vpop.f32.mrb[18].mxu1 }
0x11b7   :  { %v2788_v35 = vadd.f32 %v4527_v16, %v2787_v11  ;;  %v2789_v55 = vpop.f32.mrb[19].mxu1  ;;  %v2803_v18 = vsel %vm1292_vm14, %v2785_v4, 0.0 }
0x11b8   :  { %2804 = vadd.xlane.f32.xlu0 %v2803_v18 }
0x11b9   :  { %v2806_v20 = vsel %vm1292_vm14, %v2788_v35, 0.0 }
0x11ba   :  { %2807 = vadd.xlane.f32.xlu1 %v2806_v20 }
0x11bd   :  { %v2792_v19 = vpop.f32.mrb[20].mxu1 }
0x11be   :  { %v2793_v58 = vadd.f32 %v4527_v16, %v2792_v19  ;;  %v2794_v33 = vpop.f32.mrb[21].mxu1 }
0x11bf   :  { %v2795_v13 = vpop.f32.mrb[22].mxu1 }
0x11c0   :  { %v2796_v2 = vadd.f32 %v4527_v16, %v2795_v13  ;;  %v2797_v22 = vpop.f32.mrb[23].mxu1  ;;  %v2809_v47 = vsel %vm1292_vm14, %v2793_v58, 0.0 }
0x11c1   :  { %2810 = vadd.xlane.f32.xlu0 %v2809_v47 }
0x11c2   :  { %v2812_v34 = vsel %vm1292_vm14, %v2796_v2, 0.0 }
0x11c5   :  { %2813 = vadd.xlane.f32.xlu0 %v2812_v34 }
0x11f9   :  { %v2230_v10 = vpop.permute.xlu0 %2229  ;;  %v2228_v43 = vpop.permute.xlu1 %2227 }
0x11fa   :  { %v2242_v8 = vsel %vm1292_vm14, %v2230_v10, 0.0  ;;  %v2239_v23 = vsel %vm1292_vm14, %v2228_v43, 0.0 }
0x11fb   :  { %2240 = vadd.xlane.f32.xlu1 %v2239_v23  ;;  %2243 = vadd.xlane.f32.xlu0 %v2242_v8 }
0x1202   :  { %v2232_v24 = vpop.permute.xlu1 %2231 }
0x1203   :  { %v2245_v25 = vsel %vm1292_vm14, %v2232_v24, 0.0 }
0x1204   :  { %2246 = vadd.xlane.f32.xlu1 %v2245_v25 }
0x1206   :  { %v2234_v45 = vpop.permute.xlu1 %2233 }
0x1207   :  { %v2248_v44 = vsel %vm1292_vm14, %v2234_v45, 0.0 }
0x1208   :  { %2249 = vadd.xlane.f32.xlu0 %v2248_v44 }
0x1215   :  { %2277 = vrot.lane.b32.xlu1 %v2167_v32, %s6090_s18 }
0x1219   :  { %2289 = vrot.lane.b32.xlu1 %v2169_v30, %s6090_s18 }
0x121d   :  { %2291 = vrot.lane.b32.xlu1 %v2170_v60, %s6090_s18 }
0x121e   :  { %2279 = vrot.lane.b32.xlu0 %v2168_v40, %s6090_s18 }
0x1245   :  { %v2805_v41 = vpop.xlane.xlu0 %2804 }
0x1247   :  { %v2808_v0 = vpop.xlane.xlu1 %2807 }
0x1248   :  { %v2815_v29 = vadd.f32 %v2808_v0, %v2805_v41 }
0x124a   :  { %v2816_v42 = vrot.slane %v2815_v29, 4 }
0x124c   :  { %v2817_v63 = vadd.f32 %v2816_v42, %v2815_v29 }
0x124e   :  { %v2818_v49 = vrot.slane %v2817_v63, 2  ;;  %v2811_v50 = vpop.xlane.xlu0 %2810 }
0x1250   :  { %v2819_v7 = vadd.f32 %v2818_v49, %v2817_v63 }
0x1252   :  { %v2820_v28 = vrot.slane %v2819_v7, 1  ;;  %v2814_v37 = vpop.xlane.xlu0 %2813 }
0x1253   :  { %v2822_v36 = vadd.f32 %v2814_v37, %v2811_v50 }
0x1254   :  { %v2821_v52 = vadd.f32 %v2820_v28, %v2819_v7 }
0x1255   :  { %v2823_v51 = vrot.slane %v2822_v36, 4 }
0x1256   :  { %v2829_v39 = vmul.f32 0.0009765625, %v2821_v52 }
0x1257   :  { %v2824_v53 = vadd.f32 %v2823_v51, %v2822_v36  ;;  %v5163_v51 = vld [vmem:[%s7810_s3] ss:$8 sps:$4 sm:$0xff]  }
0x1258   :  { %v7361_v38 = vsub.f32 %v2788_v35, %v2829_v39  ;;  %v7363_v54 = vsub.f32 %v2785_v4, %v2829_v39  ;;  %v5165_v39 = vld [vmem:[%s7810_s3 + $0x4] ss:$8 sps:$4 sm:$0xff]  }
0x1259   :  { %v2825_v57 = vrot.slane %v2824_v53, 2  ;;  %3121 = vmatprep.subr.bf16.mxu0 %v5165_v39 }
0x125a   :  { %v2836_v12 = vmul.f32 %v7361_v38, %v7361_v38  ;;  %v2835_v3 = vmul.f32 %v7363_v54, %v7363_v54  ;;  %3122 = vmatpush1.bf16.msra.mxu0 %v5163_v51  ;;  %v2802_v51 = vld [vmem:[#allocation36 + $0x8] sm:$0xff] }
0x125b   :  { %v2826_v48 = vadd.f32 %v2825_v57, %v2824_v53 }
0x125c   :  { %v2842_v5 = vsel %vm1292_vm14, %v2836_v12, 0.0  ;;  %v2839_v9 = vsel %vm1292_vm14, %v2835_v3, 0.0  ;;  %v5168_v12 = vld [vmem:[%s7810_s3 + $0x14] ss:$8 sps:$4 sm:$0xff]   ;;  %v5166_v3 = vld [vmem:[%s7810_s3 + $0x10] ss:$8 sps:$4 sm:$0xff]  }
0x125d   :  { %v2827_v14 = vrot.slane %v2826_v48, 1  ;;  %2843 = vadd.xlane.f32.xlu1 %v2842_v5  ;;  %2840 = vadd.xlane.f32.xlu0 %v2839_v9  ;;  %v5174_v5 = vld [vmem:[%s7810_s3 + $0x34] ss:$8 sps:$4 sm:$0xff]   ;;  %v5172_v9 = vld [vmem:[%s7810_s3 + $0x30] ss:$8 sps:$4 sm:$0xff]  }
0x125e   :  { %3123 = vmatprep.subr.bf16.mxu0 %v5168_v12  ;;  %v5196_v12 = vld [vmem:[%s7810_s3 + $0xb0] ss:$8 sps:$4 sm:$0xff]  }
0x125f   :  { %v2828_v26 = vadd.f32 %v2827_v14, %v2826_v48  ;;  %3124 = vmatpush1.bf16.msra.mxu0 %v5166_v3  ;;  %v5169_v48 = vld [vmem:[%s7810_s3 + $0x20] ss:$8 sps:$4 sm:$0xff]   ;;  %v5177_v14 = vld [vmem:[%s7810_s3 + $0x44] ss:$8 sps:$4 sm:$0xff]   ;;  %v5198_v3 = vld [vmem:[%s7810_s3 + $0xb4] ss:$8 sps:$4 sm:$0xff]  }
0x1261   :  { %v2830_v59 = vmul.f32 0.0009765625, %v2828_v26  ;;  %v5175_v26 = vld [vmem:[%s7810_s3 + $0x40] ss:$8 sps:$4 sm:$0xff]  }
0x1263   :  { %v7371_v16 = vsub.f32 %v2793_v58, %v2830_v59  ;;  %v7373_v17 = vsub.f32 %v2796_v2, %v2830_v59  ;;  %v5180_v59 = vld [vmem:[%s7810_s3 + $0x54] ss:$8 sps:$4 sm:$0xff]  }
0x1265   :  { %v2837_v4 = vmul.f32 %v7371_v16, %v7371_v16  ;;  %v2838_v11 = vmul.f32 %v7373_v17, %v7373_v17 }
0x1267   :  { %v2845_v56 = vsel %vm1292_vm14, %v2837_v4, 0.0  ;;  %v2848_v35 = vsel %vm1292_vm14, %v2838_v11, 0.0  ;;  %v5178_v4 = vld [vmem:[%s7810_s3 + $0x50] ss:$8 sps:$4 sm:$0xff]   ;;  %v5181_v11 = vld [vmem:[%s7810_s3 + $0x60] ss:$8 sps:$4 sm:$0xff]  }
0x1268   :  { %2846 = vadd.xlane.f32.xlu0 %v2845_v56  ;;  %v5183_v56 = vld [vmem:[%s7810_s3 + $0x64] ss:$8 sps:$4 sm:$0xff]  }
0x126c   :  { %2849 = vadd.xlane.f32.xlu0 %v2848_v35  ;;  %v5186_v35 = vld [vmem:[%s7810_s3 + $0x74] ss:$8 sps:$4 sm:$0xff]  }
0x1288   :  { %v2241_v55 = vpop.xlane.xlu1 %2240  ;;  %v2244_v18 = vpop.xlane.xlu0 %2243 }
0x1289   :  { %v2251_v20 = vadd.f32 %v2244_v18, %v2241_v55  ;;  %v5184_v55 = vld [vmem:[%s7810_s3 + $0x70] ss:$8 sps:$4 sm:$0xff]   ;;  %v5189_v18 = vld [vmem:[%s7810_s3 + $0x84] ss:$8 sps:$4 sm:$0xff]  }
0x128b   :  { %v2252_v19 = vrot.slane %v2251_v20, 4 }
0x128d   :  { %v2253_v58 = vadd.f32 %v2252_v19, %v2251_v20  ;;  %v5187_v20 = vld [vmem:[%s7810_s3 + $0x80] ss:$8 sps:$4 sm:$0xff]   ;;  %v5192_v19 = vld [vmem:[%s7810_s3 + $0x94] ss:$8 sps:$4 sm:$0xff]  }
0x128f   :  { %v2254_v33 = vrot.slane %v2253_v58, 2 }
0x1291   :  { %v2255_v13 = vadd.f32 %v2254_v33, %v2253_v58  ;;  %v2247_v47 = vpop.xlane.xlu1 %2246  ;;  %v5190_v58 = vld [vmem:[%s7810_s3 + $0x90] ss:$8 sps:$4 sm:$0xff]   ;;  %v5195_v33 = vld [vmem:[%s7810_s3 + $0xa4] ss:$8 sps:$4 sm:$0xff]  }
0x1293   :  { %v2256_v2 = vrot.slane %v2255_v13, 1 }
0x1295   :  { %v2257_v22 = vadd.f32 %v2256_v2, %v2255_v13  ;;  %v2250_v34 = vpop.xlane.xlu0 %2249  ;;  %v2278_v25 = vpop.permute.xlu1 %2277  ;;  %v5193_v13 = vld [vmem:[%s7810_s3 + $0xa0] ss:$8 sps:$4 sm:$0xff]  }
0x1296   :  { %v2258_v10 = vadd.f32 %v2250_v34, %v2247_v47 }
0x1297   :  { %v2265_v43 = vmul.f32 0.0009765625, %v2257_v22 }
0x1298   :  { %v2259_v8 = vrot.slane %v2258_v10, 4 }
0x1299   :  { %v2267_v23 = vadd.f32 1e-05, %v2265_v43  ;;  %v2290_v30 = vpop.permute.xlu1 %2289  ;;  %v2280_v0 = vpop.permute.xlu0 %2279 }
0x129a   :  { %v2260_v24 = vadd.f32 %v2259_v8, %v2258_v10 }
0x129b   :  { %5287 = vrsqrt.f32 %v2267_v23 }
0x129c   :  { %v2261_v45 = vrot.slane %v2260_v24, 2 }
0x129d   :  { %v2292_v49 = vpop.permute.xlu1 %2291 }
0x129e   :  { %v2262_v44 = vadd.f32 %v2261_v45, %v2260_v24 }
0x12a0   :  { %v2263_v32 = vrot.slane %v2262_v44, 1 }
0x12a2   :  { %v2264_v60 = vadd.f32 %v2263_v32, %v2262_v44 }
0x12a4   :  { %v2266_v40 = vmul.f32 0.0009765625, %v2264_v60 }
0x12a5   :  { %v5288_v41 = vpop.eup %5287 }
0x12a6   :  { %v2268_v29 = vadd.f32 1e-05, %v2266_v40  ;;  %v2271_v42 = vmul.f32 %v5288_v41, %v7329_v62  ;;  %v2272_v63 = vmul.f32 %v5288_v41, %v7326_v61 }
0x12a8   :  { %5289 = vrsqrt.f32 %v2268_v29  ;;  %v2283_v50 = vmul.f32 %v2278_v25, %v2271_v42  ;;  %v2284_v7 = vmul.f32 %v2280_v0, %v2272_v63 }
0x12aa   :  { %v2295_v28 = vadd.f32 %v2290_v30, %v2283_v50  ;;  %v2296_v37 = vadd.f32 %v2292_v49, %v2284_v7 }
0x12ac   :  { %2891 = vrot.lane.b32.xlu1 %v2295_v28, %s6090_s18  ;;  %2893 = vrot.lane.b32.xlu0 %v2296_v37, %s6090_s18  ;;  %v2799_v37 = vld [vmem:[#allocation34] sm:$0xff] }
0x12b2   :  { %v5290_v36 = vpop.eup %5289 }
0x12b3   :  { %v2273_v52 = vmul.f32 %v5290_v36, %v7338_v21  ;;  %v2274_v62 = vmul.f32 %v5290_v36, %v7343_v15  ;;  %v5171_v21 = vld [vmem:[%s7810_s3 + $0x24] ss:$8 sps:$4 sm:$0xff]  }
0x12b4   :  { %3125 = vmatprep.subr.bf16.mxu0 %v5171_v21  ;;  %v2800_v36 = vld [vmem:[#allocation34 + $0x8] sm:$0xff] }
0x12b5   :  { %v2285_v61 = vmul.f32 %v2278_v25, %v2273_v52  ;;  %v2286_v57 = vmul.f32 %v2280_v0, %v2274_v62  ;;  %3126 = vmatpush1.bf16.msra.mxu0 %v5169_v48 }
0x12b6   :  { %3127 = vmatprep.subr.bf16.mxu0 %v5174_v5 }
0x12b7   :  { %v2297_v53 = vadd.f32 %v2290_v30, %v2285_v61  ;;  %v2298_v15 = vadd.f32 %v2292_v49, %v2286_v57  ;;  %v2801_v61 = vld [vmem:[#allocation36] sm:$0xff] }
0x12b9   :  { %2895 = vrot.lane.b32.xlu1 %v2297_v53, %s6090_s18  ;;  %3128 = vmatpush1.bf16.msra.mxu0 %v5172_v9 }
0x12ba   :  { %3129 = vmatprep.subr.bf16.mxu0 %v5177_v14 }
0x12bd   :  { %2897 = vrot.lane.b32.xlu1 %v2298_v15, %s6090_s18  ;;  %3130 = vmatpush1.bf16.msra.mxu0 %v5175_v26 }
0x12be   :  { %3131 = vmatprep.subr.bf16.mxu0 %v5180_v59 }
0x12c1   :  { %3132 = vmatpush1.bf16.msra.mxu0 %v5178_v4 }
0x12c2   :  { %3133 = vmatprep.subr.bf16.mxu0 %v5183_v56 }
0x12c5   :  { %3134 = vmatpush1.bf16.msra.mxu0 %v5181_v11 }
0x12c6   :  { %3135 = vmatprep.subr.bf16.mxu0 %v5186_v35 }
0x12c9   :  { %3136 = vmatpush1.bf16.msra.mxu0 %v5184_v55 }
0x12ca   :  { %3137 = vmatprep.subr.bf16.mxu0 %v5189_v18 }
0x12cd   :  { %3138 = vmatpush1.bf16.msra.mxu0 %v5187_v20 }
0x12ce   :  { %3139 = vmatprep.subr.bf16.mxu0 %v5192_v19 }
0x12d1   :  { %3140 = vmatpush1.bf16.msra.mxu0 %v5190_v58 }
0x12d2   :  { %3141 = vmatprep.subr.bf16.mxu0 %v5195_v33 }
0x12d5   :  { %3142 = vmatpush1.bf16.msra.mxu0 %v5193_v13 }
0x12d6   :  { %3143 = vmatprep.subr.bf16.mxu0 %v5198_v3  ;;  %v2987_v3 = vsub.s32 0, %v6598_v1 }
0x12d9   :  { %3144 = vmatpush1.bf16.msra.mxu0 %v5196_v12 }
0x12ea   :  { %v2844_v2 = vpop.xlane.xlu1 %2843  ;;  %v2841_v22 = vpop.xlane.xlu0 %2840 }
0x12eb   :  { %v2851_v47 = vadd.f32 %v2844_v2, %v2841_v22 }
0x12ed   :  { %v2852_v34 = vrot.slane %v2851_v47, 4 }
0x12ef   :  { %v2853_v10 = vadd.f32 %v2852_v34, %v2851_v47 }
0x12f1   :  { %v2854_v43 = vrot.slane %v2853_v10, 2 }
0x12f3   :  { %v2855_v8 = vadd.f32 %v2854_v43, %v2853_v10 }
0x12f5   :  { %v2856_v23 = vrot.slane %v2855_v8, 1  ;;  %v2847_v24 = vpop.xlane.xlu0 %2846 }
0x12f7   :  { %v2857_v25 = vadd.f32 %v2856_v23, %v2855_v8 }
0x12f9   :  { %v2850_v45 = vpop.xlane.xlu0 %2849  ;;  %v2865_v32 = vmul.f32 0.0009765625, %v2857_v25 }
0x12fa   :  { %v2858_v44 = vadd.f32 %v2850_v45, %v2847_v24 }
0x12fb   :  { %v2867_v40 = vadd.f32 1e-05, %v2865_v32 }
0x12fc   :  { %v2859_v30 = vrot.slane %v2858_v44, 4 }
0x12fd   :  { %5291 = vrsqrt.f32 %v2867_v40 }
0x12fe   :  { %v2860_v60 = vadd.f32 %v2859_v30, %v2858_v44 }
0x1300   :  { %v2861_v41 = vrot.slane %v2860_v60, 2 }
0x1302   :  { %v2862_v0 = vadd.f32 %v2861_v41, %v2860_v60 }
0x1304   :  { %v2863_v29 = vrot.slane %v2862_v0, 1 }
0x1306   :  { %v2864_v42 = vadd.f32 %v2863_v29, %v2862_v0 }
0x1307   :  { %v5292_v50 = vpop.eup %5291 }
0x1308   :  { %v2866_v63 = vmul.f32 0.0009765625, %v2864_v42  ;;  %v2871_v7 = vmul.f32 %v5292_v50, %v7363_v54  ;;  %v2872_v28 = vmul.f32 %v5292_v50, %v7361_v38 }
0x130a   :  { %v2868_v49 = vadd.f32 1e-05, %v2866_v63  ;;  %v2875_v52 = vmul.f32 %v2871_v7, %v2799_v37  ;;  %v2876_v62 = vmul.f32 %v2872_v28, %v2800_v36 }
0x130c   :  { %5293 = vrsqrt.f32 %v2868_v49  ;;  %v2879_v39 = vadd.f32 %v2875_v52, %v2801_v61  ;;  %v2880_v53 = vadd.f32 %v2876_v62, %v2802_v51 }
0x130e   :  { %v2883_v21 = vmax.f32 %v2879_v39, 0.0  ;;  %v2884_v15 = vmax.f32 %v2880_v53, 0.0 }
0x1316   :  { %v5294_v57 = vpop.eup %5293 }
0x1317   :  { %v2873_v9 = vmul.f32 %v5294_v57, %v7371_v16  ;;  %v2874_v4 = vmul.f32 %v5294_v57, %v7373_v17 }
0x1319   :  { %v2877_v59 = vmul.f32 %v2873_v9, %v2799_v37  ;;  %v2878_v20 = vmul.f32 %v2874_v4, %v2800_v36 }
0x131b   :  { %v2881_v18 = vadd.f32 %v2877_v59, %v2801_v61  ;;  %v2882_v19 = vadd.f32 %v2878_v20, %v2802_v51 }
0x131d   :  { %v2885_v16 = vmax.f32 %v2881_v18, 0.0  ;;  %v2886_v2 = vmax.f32 %v2882_v19, 0.0 }
0x131e   :  { %v2892_v48 = vpop.permute.xlu1 %2891  ;;  %v2894_v5 = vpop.permute.xlu0 %2893 }
0x131f   :  { %v2903_v54 = vadd.f32 %v2892_v48, %v2883_v21  ;;  %v2904_v38 = vadd.f32 %v2894_v5, %v2884_v15 }
0x1321   :  { %v2907_v14 = vmax.f32 %v2903_v54, 0.0  ;;  %v2908_v26 = vmax.f32 %v2904_v38, 0.0 }
0x1323   :  { %v2911_v56 = vrot.slane %v2907_v14, 7  ;;  %v2912_v11 = vrot.slane %v2908_v26, 7  ;;  %v5101_v35 = vpack.i.bf16 %v2908_v26, %v2907_v14  ;;  %v2923_v22 = vrot.slane %v2907_v14, 1 }
0x1324   :  { %v2924_v47 = vrot.slane %v2908_v26, 1  ;;  %v2991_v26 = vsub.s32 1, %v6598_v1 }
0x1325   :  { %v2917_v55 = vsel %vm698_vm0, %v2911_v56, %v2912_v11  ;;  %5102 = vrot.lane.b32.xlu0 %v5101_v35, %s6090_s18 }
0x1326   :  { %v2929_v25 = vsel %vm735_vm1, %v2923_v22, %v2924_v47 }
0x132b   :  { %v2896_v58 = vpop.permute.xlu1 %2895 }
0x132c   :  { %v2905_v33 = vadd.f32 %v2896_v58, %v2885_v16 }
0x132e   :  { %v2909_v13 = vmax.f32 %v2905_v33, 0.0 }
0x132f   :  { %v2898_v34 = vpop.permute.xlu1 %2897 }
0x1330   :  { %v2913_v17 = vrot.slane %v2909_v13, 7  ;;  %v2925_v10 = vrot.slane %v2909_v13, 1  ;;  %v2906_v43 = vadd.f32 %v2898_v34, %v2886_v2 }
0x1332   :  { %v2910_v8 = vmax.f32 %v2906_v43, 0.0  ;;  %v2928_v23 = vsel %vm735_vm1, %v2924_v47, %v2925_v10  ;;  %v2916_v24 = vsel %vm698_vm0, %v2912_v11, %v2913_v17 }
0x1333   :  { %v2932_v45 = vsel %vm749_vm8, %v2928_v23, 0.0  ;;  %v2921_v39 = vsel %vm709_vm6, %v2916_v24, 0.0 }
0x1334   :  { %v2914_v44 = vrot.slane %v2910_v8, 7  ;;  %v2926_v32 = vrot.slane %v2910_v8, 1  ;;  %v5106_v30 = vpack.i.bf16 %v2910_v8, %v2909_v13  ;;  %v2956_v60 = vpack.c.bf16 %v2932_v45, %v2929_v25 }
0x1336   :  { %5107 = vrot.lane.b32.xlu1 %v5106_v30, %s6090_s18  ;;  %4566 = vmatprep.mubr.msk.bf16.mxu0 %vm1292_vm14, %v2956_v60  ;;  %v2918_v40 = vsel %vm698_vm0, %v2914_v44, %v2911_v56  ;;  %v2927_v41 = vsel %vm735_vm1, %v2925_v10, %v2926_v32  ;;  %v2930_v0 = vsel %vm735_vm1, %v2926_v32, %v2923_v22  ;;  %s7811_s18 = sld [smem:[#allocation84_spill]] }
0x1337   :  { %v2934_v29 = vsel %vm751_vm5, %v2930_v0, 0.0  ;;  %v2915_v42 = vsel %vm698_vm0, %v2913_v17, %v2914_v44  ;;  %v2919_v28 = vsel %vm707_vm4, %v2918_v40, 0.0  ;;  %vm7530_vm4 = vmpackc.low %vm749_vm8, %vm6112_vm3 }
0x1338   :  { %v2958_v63 = vpack.c.bf16 %v2934_v29, %v2927_v41  ;;  %vm7554_vm5 = vmpackc.low %vm6112_vm3, %vm709_vm6 }
0x133c   :  { %v2983_v21 = vld [vmem:[%s7811_s18] sm:$0x3] }
0x133d   :  { %v2988_v15 = vrot.slane %v2983_v21, %v2987_v3  ;;  %v7456_v59 = vrot.slane %v2983_v21, %v2991_v26  ;;  %v5211_v3 = vld [vmem:[%s7812_s7 + $0x60] sm:$0xff]   ;;  %v5218_v26 = vld [vmem:[%s7812_s7 + $0x30] sm:$0xff]  }
0x133e   :  { %v5212_v21 = vld [vmem:[%s7812_s7 + $0x20] sm:$0xff]  }
0x1397   :  { %v5103_v49 = vpop.permute.xlu0 %5102 }
0x1398   :  { %v5105_v50 = vunpack.i.h.bf16 %v5103_v49  ;;  %v5104_v7 = vunpack.i.l.bf16 %v5103_v49 }
0x139a   :  { %v2951_v37 = vsel %vm1292_vm14, %v2919_v28, %v5104_v7  ;;  %v2952_v36 = vsel %vm1292_vm14, %v2917_v55, %v5105_v50  ;;  %v5199_v7 = vld [vmem:[%s7812_s7 + $0x40] sm:$0xff]  }
0x139b   :  { %v2955_v52 = vpack.c.bf16 %v2952_v36, %v2951_v37  ;;  %v5200_v28 = vld [vmem:[%s7812_s7] sm:$0xff]   ;;  %4672 = vmatprep.subr.bf16.mxu1 %v5199_v7  ;;  %v5202_v36 = vld [vmem:[%s7812_s7 + $0x48] sm:$0xff]  }
0x139c   :  { %v5201_v37 = vld [vmem:[%s7812_s7 + $0x80] sm:$0xff]   ;;  %4673 = vmatpush3.bf16.msra.mxu1 %v5200_v28 }
0x139d   :  { %3154 = vmatmul.mubr.bf16.vlgmr.msra.gmra.mrb[16].mxu0 %v2955_v52  ;;  %4790 = vmatprep.subr.bf16.mxu0 %v5201_v37  ;;  %v5203_v52 = vld [vmem:[%s7812_s7 + $0x8] sm:$0xff]   ;;  %v3177_v7 = vld [vmem:[#allocation39 + $0x8] sm:$0xff] }
0x139e   :  { %4567 = vmatprep.mubr.msk.bf16.mxu0 %vm1292_vm14, %v2958_v63  ;;  %4791 = vmatpush3.bf16.msra.mxu0 %v5201_v37 }
0x139f   :  { %4674 = vmatprep.subr.bf16.mxu1 %v5202_v36 }
0x13a0   :  { %4675 = vmatpush3.bf16.msra.mxu1 %v5203_v52 }
0x13a8   :  { %v5108_v62 = vpop.permute.xlu1 %5107 }
0x13a9   :  { %v5110_v61 = vunpack.i.h.bf16 %v5108_v62  ;;  %v5109_v51 = vunpack.i.l.bf16 %v5108_v62  ;;  %v5204_v62 = vld [vmem:[%s7812_s7 + $0x88] sm:$0xff]  }
0x13aa   :  { %4792 = vmatprep.subr.bf16.mxu0 %v5204_v62 }
0x13ab   :  { %v2953_v53 = vsel %vm1292_vm14, %v2921_v39, %v5109_v51  ;;  %v2954_v57 = vsel %vm1292_vm14, %v2915_v42, %v5110_v61  ;;  %v5205_v61 = vld [vmem:[%s7812_s7 + $0x50] sm:$0xff]   ;;  %4793 = vmatpush3.bf16.msra.mxu0 %v5204_v62 }
0x13ac   :  { %v2957_v12 = vpack.c.bf16 %v2954_v57, %v2953_v53  ;;  %v5207_v51 = vld [vmem:[%s7812_s7 + $0x90] sm:$0xff]   ;;  %4676 = vmatprep.subr.bf16.mxu1 %v5205_v61  ;;  %v5208_v53 = vld [vmem:[%s7812_s7 + $0x58] sm:$0xff]  }
0x13ad   :  { %v5206_v39 = vld [vmem:[%s7812_s7 + $0x10] sm:$0xff]   ;;  %4794 = vmatprep.subr.bf16.mxu0 %v5207_v51  ;;  %v5209_v57 = vld [vmem:[%s7812_s7 + $0x18] sm:$0xff]  }
0x13ae   :  { %3164 = vmatmul.mubr.bf16.gmra.mrb[20].mxu0 %v2957_v12  ;;  %4677 = vmatpush3.bf16.msra.mxu1 %v5206_v39  ;;  %v5210_v12 = vld [vmem:[%s7812_s7 + $0x98] sm:$0xff]  }
0x13af   :  { %4795 = vmatpush3.bf16.msra.mxu0 %v5207_v51  ;;  %4678 = vmatprep.subr.bf16.mxu1 %v5208_v53 }
0x13b0   :  { %4796 = vmatprep.subr.bf16.mxu0 %v5210_v12 }
0x13b2   :  { %4679 = vmatpush3.bf16.msra.mxu1 %v5209_v57 }
0x13b3   :  { %4797 = vmatpush3.bf16.msra.mxu0 %v5210_v12  ;;  %4680 = vmatprep.subr.bf16.mxu1 %v5211_v3 }
0x13b6   :  { %4681 = vmatpush3.bf16.msra.mxu1 %v5212_v21 }
0x1470   :  { %v3155_v48 = vpop.f32.mrb[16].mxu0 }
0x1471   :  { %v3156_v5 = vadd.f32 %v3155_v48, %v2988_v15  ;;  %v7451_v9 = vpop.f32.mrb[17].mxu0  ;;  %v5214_v48 = vld [vmem:[%s7812_s7 + $0x68] sm:$0xff]  }
0x1472   :  { %v3159_v54 = vpop.f32.mrb[18].mxu0  ;;  %4682 = vmatprep.subr.bf16.mxu1 %v5214_v48 }
0x1473   :  { %v3160_v38 = vadd.f32 %v3159_v54, %v2988_v15  ;;  %v7453_v14 = vpop.f32.mrb[19].mxu0  ;;  %3178 = vadd.xlane.f32.xlu0 %v3156_v5  ;;  %v5216_v54 = vld [vmem:[%s7812_s7 + $0xa8] sm:$0xff]  }
0x1475   :  { %3180 = vadd.xlane.f32.xlu1 %v3160_v38 }
0x1481   :  { %v3165_v4 = vpop.f32.mrb[20].mxu0 }
0x1482   :  { %v3166_v56 = vadd.f32 %v3165_v4, %v2988_v15  ;;  %v3167_v11 = vpop.f32.mrb[21].mxu0  ;;  %v5219_v4 = vld [vmem:[%s7812_s7 + $0xb0] sm:$0xff]  }
0x1483   :  { %v7459_v35 = vadd.f32 %v3167_v11, %v7456_v59  ;;  %v3169_v55 = vpop.f32.mrb[22].mxu0  ;;  %v5221_v11 = vld [vmem:[%s7812_s7 + $0x38] sm:$0xff]  }
0x1484   :  { %v3171_v18 = vpop.f32.mrb[23].mxu0  ;;  %3182 = vadd.xlane.f32.xlu0 %v3166_v56  ;;  %v3170_v16 = vadd.f32 %v3169_v55, %v2988_v15  ;;  %v5213_v15 = vld [vmem:[%s7812_s7 + $0xa0] sm:$0xff]   ;;  %v5222_v55 = vld [vmem:[%s7812_s7 + $0xb8] sm:$0xff]  }
0x1485   :  { %v7462_v20 = vadd.f32 %v3171_v18, %v7456_v59  ;;  %4798 = vmatprep.subr.bf16.mxu0 %v5213_v15 }
0x1486   :  { %4799 = vmatpush3.bf16.msra.mxu0 %v5213_v15 }
0x1487   :  { %4800 = vmatprep.subr.bf16.mxu0 %v5216_v54 }
0x1488   :  { %3184 = vadd.xlane.f32.xlu0 %v3170_v16 }
0x148a   :  { %4801 = vmatpush3.bf16.msra.mxu0 %v5216_v54 }
0x148b   :  { %4802 = vmatprep.subr.bf16.mxu0 %v5219_v4 }
0x148e   :  { %4803 = vmatpush3.bf16.msra.mxu0 %v5219_v4 }
0x148f   :  { %4804 = vmatprep.subr.bf16.mxu0 %v5222_v55 }
0x1492   :  { %4805 = vmatpush3.bf16.msra.mxu0 %v5222_v55 }
0x1500   :  { %v3179_v19 = vpop.xlane.xlu0 %3178 }
0x1502   :  { %v3181_v58 = vpop.xlane.xlu1 %3180 }
0x1503   :  { %v3186_v33 = vadd.f32 %v3181_v58, %v3179_v19 }
0x1505   :  { %v3187_v13 = vrot.slane %v3186_v33, 4 }
0x1507   :  { %v3188_v2 = vadd.f32 %v3187_v13, %v3186_v33 }
0x1509   :  { %v3189_v22 = vrot.slane %v3188_v2, 2 }
0x150b   :  { %v3190_v47 = vadd.f32 %v3189_v22, %v3188_v2 }
0x150d   :  { %v3191_v34 = vrot.slane %v3190_v47, 1 }
0x150f   :  { %v3192_v17 = vadd.f32 %v3191_v34, %v3190_v47 }
0x1511   :  { %v3183_v10 = vpop.xlane.xlu0 %3182  ;;  %v3201_v43 = vmul.f32 0.00048828125, %v3192_v17 }
0x1513   :  { %v7464_v8 = vsub.f32 %v3156_v5, %v3201_v43  ;;  %v7466_v23 = vsub.f32 %v3160_v38, %v3201_v43  ;;  %v5215_v5 = vld [vmem:[%s7812_s7 + $0x28] sm:$0xff]   ;;  %v5217_v38 = vld [vmem:[%s7812_s7 + $0x70] sm:$0xff]  }
0x1514   :  { %4683 = vmatpush3.bf16.msra.mxu1 %v5215_v5 }
0x1515   :  { %v3185_v24 = vpop.xlane.xlu0 %3184  ;;  %v3207_v45 = vmul.f32 %v7464_v8, %v7464_v8  ;;  %v3208_v44 = vmul.f32 %v7466_v23, %v7466_v23  ;;  %4684 = vmatprep.subr.bf16.mxu1 %v5217_v38 }
0x1516   :  { %v3193_v25 = vadd.f32 %v3185_v24, %v3183_v10 }
0x1517   :  { %3211 = vadd.xlane.f32.xlu1 %v3207_v45  ;;  %3213 = vadd.xlane.f32.xlu0 %v3208_v44 }
0x1518   :  { %v3194_v32 = vrot.slane %v3193_v25, 4  ;;  %4685 = vmatpush3.bf16.msra.mxu1 %v5218_v26 }
0x151a   :  { %v3195_v30 = vadd.f32 %v3194_v32, %v3193_v25 }
0x151c   :  { %v3196_v60 = vrot.slane %v3195_v30, 2 }
0x151e   :  { %v3197_v40 = vadd.f32 %v3196_v60, %v3195_v30 }
0x1520   :  { %v3198_v41 = vrot.slane %v3197_v40, 1 }
0x1522   :  { %v3199_v0 = vadd.f32 %v3198_v41, %v3197_v40  ;;  %v3174_v40 = vld [vmem:[#allocation37] sm:$0xff]  ;;  %v3175_v41 = vld [vmem:[#allocation37 + $0x8] sm:$0xff] }
0x1524   :  { %v3202_v29 = vmul.f32 0.00048828125, %v3199_v0 }
0x1526   :  { %v7472_v42 = vsub.f32 %v3170_v16, %v3202_v29  ;;  %v7474_v63 = vsub.f32 %v3166_v56, %v3202_v29  ;;  %v5220_v56 = vld [vmem:[%s7812_s7 + $0x78] sm:$0xff]  }
0x1527   :  { %4686 = vmatprep.subr.bf16.mxu1 %v5220_v56 }
0x1528   :  { %v3210_v49 = vmul.f32 %v7472_v42, %v7472_v42  ;;  %v3209_v50 = vmul.f32 %v7474_v63, %v7474_v63  ;;  %4687 = vmatpush3.bf16.msra.mxu1 %v5221_v11 }
0x152a   :  { %3217 = vadd.xlane.f32.xlu0 %v3210_v49  ;;  %3215 = vadd.xlane.f32.xlu1 %v3209_v50  ;;  %v3176_v50 = vld [vmem:[#allocation39] sm:$0xff] }
0x15a4   :  { %v3212_v18 = vpop.xlane.xlu1 %3211  ;;  %v3214_v16 = vpop.xlane.xlu0 %3213 }
0x15a5   :  { %v3219_v19 = vadd.f32 %v3214_v16, %v3212_v18 }
0x15a7   :  { %v3220_v58 = vrot.slane %v3219_v19, 4 }
0x15a9   :  { %v3221_v33 = vadd.f32 %v3220_v58, %v3219_v19 }
0x15ab   :  { %v3222_v13 = vrot.slane %v3221_v33, 2 }
0x15ad   :  { %v3223_v2 = vadd.f32 %v3222_v13, %v3221_v33 }
0x15af   :  { %v3224_v22 = vrot.slane %v3223_v2, 1 }
0x15b1   :  { %v3225_v47 = vadd.f32 %v3224_v22, %v3223_v2 }
0x15b3   :  { %v3233_v34 = vmul.f32 0.00048828125, %v3225_v47 }
0x15b5   :  { %v3235_v17 = vadd.f32 1e-05, %v3233_v34 }
0x15b7   :  { %v3216_v10 = vpop.xlane.xlu1 %3215  ;;  %v3218_v43 = vpop.xlane.xlu0 %3217  ;;  %5295 = vrsqrt.f32 %v3235_v17 }
0x15b8   :  { %v3226_v24 = vadd.f32 %v3218_v43, %v3216_v10 }
0x15ba   :  { %v3227_v25 = vrot.slane %v3226_v24, 4 }
0x15bc   :  { %v3228_v45 = vadd.f32 %v3227_v25, %v3226_v24 }
0x15be   :  { %v3229_v44 = vrot.slane %v3228_v45, 2 }
0x15c0   :  { %v3230_v32 = vadd.f32 %v3229_v44, %v3228_v45  ;;  %v4568_v44 = vld [vmem:[#allocation43] ss:$0 sm:$0xff] }
0x15c1   :  { %v5296_v30 = vpop.eup %5295 }
0x15c2   :  { %v3231_v60 = vrot.slane %v3230_v32, 1  ;;  %v3239_v0 = vmul.f32 %v5296_v30, %v7464_v8  ;;  %v3240_v29 = vmul.f32 %v5296_v30, %v7466_v23 }
0x15c4   :  { %v3232_v49 = vadd.f32 %v3231_v60, %v3230_v32  ;;  %v3243_v28 = vmul.f32 %v3239_v0, %v3174_v40  ;;  %v3244_v37 = vmul.f32 %v3240_v29, %v3175_v41 }
0x15c6   :  { %v3234_v36 = vmul.f32 0.00048828125, %v3232_v49  ;;  %v3247_v52 = vadd.f32 %v3243_v28, %v3176_v50  ;;  %v3248_v62 = vadd.f32 %v3244_v37, %v3177_v7 }
0x15c8   :  { %v3236_v61 = vadd.f32 1e-05, %v3234_v36  ;;  %v3251_v51 = vmax.f32 %v3247_v52, 0.0  ;;  %v3252_v39 = vmax.f32 %v3248_v62, 0.0 }
0x15ca   :  { %5297 = vrsqrt.f32 %v3236_v61  ;;  %v3356_v53 = vpack.c.bf16 %v3252_v39, %v3251_v51  ;;  %v3331_v48 = vrot.slane %v3251_v51, 7  ;;  %v3332_v5 = vrot.slane %v3252_v39, 7 }
0x15cb   :  { %v3343_v54 = vrot.slane %v3251_v51, 1  ;;  %v3344_v38 = vrot.slane %v3252_v39, 1 }
0x15cc   :  { %3592 = vmatprep.mubr.bf16.mxu1 %v3356_v53  ;;  %v3337_v18 = vsel %vm698_vm0, %v3331_v48, %v3332_v5 }
0x15d4   :  { %v5298_v57 = vpop.eup %5297 }
0x15d5   :  { %v3241_v12 = vmul.f32 %v5298_v57, %v7474_v63  ;;  %v3242_v8 = vmul.f32 %v5298_v57, %v7472_v42  ;;  %v3349_v63 = vsel %vm735_vm1, %v3343_v54, %v3344_v38 }
0x15d7   :  { %v3245_v23 = vmul.f32 %v3241_v12, %v3174_v40  ;;  %v3246_v3 = vmul.f32 %v3242_v8, %v3175_v41 }
0x15d9   :  { %v3249_v21 = vadd.f32 %v3245_v23, %v3176_v50  ;;  %v3250_v15 = vadd.f32 %v3246_v3, %v3177_v7 }
0x15db   :  { %v3253_v26 = vmax.f32 %v3249_v21, 0.0  ;;  %v3254_v4 = vmax.f32 %v3250_v15, 0.0 }
0x15dd   :  { %v3334_v56 = vrot.slane %v3254_v4, 7  ;;  %v3346_v11 = vrot.slane %v3254_v4, 1  ;;  %v3345_v55 = vrot.slane %v3253_v26, 1  ;;  %v3359_v34 = vpack.c.bf16 %v3254_v4, %v3253_v26 }
0x15de   :  { %v3333_v17 = vrot.slane %v3253_v26, 7 }
0x15df   :  { %v3338_v16 = vsel %vm698_vm0, %v3334_v56, %v3331_v48  ;;  %v3347_v19 = vsel %vm735_vm1, %v3345_v55, %v3346_v11  ;;  %v3348_v58 = vsel %vm735_vm1, %v3344_v38, %v3345_v55  ;;  %v3350_v6 = vsel %vm735_vm1, %v3346_v11, %v3343_v54 }
0x15e0   :  { %v4594_v13 = vpack.c.bf16 %v3337_v18, %v3338_v16  ;;  %v4600_v2 = vpack.c.bf16 %v3348_v58, %v3349_v63  ;;  %v4603_v47 = vpack.c.bf16 %v3350_v6, %v3347_v19  ;;  %v3335_v27 = vsel %vm698_vm0, %v3333_v17, %v3334_v56 }
0x15e1   :  { %v3336_v46 = vsel %vm698_vm0, %v3332_v5, %v3333_v17 }
0x15e2   :  { %4595 = vmatmul.mubr.msk.bf16.vlgmr.msra.gmra.mrb[24].mxu1 %vm7513_vm7, %v4594_v13  ;;  %4806 = vmatprep.mubr.msk.bf16.mxu0 %vm7530_vm4, %v4600_v2  ;;  %v4597_v43 = vpack.c.bf16 %v3335_v27, %v3336_v46 }
0x15e3   :  { %3600 = vmatprep.mubr.bf16.mxu1 %v3359_v34  ;;  %4807 = vmatmul.mubr.msk.bf16.vlgmr.msra.gmra.mrb[24].mxu0 %vm7537_vm9, %v4603_v47 }
0x15ea   :  { %4598 = vmatmul.mubr.msk.bf16.gmra.mrb[28].mxu1 %vm7554_vm5, %v4597_v43  ;;  %v7578_v43 = vadd.f32 %v7451_v9, %v7456_v59  ;;  %v5226_v9 = vld [vmem:[%s7821_s14 + $0x48] sm:$0xff]  }
0x16b5   :  { %v4688_v24 = vpop.f32.mrb[24].mxu1 }
0x16b6   :  { %v4689_v25 = vpop.f32.mrb[25].mxu1  ;;  %v4808_v45 = vpop.f32.mrb[24].mxu0 }
0x16b7   :  { %v4690_v32 = vadd.f32 %v4689_v25, %v4688_v24  ;;  %v4691_v30 = vpop.f32.mrb[26].mxu1  ;;  %v3643_v60 = vpop.f32.mrb[25].mxu0  ;;  %v7582_v24 = vadd.f32 %v7453_v14, %v7456_v59  ;;  %v5223_v25 = vld [vmem:[%s7821_s14 + $0x40] sm:$0xff]   ;;  %v5229_v14 = vld [vmem:[%s7821_s14 + $0x50] sm:$0xff]  }
0x16b8   :  { %v4692_v40 = vpop.f32.mrb[27].mxu1  ;;  %v4809_v41 = vpop.f32.mrb[26].mxu0  ;;  %4710 = vmatprep.subr.bf16.mxu1 %v5223_v25  ;;  %v5231_v59 = vld [vmem:[%s7821_s14 + $0x90] sm:$0xff]   ;;  %v3660_v25 = vld [vmem:[#allocation45] sm:$0xff] }
0x16b9   :  { %v3595_v0 = vadd.f32 %v4690_v32, %v4568_v44  ;;  %v4693_v31 = vadd.f32 %v4692_v40, %v4691_v30  ;;  %v3646_v29 = vpop.f32.mrb[27].mxu0  ;;  %v5227_v32 = vld [vmem:[%s7821_s14 + $0x8] sm:$0xff]   ;;  %v5232_v40 = vld [vmem:[%s7821_s14 + $0x58] sm:$0xff]  }
0x16ba   :  { %v5228_v30 = vld [vmem:[%s7821_s14 + $0x88] sm:$0xff]  }
0x16bb   :  { %v3644_v49 = vadd.f32 %v3643_v60, %v3595_v0  ;;  %v3598_v50 = vadd.f32 %v4693_v31, %v4568_v44  ;;  %v5230_v60 = vld [vmem:[%s7821_s14 + $0x10] sm:$0xff]   ;;  %v5233_v0 = vld [vmem:[%s7821_s14 + $0x18] sm:$0xff]   ;;  %v5235_v31 = vld [vmem:[%s7821_s14 + $0x60] sm:$0xff]  }
0x16bd   :  { %v3647_v7 = vadd.f32 %v3646_v29, %v3598_v50  ;;  %3662 = vadd.xlane.f32.xlu1 %v3644_v49  ;;  %v4694_v28 = vpop.f32.mrb[28].mxu1  ;;  %v5237_v29 = vld [vmem:[%s7821_s14 + $0xa0] sm:$0xff]   ;;  %v5238_v50 = vld [vmem:[%s7821_s14 + $0x68] sm:$0xff]  }
0x16be   :  { %v4695_v37 = vpop.f32.mrb[29].mxu1 }
0x16bf   :  { %v4696_v36 = vadd.f32 %v4695_v37, %v4694_v28  ;;  %3664 = vadd.xlane.f32.xlu0 %v3647_v7  ;;  %v4697_v52 = vpop.f32.mrb[30].mxu1  ;;  %v5240_v28 = vld [vmem:[%s7821_s14 + $0xa8] sm:$0xff]   ;;  %v5241_v37 = vld [vmem:[%s7821_s14 + $0x70] sm:$0xff]  }
0x16c0   :  { %v4698_v62 = vpop.f32.mrb[31].mxu1 }
0x16c1   :  { %v3603_v61 = vadd.f32 %v4696_v36, %v4568_v44  ;;  %v4699_v51 = vadd.f32 %v4698_v62, %v4697_v52  ;;  %v5242_v36 = vld [vmem:[%s7821_s14 + $0x30] sm:$0xff]   ;;  %v5244_v62 = vld [vmem:[%s7821_s14 + $0x78] sm:$0xff]  }
0x16c2   :  { %v5243_v52 = vld [vmem:[%s7821_s14 + $0xb0] sm:$0xff]  }
0x16c3   :  { %v3606_v39 = vadd.f32 %v4699_v51, %v4568_v44  ;;  %v3652_v53 = vadd.f32 %v4808_v45, %v3603_v61  ;;  %v5224_v45 = vld [vmem:[%s7821_s14] sm:$0xff]   ;;  %v5245_v61 = vld [vmem:[%s7821_s14 + $0x38] sm:$0xff]  }
0x16c4   :  { %v5225_v44 = vld [vmem:[%s7821_s14 + $0x80] sm:$0xff]   ;;  %4711 = vmatpush3.bf16.msra.mxu1 %v5224_v45  ;;  %v5246_v51 = vld [vmem:[%s7821_s14 + $0xb8] sm:$0xff]   ;;  %v3661_v45 = vld [vmem:[#allocation45 + $0x8] sm:$0xff] }
0x16c5   :  { %3666 = vadd.xlane.f32.xlu1 %v3652_v53  ;;  %v3655_v57 = vadd.f32 %v4809_v41, %v3606_v39  ;;  %4810 = vmatprep.subr.bf16.mxu0 %v5225_v44  ;;  %v5234_v41 = vld [vmem:[%s7821_s14 + $0x98] sm:$0xff]  }
0x16c6   :  { %4811 = vmatpush3.bf16.msra.mxu0 %v5225_v44  ;;  %4712 = vmatprep.subr.bf16.mxu1 %v5226_v9 }
0x16c7   :  { %3668 = vadd.xlane.f32.xlu0 %v3655_v57  ;;  %4812 = vmatprep.subr.bf16.mxu0 %v5228_v30 }
0x16c8   :  { %4713 = vmatpush3.bf16.msra.mxu1 %v5227_v32 }
0x16c9   :  { %4714 = vmatprep.subr.bf16.mxu1 %v5229_v14 }
0x16ca   :  { %4813 = vmatpush3.bf16.msra.mxu0 %v5228_v30 }
0x16cb   :  { %4814 = vmatprep.subr.bf16.mxu0 %v5231_v59 }
0x16cc   :  { %4715 = vmatpush3.bf16.msra.mxu1 %v5230_v60 }
0x16cd   :  { %4716 = vmatprep.subr.bf16.mxu1 %v5232_v40 }
0x16ce   :  { %4815 = vmatpush3.bf16.msra.mxu0 %v5231_v59 }
0x16cf   :  { %4816 = vmatprep.subr.bf16.mxu0 %v5234_v41 }
0x16d0   :  { %4717 = vmatpush3.bf16.msra.mxu1 %v5233_v0 }
0x16d1   :  { %4718 = vmatprep.subr.bf16.mxu1 %v5235_v31 }
0x16d2   :  { %4817 = vmatpush3.bf16.msra.mxu0 %v5234_v41 }
0x16d3   :  { %4818 = vmatprep.subr.bf16.mxu0 %v5237_v29 }
0x16d6   :  { %4819 = vmatpush3.bf16.msra.mxu0 %v5237_v29 }
0x16d7   :  { %4820 = vmatprep.subr.bf16.mxu0 %v5240_v28 }
0x16da   :  { %4821 = vmatpush3.bf16.msra.mxu0 %v5240_v28 }
0x16db   :  { %4822 = vmatprep.subr.bf16.mxu0 %v5243_v52 }
0x16de   :  { %4823 = vmatpush3.bf16.msra.mxu0 %v5243_v52 }
0x16df   :  { %4824 = vmatprep.subr.bf16.mxu0 %v5246_v51 }
0x16e2   :  { %4825 = vmatpush3.bf16.msra.mxu0 %v5246_v51 }
0x174a   :  { %v3663_v12 = vpop.xlane.xlu1 %3662 }
0x174c   :  { %v3665_v8 = vpop.xlane.xlu0 %3664 }
0x174d   :  { %v3670_v23 = vadd.f32 %v3665_v8, %v3663_v12 }
0x174f   :  { %v3671_v3 = vrot.slane %v3670_v23, 4 }
0x1751   :  { %v3672_v21 = vadd.f32 %v3671_v3, %v3670_v23 }
0x1752   :  { %v3667_v48 = vpop.xlane.xlu1 %3666 }
0x1753   :  { %v3673_v15 = vrot.slane %v3672_v21, 2 }
0x1754   :  { %v3669_v5 = vpop.xlane.xlu0 %3668 }
0x1755   :  { %v3674_v54 = vadd.f32 %v3673_v15, %v3672_v21  ;;  %v3677_v38 = vadd.f32 %v3669_v5, %v3667_v48 }
0x1757   :  { %v3675_v26 = vrot.slane %v3674_v54, 1  ;;  %v3678_v4 = vrot.slane %v3677_v38, 4 }
0x1759   :  { %v3676_v56 = vadd.f32 %v3675_v26, %v3674_v54  ;;  %v3679_v11 = vadd.f32 %v3678_v4, %v3677_v38 }
0x175b   :  { %v3684_v55 = vmul.f32 0.00048828125, %v3676_v56  ;;  %v3680_v18 = vrot.slane %v3679_v11, 2 }
0x175d   :  { %v3681_v63 = vadd.f32 %v3680_v18, %v3679_v11  ;;  %v7560_v16 = vsub.f32 %v3647_v7, %v3684_v55  ;;  %v7562_v19 = vsub.f32 %v3644_v49, %v3684_v55  ;;  %v5236_v49 = vld [vmem:[%s7821_s14 + $0x20] sm:$0xff]   ;;  %v5239_v7 = vld [vmem:[%s7821_s14 + $0x28] sm:$0xff]  }
0x175e   :  { %4719 = vmatpush3.bf16.msra.mxu1 %v5236_v49 }
0x175f   :  { %v3682_v58 = vrot.slane %v3681_v63, 1  ;;  %v3691_v6 = vmul.f32 %v7560_v16, %v7560_v16  ;;  %v3690_v13 = vmul.f32 %v7562_v19, %v7562_v19  ;;  %4720 = vmatprep.subr.bf16.mxu1 %v5238_v50 }
0x1761   :  { %v3683_v2 = vadd.f32 %v3682_v58, %v3681_v63  ;;  %3696 = vadd.xlane.f32.xlu0 %v3691_v6  ;;  %3694 = vadd.xlane.f32.xlu1 %v3690_v13 }
0x1762   :  { %4721 = vmatpush3.bf16.msra.mxu1 %v5239_v7 }
0x1763   :  { %v3685_v47 = vmul.f32 0.00048828125, %v3683_v2  ;;  %4722 = vmatprep.subr.bf16.mxu1 %v5241_v37  ;;  %v3658_v2 = vld [vmem:[%s7822_s10] sm:$0xff] }
0x1765   :  { %v7568_v34 = vsub.f32 %v3655_v57, %v3685_v47  ;;  %v7570_v17 = vsub.f32 %v3652_v53, %v3685_v47  ;;  %v3659_v47 = vld [vmem:[%s7822_s10 + $0x8] sm:$0xff] }
0x1766   :  { %4723 = vmatpush3.bf16.msra.mxu1 %v5242_v36 }
0x1767   :  { %v3693_v27 = vmul.f32 %v7568_v34, %v7568_v34  ;;  %v3692_v46 = vmul.f32 %v7570_v17, %v7570_v17  ;;  %4724 = vmatprep.subr.bf16.mxu1 %v5244_v62 }
0x1769   :  { %3700 = vadd.xlane.f32.xlu0 %v3693_v27  ;;  %3698 = vadd.xlane.f32.xlu1 %v3692_v46 }
0x176a   :  { %4725 = vmatpush3.bf16.msra.mxu1 %v5245_v61 }
0x176d   :  { %3261 = vadd.xlane.f32.xlu0 %v7582_v24  ;;  %3259 = vadd.xlane.f32.xlu1 %v7578_v43 }
0x17ee   :  { %v3697_v39 = vpop.xlane.xlu0 %3696  ;;  %v3695_v53 = vpop.xlane.xlu1 %3694 }
0x17ef   :  { %v3702_v57 = vadd.f32 %v3697_v39, %v3695_v53 }
0x17f1   :  { %v3703_v12 = vrot.slane %v3702_v57, 4 }
0x17f3   :  { %v3704_v8 = vadd.f32 %v3703_v12, %v3702_v57 }
0x17f5   :  { %v3705_v23 = vrot.slane %v3704_v8, 2 }
0x17f6   :  { %v3701_v3 = vpop.xlane.xlu0 %3700  ;;  %v3699_v21 = vpop.xlane.xlu1 %3698 }
0x17f7   :  { %v3706_v15 = vadd.f32 %v3705_v23, %v3704_v8  ;;  %v3709_v48 = vadd.f32 %v3701_v3, %v3699_v21 }
0x17f9   :  { %v3707_v5 = vrot.slane %v3706_v15, 1  ;;  %v3710_v54 = vrot.slane %v3709_v48, 4 }
0x17fa   :  { %v3260_v42 = vpop.xlane.xlu1 %3259 }
0x17fb   :  { %v3708_v38 = vadd.f32 %v3707_v5, %v3706_v15  ;;  %v3711_v26 = vadd.f32 %v3710_v54, %v3709_v48  ;;  %v3262_v54 = vpop.xlane.xlu0 %3261 }
0x17fd   :  { %v3716_v4 = vmul.f32 0.00048828125, %v3708_v38  ;;  %v3712_v56 = vrot.slane %v3711_v26, 2  ;;  %v3267_v38 = vadd.f32 %v3262_v54, %v3260_v42 }
0x17ff   :  { %v3718_v11 = vadd.f32 1e-05, %v3716_v4  ;;  %v3713_v55 = vadd.f32 %v3712_v56, %v3711_v26  ;;  %v3268_v26 = vrot.slane %v3267_v38, 4 }
0x1801   :  { %5299 = vrsqrt.f32 %v3718_v11  ;;  %v3714_v18 = vrot.slane %v3713_v55, 1  ;;  %v3269_v33 = vadd.f32 %v3268_v26, %v3267_v38 }
0x1803   :  { %v3715_v63 = vadd.f32 %v3714_v18, %v3713_v55  ;;  %v3270_v4 = vrot.slane %v3269_v33, 2  ;;  %v4605_v55 = vld [vmem:[#allocation46] ss:$0 sm:$0xff] }
0x1805   :  { %v3717_v58 = vmul.f32 0.00048828125, %v3715_v63  ;;  %v3271_v18 = vadd.f32 %v3270_v4, %v3269_v33 }
0x1807   :  { %v3719_v6 = vadd.f32 1e-05, %v3717_v58 }
0x1809   :  { %5301 = vrsqrt.f32 %v3719_v6 }
0x180b   :  { %v5300_v13 = vpop.eup %5299 }
0x180c   :  { %v3722_v27 = vmul.f32 %v5300_v13, %v7562_v19  ;;  %v3723_v46 = vmul.f32 %v5300_v13, %v7560_v16 }
0x180e   :  { %v3726_v44 = vmul.f32 %v3722_v27, %v3658_v2  ;;  %v3727_v9 = vmul.f32 %v3723_v46, %v3659_v47  ;;  %v3272_v27 = vrot.slane %v3271_v18, 1 }
0x1810   :  { %v3730_v32 = vadd.f32 %v3726_v44, %v3660_v25  ;;  %v3731_v30 = vadd.f32 %v3727_v9, %v3661_v45 }
0x1812   :  { %v3734_v14 = vmax.f32 %v3730_v32, 0.0  ;;  %v3735_v59 = vmax.f32 %v3731_v30, 0.0  ;;  %v3273_v32 = vadd.f32 %v3272_v27, %v3271_v18  ;;  %v5247_v27 = vld [vmem:[%s7823_s19] sm:$0xff]  }
0x1813   :  { %v5302_v60 = vpop.eup %5301 }
0x1814   :  { %v3724_v40 = vmul.f32 %v5302_v60, %v7570_v17  ;;  %v3725_v41 = vmul.f32 %v5302_v60, %v7568_v34  ;;  %v3763_v0 = vpack.c.bf16 %v3735_v59, %v3734_v14  ;;  %v3738_v16 = vrot.slane %v3734_v14, 7 }
0x1815   :  { %v3739_v50 = vrot.slane %v3735_v59, 7  ;;  %v3750_v7 = vrot.slane %v3734_v14, 1  ;;  %v3751_v28 = vrot.slane %v3735_v59, 1 }
0x1816   :  { %v3728_v31 = vmul.f32 %v3724_v40, %v3658_v2  ;;  %v3729_v29 = vmul.f32 %v3725_v41, %v3659_v47  ;;  %3999 = vmatprep.mubr.bf16.mxu1 %v3763_v0  ;;  %v3281_v41 = vmul.f32 0.00048828125, %v3273_v32  ;;  %v5254_v32 = vld [vmem:[%s7823_s19 + $0x38] sm:$0xff]  }
0x1817   :  { %v3744_v17 = vsel %vm698_vm0, %v3738_v16, %v3739_v50  ;;  %v3756_v34 = vsel %vm735_vm1, %v3750_v7, %v3751_v28 }
0x1818   :  { %v3732_v19 = vadd.f32 %v3728_v31, %v3660_v25  ;;  %v3733_v49 = vadd.f32 %v3729_v29, %v3661_v45 }
0x181a   :  { %v3736_v37 = vmax.f32 %v3732_v19, 0.0  ;;  %v3737_v36 = vmax.f32 %v3733_v49, 0.0  ;;  %v7641_v19 = vsub.f32 %v7578_v43, %v3281_v41  ;;  %v7645_v49 = vsub.f32 %v7582_v24, %v3281_v41  ;;  %v5260_v41 = vld [vmem:[%s6348_s17 + $0x28] sm:$0xff]  }
0x181c   :  { %v3741_v52 = vrot.slane %v3737_v36, 7  ;;  %v3753_v62 = vrot.slane %v3737_v36, 1  ;;  %v3752_v61 = vrot.slane %v3736_v37, 1  ;;  %v3766_v3 = vpack.c.bf16 %v3737_v36, %v3736_v37 }
0x181d   :  { %v3740_v21 = vrot.slane %v3736_v37, 7 }
0x181e   :  { %v3745_v51 = vsel %vm698_vm0, %v3741_v52, %v3738_v16  ;;  %v3755_v39 = vsel %vm735_vm1, %v3751_v28, %v3752_v61  ;;  %v3754_v53 = vsel %vm735_vm1, %v3752_v61, %v3753_v62  ;;  %v3757_v57 = vsel %vm735_vm1, %v3753_v62, %v3750_v7 }
0x181f   :  { %v4631_v12 = vpack.c.bf16 %v3744_v17, %v3745_v51  ;;  %v4637_v8 = vpack.c.bf16 %v3755_v39, %v3756_v34  ;;  %v4640_v23 = vpack.c.bf16 %v3757_v57, %v3754_v53  ;;  %v3742_v15 = vsel %vm698_vm0, %v3740_v21, %v3741_v52 }
0x1820   :  { %v3743_v48 = vsel %vm698_vm0, %v3739_v50, %v3740_v21  ;;  %v3287_v16 = vmul.f32 %v7641_v19, %v7641_v19  ;;  %v3288_v50 = vmul.f32 %v7645_v49, %v7645_v49  ;;  %vm6114_vm0 = vmmov 0  }
0x1821   :  { %4632 = vmatmul.mubr.msk.bf16.vlgmr.msra.gmra.mrb[32].mxu1 %vm7513_vm7, %v4631_v12  ;;  %4826 = vmatprep.mubr.msk.bf16.mxu0 %vm7530_vm4, %v4637_v8  ;;  %v4634_v5 = vpack.c.bf16 %v3742_v15, %v3743_v48  ;;  %vm4199_vm1 = vcmask 1041409  }
0x1822   :  { %4007 = vmatprep.mubr.bf16.mxu1 %v3766_v3  ;;  %4827 = vmatmul.mubr.msk.bf16.vlgmr.msra.gmra.mrb[28].mxu0 %vm7537_vm9, %v4640_v23 }
0x1829   :  { %4635 = vmatmul.mubr.msk.bf16.gmra.mrb[36].mxu1 %vm7554_vm5, %v4634_v5 }
0x18f4   :  { %v4726_v56 = vpop.f32.mrb[32].mxu1 }
0x18f5   :  { %v4727_v11 = vpop.f32.mrb[33].mxu1  ;;  %v4828_v22 = vpop.f32.mrb[28].mxu0 }
0x18f6   :  { %v4728_v63 = vadd.f32 %v4727_v11, %v4726_v56  ;;  %v4729_v58 = vpop.f32.mrb[34].mxu1  ;;  %v4050_v6 = vpop.f32.mrb[29].mxu0 }
0x18f7   :  { %v4730_v1 = vpop.f32.mrb[35].mxu1  ;;  %v4829_v13 = vpop.f32.mrb[30].mxu0 }
0x18f8   :  { %v4002_v2 = vadd.f32 %v4728_v63, %v4605_v55  ;;  %v4731_v47 = vadd.f32 %v4730_v1, %v4729_v58  ;;  %v4053_v10 = vpop.f32.mrb[31].mxu0 }
0x18fa   :  { %v4051_v46 = vadd.f32 %v4050_v6, %v4002_v2  ;;  %v4005_v25 = vadd.f32 %v4731_v47, %v4605_v55 }
0x18fc   :  { %v4054_v45 = vadd.f32 %v4053_v10, %v4005_v25  ;;  %4069 = vadd.xlane.f32.xlu1 %v4051_v46  ;;  %v4732_v44 = vpop.f32.mrb[36].mxu1  ;;  %v5250_v25 = vld [vmem:[%s7823_s19 + $0x18] sm:$0xff]  }
0x18fd   :  { %v4733_v9 = vpop.f32.mrb[37].mxu1 }
0x18fe   :  { %v4734_v30 = vadd.f32 %v4733_v9, %v4732_v44  ;;  %4071 = vadd.xlane.f32.xlu0 %v4054_v45  ;;  %v4735_v14 = vpop.f32.mrb[38].mxu1  ;;  %v5252_v44 = vld [vmem:[%s7823_s19 + $0x28] sm:$0xff]   ;;  %v5253_v9 = vld [vmem:[%s7823_s19 + $0x30] sm:$0xff]  }
0x18ff   :  { %v4736_v59 = vpop.f32.mrb[39].mxu1 }
0x1900   :  { %v4010_v60 = vadd.f32 %v4734_v30, %v4605_v55  ;;  %v4737_v40 = vadd.f32 %v4736_v59, %v4735_v14  ;;  %v5255_v30 = vld [vmem:[%s6348_s17] sm:$0xff]   ;;  %v5256_v14 = vld [vmem:[%s6348_s17 + $0x8] sm:$0xff]   ;;  %v5257_v59 = vld [vmem:[%s6348_s17 + $0x10] sm:$0xff]  }
0x1902   :  { %v4013_v0 = vadd.f32 %v4737_v40, %v4605_v55  ;;  %v4059_v31 = vadd.f32 %v4828_v22, %v4010_v60  ;;  %v5258_v60 = vld [vmem:[%s6348_s17 + $0x18] sm:$0xff]   ;;  %v5259_v40 = vld [vmem:[%s6348_s17 + $0x20] sm:$0xff]  }
0x1904   :  { %4073 = vadd.xlane.f32.xlu1 %v4059_v31  ;;  %v4062_v29 = vadd.f32 %v4829_v13, %v4013_v0 }
0x1906   :  { %4075 = vadd.xlane.f32.xlu0 %v4062_v29 }
0x1908   :  { %3263 = vadd.xlane.f32.xlu1 %v7459_v35 }
0x190a   :  { %3265 = vadd.xlane.f32.xlu0 %v7462_v20 }
0x190c   :  { %3291 = vadd.xlane.f32.xlu1 %v3287_v16 }
0x190e   :  { %3293 = vadd.xlane.f32.xlu0 %v3288_v50 }
0x1989   :  { %v4070_v7 = vpop.xlane.xlu1 %4069 }
0x198b   :  { %v4072_v28 = vpop.xlane.xlu0 %4071 }
0x198c   :  { %v4077_v37 = vadd.f32 %v4072_v28, %v4070_v7 }
0x198e   :  { %v4078_v43 = vrot.slane %v4077_v37, 4 }
0x1990   :  { %v4079_v36 = vadd.f32 %v4078_v43, %v4077_v37 }
0x1991   :  { %v4074_v52 = vpop.xlane.xlu1 %4073 }
0x1992   :  { %v4080_v62 = vrot.slane %v4079_v36, 2 }
0x1993   :  { %v4076_v61 = vpop.xlane.xlu0 %4075 }
0x1994   :  { %v4081_v24 = vadd.f32 %v4080_v62, %v4079_v36  ;;  %v4084_v17 = vadd.f32 %v4076_v61, %v4074_v52 }
0x1995   :  { %v3264_v39 = vpop.xlane.xlu1 %3263 }
0x1996   :  { %v4082_v34 = vrot.slane %v4081_v24, 1  ;;  %v4085_v51 = vrot.slane %v4084_v17, 4 }
0x1997   :  { %v3266_v53 = vpop.xlane.xlu0 %3265 }
0x1998   :  { %v4083_v57 = vadd.f32 %v4082_v34, %v4081_v24  ;;  %v4086_v12 = vadd.f32 %v4085_v51, %v4084_v17  ;;  %v3274_v8 = vadd.f32 %v3266_v53, %v3264_v39 }
0x199a   :  { %v4091_v23 = vmul.f32 0.00048828125, %v4083_v57  ;;  %v4087_v3 = vrot.slane %v4086_v12, 2  ;;  %v3275_v21 = vrot.slane %v3274_v8, 4 }
0x199b   :  { %v3294_v0 = vpop.xlane.xlu0 %3293 }
0x199c   :  { %v4088_v15 = vadd.f32 %v4087_v3, %v4086_v12  ;;  %v3276_v48 = vadd.f32 %v3275_v21, %v3274_v8  ;;  %v7652_v5 = vsub.f32 %v4054_v45, %v4091_v23  ;;  %v7654_v54 = vsub.f32 %v4051_v46, %v4091_v23  ;;  %v5251_v45 = vld [vmem:[%s7823_s19 + $0x20] sm:$0xff]  }
0x199d   :  { %v6113_v46 = vmov 0.0  }
0x199e   :  { %v4089_v42 = vrot.slane %v4088_v15, 1  ;;  %v3277_v38 = vrot.slane %v3276_v48, 2  ;;  %v4098_v26 = vmul.f32 %v7652_v5, %v7652_v5  ;;  %v4097_v33 = vmul.f32 %v7654_v54, %v7654_v54  ;;  %4830 = vmatprep.subr.bf16.mxu1 %v6113_v46  ;;  %4850 = vmatprep.subr.bf16.mxu0 %v6113_v46 }
0x199f   :  { %4831 = vmatpush3.bf16.msra.mxu1 %v5247_v27  ;;  %4846 = vmatprep.mubr.msk.bf16.mxu1 %vm6114_vm0, %v6113_v46 }
0x19a0   :  { %v4090_v4 = vadd.f32 %v4089_v42, %v4088_v15  ;;  %v3278_v56 = vadd.f32 %v3277_v38, %v3276_v48  ;;  %4103 = vadd.xlane.f32.xlu0 %v4098_v26  ;;  %4101 = vadd.xlane.f32.xlu1 %v4097_v33 }
0x19a1   :  { %4832 = vmatprep.subr.bf16.mxu1 %v6113_v46  ;;  %4866 = vmatprep.mubr.msk.bf16.mxu0 %vm6114_vm0, %v6113_v46 }
0x19a2   :  { %v4092_v11 = vmul.f32 0.00048828125, %v4090_v4  ;;  %v3279_v22 = vrot.slane %v3278_v56, 1  ;;  %4851 = vmatpush3.bf16.msra.mxu0 %v5255_v30  ;;  %v3256_v30 = vld [vmem:[#allocation40 + $0x8] sm:$0xff] }
0x19a3   :  { %4852 = vmatprep.subr.bf16.mxu0 %v6113_v46 }
0x19a4   :  { %v3280_v55 = vadd.f32 %v3279_v22, %v3278_v56  ;;  %v7660_v18 = vsub.f32 %v4062_v29, %v4092_v11  ;;  %v7662_v63 = vsub.f32 %v4059_v31, %v4092_v11  ;;  %v3292_v31 = vpop.xlane.xlu1 %3291 }
0x19a5   :  { %v3299_v29 = vadd.f32 %v3294_v0, %v3292_v31  ;;  %v4068_v0 = vld [vmem:[#allocation48 + $0x8] sm:$0xff] }
0x19a6   :  { %v3282_v58 = vmul.f32 0.00048828125, %v3280_v55  ;;  %v4100_v6 = vmul.f32 %v7660_v18, %v7660_v18  ;;  %v4099_v1 = vmul.f32 %v7662_v63, %v7662_v63  ;;  %4853 = vmatpush3.bf16.msra.mxu0 %v5256_v14  ;;  %v4065_v14 = vld [vmem:[%s7824_s11] sm:$0xff] }
0x19a7   :  { %4854 = vmatprep.subr.bf16.mxu0 %v6113_v46  ;;  %v3300_v16 = vrot.slane %v3299_v29, 4 }
0x19a8   :  { %4107 = vadd.xlane.f32.xlu0 %v4100_v6  ;;  %4105 = vadd.xlane.f32.xlu1 %v4099_v1  ;;  %v7669_v13 = vsub.f32 %v7462_v20, %v3282_v58  ;;  %v7672_v2 = vsub.f32 %v7459_v35, %v3282_v58  ;;  %v5248_v35 = vld [vmem:[%s7823_s19 + $0x8] sm:$0xff]   ;;  %v5249_v20 = vld [vmem:[%s7823_s19 + $0x10] sm:$0xff]  }
0x19a9   :  { %4833 = vmatpush3.bf16.msra.mxu1 %v5248_v35  ;;  %v3301_v50 = vadd.f32 %v3300_v16, %v3299_v29 }
0x19aa   :  { %v3290_v47 = vmul.f32 %v7669_v13, %v7669_v13  ;;  %v3289_v10 = vmul.f32 %v7672_v2, %v7672_v2  ;;  %4834 = vmatprep.subr.bf16.mxu1 %v6113_v46  ;;  %4855 = vmatpush3.bf16.msra.mxu0 %v5257_v59  ;;  %v4066_v59 = vld [vmem:[%s7824_s11 + $0x8] sm:$0xff] }
0x19ab   :  { %4856 = vmatprep.subr.bf16.mxu0 %v6113_v46  ;;  %v3302_v7 = vrot.slane %v3301_v50, 2 }
0x19ac   :  { %3297 = vadd.xlane.f32.xlu0 %v3290_v47  ;;  %3295 = vadd.xlane.f32.xlu1 %v3289_v10 }
0x19ad   :  { %4835 = vmatpush3.bf16.msra.mxu1 %v5249_v20  ;;  %v3303_v28 = vadd.f32 %v3302_v7, %v3301_v50  ;;  %v3257_v7 = vld [vmem:[#allocation42] sm:$0xff] }
0x19ae   :  { %4836 = vmatprep.subr.bf16.mxu1 %v6113_v46  ;;  %4857 = vmatpush3.bf16.msra.mxu0 %v5258_v60 }
0x19af   :  { %4858 = vmatprep.subr.bf16.mxu0 %v6113_v46  ;;  %v3304_v37 = vrot.slane %v3303_v28, 1 }
0x19b1   :  { %4837 = vmatpush3.bf16.msra.mxu1 %v5250_v25  ;;  %v3305_v62 = vadd.f32 %v3304_v37, %v3303_v28  ;;  %v3255_v25 = vld [vmem:[#allocation40] sm:$0xff] }
0x19b2   :  { %4838 = vmatprep.subr.bf16.mxu1 %v6113_v46  ;;  %4859 = vmatpush3.bf16.msra.mxu0 %v5259_v40 }
0x19b3   :  { %4860 = vmatprep.subr.bf16.mxu0 %v6113_v46  ;;  %v3313_v17 = vmul.f32 0.00048828125, %v3305_v62 }
0x19b5   :  { %4839 = vmatpush3.bf16.msra.mxu1 %v5251_v45  ;;  %v3315_v8 = vadd.f32 1e-05, %v3313_v17 }
0x19b6   :  { %4840 = vmatprep.subr.bf16.mxu1 %v6113_v46  ;;  %4861 = vmatpush3.bf16.msra.mxu0 %v5260_v41  ;;  %v4067_v41 = vld [vmem:[#allocation48] sm:$0xff] }
0x19b7   :  { %4862 = vmatprep.subr.bf16.mxu0 %v6113_v46  ;;  %5303 = vrsqrt.f32 %v3315_v8 }
0x19b9   :  { %4841 = vmatpush3.bf16.msra.mxu1 %v5252_v44 }
0x19ba   :  { %4842 = vmatprep.subr.bf16.mxu1 %v6113_v46 }
0x19bd   :  { %4843 = vmatpush3.bf16.msra.mxu1 %v5253_v9 }
0x19be   :  { %4844 = vmatprep.subr.bf16.mxu1 %v6113_v46 }
0x19c1   :  { %4845 = vmatpush3.bf16.msra.mxu1 %v5254_v32  ;;  %v5304_v35 = vpop.eup %5303 }
0x19c2   :  { %v3319_v45 = vmul.f32 %v5304_v35, %v7641_v19  ;;  %v3320_v44 = vmul.f32 %v5304_v35, %v7645_v49  ;;  %v3258_v19 = vld [vmem:[#allocation42 + $0x8] sm:$0xff] }
0x19c4   :  { %v3323_v31 = vmul.f32 %v3319_v45, %v3255_v25  ;;  %v3324_v29 = vmul.f32 %v3320_v44, %v3256_v30 }
0x1a2d   :  { %v4104_v43 = vpop.xlane.xlu0 %4103  ;;  %v4102_v36 = vpop.xlane.xlu1 %4101 }
0x1a2e   :  { %v4109_v52 = vadd.f32 %v4104_v43, %v4102_v36  ;;  %v3327_v43 = vadd.f32 %v3323_v31, %v3257_v7  ;;  %v3328_v36 = vadd.f32 %v3324_v29, %v3258_v19 }
0x1a30   :  { %v4110_v61 = vrot.slane %v4109_v52, 4 }
0x1a32   :  { %v4111_v24 = vadd.f32 %v4110_v61, %v4109_v52 }
0x1a34   :  { %v4112_v34 = vrot.slane %v4111_v24, 2 }
0x1a35   :  { %v4108_v51 = vpop.xlane.xlu0 %4107  ;;  %v4106_v39 = vpop.xlane.xlu1 %4105 }
0x1a36   :  { %v4116_v53 = vadd.f32 %v4108_v51, %v4106_v39  ;;  %v4113_v57 = vadd.f32 %v4112_v34, %v4111_v24 }
0x1a38   :  { %v4117_v12 = vrot.slane %v4116_v53, 4  ;;  %v4114_v23 = vrot.slane %v4113_v57, 1 }
0x1a39   :  { %v3298_v3 = vpop.xlane.xlu0 %3297  ;;  %v3296_v21 = vpop.xlane.xlu1 %3295 }
0x1a3a   :  { %v4118_v15 = vadd.f32 %v4117_v12, %v4116_v53  ;;  %v3306_v48 = vadd.f32 %v3298_v3, %v3296_v21  ;;  %v4115_v42 = vadd.f32 %v4114_v23, %v4113_v57 }
0x1a3c   :  { %v4119_v38 = vrot.slane %v4118_v15, 2  ;;  %v3307_v26 = vrot.slane %v3306_v48, 4  ;;  %v4123_v33 = vmul.f32 0.00048828125, %v4115_v42 }
0x1a3e   :  { %v4120_v4 = vadd.f32 %v4119_v38, %v4118_v15  ;;  %v3308_v56 = vadd.f32 %v3307_v26, %v3306_v48  ;;  %v4125_v11 = vadd.f32 1e-05, %v4123_v33 }
0x1a40   :  { %v4121_v22 = vrot.slane %v4120_v4, 1  ;;  %v3309_v55 = vrot.slane %v3308_v56, 2  ;;  %5305 = vrsqrt.f32 %v4125_v11 }
0x1a42   :  { %v4122_v58 = vadd.f32 %v4121_v22, %v4120_v4  ;;  %v3310_v6 = vadd.f32 %v3309_v55, %v3308_v56 }
0x1a44   :  { %v4124_v1 = vmul.f32 0.00048828125, %v4122_v58  ;;  %v3311_v47 = vrot.slane %v3310_v6, 1 }
0x1a46   :  { %v4126_v10 = vadd.f32 1e-05, %v4124_v1  ;;  %v3312_v27 = vadd.f32 %v3311_v47, %v3310_v6 }
0x1a48   :  { %5307 = vrsqrt.f32 %v4126_v10  ;;  %v3314_v20 = vmul.f32 0.00048828125, %v3312_v27 }
0x1a4a   :  { %v3316_v9 = vadd.f32 1e-05, %v3314_v20  ;;  %v5306_v32 = vpop.eup %5305 }
0x1a4b   :  { %v4129_v60 = vmul.f32 %v5306_v32, %v7654_v54  ;;  %v4130_v40 = vmul.f32 %v5306_v32, %v7652_v5 }
0x1a4c   :  { %5309 = vrsqrt.f32 %v3316_v9 }
0x1a4d   :  { %v4133_v16 = vmul.f32 %v4129_v60, %v4065_v14  ;;  %v4134_v50 = vmul.f32 %v4130_v40, %v4066_v59  ;;  %v5262_v60 = vld [vmem:[%s6348_s17 + $0x38] sm:$0xff]   ;;  %v4642_v40 = vld [vmem:[%s6343_s9] ss:$0 sm:$0xff] }
0x1a4f   :  { %v4137_v28 = vadd.f32 %v4133_v16, %v4067_v41  ;;  %v4138_v49 = vadd.f32 %v4134_v50, %v4068_v0 }
0x1a51   :  { %v4141_v52 = vmax.f32 %v4137_v28, 0.0  ;;  %v4142_v62 = vmax.f32 %v4138_v49, 0.0 }
0x1a52   :  { %v5308_v37 = vpop.eup %5307 }
0x1a53   :  { %v4131_v54 = vmul.f32 %v5308_v37, %v7662_v63  ;;  %v4132_v5 = vmul.f32 %v5308_v37, %v7660_v18  ;;  %v4145_v61 = vadd.f32 %v4141_v52, %v3327_v43  ;;  %v4146_v24 = vadd.f32 %v4142_v62, %v3328_v36 }
0x1a55   :  { %v4135_v17 = vmul.f32 %v4131_v54, %v4065_v14  ;;  %v4136_v34 = vmul.f32 %v4132_v5, %v4066_v59  ;;  %v4149_v39 = vmax.f32 %v4145_v61, 0.0  ;;  %v4150_v53 = vmax.f32 %v4146_v24, 0.0  ;;  %v5261_v59 = vld [vmem:[%s6348_s17 + $0x30] sm:$0xff]  }
0x1a56   :  { %v5310_v51 = vpop.eup %5309  ;;  %4863 = vmatpush3.bf16.msra.mxu0 %v5261_v59 }
0x1a57   :  { %v4139_v57 = vadd.f32 %v4135_v17, %v4067_v41  ;;  %v4140_v12 = vadd.f32 %v4136_v34, %v4068_v0  ;;  %v3321_v8 = vmul.f32 %v5310_v51, %v7672_v2  ;;  %v3322_v23 = vmul.f32 %v5310_v51, %v7669_v13  ;;  %4864 = vmatprep.subr.bf16.mxu0 %v6113_v46 }
0x1a58   :  { %v4153_v3 = vadd.f32 %v4150_v53, %v4149_v39 }
0x1a59   :  { %v3325_v21 = vmul.f32 %v3321_v8, %v3255_v25  ;;  %v3326_v15 = vmul.f32 %v3322_v23, %v3256_v30  ;;  %v4143_v63 = vmax.f32 %v4139_v57, 0.0  ;;  %v4144_v42 = vmax.f32 %v4140_v12, 0.0 }
0x1a5a   :  { %v4154_v48 = vrot.slane %v4153_v3, 4  ;;  %4865 = vmatpush3.bf16.msra.mxu0 %v5262_v60 }
0x1a5b   :  { %v3329_v18 = vadd.f32 %v3325_v21, %v3257_v7  ;;  %v3330_v38 = vadd.f32 %v3326_v15, %v3258_v19  ;;  %v4651_v19 = vld [vmem:[%s6353_s6] ss:$0 sm:$0xff] }
0x1a5c   :  { %v4155_v26 = vadd.f32 %v4154_v48, %v4153_v3 }
0x1a5d   :  { %v4147_v33 = vadd.f32 %v4143_v63, %v3329_v18  ;;  %v4148_v4 = vadd.f32 %v4144_v42, %v3330_v38 }
0x1a5e   :  { %v4156_v56 = vrot.slane %v4155_v26, 2 }
0x1a5f   :  { %v4151_v11 = vmax.f32 %v4147_v33, 0.0  ;;  %v4152_v22 = vmax.f32 %v4148_v4, 0.0 }
0x1a60   :  { %v4157_v55 = vadd.f32 %v4156_v56, %v4155_v26 }
0x1a61   :  { %v4160_v58 = vadd.f32 %v4152_v22, %v4151_v11 }
0x1a62   :  { %v4158_v6 = vrot.slane %v4157_v55, 1 }
0x1a63   :  { %v4161_v2 = vrot.slane %v4160_v58, 4 }
0x1a64   :  { %v4159_v13 = vadd.f32 %v4158_v6, %v4157_v55 }
0x1a65   :  { %v4162_v1 = vadd.f32 %v4161_v2, %v4160_v58 }
0x1a66   :  { %v4168_v35 = vmul.f32 0.0625, %v4159_v13 }
0x1a67   :  { %v4163_v47 = vrot.slane %v4162_v1, 2 }
0x1a68   :  { %v4170_v45 = vpack.c.bf16 %v4168_v35, %v4168_v35 }
0x1a69   :  { %v4164_v10 = vadd.f32 %v4163_v47, %v4162_v1 }
0x1a6a   :  { %v4197_v9 = vunpack.c.l.b16 %v4170_v45 }
0x1a6b   :  { %v4165_v27 = vrot.slane %v4164_v10, 1 }
0x1a6d   :  { %v4166_v20 = vadd.f32 %v4165_v27, %v4164_v10 }
0x1a6f   :  { %v4169_v25 = vmul.f32 0.0625, %v4166_v20 }
0x1a71   :  { %v4171_v44 = vpack.c.bf16 %v4169_v25, %v4169_v25 }
0x1a73   :  { %v4198_v32 = vunpack.c.l.b16 %v4171_v44 }
0x1a75   :  { %v4200_v30 = vsel %vm4199_vm1, %v4198_v32, %v4197_v9 }
0x1a76   :  { %v4201_v14 = vpack.c.b16 %v4200_v30, %v4200_v30 }
0x1a78   :  { %4847 = vmatmul.mubr.bf16.vlgmr.msra.gmra.mrb[40].mxu1 %v4201_v14 }
0x1b4b   :  { %v4285_v41 = vpop.f32.mrb[40].mxu1 }
0x1b4c   :  { %v4286_v0 = vadd.f32 %v4642_v40, %v4285_v41  ;;  %v4848_v31 = vpop.f32.mrb[41].mxu1 }
0x1b4d   :  { %v4288_v29 = vpop.f32.mrb[42].mxu1 }
0x1b4e   :  { %v4291_v16 = vmax.f32 %v4286_v0, 0.0  ;;  %v4849_v50 = vpop.f32.mrb[43].mxu1 }
0x1b50   :  { %v4292_v7 = vpack.c.bf16 %v4291_v16, %v4291_v16 }
0x1b52   :  { %4867 = vmatmul.mubr.bf16.vlgmr.msra.gmra.mrb[32].mxu0 %v4292_v7 }
0x1c25   :  { %v4398_v28 = vpop.f32.mrb[32].mxu0 }
0x1c26   :  { %v4399_v49 = vadd.f32 %v4651_v19, %v4398_v28  ;;  %v4868_v37 = vpop.f32.mrb[33].mxu0 }
0x1c27   :  { %v4401_v43 = vpop.f32.mrb[34].mxu0 }
0x1c28   :  { %4404 = vst [vmem:[%s6358_s25] sm:$0x3] %v4399_v49  ;;  %v4869_v36 = vpop.f32.mrb[35].mxu0 }
0x1c29   :  { %4409 = vsyncpa [#allocation3], 1 }
0x1c2a   :  { %4410 = vsyncpa [#allocation5], 1 }
0x1c2b   :  { %4411 = vsyncpa [#allocation8], 1 }
0x1c2c   :  { %4412 = vsyncpa [#allocation11], 1 }
0x1c2d   :  { %4413 = vsyncpa [#allocation14], 1 }
0x1c2e   :  { %4414 = vsyncpa [#allocation17], 1 }
0x1c2f   :  { %4415 = vsyncpa [#allocation20], 1 }
0x1c30   :  { %4416 = vsyncpa [#allocation23], 1 }
0x1c31   :  { %4417 = vsyncpa [#allocation26], 1 }
0x1c32   :  { %4418 = vsyncpa [#allocation29], 1 }
0x1c33   :  { %4419 = vsyncpa [#allocation32], 1 }
0x1c34   :  { %4420 = vsyncpa [#allocation35], 1 }
0x1c35   :  { %4421 = vsyncpa [#allocation38], 1 }
0x1c36   :  { %4422 = vsyncpa [#allocation41], 1 }
0x1c37   :  { %4423 = vsyncpa [#allocation44], 1 }
0x1c38   :  { %4424 = vsyncpa [#allocation47], 1 }

</bundles_post_ra>
